<compile_context>
chip_gen: v7x
topology: tpu7x:2x2x1
jax: 0.10.0
libtpu: 0.0.40
codegen_flags: <defaults>
</compile_context>

<pallas_src>
import math

import jax
import jax.numpy as jnp
import numpy as np
from jax import lax
from jax.experimental import pallas as pl
from jax.experimental.pallas import tpu as pltpu

# MXU operand dtype (accumulation is always f32).
MATMUL_DTYPE = jnp.bfloat16
BN_EPS = 1e-5

TREE_ARCH = {2: [32, 64], 4: [4, 8, 8, 8], 6: [2, 4, 4, 4, 4, 4],
             8: [2, 2, 2, 2, 2, 4, 4, 4]}


def get_arch(nlevels, npts):
    logmult = int(math.log2(npts / 2048))
    assert 2048 * 2 ** logmult == npts, "num_pred must be 2048 * 2^n"
    arch = np.array(TREE_ARCH[nlevels], dtype=np.int64)
    while logmult > 0:
        last_min_pos = np.where(arch == np.min(arch))[0][-1]
        arch[last_min_pos] *= 2
        logmult -= 1
    return [int(a) for a in arch]


class TopConfig:
    def __init__(self, node_feature=16, encoder_feature=1024, nlevels=8, num_pred=2048):
        assert nlevels in TREE_ARCH
        self.node_feature = node_feature
        self.encoder_feature = encoder_feature
        self.nlevels = nlevels
        self.num_pred = num_pred
        self.tarch = get_arch(nlevels, num_pred)
        self.in_channel = encoder_feature + node_feature   # Top_in_channel
        self.c1 = self.in_channel // 2
        self.c2 = self.in_channel // 4
        self.c3 = self.in_channel // 8
        assert int(np.prod(self.tarch)) == num_pred


# ----------------------------------------------------------------------------- params --

def _dense(key, shape, fan_in):
    return jax.random.normal(key, shape, jnp.float32) / np.sqrt(fan_in)


def _bn_init(key, c):
    k1, k2, k3, k4 = jax.random.split(key, 4)
    return dict(
        gamma=1.0 + 0.05 * jax.random.normal(k1, (c,), jnp.float32),
        beta=0.05 * jax.random.normal(k2, (c,), jnp.float32),
        mean=0.05 * jax.random.normal(k3, (c,), jnp.float32),
        var=1.0 + 0.1 * jnp.abs(jax.random.normal(k4, (c,), jnp.float32)),
    )


def init_raw_params(key, cfg):
    """PyTorch-style raw parameters (conv/linear weights as (out, in), BN running stats)."""
    E, F = cfg.encoder_feature, cfg.node_feature
    n0 = cfg.tarch[0]
    keys = iter(jax.random.split(key, 8 + 11 * (cfg.nlevels - 1)))
    root = dict(
        w1=_dense(next(keys), (256, E), E),
        b1=0.05 * jax.random.normal(next(keys), (256,), jnp.float32),
        bn1=_bn_init(next(keys), 256),
        w2=_dense(next(keys), (64, 256), 256),
        b2=0.05 * jax.random.normal(next(keys), (64,), jnp.float32),
        bn2=_bn_init(next(keys), 64),
        w3=_dense(next(keys), (F * n0, 64), 64),
        b3=0.05 * jax.random.normal(next(keys), (F * n0,), jnp.float32),
    )
    levels = []
    for i in range(1, cfg.nlevels):
        out_ch = 3 if i == cfg.nlevels - 1 else F
        node = cfg.tarch[i]
        levels.append(dict(
            w1=_dense(next(keys), (cfg.c1, cfg.in_channel), cfg.in_channel),
            b1=0.05 * jax.random.normal(next(keys), (cfg.c1,), jnp.float32),
            bn1=_bn_init(next(keys), cfg.c1),
            w2=_dense(next(keys), (cfg.c2, cfg.c1), cfg.c1),
            b2=0.05 * jax.random.normal(next(keys), (cfg.c2,), jnp.float32),
            bn2=_bn_init(next(keys), cfg.c2),
            w3=_dense(next(keys), (cfg.c3, cfg.c2), cfg.c2),
            b3=0.05 * jax.random.normal(next(keys), (cfg.c3,), jnp.float32),
            bn3=_bn_init(next(keys), cfg.c3),
            w4=_dense(next(keys), (out_ch * node, cfg.c3), cfg.c3),
            b4=0.05 * jax.random.normal(next(keys), (out_ch * node,), jnp.float32),
        ))
    return dict(root=root, levels=levels)


def _bn_fold(bn):
    s = bn['gamma'] / jnp.sqrt(bn['var'] + BN_EPS)
    t = bn['beta'] - bn['mean'] * s
    return s, t


def prepare_params(raw, cfg, matmul_dtype=MATMUL_DTYPE):
    """Host-side prep:
       * transpose to (in, out) matmul layout, fold BN scale into weight columns in f32,
         cast to bf16 once, fold BN shift into an f32 bias row,
       * split each tree-layer conv1 into a "global" part (multiplies feature_global,
         consumed by the XLA wrapper) and a "local" part (multiplies the previous level),
       * pre-add the folded conv1 bias into the global term,
       * permute the child-expansion conv columns to child-major and pad to a common
         width so per-level weights can be stacked."""
    E, F = cfg.encoder_feature, cfg.node_feature
    n0 = cfg.tarch[0]
    L = cfg.nlevels
    max_cols = max((3 if i == L - 1 else F) * cfg.tarch[i] for i in range(1, L))

    def row(v):
        return jnp.asarray(v, jnp.float32).reshape(1, -1)

    def fold_lin(w, b, bn):      # torch (out, in) -> BN-scaled (in, out) bf16 + f32 bias row
        s, t = _bn_fold(bn)
        wf = (jnp.asarray(w, jnp.float32).T * s[None, :]).astype(matmul_dtype)
        return wf, row(jnp.asarray(b, jnp.float32) * s + t)

    r = raw['root']
    rw1, rb1 = fold_lin(r['w1'], r['b1'], r['bn1'])
    rw2, rb2 = fold_lin(r['w2'], r['b2'], r['bn2'])
    # permute last root linear so its output is node-major (avoids an in-kernel reshape)
    perm_root = np.array([f * n0 + m for m in range(n0) for f in range(F)])
    rw3 = jnp.asarray(r['w3'], jnp.float32).T.astype(matmul_dtype)[:, perm_root]
    rb3 = row(r['b3'])[:, perm_root]

    w1g_cols, b1g_cols = [], []
    w1l, w2, b2, w3, b3, w4, b4 = [], [], [], [], [], [], []
    for i in range(1, L):
        lv = raw['levels'][i - 1]
        out_ch = 3 if i == L - 1 else F
        node = cfg.tarch[i]
        w1f, b1f = fold_lin(lv['w1'], lv['b1'], lv['bn1'])    # (E+F, C1)
        w1g_cols.append(w1f[:E, :])                           # multiplies feature_global
        w1l.append(w1f[E:, :])                                # multiplies previous level
        b1g_cols.append(b1f)                                  # pre-added into global term
        w2f, b2f = fold_lin(lv['w2'], lv['b2'], lv['bn2'])
        w3f, b3f = fold_lin(lv['w3'], lv['b3'], lv['bn3'])
        w2.append(w2f); b2.append(b2f)
        w3.append(w3f); b3.append(b3f)
        # child-major column permutation: new col j*out_ch + f  <-  old col f*node + j
        perm = np.array([f * node + j for j in range(node) for f in range(out_ch)])
        pad = max_cols - out_ch * node
        w4f = jnp.asarray(lv['w4'], jnp.float32).T.astype(matmul_dtype)[:, perm]
        w4.append(jnp.pad(w4f, ((0, 0), (0, pad))))
        b4.append(jnp.pad(row(lv['b4'])[:, perm], ((0, 0), (0, pad))))

    return dict(
        rw1=rw1, rb1=rb1, rw2=rw2, rb2=rb2, rw3=rw3, rb3=rb3,
        w1g=jnp.concatenate(w1g_cols, axis=1),     # (E, (L-1)*C1)   bf16, BN-scaled
        b1g=jnp.concatenate(b1g_cols, axis=1),     # (1, (L-1)*C1)   f32 folded bias
        w1l=jnp.stack(w1l), w2=jnp.stack(w2), b2=jnp.stack(b2),
        w3=jnp.stack(w3), b3=jnp.stack(b3),
        w4=jnp.stack(w4), b4=jnp.stack(b4),
    )


# ----------------------------------------------------------------------------- kernel --

def _make_kernel(cfg, matmul_dtype, bblk, kpad):
    """Tree layers (feature layers + leaf layer), fully unrolled.

    Row layout invariant: kernel row r = k*bblk + b  <->  (batch b in block, node index k).
    With batch-minor interleaving the child expansion stays a plain column-block ->
    row-block stack (new row = j*rows + r), identical to the single-batch case."""
    F = cfg.node_feature
    C1 = cfg.c1
    L = cfg.nlevels
    tarch = cfg.tarch
    f32 = jnp.float32
    pow2 = (bblk & (bblk - 1)) == 0

    def mm(a, w):
        return jnp.dot(a.astype(matmul_dtype), w, preferred_element_type=f32)

    def kernel(g_ref, l0_ref, w1l, w2, b2, w3, b3, w4, b4, out_ref):
        last = l0_ref[0]                                    # (n0*bblk, F) bf16, interleaved

        for i in range(1, L):
            lvl = i - 1
            node = tarch[i]
            out_ch = 3 if i == L - 1 else F
            rows = last.shape[0]                            # M * bblk

            # per-batch global contribution of conv1 (BN scale + bias already folded in);
            # row r needs g[r mod bblk].  An exact 0/1 one-hot f32 matmul replicates the
            # rows on the MXU (no broadcast relayout); padding cols >= bblk are zero.
            g = g_ref[0, :, lvl * C1:(lvl + 1) * C1]        # (kpad, C1) f32
            if bblk == 1:
                gb = g                                      # sublane broadcast in the add
            else:
                r_ids = lax.broadcasted_iota(jnp.int32, (rows, kpad), 0)
                b_ids = lax.broadcasted_iota(jnp.int32, (rows, kpad), 1)
                r_mod = jnp.bitwise_and(r_ids, bblk - 1) if pow2 else r_ids % bblk
                onehot = (r_mod == b_ids).astype(f32)
                gb = jnp.dot(onehot, g, preferred_element_type=f32)   # exact replication

            h = jnp.maximum(mm(last, w1l[lvl]) + gb, 0.0)             # conv1 (concat-free)
            h = jnp.maximum(mm(h, w2[lvl]) + b2[lvl], 0.0)            # conv2
            h = jnp.maximum(mm(h, w3[lvl]) + b3[lvl], 0.0)            # conv3
            ncols = out_ch * node
            y = mm(h, w4[lvl, :, :ncols]) + b4[lvl, :, :ncols]        # conv4 (child-major)

            if i == L - 1:
                # lane-dense output block (rows, node*3); child-major reorder to
                # (num_pred, 3) happens in the XLA wrapper (cheap transpose there).
                out_ref[0] = jnp.tanh(y).astype(out_ref.dtype)
            else:
                # children j are column blocks; stacking them row-wise keeps the
                # r = k*bblk + b invariant.  bf16 halves the relayout traffic.
                yt = jnp.tanh(y).astype(matmul_dtype)
                last = jnp.concatenate(
                    [yt[:, j * out_ch:(j + 1) * out_ch] for j in range(node)], axis=0)

    return kernel


def top_forward(feature_global, prepared, cfg, matmul_dtype=MATMUL_DTYPE, batch_block=None):
    f32 = jnp.float32
    p = prepared
    bs, E = feature_global.shape
    assert E == cfg.encoder_feature
    F = cfg.node_feature
    n0 = cfg.tarch[0]

    # Batch elements per grid step.  Cap ~4 for v7x's 64 MiB VMEM; can be raised to 8 on
    # v5e/v6e (128 MiB) for slightly better MXU row utilisation at the early levels.
    if batch_block is None:
        batch_block = next(b for b in (4, 2, 1) if bs % b == 0)
    B = batch_block
    assert bs % B == 0
    nb = bs // B

    x = feature_global.astype(f32)
    xm = x.astype(matmul_dtype)

    def mm(a, w):
        return jnp.dot(a.astype(matmul_dtype), w, preferred_element_type=f32)

    # ---- hoisted prologue (M=1-row matmuls), batched over bs in XLA ----
    h = jnp.maximum(mm(xm, p['rw1']) + p['rb1'], 0.0)
    h = jnp.maximum(mm(h, p['rw2']) + p['rb2'], 0.0)
    rt = mm(h, p['rw3']) + p['rb3']                          # (bs, F*n0), node-major
    last0 = jnp.tanh(rt).astype(matmul_dtype).reshape(bs, n0, F)
    g_all = mm(xm, p['w1g']) + p['b1g']                      # (bs, (L-1)*C1), bias folded

    # ---- batch-minor row interleaving for the kernel: row r = k*B + b ----
    G = g_all.shape[1]
    if B > 1:
        kpad = max(8, B)                                     # sublane-aligned one-hot K dim
        g_k = jnp.pad(g_all.reshape(nb, B, G), ((0, 0), (0, kpad - B), (0, 0)))
    else:
        kpad = 1
        g_k = g_all.reshape(nb, 1, G)
    l0_k = last0.reshape(nb, B, n0, F).transpose(0, 2, 1, 3).reshape(nb, n0 * B, F)

    node_last = cfg.tarch[-1]
    m_last = cfg.num_pred // node_last                       # rows fed into the leaf layer
    leaf_cols = 3 * node_last

    kernel = _make_kernel(cfg, matmul_dtype, B, kpad)
    # Weights never change across the batch grid -> whole-array VMEM residency
    # (single copy, no double-buffering).
    wspecs = [pl.BlockSpec(memory_space=pltpu.MemorySpace.VMEM) for _ in range(7)]

    out = pl.pallas_call(
        kernel,
        out_shape=jax.ShapeDtypeStruct((nb, m_last * B, leaf_cols), jnp.float32),
        grid=(nb,),
        in_specs=[
            pl.BlockSpec((1, kpad, G), lambda g: (g, 0, 0)),
            pl.BlockSpec((1, n0 * B, F), lambda g: (g, 0, 0)),
        ] + wspecs,
        out_specs=pl.BlockSpec((1, m_last * B, leaf_cols), lambda g: (g, 0, 0)),
        compiler_params=pltpu.CompilerParams(
            dimension_semantics=("parallel",),               # shard batch blocks across TCs
            vmem_limit_bytes=48 * 1024 * 1024),              # headroom under v7x 64 MiB
    )(g_k, l0_k, p['w1l'], p['w2'], p['b2'], p['w3'], p['b3'], p['w4'], p['b4'])

    # lane-dense kernel output -> reference point ordering (cheap XLA transpose):
    # out[g, m*B + b, j*3 + f]  ->  pred[g*B + b, j*m_last + m, f]
    out = out.reshape(nb, m_last, B, node_last, 3)
    out = out.transpose(0, 2, 3, 1, 4).reshape(bs, cfg.num_pred, 3)
    return out


# -------------------------------------------------------------------------- reference --

def top_reference(feature_global, raw, cfg, matmul_dtype=MATMUL_DTYPE):
    """Literal JAX transcription of the PyTorch forward (inference-mode BatchNorm).
    The BN scale is folded into the conv/linear weights in f32 before a single cast to the
    MXU dtype (the same quantisation points as the kernel), so the comparison isolates the
    kernel's structural/ordering logic."""
    f32 = jnp.float32
    md = matmul_dtype
    E, F = cfg.encoder_feature, cfg.node_feature
    bs = feature_global.shape[0]
    x = feature_global.astype(f32)

    def mm(a, b):
        return jnp.dot(a.astype(md), b.astype(md), preferred_element_type=f32)

    def lin_bn_relu(h, w, b, bn):
        s, t = _bn_fold(bn)
        wf = (jnp.asarray(w, f32) * s[:, None]).T            # (in, out), scale folded
        return jax.nn.relu(mm(h, wf) + (b * s + t))

    def conv_bn_relu(y, w, b, bn):                            # y: (bs, Cin, M)
        s, t = _bn_fold(bn)
        wf = jnp.asarray(w, f32) * s[:, None]
        out = jnp.einsum('oc,bcm->bom', wf.astype(md), y.astype(md),
                         preferred_element_type=f32)
        return jax.nn.relu(out + (b * s + t)[None, :, None])

    def conv(y, w, b):
        out = jnp.einsum('oc,bcm->bom', jnp.asarray(w, f32).astype(md), y.astype(md),
                         preferred_element_type=f32)
        return out + b[None, :, None]

    r = raw['root']
    h = lin_bn_relu(x, r['w1'], r['b1'], r['bn1'])
    h = lin_bn_relu(h, r['w2'], r['b2'], r['bn2'])
    last = jnp.tanh(mm(h, jnp.asarray(r['w3'], f32).T) + r['b3']).reshape(bs, F, cfg.tarch[0])

    for i in range(1, cfg.nlevels):
        lv = raw['levels'][i - 1]
        M = last.shape[2]
        expand = jnp.broadcast_to(x[:, :, None], (bs, E, M))
        cat = jnp.concatenate([expand, last], axis=1)
        y = conv_bn_relu(cat, lv['w1'], lv['b1'], lv['bn1'])
        y = conv_bn_relu(y, lv['w2'], lv['b2'], lv['bn2'])
        y = conv_bn_relu(y, lv['w3'], lv['b3'], lv['bn3'])
        y = conv(y, lv['w4'], lv['b4'])
        out_ch = 3 if i == cfg.nlevels - 1 else F
        last = jnp.tanh(y.reshape(bs, out_ch, -1))
    return jnp.transpose(last, (0, 2, 1))                    # (bs, num_pred, 3)


# -------------------------------------------------------------------------------- main --

if __name__ == "__main__":
    # Small-but-structurally-faithful config: full 8-level tree producing 2048 points
    # (the module requires num_pred = 2048*2^n), reduced encoder width to stay light.
    cfg = TopConfig(node_feature=16, encoder_feature=256, nlevels=8, num_pred=2048)

    key = jax.random.PRNGKey(0)
    kx, kp = jax.random.split(key)
    bs = 2
    feature_global = jax.random.normal(kx, (bs, cfg.encoder_feature), jnp.float32)

    raw = init_raw_params(kp, cfg)
    prepared = prepare_params(raw, cfg)

    fwd = jax.jit(lambda fg: top_forward(fg, prepared, cfg))
    out = jax.block_until_ready(fwd(feature_global))
    assert out.shape == (bs, cfg.num_pred, 3), out.shape

    ref = jax.block_until_ready(top_reference(feature_global, raw, cfg))
    # kernel and reference share the same bf16 weight-quantisation points and f32
    # accumulation; remaining differences are f32 reassociation only.
    np.testing.assert_allclose(np.asarray(out), np.asarray(ref), rtol=3e-3, atol=3e-3)

    print("KERNEL_OK")
</pallas_src>

<mosaic_0001>
module attributes {stable_mosaic.version = 11 : i64} {
  func.func @kernel(%arg0: i32, %arg1: memref<1x8x952xf32, #tpu.memory_space<vmem>>, %arg2: memref<1x4x16xbf16, #tpu.memory_space<vmem>>, %arg3: memref<7x16x136xbf16, #tpu.memory_space<vmem>>, %arg4: memref<7x136x68xbf16, #tpu.memory_space<vmem>>, %arg5: memref<7x1x68xf32, #tpu.memory_space<vmem>>, %arg6: memref<7x68x34xbf16, #tpu.memory_space<vmem>>, %arg7: memref<7x1x34xf32, #tpu.memory_space<vmem>>, %arg8: memref<7x34x64xbf16, #tpu.memory_space<vmem>>, %arg9: memref<7x1x64xf32, #tpu.memory_space<vmem>>, %arg10: memref<1x1024x12xf32, #tpu.memory_space<vmem>>) attributes {dimension_semantics = [#tpu.dimension_semantics<parallel>], iteration_bounds = array<i64: 1>, scalar_prefetch = 0 : i64, scratch_operands = 0 : i64, tpu.core_type = #tpu.core_type<tc>, window_params = [{transform_indices = @transform_0, window_bounds = array<i64: 1, 8, 952>}, {transform_indices = @transform_1, window_bounds = array<i64: 1, 4, 16>}, {pipeline_mode = #tpu.pipeline_mode<synchronous>, transform_indices = @transform_2, window_bounds = array<i64: 7, 16, 136>}, {pipeline_mode = #tpu.pipeline_mode<synchronous>, transform_indices = @transform_3, window_bounds = array<i64: 7, 136, 68>}, {pipeline_mode = #tpu.pipeline_mode<synchronous>, transform_indices = @transform_4, window_bounds = array<i64: 7, 1, 68>}, {pipeline_mode = #tpu.pipeline_mode<synchronous>, transform_indices = @transform_5, window_bounds = array<i64: 7, 68, 34>}, {pipeline_mode = #tpu.pipeline_mode<synchronous>, transform_indices = @transform_6, window_bounds = array<i64: 7, 1, 34>}, {pipeline_mode = #tpu.pipeline_mode<synchronous>, transform_indices = @transform_7, window_bounds = array<i64: 7, 34, 64>}, {pipeline_mode = #tpu.pipeline_mode<synchronous>, transform_indices = @transform_8, window_bounds = array<i64: 7, 1, 64>}, {transform_indices = @transform_9, window_bounds = array<i64: 1, 1024, 12>}]} {
    %c0 = arith.constant 0 : index
    %c0_0 = arith.constant 0 : index
    %c0_1 = arith.constant 0 : index
    %0 = vector.load %arg2[%c0, %c0_0, %c0_1] : memref<1x4x16xbf16, #tpu.memory_space<vmem>>, vector<1x4x16xbf16>
    %1 = vector.shape_cast %0 : vector<1x4x16xbf16> to vector<4x16xbf16>
    %c0_2 = arith.constant 0 : index
    %c0_3 = arith.constant 0 : index
    %c0_4 = arith.constant 0 : index
    %2 = vector.load %arg1[%c0_2, %c0_3, %c0_4] : memref<1x8x952xf32, #tpu.memory_space<vmem>>, vector<1x8x136xf32>
    %3 = vector.shape_cast %2 : vector<1x8x136xf32> to vector<8x136xf32>
    %4 = tpu.iota {dimensions = array<i32: 0>} : vector<4x8xi32>
    %5 = tpu.iota {dimensions = array<i32: 1>} : vector<4x8xi32>
    %c1_i32 = arith.constant 1 : i32
    %6 = vector.broadcast %c1_i32 : i32 to vector<4x8xi32>
    %7 = arith.andi %4, %6 : vector<4x8xi32>
    %8 = arith.cmpi eq, %7, %5 : vector<4x8xi32>
    %9 = arith.extui %8 : vector<4x8xi1> to vector<4x8xi32>
    %10 = arith.sitofp %9 : vector<4x8xi32> to vector<4x8xf32>
    %cst = arith.constant dense<0.000000e+00> : vector<4x136xf32>
    %11 = tpu.matmul %10, %3, %cst {dimension_numbers = #tpu.dot_dimension_numbers<[1], [0], [0], [1], [0, 0, 1, 1], [], []>} : vector<4x8xf32>, vector<8x136xf32>, vector<4x136xf32> -> vector<4x136xf32>
    %c0_5 = arith.constant 0 : index
    %c0_6 = arith.constant 0 : index
    %c0_7 = arith.constant 0 : index
    %12 = vector.load %arg3[%c0_5, %c0_6, %c0_7] : memref<7x16x136xbf16, #tpu.memory_space<vmem>>, vector<1x16x136xbf16>
    %13 = vector.shape_cast %12 : vector<1x16x136xbf16> to vector<16x136xbf16>
    %cst_8 = arith.constant dense<0.000000e+00> : vector<4x136xf32>
    %14 = tpu.matmul %1, %13, %cst_8 {dimension_numbers = #tpu.dot_dimension_numbers<[1], [0], [0], [1], [0, 0, 1, 1], [], []>} : vector<4x16xbf16>, vector<16x136xbf16>, vector<4x136xf32> -> vector<4x136xf32>
    %15 = arith.addf %14, %11 : vector<4x136xf32>
    %cst_9 = arith.constant 0.000000e+00 : f32
    %16 = vector.broadcast %cst_9 : f32 to vector<4x136xf32>
    %17 = arith.maximumf %15, %16 : vector<4x136xf32>
    %c0_10 = arith.constant 0 : index
    %c0_11 = arith.constant 0 : index
    %c0_12 = arith.constant 0 : index
    %18 = vector.load %arg4[%c0_10, %c0_11, %c0_12] : memref<7x136x68xbf16, #tpu.memory_space<vmem>>, vector<1x136x68xbf16>
    %19 = vector.shape_cast %18 : vector<1x136x68xbf16> to vector<136x68xbf16>
    %20 = arith.truncf %17 : vector<4x136xf32> to vector<4x136xbf16>
    %cst_13 = arith.constant dense<0.000000e+00> : vector<4x68xf32>
    %21 = tpu.matmul %20, %19, %cst_13 {dimension_numbers = #tpu.dot_dimension_numbers<[1], [0], [0], [1], [0, 0, 1, 1], [], []>} : vector<4x136xbf16>, vector<136x68xbf16>, vector<4x68xf32> -> vector<4x68xf32>
    %c0_14 = arith.constant 0 : index
    %c0_15 = arith.constant 0 : index
    %c0_16 = arith.constant 0 : index
    %22 = vector.load %arg5[%c0_14, %c0_15, %c0_16] : memref<7x1x68xf32, #tpu.memory_space<vmem>>, vector<1x1x68xf32>
    %23 = vector.shape_cast %22 : vector<1x1x68xf32> to vector<1x68xf32>
    %24 = vector.broadcast %23 : vector<1x68xf32> to vector<4x68xf32>
    %25 = arith.addf %21, %24 : vector<4x68xf32>
    %cst_17 = arith.constant 0.000000e+00 : f32
    %26 = vector.broadcast %cst_17 : f32 to vector<4x68xf32>
    %27 = arith.maximumf %25, %26 : vector<4x68xf32>
    %c0_18 = arith.constant 0 : index
    %c0_19 = arith.constant 0 : index
    %c0_20 = arith.constant 0 : index
    %28 = vector.load %arg6[%c0_18, %c0_19, %c0_20] : memref<7x68x34xbf16, #tpu.memory_space<vmem>>, vector<1x68x34xbf16>
    %29 = vector.shape_cast %28 : vector<1x68x34xbf16> to vector<68x34xbf16>
    %30 = arith.truncf %27 : vector<4x68xf32> to vector<4x68xbf16>
    %cst_21 = arith.constant dense<0.000000e+00> : vector<4x34xf32>
    %31 = tpu.matmul %30, %29, %cst_21 {dimension_numbers = #tpu.dot_dimension_numbers<[1], [0], [0], [1], [0, 0, 1, 1], [], []>} : vector<4x68xbf16>, vector<68x34xbf16>, vector<4x34xf32> -> vector<4x34xf32>
    %c0_22 = arith.constant 0 : index
    %c0_23 = arith.constant 0 : index
    %c0_24 = arith.constant 0 : index
    %32 = vector.load %arg7[%c0_22, %c0_23, %c0_24] : memref<7x1x34xf32, #tpu.memory_space<vmem>>, vector<1x1x34xf32>
    %33 = vector.shape_cast %32 : vector<1x1x34xf32> to vector<1x34xf32>
    %34 = vector.broadcast %33 : vector<1x34xf32> to vector<4x34xf32>
    %35 = arith.addf %31, %34 : vector<4x34xf32>
    %cst_25 = arith.constant 0.000000e+00 : f32
    %36 = vector.broadcast %cst_25 : f32 to vector<4x34xf32>
    %37 = arith.maximumf %35, %36 : vector<4x34xf32>
    %c0_26 = arith.constant 0 : index
    %c0_27 = arith.constant 0 : index
    %c0_28 = arith.constant 0 : index
    %38 = vector.load %arg8[%c0_26, %c0_27, %c0_28] : memref<7x34x64xbf16, #tpu.memory_space<vmem>>, vector<1x34x32xbf16>
    %39 = vector.shape_cast %38 : vector<1x34x32xbf16> to vector<34x32xbf16>
    %40 = arith.truncf %37 : vector<4x34xf32> to vector<4x34xbf16>
    %cst_29 = arith.constant dense<0.000000e+00> : vector<4x32xf32>
    %41 = tpu.matmul %40, %39, %cst_29 {dimension_numbers = #tpu.dot_dimension_numbers<[1], [0], [0], [1], [0, 0, 1, 1], [], []>} : vector<4x34xbf16>, vector<34x32xbf16>, vector<4x32xf32> -> vector<4x32xf32>
    %c0_30 = arith.constant 0 : index
    %c0_31 = arith.constant 0 : index
    %c0_32 = arith.constant 0 : index
    %42 = vector.load %arg9[%c0_30, %c0_31, %c0_32] : memref<7x1x64xf32, #tpu.memory_space<vmem>>, vector<1x1x32xf32>
    %43 = vector.shape_cast %42 : vector<1x1x32xf32> to vector<1x32xf32>
    %44 = vector.broadcast %43 : vector<1x32xf32> to vector<4x32xf32>
    %45 = arith.addf %41, %44 : vector<4x32xf32>
    %46 = math.tanh %45 : vector<4x32xf32>
    %47 = arith.truncf %46 : vector<4x32xf32> to vector<4x32xbf16>
    %48 = vector.extract_strided_slice %47 {offsets = [0, 0], sizes = [4, 16], strides = [1, 1]} : vector<4x32xbf16> to vector<4x16xbf16>
    %49 = vector.extract_strided_slice %47 {offsets = [0, 16], sizes = [4, 16], strides = [1, 1]} : vector<4x32xbf16> to vector<4x16xbf16>
    %50 = tpu.concatenate %48, %49 in 0 : vector<4x16xbf16>, vector<4x16xbf16> -> vector<8x16xbf16>
    %c0_33 = arith.constant 0 : index
    %c0_34 = arith.constant 0 : index
    %c136 = arith.constant 136 : index
    %51 = vector.load %arg1[%c0_33, %c0_34, %c136] : memref<1x8x952xf32, #tpu.memory_space<vmem>>, vector<1x8x136xf32>
    %52 = vector.shape_cast %51 : vector<1x8x136xf32> to vector<8x136xf32>
    %53 = tpu.iota {dimensions = array<i32: 0>} : vector<8x8xi32>
    %54 = tpu.iota {dimensions = array<i32: 1>} : vector<8x8xi32>
    %c1_i32_35 = arith.constant 1 : i32
    %55 = vector.broadcast %c1_i32_35 : i32 to vector<8x8xi32>
    %56 = arith.andi %53, %55 : vector<8x8xi32>
    %57 = arith.cmpi eq, %56, %54 : vector<8x8xi32>
    %58 = arith.extui %57 : vector<8x8xi1> to vector<8x8xi32>
    %59 = arith.sitofp %58 : vector<8x8xi32> to vector<8x8xf32>
    %cst_36 = arith.constant dense<0.000000e+00> : vector<8x136xf32>
    %60 = tpu.matmul %59, %52, %cst_36 {dimension_numbers = #tpu.dot_dimension_numbers<[1], [0], [0], [1], [0, 0, 1, 1], [], []>} : vector<8x8xf32>, vector<8x136xf32>, vector<8x136xf32> -> vector<8x136xf32>
    %c1 = arith.constant 1 : index
    %c0_37 = arith.constant 0 : index
    %c0_38 = arith.constant 0 : index
    %61 = vector.load %arg3[%c1, %c0_37, %c0_38] : memref<7x16x136xbf16, #tpu.memory_space<vmem>>, vector<1x16x136xbf16>
    %62 = vector.shape_cast %61 : vector<1x16x136xbf16> to vector<16x136xbf16>
    %cst_39 = arith.constant dense<0.000000e+00> : vector<8x136xf32>
    %63 = tpu.matmul %50, %62, %cst_39 {dimension_numbers = #tpu.dot_dimension_numbers<[1], [0], [0], [1], [0, 0, 1, 1], [], []>} : vector<8x16xbf16>, vector<16x136xbf16>, vector<8x136xf32> -> vector<8x136xf32>
    %64 = arith.addf %63, %60 : vector<8x136xf32>
    %cst_40 = arith.constant 0.000000e+00 : f32
    %65 = vector.broadcast %cst_40 : f32 to vector<8x136xf32>
    %66 = arith.maximumf %64, %65 : vector<8x136xf32>
    %c1_41 = arith.constant 1 : index
    %c0_42 = arith.constant 0 : index
    %c0_43 = arith.constant 0 : index
    %67 = vector.load %arg4[%c1_41, %c0_42, %c0_43] : memref<7x136x68xbf16, #tpu.memory_space<vmem>>, vector<1x136x68xbf16>
    %68 = vector.shape_cast %67 : vector<1x136x68xbf16> to vector<136x68xbf16>
    %69 = arith.truncf %66 : vector<8x136xf32> to vector<8x136xbf16>
    %cst_44 = arith.constant dense<0.000000e+00> : vector<8x68xf32>
    %70 = tpu.matmul %69, %68, %cst_44 {dimension_numbers = #tpu.dot_dimension_numbers<[1], [0], [0], [1], [0, 0, 1, 1], [], []>} : vector<8x136xbf16>, vector<136x68xbf16>, vector<8x68xf32> -> vector<8x68xf32>
    %c1_45 = arith.constant 1 : index
    %c0_46 = arith.constant 0 : index
    %c0_47 = arith.constant 0 : index
    %71 = vector.load %arg5[%c1_45, %c0_46, %c0_47] : memref<7x1x68xf32, #tpu.memory_space<vmem>>, vector<1x1x68xf32>
    %72 = vector.shape_cast %71 : vector<1x1x68xf32> to vector<1x68xf32>
    %73 = vector.broadcast %72 : vector<1x68xf32> to vector<8x68xf32>
    %74 = arith.addf %70, %73 : vector<8x68xf32>
    %cst_48 = arith.constant 0.000000e+00 : f32
    %75 = vector.broadcast %cst_48 : f32 to vector<8x68xf32>
    %76 = arith.maximumf %74, %75 : vector<8x68xf32>
    %c1_49 = arith.constant 1 : index
    %c0_50 = arith.constant 0 : index
    %c0_51 = arith.constant 0 : index
    %77 = vector.load %arg6[%c1_49, %c0_50, %c0_51] : memref<7x68x34xbf16, #tpu.memory_space<vmem>>, vector<1x68x34xbf16>
    %78 = vector.shape_cast %77 : vector<1x68x34xbf16> to vector<68x34xbf16>
    %79 = arith.truncf %76 : vector<8x68xf32> to vector<8x68xbf16>
    %cst_52 = arith.constant dense<0.000000e+00> : vector<8x34xf32>
    %80 = tpu.matmul %79, %78, %cst_52 {dimension_numbers = #tpu.dot_dimension_numbers<[1], [0], [0], [1], [0, 0, 1, 1], [], []>} : vector<8x68xbf16>, vector<68x34xbf16>, vector<8x34xf32> -> vector<8x34xf32>
    %c1_53 = arith.constant 1 : index
    %c0_54 = arith.constant 0 : index
    %c0_55 = arith.constant 0 : index
    %81 = vector.load %arg7[%c1_53, %c0_54, %c0_55] : memref<7x1x34xf32, #tpu.memory_space<vmem>>, vector<1x1x34xf32>
    %82 = vector.shape_cast %81 : vector<1x1x34xf32> to vector<1x34xf32>
    %83 = vector.broadcast %82 : vector<1x34xf32> to vector<8x34xf32>
    %84 = arith.addf %80, %83 : vector<8x34xf32>
    %cst_56 = arith.constant 0.000000e+00 : f32
    %85 = vector.broadcast %cst_56 : f32 to vector<8x34xf32>
    %86 = arith.maximumf %84, %85 : vector<8x34xf32>
    %c1_57 = arith.constant 1 : index
    %c0_58 = arith.constant 0 : index
    %c0_59 = arith.constant 0 : index
    %87 = vector.load %arg8[%c1_57, %c0_58, %c0_59] : memref<7x34x64xbf16, #tpu.memory_space<vmem>>, vector<1x34x32xbf16>
    %88 = vector.shape_cast %87 : vector<1x34x32xbf16> to vector<34x32xbf16>
    %89 = arith.truncf %86 : vector<8x34xf32> to vector<8x34xbf16>
    %cst_60 = arith.constant dense<0.000000e+00> : vector<8x32xf32>
    %90 = tpu.matmul %89, %88, %cst_60 {dimension_numbers = #tpu.dot_dimension_numbers<[1], [0], [0], [1], [0, 0, 1, 1], [], []>} : vector<8x34xbf16>, vector<34x32xbf16>, vector<8x32xf32> -> vector<8x32xf32>
    %c1_61 = arith.constant 1 : index
    %c0_62 = arith.constant 0 : index
    %c0_63 = arith.constant 0 : index
    %91 = vector.load %arg9[%c1_61, %c0_62, %c0_63] : memref<7x1x64xf32, #tpu.memory_space<vmem>>, vector<1x1x32xf32>
    %92 = vector.shape_cast %91 : vector<1x1x32xf32> to vector<1x32xf32>
    %93 = vector.broadcast %92 : vector<1x32xf32> to vector<8x32xf32>
    %94 = arith.addf %90, %93 : vector<8x32xf32>
    %95 = math.tanh %94 : vector<8x32xf32>
    %96 = arith.truncf %95 : vector<8x32xf32> to vector<8x32xbf16>
    %97 = vector.extract_strided_slice %96 {offsets = [0, 0], sizes = [8, 16], strides = [1, 1]} : vector<8x32xbf16> to vector<8x16xbf16>
    %98 = vector.extract_strided_slice %96 {offsets = [0, 16], sizes = [8, 16], strides = [1, 1]} : vector<8x32xbf16> to vector<8x16xbf16>
    %99 = tpu.concatenate %97, %98 in 0 : vector<8x16xbf16>, vector<8x16xbf16> -> vector<16x16xbf16>
    %c0_64 = arith.constant 0 : index
    %c0_65 = arith.constant 0 : index
    %c272 = arith.constant 272 : index
    %100 = vector.load %arg1[%c0_64, %c0_65, %c272] : memref<1x8x952xf32, #tpu.memory_space<vmem>>, vector<1x8x136xf32>
    %101 = vector.shape_cast %100 : vector<1x8x136xf32> to vector<8x136xf32>
    %102 = tpu.iota {dimensions = array<i32: 0>} : vector<16x8xi32>
    %103 = tpu.iota {dimensions = array<i32: 1>} : vector<16x8xi32>
    %c1_i32_66 = arith.constant 1 : i32
    %104 = vector.broadcast %c1_i32_66 : i32 to vector<16x8xi32>
    %105 = arith.andi %102, %104 : vector<16x8xi32>
    %106 = arith.cmpi eq, %105, %103 : vector<16x8xi32>
    %107 = arith.extui %106 : vector<16x8xi1> to vector<16x8xi32>
    %108 = arith.sitofp %107 : vector<16x8xi32> to vector<16x8xf32>
    %cst_67 = arith.constant dense<0.000000e+00> : vector<16x136xf32>
    %109 = tpu.matmul %108, %101, %cst_67 {dimension_numbers = #tpu.dot_dimension_numbers<[1], [0], [0], [1], [0, 0, 1, 1], [], []>} : vector<16x8xf32>, vector<8x136xf32>, vector<16x136xf32> -> vector<16x136xf32>
    %c2 = arith.constant 2 : index
    %c0_68 = arith.constant 0 : index
    %c0_69 = arith.constant 0 : index
    %110 = vector.load %arg3[%c2, %c0_68, %c0_69] : memref<7x16x136xbf16, #tpu.memory_space<vmem>>, vector<1x16x136xbf16>
    %111 = vector.shape_cast %110 : vector<1x16x136xbf16> to vector<16x136xbf16>
    %cst_70 = arith.constant dense<0.000000e+00> : vector<16x136xf32>
    %112 = tpu.matmul %99, %111, %cst_70 {dimension_numbers = #tpu.dot_dimension_numbers<[1], [0], [0], [1], [0, 0, 1, 1], [], []>} : vector<16x16xbf16>, vector<16x136xbf16>, vector<16x136xf32> -> vector<16x136xf32>
    %113 = arith.addf %112, %109 : vector<16x136xf32>
    %cst_71 = arith.constant 0.000000e+00 : f32
    %114 = vector.broadcast %cst_71 : f32 to vector<16x136xf32>
    %115 = arith.maximumf %113, %114 : vector<16x136xf32>
    %c2_72 = arith.constant 2 : index
    %c0_73 = arith.constant 0 : index
    %c0_74 = arith.constant 0 : index
    %116 = vector.load %arg4[%c2_72, %c0_73, %c0_74] : memref<7x136x68xbf16, #tpu.memory_space<vmem>>, vector<1x136x68xbf16>
    %117 = vector.shape_cast %116 : vector<1x136x68xbf16> to vector<136x68xbf16>
    %118 = arith.truncf %115 : vector<16x136xf32> to vector<16x136xbf16>
    %cst_75 = arith.constant dense<0.000000e+00> : vector<16x68xf32>
    %119 = tpu.matmul %118, %117, %cst_75 {dimension_numbers = #tpu.dot_dimension_numbers<[1], [0], [0], [1], [0, 0, 1, 1], [], []>} : vector<16x136xbf16>, vector<136x68xbf16>, vector<16x68xf32> -> vector<16x68xf32>
    %c2_76 = arith.constant 2 : index
    %c0_77 = arith.constant 0 : index
    %c0_78 = arith.constant 0 : index
    %120 = vector.load %arg5[%c2_76, %c0_77, %c0_78] : memref<7x1x68xf32, #tpu.memory_space<vmem>>, vector<1x1x68xf32>
    %121 = vector.shape_cast %120 : vector<1x1x68xf32> to vector<1x68xf32>
    %122 = vector.broadcast %121 : vector<1x68xf32> to vector<16x68xf32>
    %123 = arith.addf %119, %122 : vector<16x68xf32>
    %cst_79 = arith.constant 0.000000e+00 : f32
    %124 = vector.broadcast %cst_79 : f32 to vector<16x68xf32>
    %125 = arith.maximumf %123, %124 : vector<16x68xf32>
    %c2_80 = arith.constant 2 : index
    %c0_81 = arith.constant 0 : index
    %c0_82 = arith.constant 0 : index
    %126 = vector.load %arg6[%c2_80, %c0_81, %c0_82] : memref<7x68x34xbf16, #tpu.memory_space<vmem>>, vector<1x68x34xbf16>
    %127 = vector.shape_cast %126 : vector<1x68x34xbf16> to vector<68x34xbf16>
    %128 = arith.truncf %125 : vector<16x68xf32> to vector<16x68xbf16>
    %cst_83 = arith.constant dense<0.000000e+00> : vector<16x34xf32>
    %129 = tpu.matmul %128, %127, %cst_83 {dimension_numbers = #tpu.dot_dimension_numbers<[1], [0], [0], [1], [0, 0, 1, 1], [], []>} : vector<16x68xbf16>, vector<68x34xbf16>, vector<16x34xf32> -> vector<16x34xf32>
    %c2_84 = arith.constant 2 : index
    %c0_85 = arith.constant 0 : index
    %c0_86 = arith.constant 0 : index
    %130 = vector.load %arg7[%c2_84, %c0_85, %c0_86] : memref<7x1x34xf32, #tpu.memory_space<vmem>>, vector<1x1x34xf32>
    %131 = vector.shape_cast %130 : vector<1x1x34xf32> to vector<1x34xf32>
    %132 = vector.broadcast %131 : vector<1x34xf32> to vector<16x34xf32>
    %133 = arith.addf %129, %132 : vector<16x34xf32>
    %cst_87 = arith.constant 0.000000e+00 : f32
    %134 = vector.broadcast %cst_87 : f32 to vector<16x34xf32>
    %135 = arith.maximumf %133, %134 : vector<16x34xf32>
    %c2_88 = arith.constant 2 : index
    %c0_89 = arith.constant 0 : index
    %c0_90 = arith.constant 0 : index
    %136 = vector.load %arg8[%c2_88, %c0_89, %c0_90] : memref<7x34x64xbf16, #tpu.memory_space<vmem>>, vector<1x34x32xbf16>
    %137 = vector.shape_cast %136 : vector<1x34x32xbf16> to vector<34x32xbf16>
    %138 = arith.truncf %135 : vector<16x34xf32> to vector<16x34xbf16>
    %cst_91 = arith.constant dense<0.000000e+00> : vector<16x32xf32>
    %139 = tpu.matmul %138, %137, %cst_91 {dimension_numbers = #tpu.dot_dimension_numbers<[1], [0], [0], [1], [0, 0, 1, 1], [], []>} : vector<16x34xbf16>, vector<34x32xbf16>, vector<16x32xf32> -> vector<16x32xf32>
    %c2_92 = arith.constant 2 : index
    %c0_93 = arith.constant 0 : index
    %c0_94 = arith.constant 0 : index
    %140 = vector.load %arg9[%c2_92, %c0_93, %c0_94] : memref<7x1x64xf32, #tpu.memory_space<vmem>>, vector<1x1x32xf32>
    %141 = vector.shape_cast %140 : vector<1x1x32xf32> to vector<1x32xf32>
    %142 = vector.broadcast %141 : vector<1x32xf32> to vector<16x32xf32>
    %143 = arith.addf %139, %142 : vector<16x32xf32>
    %144 = math.tanh %143 : vector<16x32xf32>
    %145 = arith.truncf %144 : vector<16x32xf32> to vector<16x32xbf16>
    %146 = vector.extract_strided_slice %145 {offsets = [0, 0], sizes = [16, 16], strides = [1, 1]} : vector<16x32xbf16> to vector<16x16xbf16>
    %147 = vector.extract_strided_slice %145 {offsets = [0, 16], sizes = [16, 16], strides = [1, 1]} : vector<16x32xbf16> to vector<16x16xbf16>
    %148 = tpu.concatenate %146, %147 in 0 : vector<16x16xbf16>, vector<16x16xbf16> -> vector<32x16xbf16>
    %c0_95 = arith.constant 0 : index
    %c0_96 = arith.constant 0 : index
    %c408 = arith.constant 408 : index
    %149 = vector.load %arg1[%c0_95, %c0_96, %c408] : memref<1x8x952xf32, #tpu.memory_space<vmem>>, vector<1x8x136xf32>
    %150 = vector.shape_cast %149 : vector<1x8x136xf32> to vector<8x136xf32>
    %151 = tpu.iota {dimensions = array<i32: 0>} : vector<32x8xi32>
    %152 = tpu.iota {dimensions = array<i32: 1>} : vector<32x8xi32>
    %c1_i32_97 = arith.constant 1 : i32
    %153 = vector.broadcast %c1_i32_97 : i32 to vector<32x8xi32>
    %154 = arith.andi %151, %153 : vector<32x8xi32>
    %155 = arith.cmpi eq, %154, %152 : vector<32x8xi32>
    %156 = arith.extui %155 : vector<32x8xi1> to vector<32x8xi32>
    %157 = arith.sitofp %156 : vector<32x8xi32> to vector<32x8xf32>
    %cst_98 = arith.constant dense<0.000000e+00> : vector<32x136xf32>
    %158 = tpu.matmul %157, %150, %cst_98 {dimension_numbers = #tpu.dot_dimension_numbers<[1], [0], [0], [1], [0, 0, 1, 1], [], []>} : vector<32x8xf32>, vector<8x136xf32>, vector<32x136xf32> -> vector<32x136xf32>
    %c3 = arith.constant 3 : index
    %c0_99 = arith.constant 0 : index
    %c0_100 = arith.constant 0 : index
    %159 = vector.load %arg3[%c3, %c0_99, %c0_100] : memref<7x16x136xbf16, #tpu.memory_space<vmem>>, vector<1x16x136xbf16>
    %160 = vector.shape_cast %159 : vector<1x16x136xbf16> to vector<16x136xbf16>
    %cst_101 = arith.constant dense<0.000000e+00> : vector<32x136xf32>
    %161 = tpu.matmul %148, %160, %cst_101 {dimension_numbers = #tpu.dot_dimension_numbers<[1], [0], [0], [1], [0, 0, 1, 1], [], []>} : vector<32x16xbf16>, vector<16x136xbf16>, vector<32x136xf32> -> vector<32x136xf32>
    %162 = arith.addf %161, %158 : vector<32x136xf32>
    %cst_102 = arith.constant 0.000000e+00 : f32
    %163 = vector.broadcast %cst_102 : f32 to vector<32x136xf32>
    %164 = arith.maximumf %162, %163 : vector<32x136xf32>
    %c3_103 = arith.constant 3 : index
    %c0_104 = arith.constant 0 : index
    %c0_105 = arith.constant 0 : index
    %165 = vector.load %arg4[%c3_103, %c0_104, %c0_105] : memref<7x136x68xbf16, #tpu.memory_space<vmem>>, vector<1x136x68xbf16>
    %166 = vector.shape_cast %165 : vector<1x136x68xbf16> to vector<136x68xbf16>
    %167 = arith.truncf %164 : vector<32x136xf32> to vector<32x136xbf16>
    %cst_106 = arith.constant dense<0.000000e+00> : vector<32x68xf32>
    %168 = tpu.matmul %167, %166, %cst_106 {dimension_numbers = #tpu.dot_dimension_numbers<[1], [0], [0], [1], [0, 0, 1, 1], [], []>} : vector<32x136xbf16>, vector<136x68xbf16>, vector<32x68xf32> -> vector<32x68xf32>
    %c3_107 = arith.constant 3 : index
    %c0_108 = arith.constant 0 : index
    %c0_109 = arith.constant 0 : index
    %169 = vector.load %arg5[%c3_107, %c0_108, %c0_109] : memref<7x1x68xf32, #tpu.memory_space<vmem>>, vector<1x1x68xf32>
    %170 = vector.shape_cast %169 : vector<1x1x68xf32> to vector<1x68xf32>
    %171 = vector.broadcast %170 : vector<1x68xf32> to vector<32x68xf32>
    %172 = arith.addf %168, %171 : vector<32x68xf32>
    %cst_110 = arith.constant 0.000000e+00 : f32
    %173 = vector.broadcast %cst_110 : f32 to vector<32x68xf32>
    %174 = arith.maximumf %172, %173 : vector<32x68xf32>
    %c3_111 = arith.constant 3 : index
    %c0_112 = arith.constant 0 : index
    %c0_113 = arith.constant 0 : index
    %175 = vector.load %arg6[%c3_111, %c0_112, %c0_113] : memref<7x68x34xbf16, #tpu.memory_space<vmem>>, vector<1x68x34xbf16>
    %176 = vector.shape_cast %175 : vector<1x68x34xbf16> to vector<68x34xbf16>
    %177 = arith.truncf %174 : vector<32x68xf32> to vector<32x68xbf16>
    %cst_114 = arith.constant dense<0.000000e+00> : vector<32x34xf32>
    %178 = tpu.matmul %177, %176, %cst_114 {dimension_numbers = #tpu.dot_dimension_numbers<[1], [0], [0], [1], [0, 0, 1, 1], [], []>} : vector<32x68xbf16>, vector<68x34xbf16>, vector<32x34xf32> -> vector<32x34xf32>
    %c3_115 = arith.constant 3 : index
    %c0_116 = arith.constant 0 : index
    %c0_117 = arith.constant 0 : index
    %179 = vector.load %arg7[%c3_115, %c0_116, %c0_117] : memref<7x1x34xf32, #tpu.memory_space<vmem>>, vector<1x1x34xf32>
    %180 = vector.shape_cast %179 : vector<1x1x34xf32> to vector<1x34xf32>
    %181 = vector.broadcast %180 : vector<1x34xf32> to vector<32x34xf32>
    %182 = arith.addf %178, %181 : vector<32x34xf32>
    %cst_118 = arith.constant 0.000000e+00 : f32
    %183 = vector.broadcast %cst_118 : f32 to vector<32x34xf32>
    %184 = arith.maximumf %182, %183 : vector<32x34xf32>
    %c3_119 = arith.constant 3 : index
    %c0_120 = arith.constant 0 : index
    %c0_121 = arith.constant 0 : index
    %185 = vector.load %arg8[%c3_119, %c0_120, %c0_121] : memref<7x34x64xbf16, #tpu.memory_space<vmem>>, vector<1x34x32xbf16>
    %186 = vector.shape_cast %185 : vector<1x34x32xbf16> to vector<34x32xbf16>
    %187 = arith.truncf %184 : vector<32x34xf32> to vector<32x34xbf16>
    %cst_122 = arith.constant dense<0.000000e+00> : vector<32x32xf32>
    %188 = tpu.matmul %187, %186, %cst_122 {dimension_numbers = #tpu.dot_dimension_numbers<[1], [0], [0], [1], [0, 0, 1, 1], [], []>} : vector<32x34xbf16>, vector<34x32xbf16>, vector<32x32xf32> -> vector<32x32xf32>
    %c3_123 = arith.constant 3 : index
    %c0_124 = arith.constant 0 : index
    %c0_125 = arith.constant 0 : index
    %189 = vector.load %arg9[%c3_123, %c0_124, %c0_125] : memref<7x1x64xf32, #tpu.memory_space<vmem>>, vector<1x1x32xf32>
    %190 = vector.shape_cast %189 : vector<1x1x32xf32> to vector<1x32xf32>
    %191 = vector.broadcast %190 : vector<1x32xf32> to vector<32x32xf32>
    %192 = arith.addf %188, %191 : vector<32x32xf32>
    %193 = math.tanh %192 : vector<32x32xf32>
    %194 = arith.truncf %193 : vector<32x32xf32> to vector<32x32xbf16>
    %195 = vector.extract_strided_slice %194 {offsets = [0, 0], sizes = [32, 16], strides = [1, 1]} : vector<32x32xbf16> to vector<32x16xbf16>
    %196 = vector.extract_strided_slice %194 {offsets = [0, 16], sizes = [32, 16], strides = [1, 1]} : vector<32x32xbf16> to vector<32x16xbf16>
    %197 = tpu.concatenate %195, %196 in 0 : vector<32x16xbf16>, vector<32x16xbf16> -> vector<64x16xbf16>
    %c0_126 = arith.constant 0 : index
    %c0_127 = arith.constant 0 : index
    %c544 = arith.constant 544 : index
    %198 = vector.load %arg1[%c0_126, %c0_127, %c544] : memref<1x8x952xf32, #tpu.memory_space<vmem>>, vector<1x8x136xf32>
    %199 = vector.shape_cast %198 : vector<1x8x136xf32> to vector<8x136xf32>
    %200 = tpu.iota {dimensions = array<i32: 0>} : vector<64x8xi32>
    %201 = tpu.iota {dimensions = array<i32: 1>} : vector<64x8xi32>
    %c1_i32_128 = arith.constant 1 : i32
    %202 = vector.broadcast %c1_i32_128 : i32 to vector<64x8xi32>
    %203 = arith.andi %200, %202 : vector<64x8xi32>
    %204 = arith.cmpi eq, %203, %201 : vector<64x8xi32>
    %205 = arith.extui %204 : vector<64x8xi1> to vector<64x8xi32>
    %206 = arith.sitofp %205 : vector<64x8xi32> to vector<64x8xf32>
    %cst_129 = arith.constant dense<0.000000e+00> : vector<64x136xf32>
    %207 = tpu.matmul %206, %199, %cst_129 {dimension_numbers = #tpu.dot_dimension_numbers<[1], [0], [0], [1], [0, 0, 1, 1], [], []>} : vector<64x8xf32>, vector<8x136xf32>, vector<64x136xf32> -> vector<64x136xf32>
    %c4 = arith.constant 4 : index
    %c0_130 = arith.constant 0 : index
    %c0_131 = arith.constant 0 : index
    %208 = vector.load %arg3[%c4, %c0_130, %c0_131] : memref<7x16x136xbf16, #tpu.memory_space<vmem>>, vector<1x16x136xbf16>
    %209 = vector.shape_cast %208 : vector<1x16x136xbf16> to vector<16x136xbf16>
    %cst_132 = arith.constant dense<0.000000e+00> : vector<64x136xf32>
    %210 = tpu.matmul %197, %209, %cst_132 {dimension_numbers = #tpu.dot_dimension_numbers<[1], [0], [0], [1], [0, 0, 1, 1], [], []>} : vector<64x16xbf16>, vector<16x136xbf16>, vector<64x136xf32> -> vector<64x136xf32>
    %211 = arith.addf %210, %207 : vector<64x136xf32>
    %cst_133 = arith.constant 0.000000e+00 : f32
    %212 = vector.broadcast %cst_133 : f32 to vector<64x136xf32>
    %213 = arith.maximumf %211, %212 : vector<64x136xf32>
    %c4_134 = arith.constant 4 : index
    %c0_135 = arith.constant 0 : index
    %c0_136 = arith.constant 0 : index
    %214 = vector.load %arg4[%c4_134, %c0_135, %c0_136] : memref<7x136x68xbf16, #tpu.memory_space<vmem>>, vector<1x136x68xbf16>
    %215 = vector.shape_cast %214 : vector<1x136x68xbf16> to vector<136x68xbf16>
    %216 = arith.truncf %213 : vector<64x136xf32> to vector<64x136xbf16>
    %cst_137 = arith.constant dense<0.000000e+00> : vector<64x68xf32>
    %217 = tpu.matmul %216, %215, %cst_137 {dimension_numbers = #tpu.dot_dimension_numbers<[1], [0], [0], [1], [0, 0, 1, 1], [], []>} : vector<64x136xbf16>, vector<136x68xbf16>, vector<64x68xf32> -> vector<64x68xf32>
    %c4_138 = arith.constant 4 : index
    %c0_139 = arith.constant 0 : index
    %c0_140 = arith.constant 0 : index
    %218 = vector.load %arg5[%c4_138, %c0_139, %c0_140] : memref<7x1x68xf32, #tpu.memory_space<vmem>>, vector<1x1x68xf32>
    %219 = vector.shape_cast %218 : vector<1x1x68xf32> to vector<1x68xf32>
    %220 = vector.broadcast %219 : vector<1x68xf32> to vector<64x68xf32>
    %221 = arith.addf %217, %220 : vector<64x68xf32>
    %cst_141 = arith.constant 0.000000e+00 : f32
    %222 = vector.broadcast %cst_141 : f32 to vector<64x68xf32>
    %223 = arith.maximumf %221, %222 : vector<64x68xf32>
    %c4_142 = arith.constant 4 : index
    %c0_143 = arith.constant 0 : index
    %c0_144 = arith.constant 0 : index
    %224 = vector.load %arg6[%c4_142, %c0_143, %c0_144] : memref<7x68x34xbf16, #tpu.memory_space<vmem>>, vector<1x68x34xbf16>
    %225 = vector.shape_cast %224 : vector<1x68x34xbf16> to vector<68x34xbf16>
    %226 = arith.truncf %223 : vector<64x68xf32> to vector<64x68xbf16>
    %cst_145 = arith.constant dense<0.000000e+00> : vector<64x34xf32>
    %227 = tpu.matmul %226, %225, %cst_145 {dimension_numbers = #tpu.dot_dimension_numbers<[1], [0], [0], [1], [0, 0, 1, 1], [], []>} : vector<64x68xbf16>, vector<68x34xbf16>, vector<64x34xf32> -> vector<64x34xf32>
    %c4_146 = arith.constant 4 : index
    %c0_147 = arith.constant 0 : index
    %c0_148 = arith.constant 0 : index
    %228 = vector.load %arg7[%c4_146, %c0_147, %c0_148] : memref<7x1x34xf32, #tpu.memory_space<vmem>>, vector<1x1x34xf32>
    %229 = vector.shape_cast %228 : vector<1x1x34xf32> to vector<1x34xf32>
    %230 = vector.broadcast %229 : vector<1x34xf32> to vector<64x34xf32>
    %231 = arith.addf %227, %230 : vector<64x34xf32>
    %cst_149 = arith.constant 0.000000e+00 : f32
    %232 = vector.broadcast %cst_149 : f32 to vector<64x34xf32>
    %233 = arith.maximumf %231, %232 : vector<64x34xf32>
    %c4_150 = arith.constant 4 : index
    %c0_151 = arith.constant 0 : index
    %c0_152 = arith.constant 0 : index
    %234 = vector.load %arg8[%c4_150, %c0_151, %c0_152] : memref<7x34x64xbf16, #tpu.memory_space<vmem>>, vector<1x34x64xbf16>
    %235 = vector.shape_cast %234 : vector<1x34x64xbf16> to vector<34x64xbf16>
    %236 = arith.truncf %233 : vector<64x34xf32> to vector<64x34xbf16>
    %cst_153 = arith.constant dense<0.000000e+00> : vector<64x64xf32>
    %237 = tpu.matmul %236, %235, %cst_153 {dimension_numbers = #tpu.dot_dimension_numbers<[1], [0], [0], [1], [0, 0, 1, 1], [], []>} : vector<64x34xbf16>, vector<34x64xbf16>, vector<64x64xf32> -> vector<64x64xf32>
    %c4_154 = arith.constant 4 : index
    %c0_155 = arith.constant 0 : index
    %c0_156 = arith.constant 0 : index
    %238 = vector.load %arg9[%c4_154, %c0_155, %c0_156] : memref<7x1x64xf32, #tpu.memory_space<vmem>>, vector<1x1x64xf32>
    %239 = vector.shape_cast %238 : vector<1x1x64xf32> to vector<1x64xf32>
    %240 = vector.broadcast %239 : vector<1x64xf32> to vector<64x64xf32>
    %241 = arith.addf %237, %240 : vector<64x64xf32>
    %242 = math.tanh %241 : vector<64x64xf32>
    %243 = arith.truncf %242 : vector<64x64xf32> to vector<64x64xbf16>
    %244 = vector.extract_strided_slice %243 {offsets = [0, 0], sizes = [64, 16], strides = [1, 1]} : vector<64x64xbf16> to vector<64x16xbf16>
    %245 = vector.extract_strided_slice %243 {offsets = [0, 16], sizes = [64, 16], strides = [1, 1]} : vector<64x64xbf16> to vector<64x16xbf16>
    %246 = vector.extract_strided_slice %243 {offsets = [0, 32], sizes = [64, 16], strides = [1, 1]} : vector<64x64xbf16> to vector<64x16xbf16>
    %247 = vector.extract_strided_slice %243 {offsets = [0, 48], sizes = [64, 16], strides = [1, 1]} : vector<64x64xbf16> to vector<64x16xbf16>
    %248 = tpu.concatenate %244, %245, %246, %247 in 0 : vector<64x16xbf16>, vector<64x16xbf16>, vector<64x16xbf16>, vector<64x16xbf16> -> vector<256x16xbf16>
    %c0_157 = arith.constant 0 : index
    %c0_158 = arith.constant 0 : index
    %c680 = arith.constant 680 : index
    %249 = vector.load %arg1[%c0_157, %c0_158, %c680] : memref<1x8x952xf32, #tpu.memory_space<vmem>>, vector<1x8x136xf32>
    %250 = vector.shape_cast %249 : vector<1x8x136xf32> to vector<8x136xf32>
    %251 = tpu.iota {dimensions = array<i32: 0>} : vector<256x8xi32>
    %252 = tpu.iota {dimensions = array<i32: 1>} : vector<256x8xi32>
    %c1_i32_159 = arith.constant 1 : i32
    %253 = vector.broadcast %c1_i32_159 : i32 to vector<256x8xi32>
    %254 = arith.andi %251, %253 : vector<256x8xi32>
    %255 = arith.cmpi eq, %254, %252 : vector<256x8xi32>
    %256 = arith.extui %255 : vector<256x8xi1> to vector<256x8xi32>
    %257 = arith.sitofp %256 : vector<256x8xi32> to vector<256x8xf32>
    %cst_160 = arith.constant dense<0.000000e+00> : vector<256x136xf32>
    %258 = tpu.matmul %257, %250, %cst_160 {dimension_numbers = #tpu.dot_dimension_numbers<[1], [0], [0], [1], [0, 0, 1, 1], [], []>} : vector<256x8xf32>, vector<8x136xf32>, vector<256x136xf32> -> vector<256x136xf32>
    %c5 = arith.constant 5 : index
    %c0_161 = arith.constant 0 : index
    %c0_162 = arith.constant 0 : index
    %259 = vector.load %arg3[%c5, %c0_161, %c0_162] : memref<7x16x136xbf16, #tpu.memory_space<vmem>>, vector<1x16x136xbf16>
    %260 = vector.shape_cast %259 : vector<1x16x136xbf16> to vector<16x136xbf16>
    %cst_163 = arith.constant dense<0.000000e+00> : vector<256x136xf32>
    %261 = tpu.matmul %248, %260, %cst_163 {dimension_numbers = #tpu.dot_dimension_numbers<[1], [0], [0], [1], [0, 0, 1, 1], [], []>} : vector<256x16xbf16>, vector<16x136xbf16>, vector<256x136xf32> -> vector<256x136xf32>
    %262 = arith.addf %261, %258 : vector<256x136xf32>
    %cst_164 = arith.constant 0.000000e+00 : f32
    %263 = vector.broadcast %cst_164 : f32 to vector<256x136xf32>
    %264 = arith.maximumf %262, %263 : vector<256x136xf32>
    %c5_165 = arith.constant 5 : index
    %c0_166 = arith.constant 0 : index
    %c0_167 = arith.constant 0 : index
    %265 = vector.load %arg4[%c5_165, %c0_166, %c0_167] : memref<7x136x68xbf16, #tpu.memory_space<vmem>>, vector<1x136x68xbf16>
    %266 = vector.shape_cast %265 : vector<1x136x68xbf16> to vector<136x68xbf16>
    %267 = arith.truncf %264 : vector<256x136xf32> to vector<256x136xbf16>
    %cst_168 = arith.constant dense<0.000000e+00> : vector<256x68xf32>
    %268 = tpu.matmul %267, %266, %cst_168 {dimension_numbers = #tpu.dot_dimension_numbers<[1], [0], [0], [1], [0, 0, 1, 1], [], []>} : vector<256x136xbf16>, vector<136x68xbf16>, vector<256x68xf32> -> vector<256x68xf32>
    %c5_169 = arith.constant 5 : index
    %c0_170 = arith.constant 0 : index
    %c0_171 = arith.constant 0 : index
    %269 = vector.load %arg5[%c5_169, %c0_170, %c0_171] : memref<7x1x68xf32, #tpu.memory_space<vmem>>, vector<1x1x68xf32>
    %270 = vector.shape_cast %269 : vector<1x1x68xf32> to vector<1x68xf32>
    %271 = vector.broadcast %270 : vector<1x68xf32> to vector<256x68xf32>
    %272 = arith.addf %268, %271 : vector<256x68xf32>
    %cst_172 = arith.constant 0.000000e+00 : f32
    %273 = vector.broadcast %cst_172 : f32 to vector<256x68xf32>
    %274 = arith.maximumf %272, %273 : vector<256x68xf32>
    %c5_173 = arith.constant 5 : index
    %c0_174 = arith.constant 0 : index
    %c0_175 = arith.constant 0 : index
    %275 = vector.load %arg6[%c5_173, %c0_174, %c0_175] : memref<7x68x34xbf16, #tpu.memory_space<vmem>>, vector<1x68x34xbf16>
    %276 = vector.shape_cast %275 : vector<1x68x34xbf16> to vector<68x34xbf16>
    %277 = arith.truncf %274 : vector<256x68xf32> to vector<256x68xbf16>
    %cst_176 = arith.constant dense<0.000000e+00> : vector<256x34xf32>
    %278 = tpu.matmul %277, %276, %cst_176 {dimension_numbers = #tpu.dot_dimension_numbers<[1], [0], [0], [1], [0, 0, 1, 1], [], []>} : vector<256x68xbf16>, vector<68x34xbf16>, vector<256x34xf32> -> vector<256x34xf32>
    %c5_177 = arith.constant 5 : index
    %c0_178 = arith.constant 0 : index
    %c0_179 = arith.constant 0 : index
    %279 = vector.load %arg7[%c5_177, %c0_178, %c0_179] : memref<7x1x34xf32, #tpu.memory_space<vmem>>, vector<1x1x34xf32>
    %280 = vector.shape_cast %279 : vector<1x1x34xf32> to vector<1x34xf32>
    %281 = vector.broadcast %280 : vector<1x34xf32> to vector<256x34xf32>
    %282 = arith.addf %278, %281 : vector<256x34xf32>
    %cst_180 = arith.constant 0.000000e+00 : f32
    %283 = vector.broadcast %cst_180 : f32 to vector<256x34xf32>
    %284 = arith.maximumf %282, %283 : vector<256x34xf32>
    %c5_181 = arith.constant 5 : index
    %c0_182 = arith.constant 0 : index
    %c0_183 = arith.constant 0 : index
    %285 = vector.load %arg8[%c5_181, %c0_182, %c0_183] : memref<7x34x64xbf16, #tpu.memory_space<vmem>>, vector<1x34x64xbf16>
    %286 = vector.shape_cast %285 : vector<1x34x64xbf16> to vector<34x64xbf16>
    %287 = arith.truncf %284 : vector<256x34xf32> to vector<256x34xbf16>
    %cst_184 = arith.constant dense<0.000000e+00> : vector<256x64xf32>
    %288 = tpu.matmul %287, %286, %cst_184 {dimension_numbers = #tpu.dot_dimension_numbers<[1], [0], [0], [1], [0, 0, 1, 1], [], []>} : vector<256x34xbf16>, vector<34x64xbf16>, vector<256x64xf32> -> vector<256x64xf32>
    %c5_185 = arith.constant 5 : index
    %c0_186 = arith.constant 0 : index
    %c0_187 = arith.constant 0 : index
    %289 = vector.load %arg9[%c5_185, %c0_186, %c0_187] : memref<7x1x64xf32, #tpu.memory_space<vmem>>, vector<1x1x64xf32>
    %290 = vector.shape_cast %289 : vector<1x1x64xf32> to vector<1x64xf32>
    %291 = vector.broadcast %290 : vector<1x64xf32> to vector<256x64xf32>
    %292 = arith.addf %288, %291 : vector<256x64xf32>
    %293 = math.tanh %292 : vector<256x64xf32>
    %294 = arith.truncf %293 : vector<256x64xf32> to vector<256x64xbf16>
    %295 = vector.extract_strided_slice %294 {offsets = [0, 0], sizes = [256, 16], strides = [1, 1]} : vector<256x64xbf16> to vector<256x16xbf16>
    %296 = vector.extract_strided_slice %294 {offsets = [0, 16], sizes = [256, 16], strides = [1, 1]} : vector<256x64xbf16> to vector<256x16xbf16>
    %297 = vector.extract_strided_slice %294 {offsets = [0, 32], sizes = [256, 16], strides = [1, 1]} : vector<256x64xbf16> to vector<256x16xbf16>
    %298 = vector.extract_strided_slice %294 {offsets = [0, 48], sizes = [256, 16], strides = [1, 1]} : vector<256x64xbf16> to vector<256x16xbf16>
    %299 = tpu.concatenate %295, %296, %297, %298 in 0 : vector<256x16xbf16>, vector<256x16xbf16>, vector<256x16xbf16>, vector<256x16xbf16> -> vector<1024x16xbf16>
    %c0_188 = arith.constant 0 : index
    %c0_189 = arith.constant 0 : index
    %c816 = arith.constant 816 : index
    %300 = vector.load %arg1[%c0_188, %c0_189, %c816] : memref<1x8x952xf32, #tpu.memory_space<vmem>>, vector<1x8x136xf32>
    %301 = vector.shape_cast %300 : vector<1x8x136xf32> to vector<8x136xf32>
    %302 = tpu.iota {dimensions = array<i32: 0>} : vector<1024x8xi32>
    %303 = tpu.iota {dimensions = array<i32: 1>} : vector<1024x8xi32>
    %c1_i32_190 = arith.constant 1 : i32
    %304 = vector.broadcast %c1_i32_190 : i32 to vector<1024x8xi32>
    %305 = arith.andi %302, %304 : vector<1024x8xi32>
    %306 = arith.cmpi eq, %305, %303 : vector<1024x8xi32>
    %307 = arith.extui %306 : vector<1024x8xi1> to vector<1024x8xi32>
    %308 = arith.sitofp %307 : vector<1024x8xi32> to vector<1024x8xf32>
    %cst_191 = arith.constant dense<0.000000e+00> : vector<1024x136xf32>
    %309 = tpu.matmul %308, %301, %cst_191 {dimension_numbers = #tpu.dot_dimension_numbers<[1], [0], [0], [1], [0, 0, 1, 1], [], []>} : vector<1024x8xf32>, vector<8x136xf32>, vector<1024x136xf32> -> vector<1024x136xf32>
    %c6 = arith.constant 6 : index
    %c0_192 = arith.constant 0 : index
    %c0_193 = arith.constant 0 : index
    %310 = vector.load %arg3[%c6, %c0_192, %c0_193] : memref<7x16x136xbf16, #tpu.memory_space<vmem>>, vector<1x16x136xbf16>
    %311 = vector.shape_cast %310 : vector<1x16x136xbf16> to vector<16x136xbf16>
    %cst_194 = arith.constant dense<0.000000e+00> : vector<1024x136xf32>
    %312 = tpu.matmul %299, %311, %cst_194 {dimension_numbers = #tpu.dot_dimension_numbers<[1], [0], [0], [1], [0, 0, 1, 1], [], []>} : vector<1024x16xbf16>, vector<16x136xbf16>, vector<1024x136xf32> -> vector<1024x136xf32>
    %313 = arith.addf %312, %309 : vector<1024x136xf32>
    %cst_195 = arith.constant 0.000000e+00 : f32
    %314 = vector.broadcast %cst_195 : f32 to vector<1024x136xf32>
    %315 = arith.maximumf %313, %314 : vector<1024x136xf32>
    %c6_196 = arith.constant 6 : index
    %c0_197 = arith.constant 0 : index
    %c0_198 = arith.constant 0 : index
    %316 = vector.load %arg4[%c6_196, %c0_197, %c0_198] : memref<7x136x68xbf16, #tpu.memory_space<vmem>>, vector<1x136x68xbf16>
    %317 = vector.shape_cast %316 : vector<1x136x68xbf16> to vector<136x68xbf16>
    %318 = arith.truncf %315 : vector<1024x136xf32> to vector<1024x136xbf16>
    %cst_199 = arith.constant dense<0.000000e+00> : vector<1024x68xf32>
    %319 = tpu.matmul %318, %317, %cst_199 {dimension_numbers = #tpu.dot_dimension_numbers<[1], [0], [0], [1], [0, 0, 1, 1], [], []>} : vector<1024x136xbf16>, vector<136x68xbf16>, vector<1024x68xf32> -> vector<1024x68xf32>
    %c6_200 = arith.constant 6 : index
    %c0_201 = arith.constant 0 : index
    %c0_202 = arith.constant 0 : index
    %320 = vector.load %arg5[%c6_200, %c0_201, %c0_202] : memref<7x1x68xf32, #tpu.memory_space<vmem>>, vector<1x1x68xf32>
    %321 = vector.shape_cast %320 : vector<1x1x68xf32> to vector<1x68xf32>
    %322 = vector.broadcast %321 : vector<1x68xf32> to vector<1024x68xf32>
    %323 = arith.addf %319, %322 : vector<1024x68xf32>
    %cst_203 = arith.constant 0.000000e+00 : f32
    %324 = vector.broadcast %cst_203 : f32 to vector<1024x68xf32>
    %325 = arith.maximumf %323, %324 : vector<1024x68xf32>
    %c6_204 = arith.constant 6 : index
    %c0_205 = arith.constant 0 : index
    %c0_206 = arith.constant 0 : index
    %326 = vector.load %arg6[%c6_204, %c0_205, %c0_206] : memref<7x68x34xbf16, #tpu.memory_space<vmem>>, vector<1x68x34xbf16>
    %327 = vector.shape_cast %326 : vector<1x68x34xbf16> to vector<68x34xbf16>
    %328 = arith.truncf %325 : vector<1024x68xf32> to vector<1024x68xbf16>
    %cst_207 = arith.constant dense<0.000000e+00> : vector<1024x34xf32>
    %329 = tpu.matmul %328, %327, %cst_207 {dimension_numbers = #tpu.dot_dimension_numbers<[1], [0], [0], [1], [0, 0, 1, 1], [], []>} : vector<1024x68xbf16>, vector<68x34xbf16>, vector<1024x34xf32> -> vector<1024x34xf32>
    %c6_208 = arith.constant 6 : index
    %c0_209 = arith.constant 0 : index
    %c0_210 = arith.constant 0 : index
    %330 = vector.load %arg7[%c6_208, %c0_209, %c0_210] : memref<7x1x34xf32, #tpu.memory_space<vmem>>, vector<1x1x34xf32>
    %331 = vector.shape_cast %330 : vector<1x1x34xf32> to vector<1x34xf32>
    %332 = vector.broadcast %331 : vector<1x34xf32> to vector<1024x34xf32>
    %333 = arith.addf %329, %332 : vector<1024x34xf32>
    %cst_211 = arith.constant 0.000000e+00 : f32
    %334 = vector.broadcast %cst_211 : f32 to vector<1024x34xf32>
    %335 = arith.maximumf %333, %334 : vector<1024x34xf32>
    %c6_212 = arith.constant 6 : index
    %c0_213 = arith.constant 0 : index
    %c0_214 = arith.constant 0 : index
    %336 = vector.load %arg8[%c6_212, %c0_213, %c0_214] : memref<7x34x64xbf16, #tpu.memory_space<vmem>>, vector<1x34x12xbf16>
    %337 = vector.shape_cast %336 : vector<1x34x12xbf16> to vector<34x12xbf16>
    %338 = arith.truncf %335 : vector<1024x34xf32> to vector<1024x34xbf16>
    %cst_215 = arith.constant dense<0.000000e+00> : vector<1024x12xf32>
    %339 = tpu.matmul %338, %337, %cst_215 {dimension_numbers = #tpu.dot_dimension_numbers<[1], [0], [0], [1], [0, 0, 1, 1], [], []>} : vector<1024x34xbf16>, vector<34x12xbf16>, vector<1024x12xf32> -> vector<1024x12xf32>
    %c6_216 = arith.constant 6 : index
    %c0_217 = arith.constant 0 : index
    %c0_218 = arith.constant 0 : index
    %340 = vector.load %arg9[%c6_216, %c0_217, %c0_218] : memref<7x1x64xf32, #tpu.memory_space<vmem>>, vector<1x1x12xf32>
    %341 = vector.shape_cast %340 : vector<1x1x12xf32> to vector<1x12xf32>
    %342 = vector.broadcast %341 : vector<1x12xf32> to vector<1024x12xf32>
    %343 = arith.addf %339, %342 : vector<1024x12xf32>
    %344 = math.tanh %343 : vector<1024x12xf32>
    %c0_219 = arith.constant 0 : index
    %c0_220 = arith.constant 0 : index
    %c0_221 = arith.constant 0 : index
    %345 = vector.load %arg10[%c0_219, %c0_220, %c0_221] : memref<1x1024x12xf32, #tpu.memory_space<vmem>>, vector<1x1024x12xf32>
    %346 = vector.shape_cast %345 : vector<1x1024x12xf32> to vector<1024x12xf32>
    %347 = vector.shape_cast %344 : vector<1024x12xf32> to vector<1x1024x12xf32>
    tpu.vector_store %arg10[%c0_219, %c0_220, %c0_221], %347 {strides = array<i32>} : memref<1x1024x12xf32, #tpu.memory_space<vmem>>, vector<1x1024x12xf32>,
    return
  }
  func.func @transform_0(%arg0: i32) -> (i32, i32, i32) {
    %c0_i32 = arith.constant 0 : i32
    %c0_i32_0 = arith.constant 0 : i32
    %c0_i32_1 = arith.constant 0 : i32
    return %arg0, %c0_i32, %c0_i32_0 : i32, i32, i32
  }
  func.func @transform_1(%arg0: i32) -> (i32, i32, i32) {
    %c0_i32 = arith.constant 0 : i32
    %c0_i32_0 = arith.constant 0 : i32
    %c0_i32_1 = arith.constant 0 : i32
    return %arg0, %c0_i32, %c0_i32_0 : i32, i32, i32
  }
  func.func @transform_2(%arg0: i32) -> (i32, i32, i32) {
    %c0_i32 = arith.constant 0 : i32
    %c0_i32_0 = arith.constant 0 : i32
    %c0_i32_1 = arith.constant 0 : i32
    %c0_i32_2 = arith.constant 0 : i32
    return %c0_i32, %c0_i32_0, %c0_i32_1 : i32, i32, i32
  }
  func.func @transform_3(%arg0: i32) -> (i32, i32, i32) {
    %c0_i32 = arith.constant 0 : i32
    %c0_i32_0 = arith.constant 0 : i32
    %c0_i32_1 = arith.constant 0 : i32
    %c0_i32_2 = arith.constant 0 : i32
    return %c0_i32, %c0_i32_0, %c0_i32_1 : i32, i32, i32
  }
  func.func @transform_4(%arg0: i32) -> (i32, i32, i32) {
    %c0_i32 = arith.constant 0 : i32
    %c0_i32_0 = arith.constant 0 : i32
    %c0_i32_1 = arith.constant 0 : i32
    %c0_i32_2 = arith.constant 0 : i32
    return %c0_i32, %c0_i32_0, %c0_i32_1 : i32, i32, i32
  }
  func.func @transform_5(%arg0: i32) -> (i32, i32, i32) {
    %c0_i32 = arith.constant 0 : i32
    %c0_i32_0 = arith.constant 0 : i32
    %c0_i32_1 = arith.constant 0 : i32
    %c0_i32_2 = arith.constant 0 : i32
    return %c0_i32, %c0_i32_0, %c0_i32_1 : i32, i32, i32
  }
  func.func @transform_6(%arg0: i32) -> (i32, i32, i32) {
    %c0_i32 = arith.constant 0 : i32
    %c0_i32_0 = arith.constant 0 : i32
    %c0_i32_1 = arith.constant 0 : i32
    %c0_i32_2 = arith.constant 0 : i32
    return %c0_i32, %c0_i32_0, %c0_i32_1 : i32, i32, i32
  }
  func.func @transform_7(%arg0: i32) -> (i32, i32, i32) {
    %c0_i32 = arith.constant 0 : i32
    %c0_i32_0 = arith.constant 0 : i32
    %c0_i32_1 = arith.constant 0 : i32
    %c0_i32_2 = arith.constant 0 : i32
    return %c0_i32, %c0_i32_0, %c0_i32_1 : i32, i32, i32
  }
  func.func @transform_8(%arg0: i32) -> (i32, i32, i32) {
    %c0_i32 = arith.constant 0 : i32
    %c0_i32_0 = arith.constant 0 : i32
    %c0_i32_1 = arith.constant 0 : i32
    %c0_i32_2 = arith.constant 0 : i32
    return %c0_i32, %c0_i32_0, %c0_i32_1 : i32, i32, i32
  }
  func.func @transform_9(%arg0: i32) -> (i32, i32, i32) {
    %c0_i32 = arith.constant 0 : i32
    %c0_i32_0 = arith.constant 0 : i32
    %c0_i32_1 = arith.constant 0 : i32
    return %arg0, %c0_i32, %c0_i32_0 : i32, i32, i32
  }
}

</mosaic_0001>

<bundles_post_ra>
// kernel: _lambda_.1
= control target key start
LH: loop header
LB: loop body
LE: loop exit
PB: predicated region body
PF: predicated region fallthrough
CT: control target
= control target key end

     0   :  { %14 = vsyncpa [#allocation3], 0  ;;  %s16831_s0 = inlined_call_operand.vmem [shape: f32[1,8,952], index: 0, kind: input, shape index: {}]   ;;  %s16832_s1 = inlined_call_operand.vmem [shape: bf16[1,4,16], index: 1, kind: input, shape index: {}]   ;;  %s16833_s2 = inlined_call_operand.vmem [shape: bf16[7,16,136], index: 2, kind: input, shape index: {}]   ;;  %s16834_s3 = inlined_call_operand.hbm [shape: bf16[7,136,68], index: 3, kind: input, shape index: {}]   ;;  %s16835_s4 = inlined_call_operand.hbm [shape: f32[7,1,68], index: 4, kind: input, shape index: {}]   ;;  %s16836_s5 = inlined_call_operand.hbm [shape: bf16[7,68,34], index: 5, kind: input, shape index: {}]   ;;  %s16837_s6 = inlined_call_operand.hbm [shape: f32[7,1,34], index: 6, kind: input, shape index: {}]   ;;  %s16838_s7 = inlined_call_operand.hbm [shape: bf16[7,34,64], index: 7, kind: input, shape index: {}]   ;;  %s16839_s8 = inlined_call_operand.hbm [shape: f32[7,1,64], index: 8, kind: input, shape index: {}]   ;;  %s16840_s9 = inlined_call_operand.vmem [shape: f32[1,1024,12], index: 9, kind: output, shape index: {}]  }
   0x1   :  { %15 = vsyncpa [#allocation5], 0 }
   0x2   :  { %16 = vsyncpa [#allocation8], 0 }
   0x3   :  { %17 = vsyncpa [#allocation11], 0  ;;  %s12712_s30 = smov [#allocation4]   ;;  %s12572_s13 = scalar_lea.hbm %s16835_s4, 112 }
   0x4   :  { %s41_s10 = sshll.u32 %s12712_s30, 4  ;;  %p12573_p0 = scmp.ne.s32.totalorder %s16835_s4, %s12572_s13  ;;  %s42_s10 = int_to_ptr.vmem [resolvable:$true] %s41_s10 }
   0x5   :  { %p12576_p1 = scmp.lt.u32.totalorder %s12572_s13, %s16835_s4 }
   0x7   :  { %p12578_p2 = pnand %p12576_p1, %p12573_p0 }
   0x9   :  { %12581 = shalt.err (!%p12578_p2)
}
   0xa   :  { %s12582_s18 = scalar_lea.vmem %s42_s10, 112  ;;  %s12586_s19 = scalar_lea.vmem %s42_s10, 128 }
   0xb   :  { %p12583_p3 = scmp.ne.s32.totalorder %s42_s10, %s12582_s18  ;;  %p12587_p4 = scmp.lt.s32.totalorder %s42_s10, %s42_s10 }
   0xc   :  { %p12588_p5 = scmp.lt.s32.totalorder %s12586_s19, %s12582_s18 }
   0xe   :  { %p12589_p6 = por %p12588_p5, %p12587_p4 }
  0x10   :  { %p12590_p7 = pnand %p12589_p6, %p12583_p3 }
  0x12   :  { %12593 = shalt.err (!%p12590_p7)
}
  0x13   :  { %s12713_s20 = smov 16   ;;  %s12714_s21 = smov 1  }
  0x14   :  { %47 = dma.hbm_to_vmem [thread:$0]  %s16835_s4, 112, %s42_s10, [#allocation5], %s12713_s20, %s12713_s20, %s12714_s21  }
  0x15   :  { %s12715_s24 = smov [#allocation7]   ;;  %s12716_s26 = smov [#allocation2]  }
  0x16   :  { %s65_s25 = sshll.u32 %s12715_s24, 4  ;;  %s29_s27 = sshll.u32 %s12716_s26, 4  ;;  %s66_s25 = int_to_ptr.vmem [resolvable:$true] %s65_s25  ;;  %s30_s27 = int_to_ptr.vmem [resolvable:$true] %s29_s27 }
  0x17   :  { %s12594_s30 = scalar_lea.hbm %s16837_s6, 112 }
  0x18   :  { %p12595_p8 = scmp.ne.s32.totalorder %s16837_s6, %s12594_s30  ;;  %p12598_p9 = scmp.lt.u32.totalorder %s12594_s30, %s16837_s6 }
  0x1a   :  { %p12600_p10 = pnand %p12598_p9, %p12595_p8 }
  0x1c   :  { %12603 = shalt.err (!%p12600_p10)
}
  0x1d   :  { %s12604_s4 = scalar_lea.vmem %s66_s25, 112  ;;  %s12608_s10 = scalar_lea.vmem %s66_s25, 128 }
  0x1e   :  { %p12605_p11 = scmp.ne.s32.totalorder %s66_s25, %s12604_s4  ;;  %p12609_p12 = scmp.lt.s32.totalorder %s66_s25, %s66_s25 }
  0x1f   :  { %p12610_p13 = scmp.lt.s32.totalorder %s12608_s10, %s12604_s4 }
  0x21   :  { %p12611_p0 = por %p12610_p13, %p12609_p12 }
  0x23   :  { %p12612_p1 = pnand %p12611_p0, %p12605_p11 }
  0x25   :  { %12615 = shalt.err (!%p12612_p1)
}
  0x26   :  { %71 = dma.hbm_to_vmem [thread:$0]  %s16837_s6, 112, %s66_s25, [#allocation8], %s12713_s20, %s12713_s20, %s12714_s21  }
  0x27   :  { %s12616_s19 = scalar_lea.hbm %s16834_s3, 7616 }
  0x28   :  { %p12617_p2 = scmp.ne.s32.totalorder %s16834_s3, %s12616_s19  ;;  %p12620_p3 = scmp.lt.u32.totalorder %s12616_s19, %s16834_s3 }
  0x2a   :  { %p12622_p4 = pnand %p12620_p3, %p12617_p2 }
  0x2c   :  { %12625 = shalt.err (!%p12622_p4)
}
  0x2d   :  { %s12626_s28 = scalar_lea.vmem %s30_s27, 7616  ;;  %p12631_p6 = scmp.lt.s32.totalorder %s30_s27, %s30_s27 }
  0x2e   :  { %p12627_p5 = scmp.ne.s32.totalorder %s30_s27, %s12626_s28  ;;  %p12632_p7 = scmp.lt.s32.totalorder %s12626_s28, %s12626_s28 }
  0x30   :  { %p12633_p8 = por %p12632_p7, %p12631_p6 }
  0x32   :  { %p12634_p9 = pnand %p12633_p8, %p12627_p5 }
  0x34   :  { %12637 = shalt.err (!%p12634_p9)
}
  0x35   :  { %s12717_s6 = smov 64   ;;  %s12718_s25 = smov 4  }
  0x36   :  { %35 = dma.hbm_to_vmem [thread:$0]  %s16834_s3, 7616, %s30_s27, [#allocation3], %s12717_s6, %s12717_s6, %s12718_s25  }
  0x37   :  { %s12719_s11 = smov [#allocation6]   ;;  %s12720_s13 = smov [#allocation9]  }
  0x38   :  { %s53_s12 = sshll.u32 %s12719_s11, 4  ;;  %s77_s14 = sshll.u32 %s12720_s13, 4  ;;  %s54_s12 = int_to_ptr.vmem [resolvable:$true] %s53_s12  ;;  %s78_s14 = int_to_ptr.vmem [resolvable:$true] %s77_s14 }
  0x39   :  { %s12638_s15 = scalar_lea.hbm %s16836_s5, 4032 }
  0x3a   :  { %p12639_p10 = scmp.ne.s32.totalorder %s16836_s5, %s12638_s15  ;;  %p12642_p11 = scmp.lt.u32.totalorder %s12638_s15, %s16836_s5 }
  0x3c   :  { %p12644_p12 = pnand %p12642_p11, %p12639_p10 }
  0x3e   :  { %12647 = shalt.err (!%p12644_p12)
}
  0x3f   :  { %s12648_s3 = scalar_lea.vmem %s54_s12, 4032  ;;  %p12653_p0 = scmp.lt.s32.totalorder %s54_s12, %s54_s12 }
  0x40   :  { %p12649_p13 = scmp.ne.s32.totalorder %s54_s12, %s12648_s3  ;;  %p12654_p1 = scmp.lt.s32.totalorder %s12648_s3, %s12648_s3 }
  0x42   :  { %p12655_p2 = por %p12654_p1, %p12653_p0 }
  0x44   :  { %p12656_p3 = pnand %p12655_p2, %p12649_p13 }
  0x46   :  { %12659 = shalt.err (!%p12656_p3)
}
  0x47   :  { %59 = dma.hbm_to_vmem [thread:$0]  %s16836_s5, 4032, %s54_s12, [#allocation5], %s12717_s6, %s12717_s6, %s12718_s25  }
  0x48   :  { %s12660_s26 = scalar_lea.hbm %s16838_s7, 2240 }
  0x49   :  { %p12661_p4 = scmp.ne.s32.totalorder %s16838_s7, %s12660_s26  ;;  %p12664_p5 = scmp.lt.u32.totalorder %s12660_s26, %s16838_s7 }
  0x4b   :  { %p12666_p6 = pnand %p12664_p5, %p12661_p4 }
  0x4d   :  { %12669 = shalt.err (!%p12666_p6)
}
  0x4e   :  { %s12670_s13 = scalar_lea.vmem %s78_s14, 2240  ;;  %p12675_p8 = scmp.lt.s32.totalorder %s78_s14, %s78_s14 }
  0x4f   :  { %p12671_p7 = scmp.ne.s32.totalorder %s78_s14, %s12670_s13  ;;  %p12676_p9 = scmp.lt.s32.totalorder %s12670_s13, %s12670_s13 }
  0x51   :  { %p12677_p10 = por %p12676_p9, %p12675_p8 }
  0x53   :  { %p12678_p11 = pnand %p12677_p10, %p12671_p7 }
  0x55   :  { %12681 = shalt.err (!%p12678_p11)
}
  0x56   :  { %83 = dma.hbm_to_vmem [thread:$0]  %s16838_s7, 2240, %s78_s14, [#allocation8], %s12717_s6, %s12717_s6, %s12718_s25  }
  0x57   :  { %s12721_s4 = smov [#allocation10]   ;;  %s12682_s17 = scalar_lea.hbm %s16839_s8, 112 }
  0x58   :  { %s89_s10 = sshll.u32 %s12721_s4, 4  ;;  %p12683_p12 = scmp.ne.s32.totalorder %s16839_s8, %s12682_s17  ;;  %s90_s10 = int_to_ptr.vmem [resolvable:$true] %s89_s10 }
  0x59   :  { %p12686_p13 = scmp.lt.u32.totalorder %s12682_s17, %s16839_s8 }
  0x5b   :  { %p12688_p0 = pnand %p12686_p13, %p12683_p12 }
  0x5d   :  { %12691 = shalt.err (!%p12688_p0)
}
  0x5e   :  { %s12692_s22 = scalar_lea.vmem %s90_s10, 112  ;;  %s12696_s7 = scalar_lea.vmem %s90_s10, 128 }
  0x5f   :  { %p12693_p1 = scmp.ne.s32.totalorder %s90_s10, %s12692_s22  ;;  %p12697_p2 = scmp.lt.s32.totalorder %s90_s10, %s90_s10 }
  0x60   :  { %p12698_p3 = scmp.lt.s32.totalorder %s12696_s7, %s12692_s22 }
  0x62   :  { %p12699_p4 = por %p12698_p3, %p12697_p2 }
  0x64   :  { %p12700_p5 = pnand %p12699_p4, %p12693_p1 }
  0x66   :  { %12703 = shalt.err (!%p12700_p5)
}
  0x67   :  { %95 = dma.hbm_to_vmem [thread:$0]  %s16839_s8, 112, %s90_s10, [#allocation11], %s12713_s20, %s12713_s20, %s12714_s21  }
  0x68   :  { %12704 = dma.done.wait [#allocation3], 7616  }
  0x69   :  { %12705 = vsyncadd [#allocation3], 4294959680 }
  0x6a   :  { %12706 = dma.done.wait [#allocation5], 4144  }
  0x6b   :  { %12707 = vsyncadd [#allocation5], 4294963152 }
  0x6c   :  { %12708 = dma.done.wait [#allocation8], 2352  }
  0x6d   :  { %12709 = vsyncadd [#allocation8], 4294964944 }
  0x6e   :  { %12710 = dma.done.wait [#allocation11], 112  }
  0x6f   :  { %12711 = vsyncadd [#allocation11], 4294967184  ;;  %v118_v0 = vlaneseq  ;;  %v16841_v1 = vmov 0.0   ;;  %v12882_v5 = vld [vmem:[%s16831_s0 + $0x8] sm:$0xff]  ;;  %v116_v6 = vld [vmem:[%s16831_s0] sm:$0xff]  ;;  %vm126_vm1 = vcmask 64512  }
  0x70   :  { %194 = vmatprep.mubr.f32.mxu0 %v16841_v1  ;;  %11566 = vmatprep.subr.bf16.mxu1 %v16841_v1  ;;  %v12073_v8 = vld [vmem:[%s16833_s2] ss:$8 sps:$4 sm:$0xff]   ;;  %v12075_v9 = vld [vmem:[%s16833_s2 + $0x4] ss:$8 sps:$4 sm:$0xff]   ;;  %v16843_v11 = vmov 0   ;;  %vm213_vm2 = vcmask 130048  }
  0x71   :  { %v12873_v2 = vshrl.u32 %v118_v0, 7  ;;  %v12875_v3 = vand.u32 127, %v118_v0  ;;  %130 = vmatprep.subr.mxu0 %v12882_v5  ;;  %v115_v10 = vld [vmem:[%s16832_s1] sm:$0x3]  ;;  %v12077_v13 = vld [vmem:[#allocation2 + $0x8] sm:$0xff]   ;;  %v12078_v14 = vld [vmem:[#allocation2 + $0x10] sm:$0xff]  }
  0x72   :  { %131 = vmatpush1.msra.mxu0 %v116_v6  ;;  %v12076_v12 = vld [vmem:[#allocation2] sm:$0xff]   ;;  %v12079_v15 = vld [vmem:[#allocation2 + $0x18] sm:$0xff]   ;;  %v12081_v17 = vld [vmem:[#allocation2 + $0x28] sm:$0xff]   ;;  %vm340_vm3 = vcmask 1043456   ;;  %vm433_vm4 = vcmask 1041408   ;;  %vm12724_vm5 = vmmov 0  }
  0x73   :  { %16882 = vst [vmem:[#allocation16_spill] sm:$0xff] %v12873_v2  ;;  %16883 = vst [vmem:[#allocation17_spill] sm:$0xff] %v12875_v3  ;;  %v122_v4 = vand.u32 1, %v12873_v2  ;;  %217 = vmatprep.subr.bf16.mxu0 %v12075_v9  ;;  %v12080_v16 = vld [vmem:[#allocation2 + $0x20] sm:$0xff]   ;;  %v12082_v18 = vld [vmem:[#allocation2 + $0x30] sm:$0xff]   ;;  %11576 = vmatprep.mubr.msk.bf16.mxu1 %vm12724_vm5, %v16841_v1  ;;  %vm429_vm6 = vcmask 556032  }
  0x74   :  { %v12083_v19 = vld [vmem:[#allocation2 + $0x38] sm:$0xff]   ;;  %v12084_v20 = vld [vmem:[#allocation2 + $0x40] ss:$0 sps:$4 sm:$0xff]   ;;  %v12085_v22 = vld [vmem:[#allocation6] sm:$0xff]   ;;  %vm510_vm7 = vcmask 1040384   ;;  %vm506_vm8 = vcmask 277504  }
  0x75   :  { %vm123_vm0 = vcmp.eq.s32.totalorder %v122_v4, %v12875_v3  ;;  %v342_v21 = vsel %vm340_vm3, %v12084_v20, 0  ;;  %11567 = vmatpush3.bf16.msra.mxu1 %v12085_v22  ;;  %v12086_v23 = vld [vmem:[#allocation6 + $0x8] sm:$0xff]   ;;  %v12087_v24 = vld [vmem:[#allocation6 + $0x10] sm:$0xff]   ;;  %v12088_v37 = vld [vmem:[#allocation6 + $0x18] sm:$0xff]   ;;  %s12725_s1 = smov 120   ;;  %vm571_vm9 = vcmask 982016  }
  0x76   :  { %v12888_v7 = vsel %vm123_vm0, 1.0, %v16841_v1  ;;  %11568 = vmatprep.subr.bf16.mxu1 %v16841_v1  ;;  %v12089_v38 = vld [vmem:[#allocation6 + $0x20] ss:$0 sps:$4 sm:$0x33]   ;;  %v10511_v40 = vld [vmem:[#allocation4] ss:$0 sm:$0xff]  ;;  %567 = vrot.lane.b32.xlu0 %v12882_v5, %s12725_s1 }
  0x77   :  { %16884 = vst [vmem:[#allocation18_spill] sm:$0xff] %v12888_v7  ;;  %10507 = vmatmul.mubr.msk.f32.vlgmr.msra.gmra.mrb[0].mxu0 %vm126_vm1, %v12888_v7  ;;  %v435_v39 = vsel %vm433_vm4, %v12089_v38, 0  ;;  %v12090_v47 = vld [vmem:[#allocation9] sm:$0xff]   ;;  %v12091_v49 = vld [vmem:[#allocation9 + $0x8] sm:$0xff]   ;;  %v10522_v52 = vld [vmem:[#allocation7] ss:$0 sm:$0xff] }
  0x78   :  { %218 = vmatpush1.bf16.msra.mxu0 %v12073_v8  ;;  %249 = vmatprep.mubr.bf16.mxu0 %v16843_v11  ;;  %v12092_v50 = vld [vmem:[#allocation9 + $0x10] ss:$0 sps:$4 sm:$0x11]   ;;  %v564_v60 = vld [vmem:[%s16831_s0 + $0x10] sm:$0xff]  ;;  %s12726_s15 = smov 112   ;;  %v12100_v20 = vld [vmem:[#allocation2 + $0x64] sm:$0xff]  }
  0x79   :  { %344 = vmatprep.subr.bf16.mxu0 %v16843_v11  ;;  %11569 = vmatpush3.bf16.msra.mxu1 %v12086_v23  ;;  %v512_v51 = vsel %vm510_vm7, %v12092_v50, 0  ;;  %v12093_v61 = vld [vmem:[%s16833_s2 + $0x10] ss:$8 sps:$4 sm:$0xff]   ;;  %v12095_v62 = vld [vmem:[%s16833_s2 + $0x14] ss:$8 sps:$4 sm:$0xff]   ;;  %vm1021_vm10 = vcmask 916480  }
  0x7a   :  { %11570 = vmatprep.subr.bf16.mxu1 %v16841_v1  ;;  %569 = vrot.lane.b32.xlu0 %v564_v60, %s12725_s1  ;;  %v10529_v5 = vld [vmem:[#allocation10] ss:$0 sm:$0xff]  ;;  %s12727_s6 = smov 104   ;;  %vm1491_vm12 = vcmask 850944   ;;  %s12728_s24 = smov 96   ;;  %vm2051_vm15 = vcmask 785408  }
  0x7b   :  { %10510 = vmatmul.mubr.msk.bf16.vlgmr.msra.gmra.mrb[4].mxu0 %vm213_vm2, %v115_v10  ;;  %v12102_v22 = vld [vmem:[#allocation2 + $0x74] sm:$0xff]   ;;  %s12729_s13 = smov 88   ;;  %s12730_s16 = smov 80  }
  0x7c   :  { %345 = vmatpush1.bf16.msra.mxu0 %v12076_v12 }
  0x7d   :  { %346 = vmatprep.subr.bf16.mxu0 %v16843_v11  ;;  %11571 = vmatpush3.bf16.msra.mxu1 %v12087_v24 }
  0x7e   :  { %11572 = vmatprep.subr.bf16.mxu1 %v16841_v1 }
  0x80   :  { %347 = vmatpush1.bf16.msra.mxu0 %v12077_v13  ;;  %v12096_v13 = vld [vmem:[#allocation2 + $0x44] sm:$0xff]  }
  0x81   :  { %348 = vmatprep.subr.bf16.mxu0 %v16843_v11  ;;  %11573 = vmatpush3.bf16.msra.mxu1 %v12088_v37 }
  0x82   :  { %11574 = vmatprep.subr.bf16.mxu1 %v16841_v1 }
  0x84   :  { %349 = vmatpush1.bf16.msra.mxu0 %v12078_v14  ;;  %v12097_v14 = vld [vmem:[#allocation2 + $0x4c] sm:$0xff]  }
  0x85   :  { %350 = vmatprep.subr.bf16.mxu0 %v16843_v11  ;;  %11575 = vmatpush3.bf16.msra.mxu1 %v435_v39 }
  0x86   :  { %11580 = vmatprep.subr.bf16.mxu1 %v16841_v1 }
  0x88   :  { %351 = vmatpush1.bf16.msra.mxu0 %v12079_v15  ;;  %v12098_v15 = vld [vmem:[#allocation2 + $0x54] sm:$0xff]  }
  0x89   :  { %352 = vmatprep.subr.bf16.mxu0 %v16843_v11 }
  0x8c   :  { %353 = vmatpush1.bf16.msra.mxu0 %v12080_v16 }
  0x8d   :  { %354 = vmatprep.subr.bf16.mxu0 %v16843_v11 }
  0x90   :  { %355 = vmatpush1.bf16.msra.mxu0 %v12081_v17 }
  0x91   :  { %356 = vmatprep.subr.bf16.mxu0 %v16843_v11 }
  0x94   :  { %357 = vmatpush1.bf16.msra.mxu0 %v12082_v18 }
  0x95   :  { %358 = vmatprep.subr.bf16.mxu0 %v16843_v11 }
  0x98   :  { %359 = vmatpush1.bf16.msra.mxu0 %v12083_v19  ;;  %v12099_v19 = vld [vmem:[#allocation2 + $0x5c] sm:$0xff]  }
  0x99   :  { %360 = vmatprep.subr.bf16.mxu0 %v16843_v11 }
  0x9c   :  { %361 = vmatpush1.bf16.msra.mxu0 %v342_v21  ;;  %v12101_v21 = vld [vmem:[#allocation2 + $0x6c] sm:$0xff]  }
  0x9d   :  { %661 = vmatprep.subr.bf16.mxu0 %v12095_v62 }
  0xe8   :  { %v568_v63 = vpop.permute.xlu0 %567 }
  0xec   :  { %v570_v0 = vpop.permute.xlu0 %569 }
  0xed   :  { %v572_v4 = vsel %vm571_vm9, %v568_v63, %v570_v0 }
 0x14a   :  { %v196_v25 = vpop.f32.mrb[0].mxu0 }
 0x14b   :  { %v198_v26 = vpop.f32.mrb[1].mxu0 }
 0x14e   :  { %v251_v27 = vpop.f32.mrb[4].mxu0 }
 0x14f   :  { %v252_v28 = vadd.f32 %v251_v27, %v196_v25  ;;  %v253_v29 = vpop.f32.mrb[5].mxu0  ;;  %v12103_v27 = vld [vmem:[#allocation2 + $0x7c] sm:$0xff]  }
 0x150   :  { %v254_v30 = vadd.f32 %v253_v29, %v198_v26  ;;  %v255_v31 = vpop.f32.mrb[6].mxu0 }
 0x151   :  { %v258_v32 = vmax.f32 %v252_v28, 0.0  ;;  %v256_v33 = vpop.f32.mrb[7].mxu0  ;;  %v12104_v28 = vld [vmem:[#allocation2 + $0x84] ss:$0 sps:$4 sm:$0xff]   ;;  %v12106_v31 = vld [vmem:[#allocation6 + $0x2c] sm:$0xff]  }
 0x152   :  { %v259_v34 = vmax.f32 %v254_v30, 0.0  ;;  %v787_v29 = vsel %vm340_vm3, %v12104_v28, 0  ;;  %v12105_v30 = vld [vmem:[#allocation6 + $0x24] sm:$0xff]   ;;  %v12119_v28 = vld [vmem:[#allocation2 + $0xa0] sm:$0xff]  }
 0x153   :  { %v277_v36 = vpack.c.bf16 %v258_v32, %v258_v32  ;;  %v12107_v32 = vld [vmem:[#allocation6 + $0x34] sm:$0xff]  }
 0x154   :  { %v278_v35 = vpack.c.bf16 %v259_v34, %v259_v34 }
 0x156   :  { %10521 = vmatprep.mubr.msk.bf16.mxu0 %vm126_vm1, %v278_v35 }
 0x157   :  { %377 = vmatmul.mubr.bf16.vlgmr.msra.gmra.mrb[8].mxu0 %v277_v36 }
 0x158   :  { %693 = vmatprep.mubr.bf16.mxu0 %v16843_v11  ;;  %662 = vmatpush1.bf16.msra.mxu0 %v12093_v61 }
 0x159   :  { %11590 = vmatprep.subr.bf16.mxu0 %v16841_v1 }
 0x22a   :  { %v378_v41 = vpop.f32.mrb[8].mxu0 }
 0x22b   :  { %v379_v42 = vadd.f32 %v10511_v40, %v378_v41  ;;  %v380_v43 = vpop.f32.mrb[9].mxu0 }
 0x22c   :  { %v381_v44 = vpop.f32.mrb[10].mxu0  ;;  %v12108_v43 = vld [vmem:[#allocation6 + $0x3c] sm:$0xff]  }
 0x22d   :  { %v384_v45 = vmax.f32 %v379_v42, 0.0  ;;  %v382_v46 = vpop.f32.mrb[11].mxu0  ;;  %v12109_v44 = vld [vmem:[#allocation6 + $0x44] ss:$0 sps:$4 sm:$0x33]  }
 0x22e   :  { %v10540_v46 = vld [vmem:[#allocation4 + $0x1] ss:$0 sm:$0xff] }
 0x22f   :  { %v394_v48 = vpack.c.bf16 %v384_v45, %v384_v45  ;;  %v880_v45 = vsel %vm433_vm4, %v12109_v44, 0 }
 0x231   :  { %11577 = vmatmul.mubr.msk.bf16.vlgmr.msra.gmra.mrb[0].mxu1 %vm429_vm6, %v394_v48 }
 0x232   :  { %11581 = vmatpush3.bf16.msra.mxu1 %v12090_v47  ;;  %11586 = vmatprep.mubr.msk.bf16.mxu1 %vm12724_vm5, %v16841_v1 }
 0x233   :  { %11582 = vmatprep.subr.bf16.mxu1 %v16841_v1 }
 0x236   :  { %11583 = vmatpush3.bf16.msra.mxu1 %v12091_v49 }
 0x237   :  { %11584 = vmatprep.subr.bf16.mxu1 %v16841_v1 }
 0x23a   :  { %11585 = vmatpush3.bf16.msra.mxu1 %v512_v51 }
 0x23b   :  { %575 = vmatprep.subr.mxu1 %v570_v0 }
 0x304   :  { %v471_v53 = vpop.f32.mrb[0].mxu1 }
 0x305   :  { %v472_v54 = vadd.f32 %v10522_v52, %v471_v53  ;;  %v11578_v55 = vpop.f32.mrb[1].mxu1  ;;  %v12110_v53 = vld [vmem:[#allocation9 + $0x14] sm:$0xff]  }
 0x306   :  { %v474_v56 = vpop.f32.mrb[2].mxu1  ;;  %v12111_v55 = vld [vmem:[#allocation9 + $0x1c] sm:$0xff]  }
 0x307   :  { %v477_v57 = vmax.f32 %v472_v54, 0.0  ;;  %v11579_v58 = vpop.f32.mrb[3].mxu1  ;;  %v12112_v56 = vld [vmem:[#allocation9 + $0x24] ss:$0 sps:$4 sm:$0x11]  }
 0x308   :  { %v10551_v58 = vld [vmem:[#allocation7 + $0x1] ss:$0 sm:$0xff] }
 0x309   :  { %v483_v59 = vpack.c.bf16 %v477_v57, %v477_v57  ;;  %v957_v57 = vsel %vm510_vm7, %v12112_v56, 0 }
 0x30b   :  { %11587 = vmatmul.mubr.msk.bf16.vlgmr.msra.gmra.mrb[4].mxu1 %vm506_vm8, %v483_v59 }
 0x30c   :  { %639 = vmatprep.mubr.f32.mxu1 %v16841_v1  ;;  %576 = vmatpush1.msra.mxu1 %v572_v4 }
 0x30d   :  { %789 = vmatprep.subr.bf16.mxu1 %v16843_v11 }
 0x313   :  { %10534 = vmatmul.mubr.msk.f32.vlgmr.msra.gmra.mrb[8].mxu1 %vm126_vm1, %v12888_v7 }
 0x314   :  { %790 = vmatpush1.bf16.msra.mxu1 %v12096_v13  ;;  %v10558_v13 = vld [vmem:[#allocation10 + $0x1] ss:$0 sm:$0xff] }
 0x315   :  { %791 = vmatprep.subr.bf16.mxu1 %v16843_v11 }
 0x318   :  { %792 = vmatpush1.bf16.msra.mxu1 %v12097_v14 }
 0x319   :  { %793 = vmatprep.subr.bf16.mxu1 %v16843_v11 }
 0x31c   :  { %794 = vmatpush1.bf16.msra.mxu1 %v12098_v15 }
 0x31d   :  { %795 = vmatprep.subr.bf16.mxu1 %v16843_v11 }
 0x320   :  { %796 = vmatpush1.bf16.msra.mxu1 %v12099_v19 }
 0x321   :  { %797 = vmatprep.subr.bf16.mxu1 %v16843_v11 }
 0x324   :  { %798 = vmatpush1.bf16.msra.mxu1 %v12100_v20 }
 0x325   :  { %799 = vmatprep.subr.bf16.mxu1 %v16843_v11 }
 0x328   :  { %800 = vmatpush1.bf16.msra.mxu1 %v12101_v21 }
 0x329   :  { %801 = vmatprep.subr.bf16.mxu1 %v16843_v11 }
 0x32c   :  { %802 = vmatpush1.bf16.msra.mxu1 %v12102_v22  ;;  %v12116_v22 = vld [vmem:[#allocation2 + $0x88] sm:$0xff]  }
 0x32d   :  { %803 = vmatprep.subr.bf16.mxu1 %v16843_v11 }
 0x330   :  { %804 = vmatpush1.bf16.msra.mxu1 %v12103_v27 }
 0x331   :  { %805 = vmatprep.subr.bf16.mxu1 %v16843_v11 }
 0x334   :  { %806 = vmatpush1.bf16.msra.mxu1 %v787_v29  ;;  %v12120_v29 = vld [vmem:[#allocation2 + $0xa8] sm:$0xff]  }
 0x3de   :  { %v548_v6 = vpop.f32.mrb[4].mxu1 }
 0x3df   :  { %v549_v8 = vadd.f32 %v10529_v5, %v548_v6  ;;  %v11588_v9 = vpop.f32.mrb[5].mxu1  ;;  %v12980_v5 = vld [vmem:[%s16831_s0 + $0x18] sm:$0xff]  ;;  %v12113_v6 = vld [vmem:[%s16833_s2 + $0x20] ss:$8 sps:$4 sm:$0xff]  }
 0x3e0   :  { %v551_v10 = vpop.f32.mrb[6].mxu1  ;;  %1019 = vrot.lane.b32.xlu0 %v12980_v5, %s12726_s15 }
 0x3e1   :  { %12213 = vtanh.f32 %v549_v8  ;;  %v11589_v12 = vpop.f32.mrb[7].mxu1  ;;  %v12115_v8 = vld [vmem:[%s16833_s2 + $0x24] ss:$8 sps:$4 sm:$0xff]  }
 0x3e2   :  { %1120 = vmatprep.subr.bf16.mxu1 %v12115_v8 }
 0x3e4   :  { %1487 = vrot.lane.b32.xlu0 %v12980_v5, %s12727_s6  ;;  %v12133_v5 = vld [vmem:[%s16833_s2 + $0x30] ss:$8 sps:$4 sm:$0xff]  }
 0x3e6   :  { %v641_v25 = vpop.f32.mrb[8].mxu1 }
 0x3e7   :  { %v643_v26 = vpop.f32.mrb[9].mxu1 }
 0x3eb   :  { %v12214_v16 = vpop.eup %12213 }
 0x3ec   :  { %v555_v17 = vpack.c.bf16 %v12214_v16, %v12214_v16 }
 0x3ee   :  { %v557_v18 = vrot.slane %v555_v17, 6 }
 0x3f0   :  { %558 = vrot.lane.b32.xlu1 %v557_v18, %s12726_s15 }
 0x3f4   :  { %1017 = vrot.lane.b32.xlu1 %v564_v60, %s12726_s15 }
 0x452   :  { %v1020_v10 = vpop.permute.xlu0 %1019 }
 0x462   :  { %v559_v23 = vpop.permute.xlu1 %558 }
 0x463   :  { %v562_v24 = vsel %vm433_vm4, %v555_v17, %v559_v23  ;;  %v1010_v17 = vadd.s32 8, %v12873_v2  ;;  %v12117_v23 = vld [vmem:[#allocation2 + $0x90] sm:$0xff]  }
 0x464   :  { %10539 = vmatmul.mubr.msk.bf16.vlgmr.msra.gmra.mrb[12].mxu0 %vm213_vm2, %v562_v24  ;;  %v12118_v24 = vld [vmem:[#allocation2 + $0x98] sm:$0xff]  }
 0x465   :  { %11600 = vmatprep.mubr.msk.bf16.mxu0 %vm12724_vm5, %v16841_v1  ;;  %11591 = vmatpush3.bf16.msra.mxu0 %v12105_v30  ;;  %v1011_v20 = vand.u32 1, %v1010_v17  ;;  %v12121_v30 = vld [vmem:[#allocation2 + $0xb0] sm:$0xff]   ;;  %v13033_v17 = vld [vmem:[%s16831_s0 + $0x20] sm:$0xff] }
 0x466   :  { %11592 = vmatprep.subr.bf16.mxu0 %v16841_v1  ;;  %v1018_v9 = vpop.permute.xlu1 %1017 }
 0x467   :  { %v1022_v12 = vsel %vm1021_vm10, %v1018_v9, %v1020_v10  ;;  %vm1012_vm11 = vcmp.eq.s32.totalorder %v1011_v20, %v12875_v3 }
 0x468   :  { %v12998_v21 = vsel %vm1012_vm11, 1.0, %v16841_v1  ;;  %vm2885_vm11 = vcmask 719872  }
 0x469   :  { %11593 = vmatpush3.bf16.msra.mxu0 %v12106_v31  ;;  %16885 = vst [vmem:[#allocation19_spill] sm:$0xff] %v12998_v21 }
 0x46a   :  { %11594 = vmatprep.subr.bf16.mxu0 %v16841_v1 }
 0x46d   :  { %11595 = vmatpush3.bf16.msra.mxu0 %v12107_v32 }
 0x46e   :  { %11596 = vmatprep.subr.bf16.mxu0 %v16841_v1 }
 0x471   :  { %11597 = vmatpush3.bf16.msra.mxu0 %v12108_v43  ;;  %v12127_v43 = vld [vmem:[#allocation6 + $0x58] sm:$0xff]  }
 0x472   :  { %11598 = vmatprep.subr.bf16.mxu0 %v16841_v1 }
 0x475   :  { %11599 = vmatpush3.bf16.msra.mxu0 %v880_v45 }
 0x476   :  { %11604 = vmatprep.subr.bf16.mxu0 %v16841_v1 }
 0x537   :  { %v695_v33 = vpop.f32.mrb[12].mxu0 }
 0x538   :  { %v696_v34 = vadd.f32 %v695_v33, %v641_v25  ;;  %v697_v35 = vpop.f32.mrb[13].mxu0 }
 0x539   :  { %v698_v36 = vadd.f32 %v697_v35, %v643_v26  ;;  %v699_v37 = vpop.f32.mrb[14].mxu0  ;;  %v12122_v35 = vld [vmem:[#allocation2 + $0xb8] sm:$0xff]  }
 0x53a   :  { %v702_v38 = vmax.f32 %v696_v34, 0.0  ;;  %v700_v39 = vpop.f32.mrb[15].mxu0 }
 0x53b   :  { %v703_v40 = vmax.f32 %v698_v36, 0.0  ;;  %v12124_v39 = vld [vmem:[#allocation2 + $0xc8] ss:$0 sps:$4 sm:$0xff]  }
 0x53c   :  { %v722_v42 = vpack.c.bf16 %v702_v38, %v702_v38  ;;  %v12123_v38 = vld [vmem:[#allocation2 + $0xc0] sm:$0xff]  }
 0x53d   :  { %v723_v41 = vpack.c.bf16 %v703_v40, %v703_v40  ;;  %v1250_v40 = vsel %vm340_vm3, %v12124_v39, 0 }
 0x53f   :  { %10550 = vmatprep.mubr.msk.bf16.mxu1 %vm126_vm1, %v723_v41  ;;  %v12125_v41 = vld [vmem:[#allocation6 + $0x48] sm:$0xff]  }
 0x540   :  { %822 = vmatmul.mubr.bf16.vlgmr.msra.gmra.mrb[12].mxu1 %v722_v42  ;;  %v12126_v42 = vld [vmem:[#allocation6 + $0x50] sm:$0xff]  }
 0x541   :  { %1152 = vmatprep.mubr.bf16.mxu1 %v16843_v11  ;;  %1121 = vmatpush1.bf16.msra.mxu1 %v12113_v6 }
 0x542   :  { %11614 = vmatprep.subr.bf16.mxu1 %v16841_v1 }
 0x613   :  { %v823_v47 = vpop.f32.mrb[12].mxu1 }
 0x614   :  { %v824_v48 = vadd.f32 %v10540_v46, %v823_v47  ;;  %v825_v49 = vpop.f32.mrb[13].mxu1 }
 0x615   :  { %v826_v50 = vpop.f32.mrb[14].mxu1 }
 0x616   :  { %v829_v51 = vmax.f32 %v824_v48, 0.0  ;;  %v827_v52 = vpop.f32.mrb[15].mxu1 }
 0x618   :  { %v840_v54 = vpack.c.bf16 %v829_v51, %v829_v51 }
 0x61a   :  { %11601 = vmatmul.mubr.msk.bf16.vlgmr.msra.gmra.mrb[16].mxu0 %vm429_vm6, %v840_v54 }
 0x61b   :  { %11605 = vmatpush3.bf16.msra.mxu0 %v12110_v53  ;;  %11610 = vmatprep.mubr.msk.bf16.mxu0 %vm12724_vm5, %v16841_v1 }
 0x61c   :  { %11606 = vmatprep.subr.bf16.mxu0 %v16841_v1 }
 0x61f   :  { %11607 = vmatpush3.bf16.msra.mxu0 %v12111_v55 }
 0x620   :  { %11608 = vmatprep.subr.bf16.mxu0 %v16841_v1 }
 0x623   :  { %11609 = vmatpush3.bf16.msra.mxu0 %v957_v57 }
 0x624   :  { %1028 = vmatprep.subr.mxu0 %v1020_v10 }
 0x6ed   :  { %v916_v59 = vpop.f32.mrb[16].mxu0 }
 0x6ee   :  { %v917_v60 = vadd.f32 %v10551_v58, %v916_v59  ;;  %v11602_v61 = vpop.f32.mrb[17].mxu0  ;;  %v12128_v58 = vld [vmem:[#allocation6 + $0x60] sm:$0xff]   ;;  %v12129_v59 = vld [vmem:[#allocation6 + $0x68] ss:$0 sps:$4 sm:$0x33]  }
 0x6ef   :  { %v919_v62 = vpop.f32.mrb[18].mxu0  ;;  %v10571_v61 = vld [vmem:[#allocation4 + $0x2] ss:$0 sm:$0xff] }
 0x6f0   :  { %v922_v63 = vmax.f32 %v917_v60, 0.0  ;;  %v11603_v0 = vpop.f32.mrb[19].mxu0  ;;  %v1345_v60 = vsel %vm433_vm4, %v12129_v59, 0  ;;  %v12143_v59 = vld [vmem:[#allocation2 + $0x104] sm:$0xff]  }
 0x6f2   :  { %v929_v4 = vpack.c.bf16 %v922_v63, %v922_v63 }
 0x6f4   :  { %11611 = vmatmul.mubr.msk.bf16.vlgmr.msra.gmra.mrb[20].mxu0 %vm506_vm8, %v929_v4 }
 0x6f5   :  { %1092 = vmatprep.mubr.f32.mxu0 %v16841_v1  ;;  %1029 = vmatpush1.msra.mxu0 %v1022_v12  ;;  %v12130_v12 = vld [vmem:[#allocation9 + $0x28] sm:$0xff]  }
 0x6f6   :  { %1252 = vmatprep.subr.bf16.mxu0 %v16843_v11 }
 0x6fc   :  { %10564 = vmatmul.mubr.msk.f32.vlgmr.msra.gmra.mrb[2].mxu0 %vm126_vm1, %v12888_v7 }
 0x6fd   :  { %1098 = vmatprep.mubr.f32.mxu0 %v16841_v1  ;;  %1253 = vmatpush1.bf16.msra.mxu0 %v12116_v22 }
 0x6fe   :  { %1254 = vmatprep.subr.bf16.mxu0 %v16843_v11 }
 0x700   :  { %10565 = vmatmul.mubr.msk.f32.gmra.mrb[24].mxu0 %vm126_vm1, %v12998_v21 }
 0x701   :  { %1255 = vmatpush1.bf16.msra.mxu0 %v12117_v23 }
 0x702   :  { %1256 = vmatprep.subr.bf16.mxu0 %v16843_v11 }
 0x705   :  { %1257 = vmatpush1.bf16.msra.mxu0 %v12118_v24 }
 0x706   :  { %1258 = vmatprep.subr.bf16.mxu0 %v16843_v11 }
 0x709   :  { %1259 = vmatpush1.bf16.msra.mxu0 %v12119_v28 }
 0x70a   :  { %1260 = vmatprep.subr.bf16.mxu0 %v16843_v11 }
 0x70d   :  { %1261 = vmatpush1.bf16.msra.mxu0 %v12120_v29  ;;  %v1488_v29 = vpop.permute.xlu0 %1487 }
 0x70e   :  { %1262 = vmatprep.subr.bf16.mxu0 %v16843_v11 }
 0x711   :  { %1263 = vmatpush1.bf16.msra.mxu0 %v12121_v30 }
 0x712   :  { %1264 = vmatprep.subr.bf16.mxu0 %v16843_v11 }
 0x715   :  { %1265 = vmatpush1.bf16.msra.mxu0 %v12122_v35 }
 0x716   :  { %1266 = vmatprep.subr.bf16.mxu0 %v16843_v11 }
 0x719   :  { %1267 = vmatpush1.bf16.msra.mxu0 %v12123_v38  ;;  %v1476_v38 = vadd.s32 24, %v12873_v2 }
 0x71a   :  { %1268 = vmatprep.subr.bf16.mxu0 %v16843_v11 }
 0x71d   :  { %1269 = vmatpush1.bf16.msra.mxu0 %v1250_v40 }
 0x7c7   :  { %v993_v14 = vpop.f32.mrb[20].mxu0 }
 0x7c8   :  { %v994_v15 = vadd.f32 %v10558_v13, %v993_v14  ;;  %v11612_v16 = vpop.f32.mrb[21].mxu0  ;;  %v12131_v14 = vld [vmem:[#allocation9 + $0x30] sm:$0xff]  }
 0x7c9   :  { %v996_v18 = vpop.f32.mrb[22].mxu0 }
 0x7ca   :  { %12215 = vtanh.f32 %v994_v15  ;;  %v11613_v19 = vpop.f32.mrb[23].mxu0  ;;  %v12132_v15 = vld [vmem:[#allocation9 + $0x38] ss:$0 sps:$4 sm:$0x11]   ;;  %v10582_v18 = vld [vmem:[#allocation7 + $0x2] ss:$0 sm:$0xff] }
 0x7cb   :  { %v1424_v16 = vsel %vm510_vm7, %v12132_v15, 0 }
 0x7cf   :  { %v1094_v33 = vpop.f32.mrb[2].mxu0 }
 0x7d0   :  { %v1096_v34 = vpop.f32.mrb[3].mxu0 }
 0x7d3   :  { %v1100_v36 = vpop.f32.mrb[24].mxu0 }
 0x7d4   :  { %v12216_v25 = vpop.eup %12215  ;;  %v1102_v37 = vpop.f32.mrb[25].mxu0 }
 0x7d5   :  { %v1000_v26 = vpack.c.bf16 %v12216_v25, %v12216_v25 }
 0x7d7   :  { %v1002_v27 = vrot.slane %v1000_v26, 4 }
 0x7d9   :  { %1003 = vrot.lane.b32.xlu1 %v1002_v27, %s12726_s15 }
 0x7dd   :  { %1489 = vrot.lane.b32.xlu1 %v13033_v17, %s12727_s6 }
 0x7e1   :  { %2047 = vrot.lane.b32.xlu1 %v13033_v17, %s12728_s24 }
 0x84b   :  { %v1004_v31 = vpop.permute.xlu1 %1003 }
 0x84c   :  { %v1007_v32 = vsel %vm340_vm3, %v1000_v26, %v1004_v31  ;;  %v12135_v31 = vld [vmem:[%s16833_s2 + $0x34] ss:$8 sps:$4 sm:$0xff]  }
 0x84d   :  { %10570 = vmatmul.mubr.msk.bf16.vlgmr.msra.gmra.mrb[16].mxu1 %vm213_vm2, %v1007_v32  ;;  %1609 = vmatprep.subr.bf16.mxu0 %v12135_v31 }
 0x84e   :  { %11624 = vmatprep.mubr.msk.bf16.mxu1 %vm12724_vm5, %v16841_v1  ;;  %11615 = vmatpush3.bf16.msra.mxu1 %v12125_v41 }
 0x84f   :  { %11616 = vmatprep.subr.bf16.mxu1 %v16841_v1  ;;  %v1490_v30 = vpop.permute.xlu1 %1489 }
 0x850   :  { %v1492_v32 = vsel %vm1491_vm12, %v1488_v29, %v1490_v30 }
 0x852   :  { %11617 = vmatpush3.bf16.msra.mxu1 %v12126_v42  ;;  %v1478_v42 = vand.u32 1, %v1476_v38 }
 0x853   :  { %11618 = vmatprep.subr.bf16.mxu1 %v16841_v1  ;;  %v2048_v17 = vpop.permute.xlu1 %2047 }
 0x854   :  { %vm1480_vm14 = vcmp.eq.s32.totalorder %v1478_v42, %v12875_v3 }
 0x856   :  { %11619 = vmatpush3.bf16.msra.mxu1 %v12127_v43 }
 0x857   :  { %11620 = vmatprep.subr.bf16.mxu1 %v16841_v1 }
 0x85a   :  { %11621 = vmatpush3.bf16.msra.mxu1 %v12128_v58 }
 0x85b   :  { %11622 = vmatprep.subr.bf16.mxu1 %v16841_v1 }
 0x85e   :  { %11623 = vmatpush3.bf16.msra.mxu1 %v1345_v60 }
 0x85f   :  { %11628 = vmatprep.subr.bf16.mxu1 %v16841_v1 }
 0x920   :  { %v1154_v44 = vpop.f32.mrb[16].mxu1 }
 0x921   :  { %v1155_v45 = vadd.f32 %v1154_v44, %v1094_v33  ;;  %v1156_v46 = vpop.f32.mrb[17].mxu1  ;;  %v1475_v33 = vadd.s32 16, %v12873_v2 }
 0x922   :  { %v1157_v47 = vadd.f32 %v1156_v46, %v1096_v34  ;;  %v1158_v48 = vpop.f32.mrb[18].mxu1  ;;  %v12136_v46 = vld [vmem:[#allocation2 + $0xcc] sm:$0xff]  }
 0x923   :  { %v1159_v49 = vadd.f32 %v1158_v48, %v1100_v36  ;;  %v1160_v50 = vpop.f32.mrb[19].mxu1  ;;  %v1163_v52 = vmax.f32 %v1155_v45, 0.0  ;;  %v1477_v34 = vand.u32 1, %v1475_v33  ;;  %v10589_v36 = vld [vmem:[#allocation10 + $0x2] ss:$0 sm:$0xff]  ;;  %v13063_v45 = vsel %vm1480_vm14, 1.0, %v16841_v1 }
 0x924   :  { %v1161_v51 = vadd.f32 %v1160_v50, %v1102_v37  ;;  %v1164_v54 = vmax.f32 %v1157_v47, 0.0  ;;  %16887 = vst [vmem:[#allocation21_spill] sm:$0xff] %v13063_v45  ;;  %v12137_v47 = vld [vmem:[#allocation2 + $0xd4] sm:$0xff]   ;;  %v12138_v48 = vld [vmem:[#allocation2 + $0xdc] sm:$0xff]  }
 0x925   :  { %v1165_v53 = vmax.f32 %v1159_v49, 0.0  ;;  %vm1479_vm13 = vcmp.eq.s32.totalorder %v1477_v34, %v12875_v3 }
 0x926   :  { %v1166_v55 = vmax.f32 %v1161_v51, 0.0  ;;  %v13055_v35 = vsel %vm1479_vm13, 1.0, %v16841_v1  ;;  %v12139_v51 = vld [vmem:[#allocation2 + $0xe4] sm:$0xff]  }
 0x927   :  { %v1185_v56 = vpack.c.bf16 %v1165_v53, %v1163_v52  ;;  %16886 = vst [vmem:[#allocation20_spill] sm:$0xff] %v13055_v35  ;;  %v12140_v53 = vld [vmem:[#allocation2 + $0xec] sm:$0xff]  }
 0x928   :  { %v1186_v57 = vpack.c.bf16 %v1166_v55, %v1164_v54  ;;  %v12141_v54 = vld [vmem:[#allocation2 + $0xf4] sm:$0xff]  }
 0x92a   :  { %10581 = vmatprep.mubr.msk.bf16.mxu0 %vm126_vm1, %v1186_v57 }
 0x92b   :  { %1285 = vmatmul.mubr.bf16.vlgmr.msra.gmra.mrb[28].mxu0 %v1185_v56  ;;  %v12142_v56 = vld [vmem:[#allocation2 + $0xfc] sm:$0xff]  }
 0x92c   :  { %1641 = vmatprep.mubr.bf16.mxu0 %v16843_v11  ;;  %1610 = vmatpush1.bf16.msra.mxu0 %v12133_v5 }
 0x9fe   :  { %v1286_v62 = vpop.f32.mrb[28].mxu0 }
 0x9ff   :  { %v1287_v63 = vadd.f32 %v10571_v61, %v1286_v62  ;;  %v1288_v0 = vpop.f32.mrb[29].mxu0 }
 0xa00   :  { %v1289_v4 = vpop.f32.mrb[30].mxu0 }
 0xa01   :  { %v1290_v6 = vadd.f32 %v10571_v61, %v1289_v4  ;;  %v1291_v8 = vpop.f32.mrb[31].mxu0  ;;  %v1293_v9 = vmax.f32 %v1287_v63, 0.0  ;;  %v12144_v61 = vld [vmem:[#allocation2 + $0x10c] ss:$0 sps:$4 sm:$0xff]  }
 0xa02   :  { %v1758_v62 = vsel %vm340_vm3, %v12144_v61, 0 }
 0xa03   :  { %v1294_v10 = vmax.f32 %v1290_v6, 0.0 }
 0xa05   :  { %v1305_v13 = vpack.c.bf16 %v1294_v10, %v1293_v9 }
 0xa07   :  { %11625 = vmatmul.mubr.msk.bf16.vlgmr.msra.gmra.mrb[20].mxu1 %vm429_vm6, %v1305_v13 }
 0xa08   :  { %11629 = vmatpush3.bf16.msra.mxu1 %v12130_v12  ;;  %11634 = vmatprep.mubr.msk.bf16.mxu1 %vm12724_vm5, %v16841_v1 }
 0xa09   :  { %11630 = vmatprep.subr.bf16.mxu1 %v16841_v1 }
 0xa0c   :  { %11631 = vmatpush3.bf16.msra.mxu1 %v12131_v14 }
 0xa0d   :  { %11632 = vmatprep.subr.bf16.mxu1 %v16841_v1 }
 0xa10   :  { %11633 = vmatpush3.bf16.msra.mxu1 %v1424_v16 }
 0xa11   :  { %1501 = vmatprep.subr.mxu1 %v1490_v30 }
 0xada   :  { %v1381_v19 = vpop.f32.mrb[20].mxu1 }
 0xadb   :  { %v1382_v20 = vadd.f32 %v10582_v18, %v1381_v19  ;;  %v11626_v22 = vpop.f32.mrb[21].mxu1 }
 0xadc   :  { %v1384_v23 = vpop.f32.mrb[22].mxu1 }
 0xadd   :  { %v1385_v24 = vadd.f32 %v10582_v18, %v1384_v23  ;;  %v11627_v25 = vpop.f32.mrb[23].mxu1  ;;  %v1388_v26 = vmax.f32 %v1382_v20, 0.0 }
 0xadf   :  { %v1389_v27 = vmax.f32 %v1385_v24, 0.0 }
 0xae1   :  { %v1396_v28 = vpack.c.bf16 %v1389_v27, %v1388_v26  ;;  %v12145_v26 = vld [vmem:[#allocation6 + $0x6c] sm:$0xff]   ;;  %v12146_v27 = vld [vmem:[#allocation6 + $0x74] sm:$0xff]  }
 0xae2   :  { %11638 = vmatprep.subr.bf16.mxu0 %v12145_v26 }
 0xae3   :  { %11635 = vmatmul.mubr.msk.bf16.vlgmr.msra.gmra.mrb[24].mxu1 %vm506_vm8, %v1396_v28  ;;  %v12147_v28 = vld [vmem:[#allocation6 + $0x7c] sm:$0xff]  }
 0xae4   :  { %1565 = vmatprep.mubr.f32.mxu1 %v16841_v1  ;;  %1502 = vmatpush1.msra.mxu1 %v1492_v32 }
 0xae5   :  { %1760 = vmatprep.subr.bf16.mxu1 %v16843_v11 }
 0xaeb   :  { %10596 = vmatmul.mubr.msk.f32.vlgmr.msra.gmra.mrb[10].mxu1 %vm126_vm1, %v12888_v7 }
 0xaec   :  { %1571 = vmatprep.mubr.f32.mxu1 %v16841_v1  ;;  %1761 = vmatpush1.bf16.msra.mxu1 %v12136_v46 }
 0xaed   :  { %1762 = vmatprep.subr.bf16.mxu1 %v16843_v11 }
 0xaef   :  { %10597 = vmatmul.mubr.msk.f32.gmra.mrb[28].mxu1 %vm126_vm1, %v12998_v21 }
 0xaf0   :  { %1577 = vmatprep.mubr.f32.mxu1 %v16841_v1  ;;  %1763 = vmatpush1.bf16.msra.mxu1 %v12137_v47  ;;  %v12150_v47 = vld [vmem:[#allocation9 + $0x3c] sm:$0xff]  }
 0xaf1   :  { %1764 = vmatprep.subr.bf16.mxu1 %v16843_v11 }
 0xaf3   :  { %10598 = vmatmul.mubr.msk.f32.gmra.mrb[30].mxu1 %vm126_vm1, %v13055_v35 }
 0xaf4   :  { %1583 = vmatprep.mubr.f32.mxu1 %v16841_v1  ;;  %1765 = vmatpush1.bf16.msra.mxu1 %v12138_v48  ;;  %v10606_v48 = vld [vmem:[#allocation4 + $0x3] ss:$0 sm:$0xff] }
 0xaf5   :  { %1766 = vmatprep.subr.bf16.mxu1 %v16843_v11 }
 0xaf7   :  { %10599 = vmatmul.mubr.msk.f32.gmra.mrb[32].mxu1 %vm126_vm1, %v13063_v45 }
 0xaf8   :  { %1767 = vmatpush1.bf16.msra.mxu1 %v12139_v51 }
 0xaf9   :  { %1768 = vmatprep.subr.bf16.mxu1 %v16843_v11 }
 0xafc   :  { %1769 = vmatpush1.bf16.msra.mxu1 %v12140_v53 }
 0xafd   :  { %1770 = vmatprep.subr.bf16.mxu1 %v16843_v11 }
 0xb00   :  { %1771 = vmatpush1.bf16.msra.mxu1 %v12141_v54 }
 0xb01   :  { %1772 = vmatprep.subr.bf16.mxu1 %v16843_v11 }
 0xb04   :  { %1773 = vmatpush1.bf16.msra.mxu1 %v12142_v56 }
 0xb05   :  { %1774 = vmatprep.subr.bf16.mxu1 %v16843_v11 }
 0xb08   :  { %1775 = vmatpush1.bf16.msra.mxu1 %v12143_v59 }
 0xb09   :  { %1776 = vmatprep.subr.bf16.mxu1 %v16843_v11 }
 0xb0c   :  { %1777 = vmatpush1.bf16.msra.mxu1 %v1758_v62 }
 0xbb6   :  { %v1460_v37 = vpop.f32.mrb[24].mxu1 }
 0xbb7   :  { %v1461_v39 = vadd.f32 %v10589_v36, %v1460_v37  ;;  %v11636_v40 = vpop.f32.mrb[25].mxu1 }
 0xbb8   :  { %v1463_v41 = vpop.f32.mrb[26].mxu1 }
 0xbb9   :  { %v1464_v43 = vadd.f32 %v10589_v36, %v1463_v41  ;;  %v11637_v44 = vpop.f32.mrb[27].mxu1  ;;  %12217 = vtanh.f32 %v1461_v39 }
 0xbba   :  { %v12149_v44 = vld [vmem:[#allocation6 + $0x8c] ss:$0 sps:$4 sm:$0x33]  }
 0xbbb   :  { %12219 = vtanh.f32 %v1464_v43  ;;  %v12148_v43 = vld [vmem:[#allocation6 + $0x84] sm:$0xff]   ;;  %v1867_v46 = vsel %vm433_vm4, %v12149_v44, 0 }
 0xbbe   :  { %v1567_v55 = vpop.f32.mrb[10].mxu1 }
 0xbbf   :  { %v1569_v57 = vpop.f32.mrb[11].mxu1 }
 0xbc2   :  { %v1573_v58 = vpop.f32.mrb[28].mxu1 }
 0xbc3   :  { %v12218_v49 = vpop.eup %12217  ;;  %v1575_v60 = vpop.f32.mrb[29].mxu1 }
 0xbc5   :  { %v12220_v50 = vpop.eup %12219 }
 0xbc6   :  { %v1469_v52 = vpack.c.bf16 %v12220_v50, %v12218_v49  ;;  %v1579_v63 = vpop.f32.mrb[30].mxu1 }
 0xbc7   :  { %v1581_v0 = vpop.f32.mrb[31].mxu1 }
 0xbc8   :  { %1471 = vrot.lane.b32.xlu0 %v1469_v52, %s12726_s15  ;;  %10604 = vmatmul.mubr.msk.bf16.vlgmr.msra.gmra.mrb[32].mxu0 %vm213_vm2, %v1469_v52 }
 0xbc9   :  { %1651 = vmatprep.mubr.bf16.mxu0 %v16843_v11  ;;  %11639 = vmatpush3.bf16.msra.mxu0 %v12145_v26 }
 0xbca   :  { %v1585_v6 = vpop.f32.mrb[32].mxu1  ;;  %11640 = vmatprep.subr.bf16.mxu0 %v12146_v27 }
 0xbcb   :  { %v1587_v8 = vpop.f32.mrb[33].mxu1 }
 0xbcd   :  { %11641 = vmatpush3.bf16.msra.mxu0 %v12146_v27 }
 0xbce   :  { %11642 = vmatprep.subr.bf16.mxu0 %v12147_v28 }
 0xbd1   :  { %11643 = vmatpush3.bf16.msra.mxu0 %v12147_v28 }
 0xbd2   :  { %11644 = vmatprep.subr.bf16.mxu0 %v12148_v43 }
 0xbd5   :  { %11645 = vmatpush3.bf16.msra.mxu0 %v12148_v43 }
 0xbd6   :  { %12046 = vmatprep.subr.msk.bf16.mxu0 %vm433_vm4, %v12149_v44 }
 0xbd9   :  { %11647 = vmatpush3.bf16.msra.mxu0 %v1867_v46 }
 0xbda   :  { %11652 = vmatprep.subr.bf16.mxu0 %v12150_v47 }
 0xc3a   :  { %v1472_v4 = vpop.permute.xlu0 %1471 }
 0xc3b   :  { %10605 = vmatmul.mubr.msk.bf16.gmra.mrb[36].mxu0 %vm213_vm2, %v1472_v4 }
 0xc9b   :  { %v1643_v9 = vpop.f32.mrb[32].mxu0 }
 0xc9c   :  { %v1644_v10 = vadd.f32 %v1643_v9, %v1567_v55  ;;  %v1645_v12 = vpop.f32.mrb[33].mxu0  ;;  %v12152_v9 = vld [vmem:[#allocation9 + $0x4c] ss:$0 sps:$4 sm:$0x11]  }
 0xc9d   :  { %v1646_v13 = vadd.f32 %v1645_v12, %v1569_v57  ;;  %v1647_v14 = vpop.f32.mrb[34].mxu0  ;;  %v13092_v12 = vld [vmem:[%s16831_s0 + $0x28] sm:$0xff] }
 0xc9e   :  { %v1648_v15 = vadd.f32 %v1647_v14, %v1573_v58  ;;  %v1649_v16 = vpop.f32.mrb[35].mxu0  ;;  %v1662_v19 = vmax.f32 %v1644_v10, 0.0  ;;  %v1960_v10 = vsel %vm510_vm7, %v12152_v9, 0  ;;  %2049 = vrot.lane.b32.xlu0 %v13092_v12, %s12728_s24 }
 0xc9f   :  { %v1650_v18 = vadd.f32 %v1649_v16, %v1575_v60  ;;  %v1663_v22 = vmax.f32 %v1646_v13, 0.0  ;;  %v10618_v13 = vld [vmem:[#allocation7 + $0x3] ss:$0 sm:$0xff] }
 0xca0   :  { %v1664_v20 = vmax.f32 %v1648_v15, 0.0 }
 0xca1   :  { %v1665_v23 = vmax.f32 %v1650_v18, 0.0 }
 0xca2   :  { %v1688_v24 = vpack.c.bf16 %v1664_v20, %v1662_v19 }
 0xca3   :  { %v1689_v25 = vpack.c.bf16 %v1665_v23, %v1663_v22 }
 0xca5   :  { %10616 = vmatprep.mubr.msk.bf16.mxu1 %vm126_vm1, %v1689_v25 }
 0xca6   :  { %1793 = vmatmul.mubr.bf16.vlgmr.msra.gmra.mrb[36].mxu1 %v1688_v24 }
 0xd0e   :  { %v1653_v29 = vpop.f32.mrb[36].mxu0 }
 0xd0f   :  { %v1654_v30 = vadd.f32 %v1653_v29, %v1579_v63  ;;  %v1655_v5 = vpop.f32.mrb[37].mxu0 }
 0xd10   :  { %v1656_v31 = vadd.f32 %v1655_v5, %v1581_v0  ;;  %v1657_v32 = vpop.f32.mrb[38].mxu0  ;;  %v12153_v5 = vld [vmem:[%s16833_s2 + $0x40] ss:$8 sps:$4 sm:$0xff]  }
 0xd11   :  { %v1658_v33 = vadd.f32 %v1657_v32, %v1585_v6  ;;  %v1659_v34 = vpop.f32.mrb[39].mxu0  ;;  %v1666_v37 = vmax.f32 %v1654_v30, 0.0  ;;  %v2050_v30 = vpop.permute.xlu0 %2049 }
 0xd12   :  { %v1660_v36 = vadd.f32 %v1659_v34, %v1587_v8  ;;  %v1667_v39 = vmax.f32 %v1656_v31, 0.0  ;;  %v12151_v8 = vld [vmem:[#allocation9 + $0x44] sm:$0xff]   ;;  %v2052_v32 = vsel %vm2051_vm15, %v2048_v17, %v2050_v30 }
 0xd13   :  { %v1668_v38 = vmax.f32 %v1658_v33, 0.0  ;;  %v12155_v31 = vld [vmem:[%s16833_s2 + $0x44] ss:$8 sps:$4 sm:$0xff]   ;;  %v2025_v33 = vadd.s32 32, %v12873_v2 }
 0xd14   :  { %v1669_v40 = vmax.f32 %v1660_v36, 0.0  ;;  %2205 = vmatprep.subr.bf16.mxu1 %v12155_v31 }
 0xd15   :  { %v1690_v41 = vpack.c.bf16 %v1668_v38, %v1666_v37  ;;  %2206 = vmatpush1.bf16.msra.mxu1 %v12153_v5  ;;  %v2029_v34 = vand.u32 1, %v2025_v33  ;;  %v10626_v37 = vld [vmem:[#allocation10 + $0x3] ss:$0 sm:$0xff] }
 0xd16   :  { %v1691_v42 = vpack.c.bf16 %v1669_v40, %v1667_v39 }
 0xd17   :  { %vm2033_vm0 = vcmp.eq.s32.totalorder %v2029_v34, %v12875_v3 }
 0xd18   :  { %10617 = vmatprep.mubr.msk.bf16.mxu1 %vm126_vm1, %v1691_v42  ;;  %v13123_v36 = vsel %vm2033_vm0, 1.0, %v16841_v1 }
 0xd19   :  { %1801 = vmatmul.mubr.bf16.gmra.mrb[40].mxu1 %v1690_v41  ;;  %16888 = vst [vmem:[#allocation22_spill] sm:$0xff] %v13123_v36  ;;  %v2026_v41 = vadd.s32 40, %v12873_v2 }
 0xd1a   :  { %2237 = vmatprep.mubr.bf16.mxu1 %v16843_v11 }
 0xd79   :  { %v1794_v49 = vpop.f32.mrb[36].mxu1 }
 0xd7a   :  { %v1795_v50 = vadd.f32 %v10606_v48, %v1794_v49  ;;  %v1796_v51 = vpop.f32.mrb[37].mxu1  ;;  %v2027_v49 = vadd.s32 48, %v12873_v2 }
 0xd7b   :  { %v1797_v52 = vpop.f32.mrb[38].mxu1 }
 0xd7c   :  { %v1798_v53 = vadd.f32 %v10606_v48, %v1797_v52  ;;  %v1799_v54 = vpop.f32.mrb[39].mxu1  ;;  %v1809_v55 = vmax.f32 %v1795_v50, 0.0  ;;  %v2031_v51 = vand.u32 1, %v2027_v49  ;;  %v2028_v52 = vadd.s32 56, %v12873_v2 }
 0xd7e   :  { %v1810_v56 = vmax.f32 %v1798_v53, 0.0  ;;  %vm2035_vm9 = vcmp.eq.s32.totalorder %v2031_v51, %v12875_v3  ;;  %v2032_v54 = vand.u32 1, %v2028_v52 }
 0xd7f   :  { %v13140_v53 = vsel %vm2035_vm9, 1.0, %v16841_v1 }
 0xd80   :  { %v1823_v57 = vpack.c.bf16 %v1810_v56, %v1809_v55  ;;  %16890 = vst [vmem:[#allocation24_spill] sm:$0xff] %v13140_v53  ;;  %vm2036_vm10 = vcmp.eq.s32.totalorder %v2032_v54, %v12875_v3 }
 0xd82   :  { %11648 = vmatprep.mubr.msk.bf16.mxu0 %vm429_vm6, %v1823_v57  ;;  %v13147_v57 = vsel %vm2036_vm10, 1.0, %v16841_v1 }
 0xd83   :  { %16891 = vst [vmem:[#allocation25_spill] sm:$0xff] %v13147_v57 }
 0xdec   :  { %v1802_v58 = vpop.f32.mrb[40].mxu1 }
 0xded   :  { %v1803_v59 = vadd.f32 %v10606_v48, %v1802_v58  ;;  %v1804_v60 = vpop.f32.mrb[41].mxu1  ;;  %v12156_v58 = vld [vmem:[#allocation2 + $0x110] sm:$0xff]  }
 0xdee   :  { %v1805_v61 = vpop.f32.mrb[42].mxu1 }
 0xdef   :  { %v1806_v62 = vadd.f32 %v10606_v48, %v1805_v61  ;;  %v1807_v63 = vpop.f32.mrb[43].mxu1  ;;  %v1811_v0 = vmax.f32 %v1803_v59, 0.0 }
 0xdf1   :  { %v1812_v4 = vmax.f32 %v1806_v62, 0.0  ;;  %v12157_v62 = vld [vmem:[#allocation2 + $0x118] sm:$0xff]  }
 0xdf3   :  { %v1824_v6 = vpack.c.bf16 %v1812_v4, %v1811_v0  ;;  %v12158_v0 = vld [vmem:[#allocation2 + $0x120] sm:$0xff]   ;;  %v12159_v4 = vld [vmem:[#allocation2 + $0x128] sm:$0xff]  }
 0xdf5   :  { %11649 = vmatmul.mubr.msk.bf16.vlgmr.msra.gmra.mrb[40].mxu0 %vm429_vm6, %v1824_v6  ;;  %v12160_v6 = vld [vmem:[#allocation2 + $0x130] sm:$0xff]  }
 0xdf6   :  { %11653 = vmatpush3.bf16.msra.mxu0 %v12150_v47  ;;  %v2030_v47 = vand.u32 1, %v2026_v41 }
 0xdf7   :  { %11654 = vmatprep.subr.bf16.mxu0 %v12151_v8 }
 0xdf8   :  { %vm2034_vm5 = vcmp.eq.s32.totalorder %v2030_v47, %v12875_v3 }
 0xdf9   :  { %v13132_v50 = vsel %vm2034_vm5, 1.0, %v16841_v1 }
 0xdfa   :  { %11655 = vmatpush3.bf16.msra.mxu0 %v12151_v8  ;;  %16889 = vst [vmem:[#allocation23_spill] sm:$0xff] %v13132_v50  ;;  %v12161_v8 = vld [vmem:[#allocation2 + $0x138] sm:$0xff]  }
 0xdfb   :  { %12047 = vmatprep.subr.msk.bf16.mxu0 %vm510_vm7, %v12152_v9 }
 0xdfe   :  { %11657 = vmatpush3.bf16.msra.mxu0 %v1960_v10  ;;  %v12162_v10 = vld [vmem:[#allocation2 + $0x140] sm:$0xff]  }
 0xdff   :  { %2067 = vmatprep.subr.mxu0 %v2050_v30 }
 0xec8   :  { %v11650_v14 = vpop.f32.mrb[40].mxu0 }
 0xec9   :  { %v1912_v15 = vadd.f32 %v11650_v14, %v10618_v13  ;;  %v1903_v16 = vpop.f32.mrb[41].mxu0 }
 0xeca   :  { %v1904_v18 = vadd.f32 %v10618_v13, %v1903_v16  ;;  %v11651_v19 = vpop.f32.mrb[42].mxu0 }
 0xecb   :  { %v1915_v20 = vadd.f32 %v11651_v19, %v10618_v13  ;;  %v1906_v22 = vpop.f32.mrb[43].mxu0  ;;  %v1920_v24 = vmax.f32 %v1912_v15, 0.0  ;;  %v12163_v15 = vld [vmem:[#allocation2 + $0x148] sm:$0xff]  }
 0xecc   :  { %v1907_v23 = vadd.f32 %v10618_v13, %v1906_v22  ;;  %v1918_v26 = vmax.f32 %v1904_v18, 0.0  ;;  %v12164_v18 = vld [vmem:[#allocation2 + $0x150] ss:$0 sps:$4 sm:$0xff]  }
 0xecd   :  { %v1921_v25 = vmax.f32 %v1915_v20, 0.0  ;;  %v2392_v19 = vsel %vm340_vm3, %v12164_v18, 0 }
 0xece   :  { %v1919_v27 = vmax.f32 %v1907_v23, 0.0 }
 0xecf   :  { %v1929_v28 = vpack.c.bf16 %v1921_v25, %v1920_v24 }
 0xed0   :  { %v1928_v29 = vpack.c.bf16 %v1919_v27, %v1918_v26 }
 0xed2   :  { %11658 = vmatprep.mubr.msk.bf16.mxu0 %vm506_vm8, %v1928_v29 }
 0xed3   :  { %11659 = vmatmul.mubr.msk.bf16.vlgmr.msra.gmra.mrb[44].mxu0 %vm506_vm8, %v1929_v28 }
 0xed4   :  { %2131 = vmatprep.mubr.f32.mxu0 %v16841_v1  ;;  %2068 = vmatpush1.msra.mxu0 %v2052_v32 }
 0xed5   :  { %2394 = vmatprep.subr.bf16.mxu0 %v16843_v11 }
 0xedb   :  { %10636 = vmatmul.mubr.msk.f32.vlgmr.msra.gmra.mrb[26].mxu0 %vm126_vm1, %v12888_v7 }
 0xedc   :  { %2137 = vmatprep.mubr.f32.mxu0 %v16841_v1  ;;  %2395 = vmatpush1.bf16.msra.mxu0 %v12156_v58 }
 0xedd   :  { %2396 = vmatprep.subr.bf16.mxu0 %v16843_v11 }
 0xedf   :  { %10637 = vmatmul.mubr.msk.f32.gmra.mrb[48].mxu0 %vm126_vm1, %v12998_v21 }
 0xee0   :  { %2143 = vmatprep.mubr.f32.mxu0 %v16841_v1  ;;  %2397 = vmatpush1.bf16.msra.mxu0 %v12157_v62 }
 0xee1   :  { %2398 = vmatprep.subr.bf16.mxu0 %v16843_v11 }
 0xee3   :  { %10638 = vmatmul.mubr.msk.f32.gmra.mrb[50].mxu0 %vm126_vm1, %v13055_v35 }
 0xee4   :  { %2149 = vmatprep.mubr.f32.mxu0 %v16841_v1  ;;  %2399 = vmatpush1.bf16.msra.mxu0 %v12158_v0 }
 0xee5   :  { %2400 = vmatprep.subr.bf16.mxu0 %v16843_v11 }
 0xee7   :  { %10639 = vmatmul.mubr.msk.f32.gmra.mrb[52].mxu0 %vm126_vm1, %v13063_v45 }
 0xee8   :  { %2155 = vmatprep.mubr.f32.mxu0 %v16841_v1  ;;  %2401 = vmatpush1.bf16.msra.mxu0 %v12159_v4 }
 0xee9   :  { %2402 = vmatprep.subr.bf16.mxu0 %v16843_v11 }
 0xeeb   :  { %10640 = vmatmul.mubr.msk.f32.gmra.mrb[54].mxu0 %vm126_vm1, %v13123_v36 }
 0xeec   :  { %2161 = vmatprep.mubr.f32.mxu0 %v16841_v1  ;;  %2403 = vmatpush1.bf16.msra.mxu0 %v12160_v6 }
 0xeed   :  { %2404 = vmatprep.subr.bf16.mxu0 %v16843_v11 }
 0xeef   :  { %10641 = vmatmul.mubr.msk.f32.gmra.mrb[56].mxu0 %vm126_vm1, %v13132_v50 }
 0xef0   :  { %2167 = vmatprep.mubr.f32.mxu0 %v16841_v1  ;;  %2405 = vmatpush1.bf16.msra.mxu0 %v12161_v8 }
 0xef1   :  { %2406 = vmatprep.subr.bf16.mxu0 %v16843_v11 }
 0xef3   :  { %10642 = vmatmul.mubr.msk.f32.gmra.mrb[58].mxu0 %vm126_vm1, %v13140_v53 }
 0xef4   :  { %2173 = vmatprep.mubr.f32.mxu0 %v16841_v1  ;;  %2407 = vmatpush1.bf16.msra.mxu0 %v12162_v10  ;;  %v12167_v10 = vld [vmem:[#allocation6 + $0xa0] sm:$0xff]  }
 0xef5   :  { %2408 = vmatprep.subr.bf16.mxu0 %v16843_v11 }
 0xef7   :  { %10643 = vmatmul.mubr.msk.f32.gmra.mrb[60].mxu0 %vm126_vm1, %v13147_v57 }
 0xef8   :  { %2409 = vmatpush1.bf16.msra.mxu0 %v12163_v15 }
 0xef9   :  { %2410 = vmatprep.subr.bf16.mxu0 %v16843_v11 }
 0xefc   :  { %2411 = vmatpush1.bf16.msra.mxu0 %v2392_v19 }
 0xfa6   :  { %v11660_v38 = vpop.f32.mrb[44].mxu0 }
 0xfa7   :  { %v2005_v39 = vadd.f32 %v11660_v38, %v10626_v37  ;;  %v1996_v40 = vpop.f32.mrb[45].mxu0 }
 0xfa8   :  { %v1997_v42 = vadd.f32 %v10626_v37, %v1996_v40  ;;  %v11661_v43 = vpop.f32.mrb[46].mxu0 }
 0xfa9   :  { %12221 = vtanh.f32 %v2005_v39  ;;  %v2008_v44 = vadd.f32 %v11661_v43, %v10626_v37  ;;  %v1999_v46 = vpop.f32.mrb[47].mxu0 }
 0xfaa   :  { %12223 = vtanh.f32 %v1997_v42  ;;  %v2000_v48 = vadd.f32 %v10626_v37, %v1999_v46 }
 0xfab   :  { %12225 = vtanh.f32 %v2008_v44 }
 0xfac   :  { %12227 = vtanh.f32 %v2000_v48  ;;  %v12165_v48 = vld [vmem:[#allocation6 + $0x90] sm:$0xff]  }
 0xfad   :  { %11662 = vmatprep.subr.bf16.mxu1 %v12165_v48 }
 0xfae   :  { %v2133_v9 = vpop.f32.mrb[26].mxu0 }
 0xfaf   :  { %v2135_v13 = vpop.f32.mrb[27].mxu0 }
 0xfb2   :  { %v2139_v14 = vpop.f32.mrb[48].mxu0 }
 0xfb3   :  { %v12222_v55 = vpop.eup %12221  ;;  %v2141_v16 = vpop.f32.mrb[49].mxu0 }
 0xfb4   :  { %v12224_v56 = vpop.eup %12223 }
 0xfb5   :  { %v12226_v59 = vpop.eup %12225 }
 0xfb6   :  { %v12228_v60 = vpop.eup %12227  ;;  %v2016_v61 = vpack.c.bf16 %v12226_v59, %v12222_v55  ;;  %v2145_v20 = vpop.f32.mrb[50].mxu0 }
 0xfb7   :  { %v2015_v63 = vpack.c.bf16 %v12228_v60, %v12224_v56  ;;  %v2147_v22 = vpop.f32.mrb[51].mxu0 }
 0xfb8   :  { %2021 = vrot.lane.b32.xlu0 %v2016_v61, %s12726_s15 }
 0xfb9   :  { %2019 = vrot.lane.b32.xlu1 %v2015_v63, %s12726_s15  ;;  %10648 = vmatmul.mubr.msk.bf16.vlgmr.msra.gmra.mrb[44].mxu1 %vm213_vm2, %v2015_v63 }
 0xfba   :  { %2247 = vmatprep.mubr.bf16.mxu1 %v16843_v11  ;;  %v2151_v23 = vpop.f32.mrb[52].mxu0  ;;  %11663 = vmatpush3.bf16.msra.mxu1 %v12165_v48 }
 0xfbb   :  { %v2153_v24 = vpop.f32.mrb[53].mxu0 }
 0xfbd   :  { %2881 = vrot.lane.b32.xlu1 %v13092_v12, %s12729_s13  ;;  %v12173_v12 = vld [vmem:[%s16833_s2 + $0x50] ss:$8 sps:$4 sm:$0xff]  }
 0xfbe   :  { %v2157_v25 = vpop.f32.mrb[54].mxu0 }
 0xfbf   :  { %v13166_v26 = vpop.f32.mrb[55].mxu0 }
 0xfc1   :  { %10649 = vmatmul.mubr.msk.bf16.gmra.mrb[48].mxu1 %vm213_vm2, %v2016_v61 }
 0xfc2   :  { %2257 = vmatprep.mubr.bf16.mxu1 %v16843_v11  ;;  %v2163_v29 = vpop.f32.mrb[56].mxu0 }
 0xfc3   :  { %v2165_v17 = vpop.f32.mrb[57].mxu0 }
 0xfc6   :  { %v13171_v30 = vpop.f32.mrb[58].mxu0 }
 0xfc7   :  { %v13173_v5 = vpop.f32.mrb[59].mxu0 }
 0xfca   :  { %v13175_v31 = vpop.f32.mrb[60].mxu0 }
 0xfcb   :  { %v13177_v32 = vpop.f32.mrb[61].mxu0 }
0x102a   :  { %v2022_v28 = vpop.permute.xlu0 %2021 }
0x102b   :  { %v2020_v27 = vpop.permute.xlu1 %2019 }
0x102c   :  { %10650 = vmatmul.mubr.msk.bf16.gmra.mrb[52].mxu1 %vm213_vm2, %v2020_v27 }
0x102d   :  { %2267 = vmatprep.mubr.bf16.mxu1 %v16843_v11 }
0x1034   :  { %10651 = vmatmul.mubr.msk.bf16.gmra.mrb[56].mxu1 %vm213_vm2, %v2022_v28 }
0x108c   :  { %v2239_v33 = vpop.f32.mrb[44].mxu1 }
0x108d   :  { %v2240_v34 = vadd.f32 %v2239_v33, %v2133_v9  ;;  %v2241_v37 = vpop.f32.mrb[45].mxu1  ;;  %v12166_v9 = vld [vmem:[#allocation6 + $0x98] sm:$0xff]  }
0x108e   :  { %v2242_v38 = vadd.f32 %v2241_v37, %v2135_v13  ;;  %v2243_v39 = vpop.f32.mrb[46].mxu1  ;;  %11664 = vmatprep.subr.bf16.mxu1 %v12166_v9  ;;  %v12168_v13 = vld [vmem:[#allocation6 + $0xa8] sm:$0xff]  }
0x108f   :  { %v2244_v40 = vadd.f32 %v2243_v39, %v2139_v14  ;;  %v2245_v41 = vpop.f32.mrb[47].mxu1  ;;  %v2278_v43 = vmax.f32 %v2240_v34, 0.0  ;;  %11665 = vmatpush3.bf16.msra.mxu1 %v12166_v9  ;;  %v12169_v14 = vld [vmem:[#allocation6 + $0xb0] ss:$0 sps:$4 sm:$0x33]  }
0x1090   :  { %v2246_v42 = vadd.f32 %v2245_v41, %v2141_v16  ;;  %v2279_v46 = vmax.f32 %v2242_v38, 0.0  ;;  %11666 = vmatprep.subr.bf16.mxu1 %v12167_v10  ;;  %v2529_v15 = vsel %vm433_vm4, %v12169_v14, 0 }
0x1091   :  { %v2280_v44 = vmax.f32 %v2244_v40, 0.0 }
0x1092   :  { %v2281_v47 = vmax.f32 %v2246_v42, 0.0 }
0x1093   :  { %v2312_v49 = vpack.c.bf16 %v2280_v44, %v2278_v43  ;;  %11667 = vmatpush3.bf16.msra.mxu1 %v12167_v10 }
0x1094   :  { %v2313_v51 = vpack.c.bf16 %v2281_v47, %v2279_v46  ;;  %v2249_v52 = vpop.f32.mrb[48].mxu1  ;;  %11668 = vmatprep.subr.bf16.mxu1 %v12168_v13 }
0x1095   :  { %v2250_v54 = vadd.f32 %v2249_v52, %v2145_v20  ;;  %v2251_v55 = vpop.f32.mrb[49].mxu1 }
0x1096   :  { %v2252_v56 = vadd.f32 %v2251_v55, %v2147_v22  ;;  %v2253_v58 = vpop.f32.mrb[50].mxu1  ;;  %10662 = vmatprep.mubr.msk.bf16.mxu0 %vm126_vm1, %v2313_v51 }
0x1097   :  { %v2254_v59 = vadd.f32 %v2253_v58, %v2151_v23  ;;  %v2255_v60 = vpop.f32.mrb[51].mxu1  ;;  %2427 = vmatmul.mubr.bf16.vlgmr.msra.gmra.mrb[64].mxu0 %v2312_v49  ;;  %v2282_v62 = vmax.f32 %v2250_v54, 0.0  ;;  %11669 = vmatpush3.bf16.msra.mxu1 %v12168_v13  ;;  %v12170_v58 = vld [vmem:[#allocation9 + $0x50] sm:$0xff]   ;;  %v12171_v13 = vld [vmem:[#allocation9 + $0x58] sm:$0xff]  }
0x1098   :  { %v2256_v61 = vadd.f32 %v2255_v60, %v2153_v24  ;;  %v2283_v0 = vmax.f32 %v2252_v56, 0.0  ;;  %12048 = vmatprep.subr.msk.bf16.mxu1 %vm433_vm4, %v12169_v14  ;;  %v12172_v14 = vld [vmem:[#allocation9 + $0x60] ss:$0 sps:$4 sm:$0x11]  }
0x1099   :  { %v2284_v63 = vmax.f32 %v2254_v59, 0.0 }
0x109a   :  { %v2285_v4 = vmax.f32 %v2256_v61, 0.0 }
0x109b   :  { %v2314_v6 = vpack.c.bf16 %v2284_v63, %v2282_v62  ;;  %11671 = vmatpush3.bf16.msra.mxu1 %v2529_v15  ;;  %v2650_v15 = vsel %vm510_vm7, %v12172_v14, 0 }
0x109c   :  { %v2315_v8 = vpack.c.bf16 %v2285_v4, %v2283_v0  ;;  %11680 = vmatprep.subr.bf16.mxu1 %v12170_v58 }
0x109e   :  { %10663 = vmatprep.mubr.msk.bf16.mxu0 %vm126_vm1, %v2315_v8 }
0x109f   :  { %2435 = vmatmul.mubr.bf16.gmra.mrb[68].mxu0 %v2314_v6 }
0x10ff   :  { %v2259_v16 = vpop.f32.mrb[52].mxu1 }
0x1100   :  { %v2260_v18 = vadd.f32 %v2259_v16, %v2157_v25  ;;  %v2261_v19 = vpop.f32.mrb[53].mxu1 }
0x1101   :  { %v2262_v20 = vadd.f32 %v2261_v19, %v13166_v26  ;;  %v2263_v22 = vpop.f32.mrb[54].mxu1 }
0x1102   :  { %v2264_v23 = vadd.f32 %v2263_v22, %v2163_v29  ;;  %v2265_v24 = vpop.f32.mrb[55].mxu1  ;;  %v2286_v28 = vmax.f32 %v2260_v18, 0.0 }
0x1103   :  { %v2266_v27 = vadd.f32 %v2265_v24, %v2165_v17  ;;  %v2287_v34 = vmax.f32 %v2262_v20, 0.0 }
0x1104   :  { %v2288_v33 = vmax.f32 %v2264_v23, 0.0 }
0x1105   :  { %v2289_v37 = vmax.f32 %v2266_v27, 0.0 }
0x1106   :  { %v2316_v38 = vpack.c.bf16 %v2288_v33, %v2286_v28 }
0x1107   :  { %v2317_v39 = vpack.c.bf16 %v2289_v37, %v2287_v34  ;;  %v2269_v40 = vpop.f32.mrb[56].mxu1 }
0x1108   :  { %v2270_v41 = vadd.f32 %v2269_v40, %v13171_v30  ;;  %v2271_v42 = vpop.f32.mrb[57].mxu1  ;;  %v10652_v30 = vld [vmem:[#allocation4 + $0x4] ss:$0 sm:$0xff] }
0x1109   :  { %v2272_v43 = vadd.f32 %v2271_v42, %v13173_v5  ;;  %v2273_v25 = vpop.f32.mrb[58].mxu1  ;;  %10664 = vmatprep.mubr.msk.bf16.mxu0 %vm126_vm1, %v2317_v39 }
0x110a   :  { %v2274_v26 = vadd.f32 %v2273_v25, %v13175_v31  ;;  %v2275_v29 = vpop.f32.mrb[59].mxu1  ;;  %2443 = vmatmul.mubr.bf16.gmra.mrb[72].mxu0 %v2316_v38  ;;  %v2290_v44 = vmax.f32 %v2270_v41, 0.0  ;;  %v2758_v25 = vld [vmem:[%s16831_s0 + $0x30] sm:$0xff] }
0x110b   :  { %v2276_v17 = vadd.f32 %v2275_v29, %v13177_v32  ;;  %v2291_v47 = vmax.f32 %v2272_v43, 0.0  ;;  %2883 = vrot.lane.b32.xlu0 %v2758_v25, %s12729_s13 }
0x110c   :  { %v2292_v46 = vmax.f32 %v2274_v26, 0.0  ;;  %v10666_v26 = vld [vmem:[#allocation7 + $0x4] ss:$0 sm:$0xff] }
0x110d   :  { %v2293_v48 = vmax.f32 %v2276_v17, 0.0 }
0x110e   :  { %v2318_v49 = vpack.c.bf16 %v2292_v46, %v2290_v44 }
0x110f   :  { %v2319_v51 = vpack.c.bf16 %v2293_v48, %v2291_v47 }
0x1111   :  { %10665 = vmatprep.mubr.msk.bf16.mxu0 %vm126_vm1, %v2319_v51 }
0x1112   :  { %2451 = vmatmul.mubr.bf16.gmra.mrb[76].mxu0 %v2318_v49 }
0x1113   :  { %3025 = vmatprep.mubr.f32.mxu0 %v16841_v1 }
0x116a   :  { %v2428_v5 = vpop.f32.mrb[64].mxu0 }
0x116b   :  { %v2429_v52 = vadd.f32 %v10652_v30, %v2428_v5  ;;  %v2430_v54 = vpop.f32.mrb[65].mxu0 }
0x116c   :  { %v2431_v31 = vpop.f32.mrb[66].mxu0 }
0x116d   :  { %v2432_v55 = vadd.f32 %v10652_v30, %v2431_v31  ;;  %v2433_v56 = vpop.f32.mrb[67].mxu0  ;;  %v2459_v32 = vmax.f32 %v2429_v52, 0.0 }
0x116e   :  { %v12175_v56 = vld [vmem:[%s16833_s2 + $0x54] ss:$8 sps:$4 sm:$0xff]  }
0x116f   :  { %v2460_v59 = vmax.f32 %v2432_v55, 0.0 }
0x1171   :  { %v2477_v60 = vpack.c.bf16 %v2460_v59, %v2459_v32  ;;  %v2882_v32 = vpop.permute.xlu1 %2881 }
0x1172   :  { %v2436_v61 = vpop.f32.mrb[68].mxu0 }
0x1173   :  { %v2437_v62 = vadd.f32 %v10652_v30, %v2436_v61  ;;  %v2438_v63 = vpop.f32.mrb[69].mxu0  ;;  %11672 = vmatprep.mubr.msk.bf16.mxu1 %vm429_vm6, %v2477_v60 }
0x1174   :  { %v2439_v0 = vpop.f32.mrb[70].mxu0 }
0x1175   :  { %v2440_v4 = vadd.f32 %v10652_v30, %v2439_v0  ;;  %v2441_v6 = vpop.f32.mrb[71].mxu0  ;;  %v2461_v8 = vmax.f32 %v2437_v62, 0.0 }
0x1177   :  { %v2462_v9 = vmax.f32 %v2440_v4, 0.0 }
0x1179   :  { %v2478_v10 = vpack.c.bf16 %v2462_v9, %v2461_v8 }
0x117b   :  { %11673 = vmatmul.mubr.msk.bf16.vlgmr.msra.gmra.mrb[60].mxu1 %vm429_vm6, %v2478_v10 }
0x117c   :  { %11681 = vmatpush3.bf16.msra.mxu1 %v12170_v58 }
0x117d   :  { %11682 = vmatprep.subr.bf16.mxu1 %v12171_v13  ;;  %v2884_v58 = vpop.permute.xlu0 %2883 }
0x117e   :  { %v2886_v59 = vsel %vm2885_vm11, %v2882_v32, %v2884_v58  ;;  %2961 = vmatprep.subr.mxu0 %v2884_v58  ;;  %v12177_v32 = vld [vmem:[#allocation2 + $0x15c] sm:$0xff]  }
0x117f   :  { %2962 = vmatpush1.msra.mxu0 %v2886_v59 }
0x1180   :  { %11683 = vmatpush3.bf16.msra.mxu1 %v12171_v13  ;;  %10708 = vmatmul.mubr.msk.f32.vlgmr.msra.gmra.mrb[62].mxu0 %vm126_vm1, %v12888_v7 }
0x1181   :  { %12049 = vmatprep.subr.msk.bf16.mxu1 %vm510_vm7, %v12172_v14  ;;  %3696 = vmatprep.subr.bf16.mxu0 %v16843_v11 }
0x1182   :  { %3031 = vmatprep.mubr.f32.mxu0 %v16841_v1 }
0x1184   :  { %11685 = vmatpush3.bf16.msra.mxu1 %v2650_v15  ;;  %10709 = vmatmul.mubr.msk.f32.gmra.mrb[80].mxu0 %vm126_vm1, %v12998_v21 }
0x1185   :  { %3279 = vmatprep.subr.bf16.mxu1 %v12175_v56  ;;  %3037 = vmatprep.mubr.f32.mxu0 %v16841_v1 }
0x1188   :  { %10710 = vmatmul.mubr.msk.f32.gmra.mrb[82].mxu0 %vm126_vm1, %v13055_v35  ;;  %v12189_v35 = vld [vmem:[#allocation6 + $0xd4] ss:$0 sps:$4 sm:$0x33]  }
0x1189   :  { %3043 = vmatprep.mubr.f32.mxu0 %v16841_v1  ;;  %v3999_v21 = vsel %vm433_vm4, %v12189_v35, 0 }
0x118c   :  { %10711 = vmatmul.mubr.msk.f32.gmra.mrb[84].mxu0 %vm126_vm1, %v13063_v45  ;;  %v12187_v45 = vld [vmem:[#allocation6 + $0xc4] sm:$0xff]  }
0x118d   :  { %3049 = vmatprep.mubr.f32.mxu0 %v16841_v1 }
0x1190   :  { %10712 = vmatmul.mubr.msk.f32.gmra.mrb[86].mxu0 %vm126_vm1, %v13123_v36  ;;  %v12186_v36 = vld [vmem:[#allocation6 + $0xbc] sm:$0xff]  }
0x1191   :  { %3055 = vmatprep.mubr.f32.mxu0 %v16841_v1 }
0x1194   :  { %10713 = vmatmul.mubr.msk.f32.gmra.mrb[88].mxu0 %vm126_vm1, %v13132_v50 }
0x1195   :  { %3061 = vmatprep.mubr.f32.mxu0 %v16841_v1 }
0x1198   :  { %10714 = vmatmul.mubr.msk.f32.gmra.mrb[90].mxu0 %vm126_vm1, %v13140_v53 }
0x1199   :  { %3067 = vmatprep.mubr.f32.mxu0 %v16841_v1 }
0x119c   :  { %10715 = vmatmul.mubr.msk.f32.gmra.mrb[92].mxu0 %vm126_vm1, %v13147_v57 }
0x119d   :  { %3073 = vmatprep.mubr.f32.mxu0 %v16841_v1 }
0x11dd   :  { %v2444_v16 = vpop.f32.mrb[72].mxu0 }
0x11de   :  { %v2445_v18 = vadd.f32 %v10652_v30, %v2444_v16  ;;  %v2446_v19 = vpop.f32.mrb[73].mxu0 }
0x11df   :  { %v2447_v20 = vpop.f32.mrb[74].mxu0 }
0x11e0   :  { %v2448_v22 = vadd.f32 %v10652_v30, %v2447_v20  ;;  %v2449_v23 = vpop.f32.mrb[75].mxu0  ;;  %v2463_v24 = vmax.f32 %v2445_v18, 0.0  ;;  %v13237_v18 = vld [vmem:[#allocation10 + $0x4] ss:$0 sm:$0xff] }
0x11e2   :  { %v2464_v27 = vmax.f32 %v2448_v22, 0.0 }
0x11e4   :  { %v2479_v28 = vpack.c.bf16 %v2464_v27, %v2463_v24 }
0x11e5   :  { %v2452_v33 = vpop.f32.mrb[76].mxu0 }
0x11e6   :  { %v2453_v34 = vadd.f32 %v10652_v30, %v2452_v33  ;;  %v2454_v37 = vpop.f32.mrb[77].mxu0  ;;  %11676 = vmatprep.mubr.msk.bf16.mxu1 %vm429_vm6, %v2479_v28 }
0x11e7   :  { %v2455_v38 = vpop.f32.mrb[78].mxu0 }
0x11e8   :  { %v2456_v39 = vadd.f32 %v10652_v30, %v2455_v38  ;;  %v2457_v40 = vpop.f32.mrb[79].mxu0  ;;  %v2465_v41 = vmax.f32 %v2453_v34, 0.0  ;;  %v2759_v34 = vadd.s32 64, %v12873_v2 }
0x11ea   :  { %v2466_v42 = vmax.f32 %v2456_v39, 0.0  ;;  %v2783_v38 = vand.u32 1, %v2759_v34 }
0x11ec   :  { %v2480_v43 = vpack.c.bf16 %v2466_v42, %v2465_v41  ;;  %vm2807_vm12 = vcmp.eq.s32.totalorder %v2783_v38, %v12875_v3  ;;  %v2760_v41 = vadd.s32 72, %v12873_v2 }
0x11ed   :  { %v13249_v25 = vsel %vm2807_vm12, 1.0, %v16841_v1 }
0x11ee   :  { %11677 = vmatmul.mubr.msk.bf16.gmra.mrb[64].mxu1 %vm429_vm6, %v2480_v43  ;;  %16892 = vst [vmem:[#allocation26_spill] sm:$0xff] %v13249_v25  ;;  %10716 = vmatmul.mubr.msk.f32.gmra.mrb[94].mxu0 %vm126_vm1, %v13249_v25 }
0x11ef   :  { %3079 = vmatprep.mubr.f32.mxu0 %v16841_v1 }
0x124e   :  { %v11674_v29 = vpop.f32.mrb[60].mxu1 }
0x124f   :  { %v2574_v17 = vadd.f32 %v11674_v29, %v10666_v26  ;;  %v2565_v44 = vpop.f32.mrb[61].mxu1  ;;  %v2784_v29 = vand.u32 1, %v2760_v41 }
0x1250   :  { %v2566_v46 = vadd.f32 %v10666_v26, %v2565_v44  ;;  %v11675_v47 = vpop.f32.mrb[62].mxu1 }
0x1251   :  { %v2577_v48 = vadd.f32 %v11675_v47, %v10666_v26  ;;  %v2568_v49 = vpop.f32.mrb[63].mxu1  ;;  %v2598_v30 = vmax.f32 %v2574_v17, 0.0  ;;  %vm2808_vm13 = vcmp.eq.s32.totalorder %v2784_v29, %v12875_v3  ;;  %v2761_v17 = vadd.s32 80, %v12873_v2 }
0x1252   :  { %v2569_v51 = vadd.f32 %v10666_v26, %v2568_v49  ;;  %v2596_v52 = vmax.f32 %v2566_v46, 0.0  ;;  %v13266_v44 = vsel %vm2808_vm13, 1.0, %v16841_v1  ;;  %v2762_v47 = vadd.s32 88, %v12873_v2 }
0x1253   :  { %v2599_v5 = vmax.f32 %v2577_v48, 0.0  ;;  %16893 = vst [vmem:[#allocation27_spill] sm:$0xff] %v13266_v44  ;;  %10717 = vmatmul.mubr.msk.f32.gmra.mrb[96].mxu0 %vm126_vm1, %v13266_v44  ;;  %v2785_v46 = vand.u32 1, %v2761_v17  ;;  %v2775_v29 = vadd.s32 192, %v12873_v2 }
0x1254   :  { %v2597_v54 = vmax.f32 %v2569_v51, 0.0  ;;  %3085 = vmatprep.mubr.f32.mxu0 %v16841_v1  ;;  %v2786_v49 = vand.u32 1, %v2762_v47  ;;  %v2776_v47 = vadd.s32 200, %v12873_v2 }
0x1255   :  { %v2611_v31 = vpack.c.bf16 %v2599_v5, %v2598_v30  ;;  %vm2809_vm14 = vcmp.eq.s32.totalorder %v2785_v46, %v12875_v3  ;;  %v2763_v30 = vadd.s32 96, %v12873_v2  ;;  %v2799_v46 = vand.u32 1, %v2775_v29 }
0x1256   :  { %v2610_v55 = vpack.c.bf16 %v2597_v54, %v2596_v52  ;;  %v13274_v48 = vsel %vm2809_vm14, 1.0, %v16841_v1  ;;  %vm2810_vm15 = vcmp.eq.s32.totalorder %v2786_v49, %v12875_v3  ;;  %v2764_v52 = vadd.s32 104, %v12873_v2 }
0x1257   :  { %16894 = vst [vmem:[#allocation28_spill] sm:$0xff] %v13274_v48  ;;  %10718 = vmatmul.mubr.msk.f32.gmra.mrb[98].mxu0 %vm126_vm1, %v13274_v48  ;;  %v13283_v51 = vsel %vm2810_vm15, 1.0, %v16841_v1  ;;  %v2787_v5 = vand.u32 1, %v2763_v30  ;;  %v2765_v54 = vadd.s32 112, %v12873_v2  ;;  %v2800_v30 = vand.u32 1, %v2776_v47 }
0x1258   :  { %11686 = vmatprep.mubr.msk.bf16.mxu1 %vm506_vm8, %v2610_v55  ;;  %3091 = vmatprep.mubr.f32.mxu0 %v16841_v1  ;;  %16895 = vst [vmem:[#allocation29_spill] sm:$0xff] %v13283_v51  ;;  %v2766_v55 = vadd.s32 120, %v12873_v2  ;;  %v2788_v56 = vand.u32 1, %v2764_v52 }
0x1259   :  { %11687 = vmatmul.mubr.msk.bf16.vlgmr.msra.gmra.mrb[68].mxu1 %vm506_vm8, %v2611_v31  ;;  %v12176_v31 = vld [vmem:[#allocation2 + $0x154] sm:$0xff]   ;;  %vm2811_vm0 = vcmp.eq.s32.totalorder %v2787_v5, %v12875_v3  ;;  %v2789_v58 = vand.u32 1, %v2765_v54  ;;  %v2777_v5 = vadd.s32 208, %v12873_v2 }
0x125a   :  { %3280 = vmatpush1.bf16.msra.mxu1 %v12173_v12  ;;  %v13295_v12 = vsel %vm2811_vm0, 1.0, %v16841_v1  ;;  %3697 = vmatpush1.bf16.msra.mxu0 %v12176_v31  ;;  %vm2812_vm5 = vcmp.eq.s32.totalorder %v2788_v56, %v12875_v3  ;;  %v2778_v31 = vadd.s32 216, %v12873_v2 }
0x125b   :  { %10719 = vmatmul.mubr.msk.f32.gmra.mrb[100].mxu0 %vm126_vm1, %v13283_v51  ;;  %16896 = vst [vmem:[#allocation30_spill] sm:$0xff] %v13295_v12  ;;  %3698 = vmatprep.subr.bf16.mxu0 %v16843_v11  ;;  %v13303_v59 = vsel %vm2812_vm5, 1.0, %v16841_v1  ;;  %vm2813_vm9 = vcmp.eq.s32.totalorder %v2789_v58, %v12875_v3  ;;  %v2801_v54 = vand.u32 1, %v2777_v5  ;;  %v2779_v58 = vadd.s32 224, %v12873_v2 }
0x125c   :  { %3097 = vmatprep.mubr.f32.mxu0 %v16841_v1  ;;  %16897 = vst [vmem:[#allocation31_spill] sm:$0xff] %v13303_v59  ;;  %v2802_v56 = vand.u32 1, %v2778_v31 }
0x125e   :  { %3699 = vmatpush1.bf16.msra.mxu0 %v12177_v32 }
0x125f   :  { %10720 = vmatmul.mubr.msk.f32.gmra.mrb[102].mxu0 %vm126_vm1, %v13295_v12  ;;  %3700 = vmatprep.subr.bf16.mxu0 %v16843_v11 }
0x1260   :  { %3103 = vmatprep.mubr.f32.mxu0 %v16841_v1 }
0x1263   :  { %10721 = vmatmul.mubr.msk.f32.gmra.mrb[104].mxu0 %vm126_vm1, %v13303_v59 }
0x1264   :  { %3109 = vmatprep.mubr.f32.mxu0 %v16841_v1 }
0x12c1   :  { %v11678_v60 = vpop.f32.mrb[64].mxu1 }
0x12c2   :  { %v2590_v61 = vadd.f32 %v11678_v60, %v10666_v26  ;;  %v2581_v62 = vpop.f32.mrb[65].mxu1  ;;  %v2790_v60 = vand.u32 1, %v2766_v55 }
0x12c3   :  { %v2582_v63 = vadd.f32 %v10666_v26, %v2581_v62  ;;  %v11679_v0 = vpop.f32.mrb[66].mxu1  ;;  %v12178_v62 = vld [vmem:[#allocation2 + $0x164] sm:$0xff]  }
0x12c4   :  { %v2593_v4 = vadd.f32 %v11679_v0, %v10666_v26  ;;  %v2584_v6 = vpop.f32.mrb[67].mxu1  ;;  %v2602_v9 = vmax.f32 %v2590_v61, 0.0  ;;  %v2767_v61 = vadd.s32 128, %v12873_v2  ;;  %vm2814_vm10 = vcmp.eq.s32.totalorder %v2790_v60, %v12875_v3  ;;  %3701 = vmatpush1.bf16.msra.mxu0 %v12178_v62 }
0x12c5   :  { %v2585_v8 = vadd.f32 %v10666_v26, %v2584_v6  ;;  %v2600_v13 = vmax.f32 %v2582_v63, 0.0  ;;  %v13312_v63 = vsel %vm2813_vm9, 1.0, %v16841_v1  ;;  %v12179_v6 = vld [vmem:[#allocation2 + $0x16c] sm:$0xff]   ;;  %3702 = vmatprep.subr.bf16.mxu0 %v16843_v11  ;;  %v2803_v60 = vand.u32 1, %v2779_v58 }
0x12c6   :  { %v2603_v10 = vmax.f32 %v2593_v4, 0.0  ;;  %16898 = vst [vmem:[#allocation32_spill] sm:$0xff] %v13312_v63  ;;  %v2791_v0 = vand.u32 1, %v2767_v61  ;;  %v2768_v4 = vadd.s32 136, %v12873_v2  ;;  %10722 = vmatmul.mubr.msk.f32.gmra.mrb[106].mxu0 %vm126_vm1, %v13312_v63  ;;  %v2780_v61 = vadd.s32 232, %v12873_v2 }
0x12c7   :  { %v2601_v14 = vmax.f32 %v2585_v8, 0.0  ;;  %3115 = vmatprep.mubr.f32.mxu0 %v16841_v1  ;;  %v13321_v8 = vsel %vm2814_vm10, 1.0, %v16841_v1  ;;  %vm2823_vm10 = vcmp.eq.s32.totalorder %v2799_v46, %v12875_v3 }
0x12c8   :  { %v2613_v15 = vpack.c.bf16 %v2603_v10, %v2602_v9  ;;  %16899 = vst [vmem:[#allocation33_spill] sm:$0xff] %v13321_v8  ;;  %vm2815_vm11 = vcmp.eq.s32.totalorder %v2791_v0, %v12875_v3  ;;  %v2792_v9 = vand.u32 1, %v2768_v4  ;;  %v2769_v10 = vadd.s32 144, %v12873_v2  ;;  %3703 = vmatpush1.bf16.msra.mxu0 %v12179_v6 }
0x12c9   :  { %v2612_v16 = vpack.c.bf16 %v2601_v14, %v2600_v13  ;;  %v12180_v13 = vld [vmem:[#allocation2 + $0x174] sm:$0xff]   ;;  %3704 = vmatprep.subr.bf16.mxu0 %v16843_v11  ;;  %v13330_v14 = vsel %vm2815_vm11, 1.0, %v16841_v1  ;;  %v13396_v52 = vsel %vm2823_vm10, 1.0, %v16841_v1  ;;  %vm2824_vm11 = vcmp.eq.s32.totalorder %v2800_v30, %v12875_v3 }
0x12ca   :  { %10723 = vmatmul.mubr.msk.f32.gmra.mrb[108].mxu0 %vm126_vm1, %v13321_v8  ;;  %16900 = vst [vmem:[#allocation34_spill] sm:$0xff] %v13330_v14  ;;  %vm2816_vm12 = vcmp.eq.s32.totalorder %v2792_v9, %v12875_v3  ;;  %16908 = vst [vmem:[#allocation42_spill] sm:$0xff] %v13396_v52  ;;  %v13404_v55 = vsel %vm2824_vm11, 1.0, %v16841_v1  ;;  %v2804_v0 = vand.u32 1, %v2780_v61  ;;  %v2781_v9 = vadd.s32 240, %v12873_v2 }
0x12cb   :  { %11690 = vmatprep.mubr.msk.bf16.mxu1 %vm506_vm8, %v2612_v16  ;;  %3121 = vmatprep.mubr.f32.mxu0 %v16841_v1  ;;  %v2770_v16 = vadd.s32 152, %v12873_v2  ;;  %16909 = vst [vmem:[#allocation43_spill] sm:$0xff] %v13404_v55 }
0x12cc   :  { %11691 = vmatmul.mubr.msk.bf16.gmra.mrb[72].mxu1 %vm506_vm8, %v2613_v15  ;;  %v2793_v15 = vand.u32 1, %v2769_v10  ;;  %3705 = vmatpush1.bf16.msra.mxu0 %v12180_v13  ;;  %v13437_v10 = vpop.f32.mrb[62].mxu0  ;;  %v12182_v13 = vld [vmem:[#allocation2 + $0x184] sm:$0xff]  }
0x12cd   :  { %3311 = vmatprep.mubr.bf16.mxu1 %v16843_v11  ;;  %3706 = vmatprep.subr.bf16.mxu0 %v16843_v11 }
0x12ce   :  { %10724 = vmatmul.mubr.msk.f32.gmra.mrb[110].mxu0 %vm126_vm1, %v13330_v14  ;;  %vm2817_vm13 = vcmp.eq.s32.totalorder %v2793_v15, %v12875_v3  ;;  %v2805_v15 = vand.u32 1, %v2781_v9 }
0x12cf   :  { %3127 = vmatprep.mubr.f32.mxu0 %v16841_v1 }
0x132c   :  { %v11688_v19 = vpop.f32.mrb[68].mxu1 }
0x132d   :  { %v2695_v20 = vadd.f32 %v11688_v19, %v13237_v18  ;;  %v2686_v22 = vpop.f32.mrb[69].mxu1  ;;  %v12181_v19 = vld [vmem:[#allocation2 + $0x17c] sm:$0xff]  }
0x132e   :  { %v2687_v23 = vadd.f32 %v13237_v18, %v2686_v22  ;;  %v11689_v24 = vpop.f32.mrb[70].mxu1  ;;  %v2794_v22 = vand.u32 1, %v2770_v16  ;;  %3707 = vmatpush1.bf16.msra.mxu0 %v12181_v19  ;;  %v13442_v16 = vpop.f32.mrb[63].mxu0  ;;  %v2782_v19 = vadd.s32 248, %v12873_v2 }
0x132f   :  { %12229 = vtanh.f32 %v2695_v20  ;;  %v2698_v27 = vadd.f32 %v11689_v24, %v13237_v18  ;;  %v2689_v28 = vpop.f32.mrb[71].mxu1  ;;  %v13339_v20 = vsel %vm2816_vm12, 1.0, %v16841_v1  ;;  %3708 = vmatprep.subr.bf16.mxu0 %v16843_v11  ;;  %v13348_v24 = vsel %vm2817_vm13, 1.0, %v16841_v1 }
0x1330   :  { %12231 = vtanh.f32 %v2687_v23  ;;  %v2690_v33 = vadd.f32 %v13237_v18, %v2689_v28  ;;  %16901 = vst [vmem:[#allocation35_spill] sm:$0xff] %v13339_v20  ;;  %v2771_v23 = vadd.s32 160, %v12873_v2  ;;  %10725 = vmatmul.mubr.msk.f32.gmra.mrb[112].mxu0 %vm126_vm1, %v13339_v20  ;;  %16902 = vst [vmem:[#allocation36_spill] sm:$0xff] %v13348_v24  ;;  %vm2818_vm14 = vcmp.eq.s32.totalorder %v2794_v22, %v12875_v3  ;;  %v13447_v22 = vpop.f32.mrb[80].mxu0 }
0x1331   :  { %12233 = vtanh.f32 %v2698_v27  ;;  %3133 = vmatprep.mubr.f32.mxu0 %v16841_v1  ;;  %v2772_v28 = vadd.s32 168, %v12873_v2  ;;  %vm2825_vm12 = vcmp.eq.s32.totalorder %v2801_v54, %v12875_v3  ;;  %vm2826_vm13 = vcmp.eq.s32.totalorder %v2802_v56, %v12875_v3 }
0x1332   :  { %12235 = vtanh.f32 %v2690_v33  ;;  %v2795_v27 = vand.u32 1, %v2771_v23  ;;  %v13356_v33 = vsel %vm2818_vm14, 1.0, %v16841_v1  ;;  %v13412_v32 = vsel %vm2825_vm12, 1.0, %v16841_v1  ;;  %3709 = vmatpush1.bf16.msra.mxu0 %v12182_v13 }
0x1333   :  { %16903 = vst [vmem:[#allocation37_spill] sm:$0xff] %v13356_v33  ;;  %v2796_v34 = vand.u32 1, %v2772_v28  ;;  %16910 = vst [vmem:[#allocation44_spill] sm:$0xff] %v13412_v32  ;;  %v13420_v62 = vsel %vm2826_vm13, 1.0, %v16841_v1  ;;  %vm2827_vm14 = vcmp.eq.s32.totalorder %v2803_v60, %v12875_v3  ;;  %3710 = vmatprep.subr.bf16.mxu0 %v16843_v11  ;;  %v13452_v28 = vpop.f32.mrb[81].mxu0 }
0x1334   :  { %10726 = vmatmul.mubr.msk.f32.gmra.mrb[114].mxu0 %vm126_vm1, %v13348_v24  ;;  %vm2819_vm15 = vcmp.eq.s32.totalorder %v2795_v27, %v12875_v3  ;;  %16911 = vst [vmem:[#allocation45_spill] sm:$0xff] %v13420_v62  ;;  %v13427_v4 = vsel %vm2827_vm14, 1.0, %v16841_v1  ;;  %v12183_v27 = vld [vmem:[#allocation2 + $0x18c] sm:$0xff]  }
0x1335   :  { %3139 = vmatprep.mubr.f32.mxu0 %v16841_v1  ;;  %v13364_v38 = vsel %vm2819_vm15, 1.0, %v16841_v1  ;;  %vm2820_vm0 = vcmp.eq.s32.totalorder %v2796_v34, %v12875_v3  ;;  %16912 = vst [vmem:[#allocation46_spill] sm:$0xff] %v13427_v4  ;;  %vm2828_vm15 = vcmp.eq.s32.totalorder %v2804_v0, %v12875_v3  ;;  %v2806_v34 = vand.u32 1, %v2782_v19 }
0x1336   :  { %16904 = vst [vmem:[#allocation38_spill] sm:$0xff] %v13364_v38  ;;  %v13372_v41 = vsel %vm2820_vm0, 1.0, %v16841_v1  ;;  %v13434_v6 = vsel %vm2828_vm15, 1.0, %v16841_v1  ;;  %vm2829_vm0 = vcmp.eq.s32.totalorder %v2805_v15, %v12875_v3  ;;  %3711 = vmatpush1.bf16.msra.mxu0 %v12183_v27 }
0x1337   :  { %16905 = vst [vmem:[#allocation39_spill] sm:$0xff] %v13372_v41  ;;  %16913 = vst [vmem:[#allocation47_spill] sm:$0xff] %v13434_v6  ;;  %v13450_v23 = vsel %vm2829_vm0, 1.0, %v16841_v1  ;;  %3712 = vmatprep.subr.bf16.mxu0 %v16843_v11 }
0x1338   :  { %10727 = vmatmul.mubr.msk.f32.gmra.mrb[116].mxu0 %vm126_vm1, %v13356_v33  ;;  %16914 = vst [vmem:[#allocation48_spill] sm:$0xff] %v13450_v23 }
0x1339   :  { %v12230_v37 = vpop.eup %12229  ;;  %3145 = vmatprep.mubr.f32.mxu0 %v16841_v1 }
0x133a   :  { %v12232_v39 = vpop.eup %12231 }
0x133b   :  { %v12234_v40 = vpop.eup %12233 }
0x133c   :  { %v12236_v42 = vpop.eup %12235  ;;  %v13246_v43 = vpack.c.bf16 %v12234_v40, %v12230_v37  ;;  %v2773_v37 = vadd.s32 176, %v12873_v2  ;;  %v2774_v40 = vadd.s32 184, %v12873_v2  ;;  %10728 = vmatmul.mubr.msk.f32.gmra.mrb[118].mxu0 %vm126_vm1, %v13364_v38 }
0x133d   :  { %v13251_v26 = vpack.c.bf16 %v12236_v42, %v12232_v39  ;;  %3151 = vmatprep.mubr.f32.mxu0 %v16841_v1 }
0x133e   :  { %2735 = vrot.lane.b32.xlu0 %v13246_v43, %s12726_s15  ;;  %v2797_v39 = vand.u32 1, %v2773_v37  ;;  %v2798_v42 = vand.u32 1, %v2774_v40  ;;  %v12184_v37 = vld [vmem:[#allocation2 + $0x194] ss:$0 sps:$4 sm:$0xff]  }
0x133f   :  { %2733 = vrot.lane.b32.xlu1 %v13251_v26, %s12726_s15  ;;  %10744 = vmatmul.mubr.msk.bf16.vlgmr.msra.gmra.mrb[76].mxu1 %vm213_vm2, %v13251_v26  ;;  %v3694_v40 = vsel %vm340_vm3, %v12184_v37, 0 }
0x1340   :  { %3321 = vmatprep.mubr.bf16.mxu1 %v16843_v11  ;;  %vm2821_vm5 = vcmp.eq.s32.totalorder %v2797_v39, %v12875_v3  ;;  %10729 = vmatmul.mubr.msk.f32.gmra.mrb[120].mxu0 %vm126_vm1, %v13372_v41  ;;  %vm2822_vm9 = vcmp.eq.s32.totalorder %v2798_v42, %v12875_v3  ;;  %v13465_v42 = vpop.f32.mrb[82].mxu0 }
0x1341   :  { %3157 = vmatprep.mubr.f32.mxu0 %v16841_v1  ;;  %v13380_v17 = vsel %vm2821_vm5, 1.0, %v16841_v1  ;;  %v13388_v49 = vsel %vm2822_vm9, 1.0, %v16841_v1  ;;  %vm2830_vm5 = vcmp.eq.s32.totalorder %v2806_v34, %v12875_v3  ;;  %3713 = vmatpush1.bf16.msra.mxu0 %v3694_v40  ;;  %v13467_v29 = vpop.f32.mrb[83].mxu0  ;;  %vm5099_vm9 = vcmask 654336  }
0x1342   :  { %16906 = vst [vmem:[#allocation40_spill] sm:$0xff] %v13380_v17  ;;  %16907 = vst [vmem:[#allocation41_spill] sm:$0xff] %v13388_v49  ;;  %v13460_v39 = vsel %vm2830_vm5, 1.0, %v16841_v1  ;;  %v13469_v46 = vpop.f32.mrb[84].mxu0 }
0x1343   :  { %16915 = vst [vmem:[#allocation49_spill] sm:$0xff] %v13460_v39  ;;  %v13471_v47 = vpop.f32.mrb[85].mxu0 }
0x1344   :  { %10730 = vmatmul.mubr.msk.f32.gmra.mrb[122].mxu0 %vm126_vm1, %v13380_v17  ;;  %v13499_v37 = vpop.f32.mrb[86].mxu0 }
0x1345   :  { %3163 = vmatprep.mubr.f32.mxu0 %v16841_v1 }
0x1347   :  { %10745 = vmatmul.mubr.msk.bf16.gmra.mrb[80].mxu1 %vm213_vm2, %v13246_v43 }
0x1348   :  { %3331 = vmatprep.mubr.bf16.mxu1 %v16843_v11  ;;  %10731 = vmatmul.mubr.msk.f32.gmra.mrb[124].mxu0 %vm126_vm1, %v13388_v49 }
0x1349   :  { %3169 = vmatprep.mubr.f32.mxu0 %v16841_v1 }
0x134c   :  { %10732 = vmatmul.mubr.msk.f32.gmra.mrb[126].mxu0 %vm126_vm1, %v13396_v52 }
0x134d   :  { %3175 = vmatprep.mubr.f32.mxu0 %v16841_v1 }
0x1350   :  { %10733 = vmatmul.mubr.msk.f32.gmra.mrb[128].mxu0 %vm126_vm1, %v13404_v55 }
0x1351   :  { %3181 = vmatprep.mubr.f32.mxu0 %v16841_v1 }
0x1354   :  { %10734 = vmatmul.mubr.msk.f32.gmra.mrb[130].mxu0 %vm126_vm1, %v13412_v32 }
0x1355   :  { %3187 = vmatprep.mubr.f32.mxu0 %v16841_v1 }
0x1358   :  { %10735 = vmatmul.mubr.msk.f32.gmra.mrb[132].mxu0 %vm126_vm1, %v13420_v62 }
0x1359   :  { %3193 = vmatprep.mubr.f32.mxu0 %v16841_v1 }
0x135c   :  { %10736 = vmatmul.mubr.msk.f32.gmra.mrb[134].mxu0 %vm126_vm1, %v13427_v4 }
0x135d   :  { %3199 = vmatprep.mubr.f32.mxu0 %v16841_v1 }
0x1360   :  { %10737 = vmatmul.mubr.msk.f32.gmra.mrb[136].mxu0 %vm126_vm1, %v13434_v6 }
0x1361   :  { %3205 = vmatprep.mubr.f32.mxu0 %v16841_v1 }
0x1364   :  { %10738 = vmatmul.mubr.msk.f32.gmra.mrb[138].mxu0 %vm126_vm1, %v13450_v23 }
0x1365   :  { %3211 = vmatprep.mubr.f32.mxu0 %v16841_v1 }
0x1368   :  { %10739 = vmatmul.mubr.msk.f32.gmra.mrb[140].mxu0 %vm126_vm1, %v13460_v39 }
0x139f   :  { %v11692_v30 = vpop.f32.mrb[72].mxu1 }
0x13a0   :  { %v2711_v5 = vadd.f32 %v11692_v30, %v13237_v18  ;;  %v2702_v54 = vpop.f32.mrb[73].mxu1 }
0x13a1   :  { %v2703_v31 = vadd.f32 %v13237_v18, %v2702_v54  ;;  %v11693_v56 = vpop.f32.mrb[74].mxu1 }
0x13a2   :  { %12237 = vtanh.f32 %v2711_v5  ;;  %v2714_v58 = vadd.f32 %v11693_v56, %v13237_v18  ;;  %v2705_v60 = vpop.f32.mrb[75].mxu1 }
0x13a3   :  { %12239 = vtanh.f32 %v2703_v31  ;;  %v2706_v61 = vadd.f32 %v13237_v18, %v2705_v60 }
0x13a4   :  { %12241 = vtanh.f32 %v2714_v58 }
0x13a5   :  { %12243 = vtanh.f32 %v2706_v61 }
0x13ac   :  { %v12238_v0 = vpop.eup %12237 }
0x13ad   :  { %v12240_v9 = vpop.eup %12239 }
0x13ae   :  { %v12242_v13 = vpop.eup %12241 }
0x13af   :  { %v12244_v15 = vpop.eup %12243  ;;  %v2728_v19 = vpack.c.bf16 %v12242_v13, %v12238_v0 }
0x13b0   :  { %v2727_v27 = vpack.c.bf16 %v12244_v15, %v12240_v9  ;;  %v2736_v34 = vpop.permute.xlu0 %2735 }
0x13b1   :  { %2739 = vrot.lane.b32.xlu0 %v2728_v19, %s12726_s15  ;;  %v2734_v18 = vpop.permute.xlu1 %2733 }
0x13b2   :  { %2737 = vrot.lane.b32.xlu1 %v2727_v27, %s12726_s15  ;;  %10746 = vmatmul.mubr.msk.bf16.gmra.mrb[84].mxu1 %vm213_vm2, %v2727_v27 }
0x13b3   :  { %3341 = vmatprep.mubr.bf16.mxu1 %v16843_v11 }
0x13b5   :  { %2743 = vrot.lane.b32.xlu0 %v13246_v43, %s12728_s24 }
0x13b6   :  { %2741 = vrot.lane.b32.xlu1 %v13251_v26, %s12728_s24 }
0x13b9   :  { %2747 = vrot.lane.b32.xlu0 %v2728_v19, %s12728_s24 }
0x13ba   :  { %2745 = vrot.lane.b32.xlu1 %v2727_v27, %s12728_s24  ;;  %10747 = vmatmul.mubr.msk.bf16.gmra.mrb[88].mxu1 %vm213_vm2, %v2728_v19 }
0x13bb   :  { %3351 = vmatprep.mubr.bf16.mxu1 %v16843_v11 }
0x13bd   :  { %2751 = vrot.lane.b32.xlu0 %v13246_v43, %s12730_s16  ;;  %v13501_v43 = vpop.f32.mrb[87].mxu0 }
0x13be   :  { %2749 = vrot.lane.b32.xlu1 %v13251_v26, %s12730_s16  ;;  %v13503_v40 = vpop.f32.mrb[88].mxu0 }
0x13bf   :  { %v13505_v26 = vpop.f32.mrb[89].mxu0 }
0x13c0   :  { %v13507_v30 = vpop.f32.mrb[90].mxu0 }
0x13c1   :  { %2755 = vrot.lane.b32.xlu0 %v2728_v19, %s12730_s16  ;;  %v13509_v5 = vpop.f32.mrb[91].mxu0 }
0x13c2   :  { %2753 = vrot.lane.b32.xlu1 %v2727_v27, %s12730_s16  ;;  %10748 = vmatmul.mubr.msk.bf16.gmra.mrb[92].mxu1 %vm213_vm2, %v2734_v18  ;;  %v13511_v54 = vpop.f32.mrb[92].mxu0 }
0x13c3   :  { %3361 = vmatprep.mubr.bf16.mxu1 %v16843_v11  ;;  %v13513_v31 = vpop.f32.mrb[93].mxu0 }
0x13c4   :  { %v13518_v15 = vpop.f32.mrb[94].mxu0 }
0x13c5   :  { %v13521_v27 = vpop.f32.mrb[95].mxu0 }
0x13c6   :  { %v13523_v1 = vpop.f32.mrb[96].mxu0 }
0x13ca   :  { %10749 = vmatmul.mubr.msk.bf16.gmra.mrb[96].mxu1 %vm213_vm2, %v2736_v34 }
0x13cb   :  { %3371 = vmatprep.mubr.bf16.mxu1 %v16843_v11 }
0x1412   :  { %v3313_v56 = vpop.f32.mrb[76].mxu1 }
0x1413   :  { %v3314_v58 = vadd.f32 %v3313_v56, %v13437_v10  ;;  %v3315_v60 = vpop.f32.mrb[77].mxu1  ;;  %v13525_v10 = vpop.f32.mrb[97].mxu0 }
0x1414   :  { %v3316_v61 = vadd.f32 %v3315_v60, %v13442_v16  ;;  %v3317_v0 = vpop.f32.mrb[78].mxu1 }
0x1415   :  { %v3318_v9 = vadd.f32 %v3317_v0, %v13447_v22  ;;  %v3319_v13 = vpop.f32.mrb[79].mxu1  ;;  %v3472_v18 = vmax.f32 %v3314_v58, 0.0 }
0x1416   :  { %v3320_v19 = vadd.f32 %v3319_v13, %v13452_v28  ;;  %v3473_v11 = vmax.f32 %v3316_v61, 0.0 }
0x1417   :  { %v3474_v34 = vmax.f32 %v3318_v9, 0.0  ;;  %v13531_v9 = vpop.f32.mrb[98].mxu0 }
0x1418   :  { %v3475_v3 = vmax.f32 %v3320_v19, 0.0  ;;  %v13534_v13 = vpop.f32.mrb[99].mxu0 }
0x1419   :  { %v3554_v56 = vpack.c.bf16 %v3474_v34, %v3472_v18  ;;  %v13536_v19 = vpop.f32.mrb[100].mxu0 }
0x141a   :  { %v3555_v16 = vpack.c.bf16 %v3475_v3, %v3473_v11  ;;  %v3323_v60 = vpop.f32.mrb[80].mxu1 }
0x141b   :  { %v3324_v22 = vadd.f32 %v3323_v60, %v13465_v42  ;;  %v3325_v0 = vpop.f32.mrb[81].mxu1 }
0x141c   :  { %v3326_v2 = vadd.f32 %v3325_v0, %v13467_v29  ;;  %v3327_v39 = vpop.f32.mrb[82].mxu1  ;;  %10770 = vmatprep.mubr.msk.bf16.mxu0 %vm126_vm1, %v3555_v16  ;;  %v13538_v29 = vpop.f32.mrb[101].mxu0 }
0x141d   :  { %v3328_v28 = vadd.f32 %v3327_v39, %v13469_v46  ;;  %v3329_v58 = vpop.f32.mrb[83].mxu1  ;;  %3729 = vmatmul.mubr.bf16.vlgmr.msra.gmra.mrb[144].mxu0 %v3554_v56  ;;  %v3476_v3 = vmax.f32 %v3324_v22, 0.0  ;;  %v16916_v39 = vmov 0   ;;  %v13543_v46 = vpop.f32.mrb[102].mxu0 }
0x141e   :  { %v3330_v61 = vadd.f32 %v3329_v58, %v13471_v47  ;;  %v3477_v42 = vmax.f32 %v3326_v2, 0.0  ;;  %v12185_v47 = vld [vmem:[#allocation6 + $0xb4] sm:$0xff]   ;;  %v13545_v56 = vpop.f32.mrb[103].mxu0 }
0x141f   :  { %v3478_v11 = vmax.f32 %v3328_v28, 0.0  ;;  %v13547_v22 = vpop.f32.mrb[104].mxu0  ;;  %11694 = vmatprep.subr.bf16.mxu1 %v12185_v47 }
0x1420   :  { %v3479_v18 = vmax.f32 %v3330_v61, 0.0  ;;  %v13549_v2 = vpop.f32.mrb[105].mxu0  ;;  %11695 = vmatpush3.bf16.msra.mxu1 %v12185_v47 }
0x1421   :  { %v3556_v34 = vpack.c.bf16 %v3478_v11, %v3476_v3  ;;  %v13551_v28 = vpop.f32.mrb[106].mxu0  ;;  %11696 = vmatprep.subr.bf16.mxu1 %v12186_v36 }
0x1422   :  { %v3557_v16 = vpack.c.bf16 %v3479_v18, %v3477_v42  ;;  %v13554_v58 = vpop.f32.mrb[107].mxu0 }
0x1423   :  { %v2740_v0 = vpop.permute.xlu0 %2739  ;;  %v13557_v61 = vpop.f32.mrb[108].mxu0 }
0x1424   :  { %v2738_v60 = vpop.permute.xlu1 %2737  ;;  %10771 = vmatprep.mubr.msk.bf16.mxu0 %vm126_vm1, %v3557_v16  ;;  %v13559_v3 = vpop.f32.mrb[109].mxu0  ;;  %11697 = vmatpush3.bf16.msra.mxu1 %v12186_v36 }
0x1425   :  { %10750 = vmatmul.mubr.msk.bf16.gmra.mrb[100].mxu1 %vm213_vm2, %v2738_v60  ;;  %3737 = vmatmul.mubr.bf16.gmra.mrb[148].mxu0 %v3556_v34  ;;  %v13561_v11 = vpop.f32.mrb[110].mxu0 }
0x1426   :  { %3381 = vmatprep.mubr.bf16.mxu1 %v16916_v39  ;;  %v13563_v42 = vpop.f32.mrb[111].mxu0  ;;  %11698 = vmatprep.subr.bf16.mxu1 %v12187_v45 }
0x1427   :  { %v13565_v34 = vpop.f32.mrb[112].mxu0 }
0x1428   :  { %v2742_v18 = vpop.permute.xlu1 %2741  ;;  %v13568_v16 = vpop.f32.mrb[113].mxu0  ;;  %11699 = vmatpush3.bf16.msra.mxu1 %v12187_v45 }
0x1429   :  { %v13571_v60 = vpop.f32.mrb[114].mxu0 }
0x142a   :  { %v13573_v47 = vpop.f32.mrb[115].mxu0 }
0x142b   :  { %v13575_v23 = vpop.f32.mrb[116].mxu0 }
0x142c   :  { %v13578_v6 = vpop.f32.mrb[117].mxu0  ;;  %v2746_v62 = vpop.permute.xlu1 %2745 }
0x142d   :  { %10751 = vmatmul.mubr.msk.bf16.gmra.mrb[104].mxu1 %vm213_vm2, %v2740_v0  ;;  %v2744_v0 = vpop.permute.xlu0 %2743  ;;  %v13581_v4 = vpop.f32.mrb[118].mxu0 }
0x142e   :  { %3391 = vmatprep.mubr.bf16.mxu1 %v16916_v39 }
0x1430   :  { %v2750_v33 = vpop.permute.xlu1 %2749 }
0x1431   :  { %v2748_v49 = vpop.permute.xlu0 %2747 }
0x1434   :  { %v2754_v51 = vpop.permute.xlu1 %2753 }
0x1435   :  { %10752 = vmatmul.mubr.msk.bf16.gmra.mrb[108].mxu1 %vm213_vm2, %v2742_v18  ;;  %v13583_v18 = vpop.f32.mrb[119].mxu0  ;;  %v2752_v8 = vpop.permute.xlu0 %2751 }
0x1436   :  { %3401 = vmatprep.mubr.bf16.mxu1 %v16916_v39  ;;  %v13585_v32 = vpop.f32.mrb[120].mxu0 }
0x1437   :  { %v13588_v55 = vpop.f32.mrb[121].mxu0 }
0x1438   :  { %v13591_v52 = vpop.f32.mrb[122].mxu0 }
0x1439   :  { %v2756_v57 = vpop.permute.xlu0 %2755 }
0x143d   :  { %10753 = vmatmul.mubr.msk.bf16.gmra.mrb[112].mxu1 %vm213_vm2, %v2744_v0  ;;  %v13593_v0 = vpop.f32.mrb[123].mxu0 }
0x143e   :  { %3411 = vmatprep.mubr.bf16.mxu1 %v16916_v39  ;;  %v13595_v17 = vpop.f32.mrb[124].mxu0 }
0x143f   :  { %v13598_v41 = vpop.f32.mrb[125].mxu0 }
0x1440   :  { %v13601_v38 = vpop.f32.mrb[126].mxu0 }
0x1445   :  { %10754 = vmatmul.mubr.msk.bf16.gmra.mrb[116].mxu1 %vm213_vm2, %v2746_v62  ;;  %v13603_v62 = vpop.f32.mrb[127].mxu0 }
0x1446   :  { %3421 = vmatprep.mubr.bf16.mxu1 %v16916_v39  ;;  %v13605_v24 = vpop.f32.mrb[128].mxu0 }
0x1447   :  { %v13608_v20 = vpop.f32.mrb[129].mxu0 }
0x1448   :  { %v13611_v14 = vpop.f32.mrb[130].mxu0 }
0x144d   :  { %10755 = vmatmul.mubr.msk.bf16.gmra.mrb[120].mxu1 %vm213_vm2, %v2748_v49  ;;  %v13613_v49 = vpop.f32.mrb[131].mxu0 }
0x144e   :  { %3431 = vmatprep.mubr.bf16.mxu1 %v16916_v39  ;;  %v13615_v63 = vpop.f32.mrb[132].mxu0 }
0x144f   :  { %v13618_v59 = vpop.f32.mrb[133].mxu0 }
0x1450   :  { %16917 = vst [vmem:[#allocation50_spill] sm:$0xff] %v13618_v59  ;;  %v13621_v12 = vpop.f32.mrb[134].mxu0 }
0x1451   :  { %16918 = vst [vmem:[#allocation51_spill] sm:$0xff] %v13621_v12 }
0x1455   :  { %10756 = vmatmul.mubr.msk.bf16.gmra.mrb[124].mxu1 %vm213_vm2, %v2750_v33  ;;  %v13623_v33 = vpop.f32.mrb[135].mxu0 }
0x1456   :  { %3441 = vmatprep.mubr.bf16.mxu1 %v16916_v39  ;;  %16919 = vst [vmem:[#allocation52_spill] sm:$0xff] %v13623_v33  ;;  %v13625_v48 = vpop.f32.mrb[136].mxu0 }
0x1457   :  { %16920 = vst [vmem:[#allocation53_spill] sm:$0xff] %v13625_v48  ;;  %v13628_v44 = vpop.f32.mrb[137].mxu0 }
0x1458   :  { %16921 = vst [vmem:[#allocation54_spill] sm:$0xff] %v13628_v44  ;;  %v13631_v25 = vpop.f32.mrb[138].mxu0 }
0x1459   :  { %16922 = vst [vmem:[#allocation55_spill] sm:$0xff] %v13631_v25 }
0x145d   :  { %10757 = vmatmul.mubr.msk.bf16.gmra.mrb[128].mxu1 %vm213_vm2, %v2752_v8  ;;  %v13633_v8 = vpop.f32.mrb[139].mxu0 }
0x145e   :  { %3451 = vmatprep.mubr.bf16.mxu1 %v16916_v39  ;;  %16923 = vst [vmem:[#allocation56_spill] sm:$0xff] %v13633_v8  ;;  %v13635_v53 = vpop.f32.mrb[140].mxu0 }
0x145f   :  { %16924 = vst [vmem:[#allocation57_spill] sm:$0xff] %v13635_v53  ;;  %v13638_v50 = vpop.f32.mrb[141].mxu0 }
0x1460   :  { %16925 = vst [vmem:[#allocation58_spill] sm:$0xff] %v13638_v50 }
0x1465   :  { %10758 = vmatmul.mubr.msk.bf16.gmra.mrb[132].mxu1 %vm213_vm2, %v2754_v51  ;;  %v12188_v51 = vld [vmem:[#allocation6 + $0xcc] sm:$0xff]  }
0x1466   :  { %3461 = vmatprep.mubr.bf16.mxu1 %v16916_v39  ;;  %11700 = vmatprep.subr.bf16.mxu1 %v12188_v51 }
0x1467   :  { %11701 = vmatpush3.bf16.msra.mxu1 %v12188_v51 }
0x1468   :  { %12050 = vmatprep.subr.msk.bf16.mxu1 %vm433_vm4, %v12189_v35 }
0x146b   :  { %11703 = vmatpush3.bf16.msra.mxu1 %v3999_v21 }
0x146d   :  { %10759 = vmatmul.mubr.msk.bf16.gmra.mrb[136].mxu1 %vm213_vm2, %v2756_v57 }
0x1485   :  { %v3333_v39 = vpop.f32.mrb[84].mxu1 }
0x1486   :  { %v3334_v57 = vadd.f32 %v3333_v39, %v13499_v37  ;;  %v3335_v7 = vpop.f32.mrb[85].mxu1 }
0x1487   :  { %v3336_v50 = vadd.f32 %v3335_v7, %v13501_v43  ;;  %v3337_v53 = vpop.f32.mrb[86].mxu1 }
0x1488   :  { %v3338_v36 = vadd.f32 %v3337_v53, %v13503_v40  ;;  %v3339_v8 = vpop.f32.mrb[87].mxu1  ;;  %v3480_v25 = vmax.f32 %v3334_v57, 0.0 }
0x1489   :  { %v3340_v45 = vadd.f32 %v3339_v8, %v13505_v26  ;;  %v3481_v44 = vmax.f32 %v3336_v50, 0.0 }
0x148a   :  { %v3482_v51 = vmax.f32 %v3338_v36, 0.0 }
0x148b   :  { %v3483_v48 = vmax.f32 %v3340_v45, 0.0 }
0x148c   :  { %v3558_v33 = vpack.c.bf16 %v3482_v51, %v3480_v25 }
0x148d   :  { %v3559_v12 = vpack.c.bf16 %v3483_v48, %v3481_v44  ;;  %v3343_v35 = vpop.f32.mrb[88].mxu1 }
0x148e   :  { %v3344_v21 = vadd.f32 %v3343_v35, %v13507_v30  ;;  %v3345_v59 = vpop.f32.mrb[89].mxu1 }
0x148f   :  { %v3346_v37 = vadd.f32 %v3345_v59, %v13509_v5  ;;  %v3347_v39 = vpop.f32.mrb[90].mxu1  ;;  %10772 = vmatprep.mubr.msk.bf16.mxu0 %vm126_vm1, %v3559_v12 }
0x1490   :  { %v3348_v7 = vadd.f32 %v3347_v39, %v13511_v54  ;;  %v3349_v53 = vpop.f32.mrb[91].mxu1  ;;  %3745 = vmatmul.mubr.bf16.gmra.mrb[152].mxu0 %v3558_v33  ;;  %v3484_v40 = vmax.f32 %v3344_v21, 0.0 }
0x1491   :  { %v3350_v43 = vadd.f32 %v3349_v53, %v13513_v31  ;;  %v3485_v26 = vmax.f32 %v3346_v37, 0.0 }
0x1492   :  { %v3486_v50 = vmax.f32 %v3348_v7, 0.0 }
0x1493   :  { %v3487_v25 = vmax.f32 %v3350_v43, 0.0 }
0x1494   :  { %v3560_v44 = vpack.c.bf16 %v3486_v50, %v3484_v40 }
0x1495   :  { %v3561_v48 = vpack.c.bf16 %v3487_v25, %v3485_v26  ;;  %v3353_v8 = vpop.f32.mrb[92].mxu1 }
0x1496   :  { %v3354_v30 = vadd.f32 %v3353_v8, %v13518_v15  ;;  %v3355_v57 = vpop.f32.mrb[93].mxu1 }
0x1497   :  { %v3356_v59 = vadd.f32 %v3355_v57, %v13521_v27  ;;  %v3357_v5 = vpop.f32.mrb[94].mxu1  ;;  %10773 = vmatprep.mubr.msk.bf16.mxu0 %vm126_vm1, %v3561_v48 }
0x1498   :  { %v3358_v12 = vadd.f32 %v3357_v5, %v13523_v1  ;;  %v3359_v54 = vpop.f32.mrb[95].mxu1  ;;  %3753 = vmatmul.mubr.bf16.gmra.mrb[156].mxu0 %v3560_v44  ;;  %v3488_v33 = vmax.f32 %v3354_v30, 0.0 }
0x1499   :  { %v3360_v31 = vadd.f32 %v3359_v54, %v13525_v10  ;;  %v3489_v45 = vmax.f32 %v3356_v59, 0.0 }
0x149a   :  { %v3490_v36 = vmax.f32 %v3358_v12, 0.0 }
0x149b   :  { %v3491_v51 = vmax.f32 %v3360_v31, 0.0 }
0x149c   :  { %v3562_v35 = vpack.c.bf16 %v3490_v36, %v3488_v33 }
0x149d   :  { %v3563_v21 = vpack.c.bf16 %v3491_v51, %v3489_v45  ;;  %v3363_v37 = vpop.f32.mrb[96].mxu1 }
0x149e   :  { %v3364_v15 = vadd.f32 %v3363_v37, %v13531_v9  ;;  %v3365_v39 = vpop.f32.mrb[97].mxu1  ;;  %v4612_v9 = vld [vmem:[%s16831_s0 + $0x38] sm:$0xff] }
0x149f   :  { %v3366_v27 = vadd.f32 %v3365_v39, %v13534_v13  ;;  %v3367_v7 = vpop.f32.mrb[98].mxu1  ;;  %10774 = vmatprep.mubr.msk.bf16.mxu0 %vm126_vm1, %v3563_v21  ;;  %v4611_v13 = vld [vmem:[%s16831_s0 + $0x30] sm:$0xff]  ;;  %5097 = vrot.lane.b32.xlu0 %v4612_v9, %s12730_s16 }
0x14a0   :  { %v3368_v1 = vadd.f32 %v3367_v7, %v13536_v19  ;;  %v3369_v53 = vpop.f32.mrb[99].mxu1  ;;  %3761 = vmatmul.mubr.bf16.gmra.mrb[160].mxu0 %v3562_v35  ;;  %v3492_v43 = vmax.f32 %v3364_v15, 0.0  ;;  %5095 = vrot.lane.b32.xlu1 %v4611_v13, %s12730_s16  ;;  %v13670_v19 = vld [vmem:[#allocation4 + $0x5] ss:$0 sm:$0xff] }
0x14a1   :  { %v3370_v10 = vadd.f32 %v3369_v53, %v13538_v29  ;;  %v3493_v50 = vmax.f32 %v3366_v27, 0.0 }
0x14a2   :  { %v3494_v40 = vmax.f32 %v3368_v1, 0.0 }
0x14a3   :  { %v3495_v26 = vmax.f32 %v3370_v10, 0.0 }
0x14a4   :  { %v3564_v25 = vpack.c.bf16 %v3494_v40, %v3492_v43 }
0x14a5   :  { %v3565_v44 = vpack.c.bf16 %v3495_v26, %v3493_v50 }
0x14a7   :  { %10775 = vmatprep.mubr.msk.bf16.mxu0 %vm126_vm1, %v3565_v44 }
0x14a8   :  { %3769 = vmatmul.mubr.bf16.gmra.mrb[164].mxu0 %v3564_v25 }
0x14f0   :  { %v3730_v29 = vpop.f32.mrb[144].mxu0 }
0x14f1   :  { %v3731_v48 = vadd.f32 %v13670_v19, %v3730_v29  ;;  %v3732_v8 = vpop.f32.mrb[145].mxu0 }
0x14f2   :  { %v3733_v30 = vpop.f32.mrb[146].mxu0 }
0x14f3   :  { %v3734_v57 = vadd.f32 %v13670_v19, %v3733_v30  ;;  %v3735_v59 = vpop.f32.mrb[147].mxu0  ;;  %v3857_v5 = vmax.f32 %v3731_v48, 0.0 }
0x14f5   :  { %v3858_v12 = vmax.f32 %v3734_v57, 0.0 }
0x14f7   :  { %v3899_v54 = vpack.c.bf16 %v3858_v12, %v3857_v5 }
0x14f8   :  { %v3373_v31 = vpop.f32.mrb[100].mxu1  ;;  %v3738_v33 = vpop.f32.mrb[148].mxu0 }
0x14f9   :  { %v3374_v36 = vadd.f32 %v3373_v31, %v13543_v46  ;;  %v3739_v45 = vadd.f32 %v13670_v19, %v3738_v33  ;;  %v3375_v51 = vpop.f32.mrb[101].mxu1  ;;  %v3740_v35 = vpop.f32.mrb[149].mxu0  ;;  %11704 = vmatprep.mubr.msk.bf16.mxu1 %vm429_vm6, %v3899_v54 }
0x14fa   :  { %v3376_v21 = vadd.f32 %v3375_v51, %v13545_v56  ;;  %v3377_v37 = vpop.f32.mrb[102].mxu1  ;;  %v3741_v15 = vpop.f32.mrb[150].mxu0 }
0x14fb   :  { %v3378_v39 = vadd.f32 %v3377_v37, %v13547_v22  ;;  %v3742_v27 = vadd.f32 %v13670_v19, %v3741_v15  ;;  %v3379_v7 = vpop.f32.mrb[103].mxu1  ;;  %v3743_v1 = vpop.f32.mrb[151].mxu0  ;;  %v3496_v10 = vmax.f32 %v3374_v36, 0.0  ;;  %v3859_v46 = vmax.f32 %v3739_v45, 0.0 }
0x14fc   :  { %v3380_v53 = vadd.f32 %v3379_v7, %v13549_v2  ;;  %v3497_v50 = vmax.f32 %v3376_v21, 0.0 }
0x14fd   :  { %v3498_v43 = vmax.f32 %v3378_v39, 0.0  ;;  %v3860_v40 = vmax.f32 %v3742_v27, 0.0 }
0x14fe   :  { %v3499_v26 = vmax.f32 %v3380_v53, 0.0 }
0x14ff   :  { %v3900_v25 = vpack.c.bf16 %v3860_v40, %v3859_v46  ;;  %v3566_v44 = vpack.c.bf16 %v3498_v43, %v3496_v10 }
0x1500   :  { %v3567_v9 = vpack.c.bf16 %v3499_v26, %v3497_v50  ;;  %v3383_v56 = vpop.f32.mrb[104].mxu1 }
0x1501   :  { %v3384_v13 = vadd.f32 %v3383_v56, %v13551_v28  ;;  %v3385_v29 = vpop.f32.mrb[105].mxu1  ;;  %11705 = vmatmul.mubr.msk.bf16.vlgmr.msra.gmra.mrb[140].mxu1 %vm429_vm6, %v3900_v25 }
0x1502   :  { %v3386_v22 = vadd.f32 %v3385_v29, %v13554_v58  ;;  %v3387_v48 = vpop.f32.mrb[106].mxu1  ;;  %10776 = vmatprep.mubr.msk.bf16.mxu0 %vm126_vm1, %v3567_v9 }
0x1503   :  { %v3388_v2 = vadd.f32 %v3387_v48, %v13557_v61  ;;  %v3389_v8 = vpop.f32.mrb[107].mxu1  ;;  %3777 = vmatmul.mubr.bf16.gmra.mrb[168].mxu0 %v3566_v44  ;;  %v3500_v57 = vmax.f32 %v3384_v13, 0.0 }
0x1504   :  { %v3390_v30 = vadd.f32 %v3389_v8, %v13559_v3  ;;  %v3501_v5 = vmax.f32 %v3386_v22, 0.0 }
0x1505   :  { %v3502_v59 = vmax.f32 %v3388_v2, 0.0 }
0x1506   :  { %v3503_v12 = vmax.f32 %v3390_v30, 0.0 }
0x1507   :  { %v3568_v54 = vpack.c.bf16 %v3502_v59, %v3500_v57 }
0x1508   :  { %v3569_v28 = vpack.c.bf16 %v3503_v12, %v3501_v5  ;;  %v3393_v31 = vpop.f32.mrb[108].mxu1 }
0x1509   :  { %v3394_v33 = vadd.f32 %v3393_v31, %v13561_v11  ;;  %v3395_v36 = vpop.f32.mrb[109].mxu1 }
0x150a   :  { %v3396_v58 = vadd.f32 %v3395_v36, %v13563_v42  ;;  %v3397_v45 = vpop.f32.mrb[110].mxu1  ;;  %10777 = vmatprep.mubr.msk.bf16.mxu0 %vm126_vm1, %v3569_v28 }
0x150b   :  { %v3398_v61 = vadd.f32 %v3397_v45, %v13565_v34  ;;  %v3399_v51 = vpop.f32.mrb[111].mxu1  ;;  %3785 = vmatmul.mubr.bf16.gmra.mrb[172].mxu0 %v3568_v54  ;;  %v3504_v35 = vmax.f32 %v3394_v33, 0.0 }
0x150c   :  { %v3400_v3 = vadd.f32 %v3399_v51, %v13568_v16  ;;  %v3505_v37 = vmax.f32 %v3396_v58, 0.0 }
0x150d   :  { %v3506_v21 = vmax.f32 %v3398_v61, 0.0 }
0x150e   :  { %v3507_v15 = vmax.f32 %v3400_v3, 0.0 }
0x150f   :  { %v3570_v39 = vpack.c.bf16 %v3506_v21, %v3504_v35 }
0x1510   :  { %v3571_v27 = vpack.c.bf16 %v3507_v15, %v3505_v37  ;;  %v3403_v7 = vpop.f32.mrb[112].mxu1 }
0x1511   :  { %v3404_v11 = vadd.f32 %v3403_v7, %v13571_v60  ;;  %v3405_v1 = vpop.f32.mrb[113].mxu1 }
0x1512   :  { %v3406_v42 = vadd.f32 %v3405_v1, %v13573_v47  ;;  %v3407_v53 = vpop.f32.mrb[114].mxu1  ;;  %10778 = vmatprep.mubr.msk.bf16.mxu0 %vm126_vm1, %v3571_v27 }
0x1513   :  { %v3408_v34 = vadd.f32 %v3407_v53, %v13575_v23  ;;  %v3409_v10 = vpop.f32.mrb[115].mxu1  ;;  %3793 = vmatmul.mubr.bf16.gmra.mrb[176].mxu0 %v3570_v39  ;;  %v3508_v46 = vmax.f32 %v3404_v11, 0.0 }
0x1514   :  { %v3410_v16 = vadd.f32 %v3409_v10, %v13578_v6  ;;  %v3509_v40 = vmax.f32 %v3406_v42, 0.0 }
0x1515   :  { %v3510_v43 = vmax.f32 %v3408_v34, 0.0 }
0x1516   :  { %v3511_v50 = vmax.f32 %v3410_v16, 0.0 }
0x1517   :  { %v3572_v26 = vpack.c.bf16 %v3510_v43, %v3508_v46 }
0x1518   :  { %v3573_v25 = vpack.c.bf16 %v3511_v50, %v3509_v40  ;;  %v3413_v44 = vpop.f32.mrb[116].mxu1 }
0x1519   :  { %v3414_v60 = vadd.f32 %v3413_v44, %v13581_v4  ;;  %v3415_v9 = vpop.f32.mrb[117].mxu1 }
0x151a   :  { %v3416_v47 = vadd.f32 %v3415_v9, %v13583_v18  ;;  %v3417_v56 = vpop.f32.mrb[118].mxu1  ;;  %10779 = vmatprep.mubr.msk.bf16.mxu0 %vm126_vm1, %v3573_v25 }
0x151b   :  { %v3418_v23 = vadd.f32 %v3417_v56, %v13585_v32  ;;  %v3419_v13 = vpop.f32.mrb[119].mxu1  ;;  %3801 = vmatmul.mubr.bf16.gmra.mrb[180].mxu0 %v3572_v26  ;;  %v3512_v29 = vmax.f32 %v3414_v60, 0.0  ;;  %v16930_v56 = vld [vmem:[#allocation54_spill] sm:$0xff] }
0x151c   :  { %v3420_v6 = vadd.f32 %v3419_v13, %v13588_v55  ;;  %v3513_v48 = vmax.f32 %v3416_v47, 0.0 }
0x151d   :  { %v3514_v22 = vmax.f32 %v3418_v23, 0.0 }
0x151e   :  { %v3515_v2 = vmax.f32 %v3420_v6, 0.0 }
0x151f   :  { %v3574_v8 = vpack.c.bf16 %v3514_v22, %v3512_v29 }
0x1520   :  { %v3575_v30 = vpack.c.bf16 %v3515_v2, %v3513_v48  ;;  %v3423_v57 = vpop.f32.mrb[120].mxu1 }
0x1521   :  { %v3424_v4 = vadd.f32 %v3423_v57, %v13591_v52  ;;  %v3425_v59 = vpop.f32.mrb[121].mxu1 }
0x1522   :  { %v3426_v18 = vadd.f32 %v3425_v59, %v13593_v0  ;;  %v3427_v5 = vpop.f32.mrb[122].mxu1  ;;  %10780 = vmatprep.mubr.msk.bf16.mxu0 %vm126_vm1, %v3575_v30  ;;  %v16931_v30 = vld [vmem:[#allocation55_spill] sm:$0xff]  ;;  %v16932_v59 = vld [vmem:[#allocation56_spill] sm:$0xff] }
0x1523   :  { %v3428_v32 = vadd.f32 %v3427_v5, %v13595_v17  ;;  %v3429_v12 = vpop.f32.mrb[123].mxu1  ;;  %3809 = vmatmul.mubr.bf16.gmra.mrb[184].mxu0 %v3574_v8  ;;  %v3516_v54 = vmax.f32 %v3424_v4, 0.0 }
0x1524   :  { %v3430_v55 = vadd.f32 %v3429_v12, %v13598_v41  ;;  %v3517_v31 = vmax.f32 %v3426_v18, 0.0 }
0x1525   :  { %v3518_v28 = vmax.f32 %v3428_v32, 0.0  ;;  %v16933_v32 = vld [vmem:[#allocation57_spill] sm:$0xff] }
0x1526   :  { %v3519_v33 = vmax.f32 %v3430_v55, 0.0 }
0x1527   :  { %v3576_v36 = vpack.c.bf16 %v3518_v28, %v3516_v54  ;;  %v16934_v54 = vld [vmem:[#allocation58_spill] sm:$0xff] }
0x1528   :  { %v3577_v58 = vpack.c.bf16 %v3519_v33, %v3517_v31  ;;  %v3433_v45 = vpop.f32.mrb[124].mxu1 }
0x1529   :  { %v3434_v52 = vadd.f32 %v3433_v45, %v13601_v38  ;;  %v3435_v61 = vpop.f32.mrb[125].mxu1 }
0x152a   :  { %v3436_v0 = vadd.f32 %v3435_v61, %v13603_v62  ;;  %v3437_v51 = vpop.f32.mrb[126].mxu1  ;;  %10781 = vmatprep.mubr.msk.bf16.mxu0 %vm126_vm1, %v3577_v58  ;;  %v16935_v61 = vmov 0.0  }
0x152b   :  { %v3438_v17 = vadd.f32 %v3437_v51, %v13605_v24  ;;  %v3439_v3 = vpop.f32.mrb[127].mxu1  ;;  %3817 = vmatmul.mubr.bf16.gmra.mrb[188].mxu0 %v3576_v36  ;;  %v3520_v35 = vmax.f32 %v3434_v52, 0.0  ;;  %v5096_v51 = vpop.permute.xlu1 %5095 }
0x152c   :  { %v3440_v41 = vadd.f32 %v3439_v3, %v13608_v20  ;;  %v3521_v37 = vmax.f32 %v3436_v0, 0.0  ;;  %v16926_v20 = vld [vmem:[#allocation50_spill] sm:$0xff]  ;;  %v5098_v0 = vpop.permute.xlu0 %5097 }
0x152d   :  { %v3522_v21 = vmax.f32 %v3438_v17, 0.0  ;;  %v5100_v17 = vsel %vm5099_vm9, %v5096_v51, %v5098_v0  ;;  %5391 = vmatprep.subr.mxu0 %v5098_v0  ;;  %v16936_v3 = vld [vmem:[#allocation18_spill] sm:$0xff]  ;;  %v16956_v51 = vld [vmem:[#allocation37_spill] sm:$0xff] }
0x152e   :  { %v3523_v15 = vmax.f32 %v3440_v41, 0.0  ;;  %5392 = vmatpush1.msra.mxu0 %v5100_v17  ;;  %v16937_v41 = vmov 0   ;;  %v16957_v17 = vld [vmem:[#allocation38_spill] sm:$0xff] }
0x152f   :  { %v3578_v39 = vpack.c.bf16 %v3522_v21, %v3520_v35  ;;  %7758 = vmatprep.subr.bf16.mxu0 %v16937_v41 }
0x1530   :  { %v3579_v27 = vpack.c.bf16 %v3523_v15, %v3521_v37  ;;  %v3443_v7 = vpop.f32.mrb[128].mxu1  ;;  %v16938_v15 = vld [vmem:[#allocation19_spill] sm:$0xff] }
0x1531   :  { %v3444_v38 = vadd.f32 %v3443_v7, %v13611_v14  ;;  %v3445_v11 = vpop.f32.mrb[129].mxu1  ;;  %v16927_v14 = vld [vmem:[#allocation51_spill] sm:$0xff] }
0x1532   :  { %v3446_v62 = vadd.f32 %v3445_v11, %v13613_v49  ;;  %v3447_v1 = vpop.f32.mrb[130].mxu1  ;;  %10782 = vmatprep.mubr.msk.bf16.mxu0 %vm126_vm1, %v3579_v27  ;;  %v16928_v49 = vld [vmem:[#allocation52_spill] sm:$0xff] }
0x1533   :  { %v3448_v24 = vadd.f32 %v3447_v1, %v13615_v63  ;;  %v3449_v42 = vpop.f32.mrb[131].mxu1  ;;  %3825 = vmatmul.mubr.bf16.gmra.mrb[192].mxu0 %v3578_v39  ;;  %v3524_v34 = vmax.f32 %v3444_v38, 0.0  ;;  %v16929_v63 = vld [vmem:[#allocation53_spill] sm:$0xff] }
0x1534   :  { %v3450_v53 = vadd.f32 %v3449_v42, %v16926_v20  ;;  %v3525_v16 = vmax.f32 %v3446_v62, 0.0  ;;  %v16939_v62 = vld [vmem:[#allocation20_spill] sm:$0xff] }
0x1535   :  { %v3526_v10 = vmax.f32 %v3448_v24, 0.0 }
0x1536   :  { %v3527_v46 = vmax.f32 %v3450_v53, 0.0  ;;  %v16940_v53 = vld [vmem:[#allocation21_spill] sm:$0xff] }
0x1537   :  { %v3580_v43 = vpack.c.bf16 %v3526_v10, %v3524_v34 }
0x1538   :  { %v3581_v40 = vpack.c.bf16 %v3527_v46, %v3525_v16  ;;  %v3453_v50 = vpop.f32.mrb[132].mxu1 }
0x1539   :  { %v3454_v26 = vadd.f32 %v3453_v50, %v16927_v14  ;;  %v3455_v25 = vpop.f32.mrb[133].mxu1 }
0x153a   :  { %v3456_v44 = vadd.f32 %v3455_v25, %v16928_v49  ;;  %v3457_v60 = vpop.f32.mrb[134].mxu1  ;;  %10783 = vmatprep.mubr.msk.bf16.mxu0 %vm126_vm1, %v3581_v40  ;;  %v16941_v40 = vld [vmem:[#allocation22_spill] sm:$0xff]  ;;  %v16942_v49 = vld [vmem:[#allocation23_spill] sm:$0xff] }
0x153b   :  { %v3458_v9 = vadd.f32 %v3457_v60, %v16929_v63  ;;  %v3459_v47 = vpop.f32.mrb[135].mxu1  ;;  %3833 = vmatmul.mubr.bf16.gmra.mrb[196].mxu0 %v3580_v43  ;;  %v3528_v13 = vmax.f32 %v3454_v26, 0.0 }
0x153c   :  { %v3460_v23 = vadd.f32 %v3459_v47, %v16930_v56  ;;  %v3529_v29 = vmax.f32 %v3456_v44, 0.0  ;;  %v16943_v56 = vld [vmem:[#allocation24_spill] sm:$0xff] }
0x153d   :  { %v3530_v6 = vmax.f32 %v3458_v9, 0.0 }
0x153e   :  { %v3531_v22 = vmax.f32 %v3460_v23, 0.0 }
0x153f   :  { %v3582_v48 = vpack.c.bf16 %v3530_v6, %v3528_v13 }
0x1540   :  { %v3583_v2 = vpack.c.bf16 %v3531_v22, %v3529_v29  ;;  %v3463_v8 = vpop.f32.mrb[136].mxu1  ;;  %v16944_v22 = vld [vmem:[#allocation25_spill] sm:$0xff] }
0x1541   :  { %v3464_v57 = vadd.f32 %v3463_v8, %v16931_v30  ;;  %v3465_v4 = vpop.f32.mrb[137].mxu1 }
0x1542   :  { %v3466_v18 = vadd.f32 %v3465_v4, %v16932_v59  ;;  %v3467_v5 = vpop.f32.mrb[138].mxu1  ;;  %10784 = vmatprep.mubr.msk.bf16.mxu0 %vm126_vm1, %v3583_v2  ;;  %v16945_v4 = vld [vmem:[#allocation26_spill] sm:$0xff] }
0x1543   :  { %v3468_v12 = vadd.f32 %v3467_v5, %v16933_v32  ;;  %v3469_v55 = vpop.f32.mrb[139].mxu1  ;;  %3841 = vmatmul.mubr.bf16.gmra.mrb[200].mxu0 %v3582_v48  ;;  %v3532_v31 = vmax.f32 %v3464_v57, 0.0  ;;  %v16947_v5 = vld [vmem:[#allocation28_spill] sm:$0xff]  ;;  %v16948_v32 = vld [vmem:[#allocation29_spill] sm:$0xff] }
0x1544   :  { %v3470_v28 = vadd.f32 %v3469_v55, %v16934_v54  ;;  %v3533_v36 = vmax.f32 %v3466_v18, 0.0  ;;  %v16946_v18 = vld [vmem:[#allocation27_spill] sm:$0xff]  ;;  %v16951_v54 = vld [vmem:[#allocation32_spill] sm:$0xff] }
0x1545   :  { %v3534_v33 = vmax.f32 %v3468_v12, 0.0  ;;  %v16949_v12 = vld [vmem:[#allocation30_spill] sm:$0xff]  ;;  %v16950_v55 = vld [vmem:[#allocation31_spill] sm:$0xff] }
0x1546   :  { %v3535_v58 = vmax.f32 %v3470_v28, 0.0  ;;  %v16952_v28 = vld [vmem:[#allocation33_spill] sm:$0xff] }
0x1547   :  { %v3584_v45 = vpack.c.bf16 %v3534_v33, %v3532_v31  ;;  %v16953_v31 = vld [vmem:[#allocation34_spill] sm:$0xff] }
0x1548   :  { %v3585_v52 = vpack.c.bf16 %v3535_v58, %v3533_v36  ;;  %v12190_v33 = vld [vmem:[#allocation9 + $0x64] sm:$0xff]   ;;  %v16954_v36 = vld [vmem:[#allocation35_spill] sm:$0xff] }
0x1549   :  { %11736 = vmatprep.subr.bf16.mxu1 %v12190_v33  ;;  %v12191_v58 = vld [vmem:[#allocation9 + $0x6c] sm:$0xff]  }
0x154a   :  { %10785 = vmatprep.mubr.msk.bf16.mxu0 %vm126_vm1, %v3585_v52  ;;  %11737 = vmatpush3.bf16.msra.mxu1 %v12190_v33  ;;  %v16955_v52 = vld [vmem:[#allocation36_spill] sm:$0xff]  ;;  %v16970_v33 = vld [vmem:[#allocation17_spill] sm:$0xff] }
0x154b   :  { %3849 = vmatmul.mubr.bf16.gmra.mrb[204].mxu0 %v3584_v45  ;;  %11738 = vmatprep.subr.bf16.mxu1 %v12191_v58  ;;  %v12192_v45 = vld [vmem:[#allocation9 + $0x74] ss:$0 sps:$4 sm:$0x11]  }
0x154c   :  { %5455 = vmatprep.mubr.f32.mxu0 %v16935_v61  ;;  %v4288_v0 = vsel %vm510_vm7, %v12192_v45, 0 }
0x154e   :  { %11739 = vmatpush3.bf16.msra.mxu1 %v12191_v58 }
0x154f   :  { %12051 = vmatprep.subr.msk.bf16.mxu1 %vm510_vm7, %v12192_v45 }
0x1552   :  { %11741 = vmatpush3.bf16.msra.mxu1 %v4288_v0 }
0x1553   :  { %10924 = vmatmul.mubr.msk.f32.vlgmr.msra.gmra.mrb[142].mxu0 %vm126_vm1, %v16936_v3  ;;  %v16958_v3 = vld [vmem:[#allocation39_spill] sm:$0xff] }
0x1554   :  { %5461 = vmatprep.mubr.f32.mxu0 %v16935_v61 }
0x1557   :  { %10925 = vmatmul.mubr.msk.f32.gmra.mrb[208].mxu0 %vm126_vm1, %v16938_v15  ;;  %v16962_v15 = vld [vmem:[#allocation43_spill] sm:$0xff] }
0x1558   :  { %5467 = vmatprep.mubr.f32.mxu0 %v16935_v61 }
0x155b   :  { %10926 = vmatmul.mubr.msk.f32.gmra.mrb[210].mxu0 %vm126_vm1, %v16939_v62  ;;  %v16966_v62 = vld [vmem:[#allocation47_spill] sm:$0xff] }
0x155c   :  { %5473 = vmatprep.mubr.f32.mxu0 %v16935_v61 }
0x155f   :  { %10927 = vmatmul.mubr.msk.f32.gmra.mrb[212].mxu0 %vm126_vm1, %v16940_v53 }
0x1560   :  { %5479 = vmatprep.mubr.f32.mxu0 %v16935_v61 }
0x1563   :  { %v3746_v35 = vpop.f32.mrb[152].mxu0  ;;  %10928 = vmatmul.mubr.msk.f32.gmra.mrb[214].mxu0 %vm126_vm1, %v16941_v40 }
0x1564   :  { %v3747_v21 = vadd.f32 %v13670_v19, %v3746_v35  ;;  %v3748_v37 = vpop.f32.mrb[153].mxu0  ;;  %5485 = vmatprep.mubr.f32.mxu0 %v16935_v61  ;;  %v16959_v35 = vld [vmem:[#allocation40_spill] sm:$0xff] }
0x1565   :  { %v3749_v39 = vpop.f32.mrb[154].mxu0  ;;  %v16961_v37 = vld [vmem:[#allocation42_spill] sm:$0xff] }
0x1566   :  { %v3750_v27 = vadd.f32 %v13670_v19, %v3749_v39  ;;  %v3751_v7 = vpop.f32.mrb[155].mxu0  ;;  %v3861_v38 = vmax.f32 %v3747_v21, 0.0  ;;  %v16960_v21 = vld [vmem:[#allocation41_spill] sm:$0xff]  ;;  %v16963_v39 = vld [vmem:[#allocation44_spill] sm:$0xff] }
0x1567   :  { %10929 = vmatmul.mubr.msk.f32.gmra.mrb[216].mxu0 %vm126_vm1, %v16942_v49  ;;  %v16965_v7 = vld [vmem:[#allocation46_spill] sm:$0xff] }
0x1568   :  { %v3862_v11 = vmax.f32 %v3750_v27, 0.0  ;;  %5491 = vmatprep.mubr.f32.mxu0 %v16935_v61  ;;  %v16964_v27 = vld [vmem:[#allocation45_spill] sm:$0xff] }
0x156a   :  { %v3901_v1 = vpack.c.bf16 %v3862_v11, %v3861_v38  ;;  %v13831_v38 = vld [vmem:[#allocation7 + $0x5] ss:$0 sm:$0xff] }
0x156b   :  { %v3754_v24 = vpop.f32.mrb[156].mxu0  ;;  %10930 = vmatmul.mubr.msk.f32.gmra.mrb[218].mxu0 %vm126_vm1, %v16943_v56 }
0x156c   :  { %v3755_v42 = vadd.f32 %v13670_v19, %v3754_v24  ;;  %v3756_v20 = vpop.f32.mrb[157].mxu0  ;;  %11708 = vmatprep.mubr.msk.bf16.mxu1 %vm429_vm6, %v3901_v1  ;;  %5497 = vmatprep.mubr.f32.mxu0 %v16935_v61 }
0x156d   :  { %v3757_v34 = vpop.f32.mrb[158].mxu0 }
0x156e   :  { %v3758_v10 = vadd.f32 %v13670_v19, %v3757_v34  ;;  %v3759_v16 = vpop.f32.mrb[159].mxu0  ;;  %v3863_v46 = vmax.f32 %v3755_v42, 0.0 }
0x156f   :  { %10931 = vmatmul.mubr.msk.f32.gmra.mrb[220].mxu0 %vm126_vm1, %v16944_v22 }
0x1570   :  { %v3864_v43 = vmax.f32 %v3758_v10, 0.0  ;;  %5503 = vmatprep.mubr.f32.mxu0 %v16935_v61 }
0x1572   :  { %v3902_v50 = vpack.c.bf16 %v3864_v43, %v3863_v46 }
0x1573   :  { %v3762_v14 = vpop.f32.mrb[160].mxu0  ;;  %10932 = vmatmul.mubr.msk.f32.gmra.mrb[222].mxu0 %vm126_vm1, %v16945_v4 }
0x1574   :  { %v3763_v26 = vadd.f32 %v13670_v19, %v3762_v14  ;;  %v3764_v25 = vpop.f32.mrb[161].mxu0  ;;  %11709 = vmatmul.mubr.msk.bf16.gmra.mrb[144].mxu1 %vm429_vm6, %v3902_v50  ;;  %5509 = vmatprep.mubr.f32.mxu0 %v16935_v61  ;;  %v16967_v50 = vld [vmem:[#allocation48_spill] sm:$0xff] }
0x1575   :  { %v3765_v44 = vpop.f32.mrb[162].mxu0 }
0x1576   :  { %v3766_v60 = vadd.f32 %v13670_v19, %v3765_v44  ;;  %v3767_v63 = vpop.f32.mrb[163].mxu0  ;;  %v3865_v9 = vmax.f32 %v3763_v26, 0.0 }
0x1577   :  { %10933 = vmatmul.mubr.msk.f32.gmra.mrb[224].mxu0 %vm126_vm1, %v16946_v18 }
0x1578   :  { %v3866_v47 = vmax.f32 %v3766_v60, 0.0  ;;  %5515 = vmatprep.mubr.f32.mxu0 %v16935_v61 }
0x157a   :  { %v3903_v23 = vpack.c.bf16 %v3866_v47, %v3865_v9 }
0x157b   :  { %v3770_v13 = vpop.f32.mrb[164].mxu0  ;;  %10934 = vmatmul.mubr.msk.f32.gmra.mrb[226].mxu0 %vm126_vm1, %v16947_v5  ;;  %v12194_v5 = vld [vmem:[#allocation2 + $0x1a0] sm:$0xff]  }
0x157c   :  { %v3771_v6 = vadd.f32 %v13670_v19, %v3770_v13  ;;  %v3772_v29 = vpop.f32.mrb[165].mxu0  ;;  %11712 = vmatprep.mubr.msk.bf16.mxu1 %vm429_vm6, %v3903_v23  ;;  %5521 = vmatprep.mubr.f32.mxu0 %v16935_v61  ;;  %v16968_v23 = vld [vmem:[#allocation49_spill] sm:$0xff] }
0x157d   :  { %v3773_v48 = vpop.f32.mrb[166].mxu0 }
0x157e   :  { %v3774_v2 = vadd.f32 %v13670_v19, %v3773_v48  ;;  %v3775_v8 = vpop.f32.mrb[167].mxu0  ;;  %v3867_v30 = vmax.f32 %v3771_v6, 0.0  ;;  %v12193_v48 = vld [vmem:[#allocation2 + $0x198] sm:$0xff]  }
0x157f   :  { %10935 = vmatmul.mubr.msk.f32.gmra.mrb[228].mxu0 %vm126_vm1, %v16948_v32 }
0x1580   :  { %v3868_v57 = vmax.f32 %v3774_v2, 0.0  ;;  %5527 = vmatprep.mubr.f32.mxu0 %v16935_v61  ;;  %7759 = vmatpush1.bf16.msra.mxu0 %v12193_v48 }
0x1581   :  { %7760 = vmatprep.subr.bf16.mxu0 %v16937_v41 }
0x1582   :  { %v3904_v59 = vpack.c.bf16 %v3868_v57, %v3867_v30  ;;  %v16969_v57 = vld [vmem:[#allocation16_spill] sm:$0xff] }
0x1583   :  { %10936 = vmatmul.mubr.msk.f32.gmra.mrb[230].mxu0 %vm126_vm1, %v16949_v12  ;;  %v4613_v4 = vadd.s32 256, %v16969_v57  ;;  %v4615_v18 = vadd.s32 272, %v16969_v57  ;;  %v4616_v58 = vadd.s32 280, %v16969_v57 }
0x1584   :  { %11713 = vmatmul.mubr.msk.bf16.gmra.mrb[148].mxu1 %vm429_vm6, %v3904_v59  ;;  %5533 = vmatprep.mubr.f32.mxu0 %v16935_v61  ;;  %v4614_v59 = vadd.s32 264, %v16969_v57 }
0x1585   :  { %7761 = vmatpush1.bf16.msra.mxu0 %v12194_v5 }
0x1586   :  { %7762 = vmatprep.subr.bf16.mxu0 %v16937_v41 }
0x1587   :  { %10937 = vmatmul.mubr.msk.f32.gmra.mrb[232].mxu0 %vm126_vm1, %v16950_v55  ;;  %v4709_v55 = vand.u32 1, %v4613_v4 }
0x1588   :  { %5539 = vmatprep.mubr.f32.mxu0 %v16935_v61 }
0x1589   :  { %vm4805_vm10 = vcmp.eq.s32.totalorder %v4709_v55, %v16970_v33 }
0x158a   :  { %v10828_v0 = vsel %vm4805_vm10, 1.0, %v16935_v61 }
0x158b   :  { %10938 = vmatmul.mubr.msk.f32.gmra.mrb[234].mxu0 %vm126_vm1, %v16951_v54  ;;  %v4710_v54 = vand.u32 1, %v4614_v59  ;;  %v4622_v59 = vadd.s32 328, %v16969_v57 }
0x158c   :  { %5545 = vmatprep.mubr.f32.mxu0 %v16935_v61 }
0x158d   :  { %vm4806_vm11 = vcmp.eq.s32.totalorder %v4710_v54, %v16970_v33 }
0x158f   :  { %10939 = vmatmul.mubr.msk.f32.gmra.mrb[236].mxu0 %vm126_vm1, %v16952_v28 }
0x1590   :  { %5551 = vmatprep.mubr.f32.mxu0 %v16935_v61 }
0x1593   :  { %10940 = vmatmul.mubr.msk.f32.gmra.mrb[238].mxu0 %vm126_vm1, %v16953_v31 }
0x1594   :  { %5557 = vmatprep.mubr.f32.mxu0 %v16935_v61 }
0x1597   :  { %10941 = vmatmul.mubr.msk.f32.gmra.mrb[240].mxu0 %vm126_vm1, %v16954_v36  ;;  %v4711_v36 = vand.u32 1, %v4615_v18 }
0x1598   :  { %5563 = vmatprep.mubr.f32.mxu0 %v16935_v61 }
0x1599   :  { %vm4807_vm12 = vcmp.eq.s32.totalorder %v4711_v36, %v16970_v33 }
0x159b   :  { %10942 = vmatmul.mubr.msk.f32.gmra.mrb[242].mxu0 %vm126_vm1, %v16955_v52 }
0x159c   :  { %5569 = vmatprep.mubr.f32.mxu0 %v16935_v61 }
0x159f   :  { %10943 = vmatmul.mubr.msk.f32.gmra.mrb[244].mxu0 %vm126_vm1, %v16956_v51 }
0x15a0   :  { %5575 = vmatprep.mubr.f32.mxu0 %v16935_v61 }
0x15a3   :  { %10944 = vmatmul.mubr.msk.f32.gmra.mrb[246].mxu0 %vm126_vm1, %v16957_v17 }
0x15a4   :  { %5581 = vmatprep.mubr.f32.mxu0 %v16935_v61 }
0x15a7   :  { %10945 = vmatmul.mubr.msk.f32.gmra.mrb[248].mxu0 %vm126_vm1, %v16958_v3 }
0x15a8   :  { %5587 = vmatprep.mubr.f32.mxu0 %v16935_v61 }
0x15ab   :  { %10946 = vmatmul.mubr.msk.f32.gmra.mrb[250].mxu0 %vm126_vm1, %v16959_v35  ;;  %v10829_v35 = vsel %vm4806_vm11, 1.0, %v16935_v61 }
0x15ac   :  { %5593 = vmatprep.mubr.f32.mxu0 %v16935_v61 }
0x15af   :  { %10947 = vmatmul.mubr.msk.f32.gmra.mrb[252].mxu0 %vm126_vm1, %v16960_v21  ;;  %v4712_v21 = vand.u32 1, %v4616_v58 }
0x15b0   :  { %5599 = vmatprep.mubr.f32.mxu0 %v16935_v61 }
0x15b1   :  { %vm4808_vm13 = vcmp.eq.s32.totalorder %v4712_v21, %v16970_v33 }
0x15b3   :  { %10948 = vmatmul.mubr.msk.f32.gmra.mrb[254].mxu0 %vm126_vm1, %v16961_v37  ;;  %v4617_v37 = vadd.s32 288, %v16969_v57 }
0x15b4   :  { %5605 = vmatprep.mubr.f32.mxu0 %v16935_v61 }
0x15b7   :  { %10949 = vmatmul.mubr.msk.f32.gmra.mrb[0].mxu0 %vm126_vm1, %v16962_v15 }
0x15b8   :  { %5611 = vmatprep.mubr.f32.mxu0 %v16935_v61 }
0x15bb   :  { %10950 = vmatmul.mubr.msk.f32.gmra.mrb[4].mxu0 %vm126_vm1, %v16963_v39 }
0x15bc   :  { %5617 = vmatprep.mubr.f32.mxu0 %v16935_v61 }
0x15bf   :  { %10951 = vmatmul.mubr.msk.f32.gmra.mrb[6].mxu0 %vm126_vm1, %v16964_v27 }
0x15c0   :  { %5623 = vmatprep.mubr.f32.mxu0 %v16935_v61 }
0x15c3   :  { %10952 = vmatmul.mubr.msk.f32.gmra.mrb[8].mxu0 %vm126_vm1, %v16965_v7  ;;  %v10830_v7 = vsel %vm4807_vm12, 1.0, %v16935_v61 }
0x15c4   :  { %5629 = vmatprep.mubr.f32.mxu0 %v16935_v61 }
0x15c7   :  { %10953 = vmatmul.mubr.msk.f32.gmra.mrb[10].mxu0 %vm126_vm1, %v16966_v62  ;;  %v4713_v62 = vand.u32 1, %v4617_v37 }
0x15c8   :  { %5635 = vmatprep.mubr.f32.mxu0 %v16935_v61 }
0x15c9   :  { %vm4809_vm14 = vcmp.eq.s32.totalorder %v4713_v62, %v16970_v33 }
0x15cb   :  { %10954 = vmatmul.mubr.msk.f32.gmra.mrb[12].mxu0 %vm126_vm1, %v16967_v50 }
0x15cc   :  { %5641 = vmatprep.mubr.f32.mxu0 %v16935_v61 }
0x15cf   :  { %10955 = vmatmul.mubr.msk.f32.gmra.mrb[14].mxu0 %vm126_vm1, %v16968_v23 }
0x15d0   :  { %5647 = vmatprep.mubr.f32.mxu0 %v16935_v61 }
0x15d3   :  { %10956 = vmatmul.mubr.msk.f32.gmra.mrb[16].mxu0 %vm126_vm1, %v10828_v0 }
0x15d4   :  { %v11706_v11 = vpop.f32.mrb[140].mxu1  ;;  %5653 = vmatprep.mubr.f32.mxu0 %v16935_v61 }
0x15d5   :  { %v4044_v1 = vadd.f32 %v11706_v11, %v13831_v38  ;;  %v4035_v24 = vpop.f32.mrb[141].mxu1 }
0x15d6   :  { %v4036_v42 = vadd.f32 %v13831_v38, %v4035_v24  ;;  %v3778_v20 = vpop.f32.mrb[168].mxu0  ;;  %v11707_v53 = vpop.f32.mrb[142].mxu1 }
0x15d7   :  { %v3779_v34 = vadd.f32 %v13670_v19, %v3778_v20  ;;  %v4047_v10 = vadd.f32 %v11707_v53, %v13831_v38  ;;  %v3780_v16 = vpop.f32.mrb[169].mxu0  ;;  %v4038_v46 = vpop.f32.mrb[143].mxu1  ;;  %v4164_v14 = vmax.f32 %v4044_v1, 0.0  ;;  %10957 = vmatmul.mubr.msk.f32.gmra.mrb[18].mxu0 %vm126_vm1, %v10829_v35  ;;  %v4618_v1 = vadd.s32 296, %v16969_v57 }
0x15d8   :  { %v4039_v43 = vadd.f32 %v13831_v38, %v4038_v46  ;;  %v3781_v40 = vpop.f32.mrb[170].mxu0  ;;  %v4162_v44 = vmax.f32 %v4036_v42, 0.0  ;;  %5659 = vmatprep.mubr.f32.mxu0 %v16935_v61  ;;  %v4619_v46 = vadd.s32 304, %v16969_v57 }
0x15d9   :  { %v4165_v26 = vmax.f32 %v4047_v10, 0.0  ;;  %v3782_v25 = vadd.f32 %v13670_v19, %v3781_v40  ;;  %v3783_v49 = vpop.f32.mrb[171].mxu0  ;;  %v3869_v63 = vmax.f32 %v3779_v34, 0.0  ;;  %v10831_v10 = vsel %vm4808_vm13, 1.0, %v16935_v61 }
0x15da   :  { %v4163_v60 = vmax.f32 %v4039_v43, 0.0  ;;  %v4714_v16 = vand.u32 1, %v4618_v1  ;;  %v4620_v49 = vadd.s32 312, %v16969_v57 }
0x15db   :  { %v13845_v9 = vpack.c.bf16 %v4165_v26, %v4164_v14  ;;  %v3870_v47 = vmax.f32 %v3782_v25, 0.0  ;;  %10958 = vmatmul.mubr.msk.f32.gmra.mrb[20].mxu0 %vm126_vm1, %v10830_v7  ;;  %v10832_v14 = vsel %vm4809_vm14, 1.0, %v16935_v61  ;;  %v4715_v25 = vand.u32 1, %v4619_v46 }
0x15dc   :  { %v13847_v56 = vpack.c.bf16 %v4163_v60, %v4162_v44  ;;  %5665 = vmatprep.mubr.f32.mxu0 %v16935_v61  ;;  %vm4810_vm15 = vcmp.eq.s32.totalorder %v4714_v16, %v16970_v33  ;;  %v4625_v7 = vadd.s32 352, %v16969_v57 }
0x15dd   :  { %v3905_v13 = vpack.c.bf16 %v3870_v47, %v3869_v63  ;;  %vm4811_vm0 = vcmp.eq.s32.totalorder %v4715_v25, %v16970_v33 }
0x15de   :  { %v3786_v6 = vpop.f32.mrb[172].mxu0 }
0x15df   :  { %v3787_v29 = vadd.f32 %v13670_v19, %v3786_v6  ;;  %v3788_v22 = vpop.f32.mrb[173].mxu0  ;;  %11716 = vmatprep.mubr.msk.bf16.mxu1 %vm429_vm6, %v3905_v13  ;;  %10959 = vmatmul.mubr.msk.f32.gmra.mrb[22].mxu0 %vm126_vm1, %v10831_v10  ;;  %v10833_v13 = vsel %vm4810_vm15, 1.0, %v16935_v61  ;;  %v4716_v6 = vand.u32 1, %v4620_v49 }
0x15e0   :  { %v3789_v2 = vpop.f32.mrb[174].mxu0  ;;  %5671 = vmatprep.mubr.f32.mxu0 %v16935_v61 }
0x15e1   :  { %v3790_v8 = vadd.f32 %v13670_v19, %v3789_v2  ;;  %v3791_v30 = vpop.f32.mrb[175].mxu0  ;;  %v3871_v32 = vmax.f32 %v3787_v29, 0.0  ;;  %v4621_v29 = vadd.s32 320, %v16969_v57  ;;  %vm4812_vm5 = vcmp.eq.s32.totalorder %v4716_v6, %v16970_v33 }
0x15e2   :  { %v10835_v54 = vsel %vm4812_vm5, 1.0, %v16935_v61 }
0x15e3   :  { %v3872_v12 = vmax.f32 %v3790_v8, 0.0  ;;  %10960 = vmatmul.mubr.msk.f32.gmra.mrb[2].mxu0 %vm126_vm1, %v10832_v14  ;;  %v10834_v8 = vsel %vm4811_vm0, 1.0, %v16935_v61  ;;  %v4717_v4 = vand.u32 1, %v4621_v29  ;;  %v4627_v14 = vadd.s32 368, %v16969_v57 }
0x15e4   :  { %5677 = vmatprep.mubr.f32.mxu0 %v16935_v61 }
0x15e5   :  { %v3906_v28 = vpack.c.bf16 %v3872_v12, %v3871_v32  ;;  %vm4813_vm9 = vcmp.eq.s32.totalorder %v4717_v4, %v16970_v33 }
0x15e6   :  { %v3794_v31 = vpop.f32.mrb[176].mxu0 }
0x15e7   :  { %v3795_v45 = vadd.f32 %v13670_v19, %v3794_v31  ;;  %v3796_v52 = vpop.f32.mrb[177].mxu0  ;;  %11717 = vmatmul.mubr.msk.bf16.gmra.mrb[152].mxu1 %vm429_vm6, %v3906_v28  ;;  %10961 = vmatmul.mubr.msk.f32.gmra.mrb[24].mxu0 %vm126_vm1, %v10833_v13  ;;  %v4718_v28 = vand.u32 1, %v4622_v59  ;;  %v4623_v31 = vadd.s32 336, %v16969_v57 }
0x15e8   :  { %v3797_v51 = vpop.f32.mrb[178].mxu0  ;;  %5683 = vmatprep.mubr.f32.mxu0 %v16935_v61  ;;  %v10836_v52 = vsel %vm4813_vm9, 1.0, %v16935_v61 }
0x15e9   :  { %v3798_v17 = vadd.f32 %v13670_v19, %v3797_v51  ;;  %v3799_v3 = vpop.f32.mrb[179].mxu0  ;;  %v3873_v15 = vmax.f32 %v3795_v45, 0.0  ;;  %vm4814_vm10 = vcmp.eq.s32.totalorder %v4718_v28, %v16970_v33  ;;  %v4719_v51 = vand.u32 1, %v4623_v31  ;;  %v12565_v31 = vld [vmem:[#allocation4 + $0x5] ss:$0 sm:$0xff] }
0x15eb   :  { %v3874_v39 = vmax.f32 %v3798_v17, 0.0  ;;  %10962 = vmatmul.mubr.msk.f32.gmra.mrb[28].mxu0 %vm126_vm1, %v10834_v8  ;;  %v4624_v17 = vadd.s32 344, %v16969_v57  ;;  %vm4815_vm11 = vcmp.eq.s32.totalorder %v4719_v51, %v16970_v33  ;;  %v4629_v8 = vadd.s32 384, %v16969_v57 }
0x15ec   :  { %5689 = vmatprep.mubr.f32.mxu0 %v16935_v61 }
0x15ed   :  { %v3907_v27 = vpack.c.bf16 %v3874_v39, %v3873_v15  ;;  %v10837_v39 = vsel %vm4814_vm10, 1.0, %v16935_v61 }
0x15ee   :  { %v3802_v11 = vpop.f32.mrb[180].mxu0 }
0x15ef   :  { %v3803_v24 = vadd.f32 %v13670_v19, %v3802_v11  ;;  %v3804_v42 = vpop.f32.mrb[181].mxu0  ;;  %11720 = vmatprep.mubr.msk.bf16.mxu1 %vm429_vm6, %v3907_v27  ;;  %10963 = vmatmul.mubr.msk.f32.gmra.mrb[30].mxu0 %vm126_vm1, %v10835_v54  ;;  %v4720_v27 = vand.u32 1, %v4624_v17 }
0x15f0   :  { %v3805_v20 = vpop.f32.mrb[182].mxu0  ;;  %5695 = vmatprep.mubr.f32.mxu0 %v16935_v61 }
0x15f1   :  { %v3806_v53 = vadd.f32 %v13670_v19, %v3805_v20  ;;  %v3807_v34 = vpop.f32.mrb[183].mxu0  ;;  %v3875_v43 = vmax.f32 %v3803_v24, 0.0  ;;  %v10838_v24 = vsel %vm4815_vm11, 1.0, %v16935_v61  ;;  %vm4816_vm12 = vcmp.eq.s32.totalorder %v4720_v27, %v16970_v33 }
0x15f2   :  { %v4721_v20 = vand.u32 1, %v4625_v7  ;;  %v4634_v7 = vadd.s32 424, %v16969_v57 }
0x15f3   :  { %v3876_v40 = vmax.f32 %v3806_v53, 0.0  ;;  %10964 = vmatmul.mubr.msk.f32.gmra.mrb[32].mxu0 %vm126_vm1, %v10836_v52  ;;  %v4626_v53 = vadd.s32 360, %v16969_v57 }
0x15f4   :  { %5701 = vmatprep.mubr.f32.mxu0 %v16935_v61  ;;  %vm4817_vm13 = vcmp.eq.s32.totalorder %v4721_v20, %v16970_v33 }
0x15f5   :  { %v3908_v50 = vpack.c.bf16 %v3876_v40, %v3875_v43  ;;  %v10839_v40 = vsel %vm4816_vm12, 1.0, %v16935_v61 }
0x15f6   :  { %v3810_v26 = vpop.f32.mrb[184].mxu0 }
0x15f7   :  { %v3811_v44 = vadd.f32 %v13670_v19, %v3810_v26  ;;  %v3812_v60 = vpop.f32.mrb[185].mxu0  ;;  %11721 = vmatmul.mubr.msk.bf16.gmra.mrb[156].mxu1 %vm429_vm6, %v3908_v50  ;;  %10965 = vmatmul.mubr.msk.f32.gmra.mrb[34].mxu0 %vm126_vm1, %v10837_v39  ;;  %v4722_v50 = vand.u32 1, %v4626_v53  ;;  %v4633_v39 = vadd.s32 416, %v16969_v57 }
0x15f8   :  { %v3813_v63 = vpop.f32.mrb[186].mxu0  ;;  %5707 = vmatprep.mubr.f32.mxu0 %v16935_v61 }
0x15f9   :  { %v3814_v47 = vadd.f32 %v13670_v19, %v3813_v63  ;;  %v3815_v23 = vpop.f32.mrb[187].mxu0  ;;  %v3877_v22 = vmax.f32 %v3811_v44, 0.0  ;;  %v10840_v44 = vsel %vm4817_vm13, 1.0, %v16935_v61  ;;  %vm4818_vm14 = vcmp.eq.s32.totalorder %v4722_v50, %v16970_v33 }
0x15fa   :  { %v4723_v63 = vand.u32 1, %v4627_v14  ;;  %v4729_v27 = vand.u32 1, %v4633_v39  ;;  %v4643_v39 = vadd.s32 496, %v16969_v57 }
0x15fb   :  { %v3878_v48 = vmax.f32 %v3814_v47, 0.0  ;;  %10966 = vmatmul.mubr.msk.f32.gmra.mrb[36].mxu0 %vm126_vm1, %v10838_v24  ;;  %v4628_v47 = vadd.s32 376, %v16969_v57 }
0x15fc   :  { %5713 = vmatprep.mubr.f32.mxu0 %v16935_v61  ;;  %vm4819_vm15 = vcmp.eq.s32.totalorder %v4723_v63, %v16970_v33  ;;  %vm4825_vm12 = vcmp.eq.s32.totalorder %v4729_v27, %v16970_v33  ;;  %v4637_v63 = vadd.s32 448, %v16969_v57  ;;  %v4739_v27 = vand.u32 1, %v4643_v39 }
0x15fd   :  { %v3909_v2 = vpack.c.bf16 %v3878_v48, %v3877_v22  ;;  %v10841_v48 = vsel %vm4818_vm14, 1.0, %v16935_v61 }
0x15fe   :  { %v3818_v30 = vpop.f32.mrb[188].mxu0 }
0x15ff   :  { %v3819_v18 = vadd.f32 %v13670_v19, %v3818_v30  ;;  %v3820_v5 = vpop.f32.mrb[189].mxu0  ;;  %11724 = vmatprep.mubr.msk.bf16.mxu1 %vm429_vm6, %v3909_v2  ;;  %10967 = vmatmul.mubr.msk.f32.gmra.mrb[38].mxu0 %vm126_vm1, %v10839_v40  ;;  %v4724_v2 = vand.u32 1, %v4628_v47 }
0x1600   :  { %v3821_v32 = vpop.f32.mrb[190].mxu0  ;;  %5719 = vmatprep.mubr.f32.mxu0 %v16935_v61 }
0x1601   :  { %v3822_v12 = vadd.f32 %v13670_v19, %v3821_v32  ;;  %v3823_v55 = vpop.f32.mrb[191].mxu0  ;;  %v3879_v36 = vmax.f32 %v3819_v18, 0.0  ;;  %v10842_v18 = vsel %vm4819_vm15, 1.0, %v16935_v61  ;;  %vm4820_vm0 = vcmp.eq.s32.totalorder %v4724_v2, %v16970_v33 }
0x1602   :  { %v4725_v32 = vand.u32 1, %v4629_v8  ;;  %v4639_v8 = vadd.s32 464, %v16969_v57 }
0x1603   :  { %v3880_v58 = vmax.f32 %v3822_v12, 0.0  ;;  %10968 = vmatmul.mubr.msk.f32.gmra.mrb[40].mxu0 %vm126_vm1, %v10840_v44  ;;  %v4630_v12 = vadd.s32 392, %v16969_v57 }
0x1604   :  { %5725 = vmatprep.mubr.f32.mxu0 %v16935_v61  ;;  %vm4821_vm5 = vcmp.eq.s32.totalorder %v4725_v32, %v16970_v33 }
0x1605   :  { %v3910_v45 = vpack.c.bf16 %v3880_v58, %v3879_v36  ;;  %v4726_v52 = vand.u32 1, %v4630_v12  ;;  %v10844_v17 = vsel %vm4821_vm5, 1.0, %v16935_v61 }
0x1606   :  { %v3826_v0 = vpop.f32.mrb[192].mxu0 }
0x1607   :  { %v3827_v3 = vadd.f32 %v13670_v19, %v3826_v0  ;;  %v3828_v35 = vpop.f32.mrb[193].mxu0  ;;  %11725 = vmatmul.mubr.msk.bf16.gmra.mrb[160].mxu1 %vm429_vm6, %v3910_v45  ;;  %10969 = vmatmul.mubr.msk.f32.gmra.mrb[42].mxu0 %vm126_vm1, %v10841_v48  ;;  %v10843_v45 = vsel %vm4820_vm0, 1.0, %v16935_v61  ;;  %vm4822_vm9 = vcmp.eq.s32.totalorder %v4726_v52, %v16970_v33 }
0x1608   :  { %v3829_v21 = vpop.f32.mrb[194].mxu0  ;;  %5731 = vmatprep.mubr.f32.mxu0 %v16935_v61  ;;  %v4631_v35 = vadd.s32 400, %v16969_v57 }
0x1609   :  { %v3830_v37 = vadd.f32 %v13670_v19, %v3829_v21  ;;  %v3831_v15 = vpop.f32.mrb[195].mxu0  ;;  %v3881_v11 = vmax.f32 %v3827_v3, 0.0  ;;  %v10845_v3 = vsel %vm4822_vm9, 1.0, %v16935_v61 }
0x160a   :  { %v4727_v21 = vand.u32 1, %v4631_v35 }
0x160b   :  { %v3882_v62 = vmax.f32 %v3830_v37, 0.0  ;;  %10970 = vmatmul.mubr.msk.f32.gmra.mrb[44].mxu0 %vm126_vm1, %v10842_v18 }
0x160c   :  { %5737 = vmatprep.mubr.f32.mxu0 %v16935_v61  ;;  %vm4823_vm10 = vcmp.eq.s32.totalorder %v4727_v21, %v16970_v33 }
0x160d   :  { %v3911_v1 = vpack.c.bf16 %v3882_v62, %v3881_v11  ;;  %v10846_v37 = vsel %vm4823_vm10, 1.0, %v16935_v61  ;;  %v10848_v11 = vsel %vm4825_vm12, 1.0, %v16935_v61  ;;  %v4730_v62 = vand.u32 1, %v4634_v7 }
0x160e   :  { %v3834_v42 = vpop.f32.mrb[196].mxu0  ;;  %v4644_v7 = vadd.s32 504, %v16969_v57 }
0x160f   :  { %v3835_v34 = vadd.f32 %v13670_v19, %v3834_v42  ;;  %v3836_v10 = vpop.f32.mrb[197].mxu0  ;;  %11728 = vmatprep.mubr.msk.bf16.mxu1 %vm429_vm6, %v3911_v1  ;;  %10971 = vmatmul.mubr.msk.f32.gmra.mrb[46].mxu0 %vm126_vm1, %v10843_v45  ;;  %vm4826_vm13 = vcmp.eq.s32.totalorder %v4730_v62, %v16970_v33  ;;  %v4635_v1 = vadd.s32 432, %v16969_v57 }
0x1610   :  { %v3837_v16 = vpop.f32.mrb[198].mxu0  ;;  %5743 = vmatprep.mubr.f32.mxu0 %v16935_v61  ;;  %v10849_v24 = vsel %vm4826_vm13, 1.0, %v16935_v61  ;;  %vm4835_vm13 = vcmp.eq.s32.totalorder %v4739_v27, %v16970_v33  ;;  %v4740_v62 = vand.u32 1, %v4644_v7 }
0x1611   :  { %v3838_v46 = vadd.f32 %v13670_v19, %v3837_v16  ;;  %v3839_v43 = vpop.f32.mrb[199].mxu0  ;;  %v3883_v26 = vmax.f32 %v3835_v34, 0.0  ;;  %v4731_v20 = vand.u32 1, %v4635_v1  ;;  %v4645_v1 = vadd.s32 512, %v16969_v57 }
0x1613   :  { %v3884_v25 = vmax.f32 %v3838_v46, 0.0  ;;  %10972 = vmatmul.mubr.msk.f32.gmra.mrb[26].mxu0 %vm126_vm1, %v10844_v17  ;;  %vm4827_vm14 = vcmp.eq.s32.totalorder %v4731_v20, %v16970_v33  ;;  %v4636_v46 = vadd.s32 440, %v16969_v57  ;;  %v4646_v20 = vadd.s32 520, %v16969_v57 }
0x1614   :  { %5749 = vmatprep.mubr.f32.mxu0 %v16935_v61  ;;  %v10850_v50 = vsel %vm4827_vm14, 1.0, %v16935_v61  ;;  %vm4836_vm14 = vcmp.eq.s32.totalorder %v4740_v62, %v16970_v33 }
0x1615   :  { %v3912_v49 = vpack.c.bf16 %v3884_v25, %v3883_v26  ;;  %v4732_v26 = vand.u32 1, %v4636_v46 }
0x1616   :  { %v3842_v60 = vpop.f32.mrb[200].mxu0 }
0x1617   :  { %v3843_v23 = vadd.f32 %v13670_v19, %v3842_v60  ;;  %v3844_v13 = vpop.f32.mrb[201].mxu0  ;;  %11729 = vmatmul.mubr.msk.bf16.gmra.mrb[164].mxu1 %vm429_vm6, %v3912_v49  ;;  %10973 = vmatmul.mubr.msk.f32.gmra.mrb[48].mxu0 %vm126_vm1, %v10845_v3  ;;  %vm4828_vm15 = vcmp.eq.s32.totalorder %v4732_v26, %v16970_v33 }
0x1618   :  { %v3845_v6 = vpop.f32.mrb[202].mxu0  ;;  %5755 = vmatprep.mubr.f32.mxu0 %v16935_v61 }
0x1619   :  { %v3846_v29 = vadd.f32 %v13670_v19, %v3845_v6  ;;  %v3847_v22 = vpop.f32.mrb[203].mxu0  ;;  %v3885_v30 = vmax.f32 %v3843_v23, 0.0  ;;  %v10851_v23 = vsel %vm4828_vm15, 1.0, %v16935_v61  ;;  %v4733_v6 = vand.u32 1, %v4637_v63 }
0x161a   :  { %v4638_v22 = vadd.s32 456, %v16969_v57  ;;  %v4651_v63 = vadd.s32 560, %v16969_v57 }
0x161b   :  { %v3886_v4 = vmax.f32 %v3846_v29, 0.0  ;;  %10974 = vmatmul.mubr.msk.f32.gmra.mrb[50].mxu0 %vm126_vm1, %v10846_v37  ;;  %v12195_v29 = vld [vmem:[#allocation2 + $0x1a8] sm:$0xff]   ;;  %vm4829_vm0 = vcmp.eq.s32.totalorder %v4733_v6, %v16970_v33  ;;  %v4652_v6 = vadd.s32 568, %v16969_v57 }
0x161c   :  { %5761 = vmatprep.mubr.f32.mxu0 %v16935_v61  ;;  %v10852_v48 = vsel %vm4829_vm0, 1.0, %v16935_v61  ;;  %7763 = vmatpush1.bf16.msra.mxu0 %v12195_v29  ;;  %v4734_v2 = vand.u32 1, %v4638_v22  ;;  %v12197_v29 = vld [vmem:[%s16833_s2 + $0x60] ss:$8 sps:$4 sm:$0xff]   ;;  %v12199_v22 = vld [vmem:[%s16833_s2 + $0x64] ss:$8 sps:$4 sm:$0xff]  }
0x161d   :  { %v3913_v59 = vpack.c.bf16 %v3886_v4, %v3885_v30  ;;  %7764 = vmatprep.subr.bf16.mxu0 %v16937_v41  ;;  %6429 = vmatprep.subr.bf16.mxu1 %v12199_v22 }
0x161e   :  { %v3850_v5 = vpop.f32.mrb[204].mxu0  ;;  %vm4830_vm5 = vcmp.eq.s32.totalorder %v4734_v2, %v16970_v33 }
0x161f   :  { %v3851_v55 = vadd.f32 %v13670_v19, %v3850_v5  ;;  %v3852_v54 = vpop.f32.mrb[205].mxu0  ;;  %11732 = vmatprep.mubr.msk.bf16.mxu1 %vm429_vm6, %v3913_v59  ;;  %v10853_v30 = vsel %vm4830_vm5, 1.0, %v16935_v61  ;;  %v4735_v59 = vand.u32 1, %v4639_v8  ;;  %v4748_v8 = vand.u32 1, %v4652_v6 }
0x1620   :  { %v3853_v28 = vpop.f32.mrb[206].mxu0 }
0x1621   :  { %v3854_v36 = vadd.f32 %v12565_v31, %v3853_v28  ;;  %v3855_v58 = vpop.f32.mrb[207].mxu0  ;;  %v3887_v0 = vmax.f32 %v3851_v55, 0.0  ;;  %vm4831_vm9 = vcmp.eq.s32.totalorder %v4735_v59, %v16970_v33  ;;  %v4640_v55 = vadd.s32 472, %v16969_v57 }
0x1622   :  { %v10854_v31 = vsel %vm4831_vm9, 1.0, %v16935_v61 }
0x1623   :  { %v3888_v51 = vmax.f32 %v3854_v36, 0.0  ;;  %v4736_v58 = vand.u32 1, %v4640_v55 }
0x1625   :  { %v3914_v19 = vpack.c.bf16 %v3888_v51, %v3887_v0  ;;  %vm4832_vm10 = vcmp.eq.s32.totalorder %v4736_v58, %v16970_v33 }
0x1626   :  { %v10855_v3 = vsel %vm4832_vm10, 1.0, %v16935_v61 }
0x1627   :  { %11733 = vmatmul.mubr.msk.bf16.gmra.mrb[168].mxu1 %vm429_vm6, %v3914_v19  ;;  %v4641_v19 = vadd.s32 480, %v16969_v57 }
0x1628   :  { %11742 = vmatprep.mubr.msk.bf16.mxu1 %vm506_vm8, %v13847_v56  ;;  %v4632_v56 = vadd.s32 408, %v16969_v57 }
0x1629   :  { %v4737_v21 = vand.u32 1, %v4641_v19  ;;  %v4659_v19 = vadd.s32 624, %v16969_v57 }
0x162a   :  { %v4728_v15 = vand.u32 1, %v4632_v56  ;;  %v4642_v56 = vadd.s32 488, %v16969_v57 }
0x162c   :  { %vm4824_vm11 = vcmp.eq.s32.totalorder %v4728_v15, %v16970_v33  ;;  %v4738_v15 = vand.u32 1, %v4642_v56  ;;  %v14139_v56 = vpop.f32.mrb[142].mxu0 }
0x162d   :  { %v14143_v39 = vpop.f32.mrb[143].mxu0 }
0x162e   :  { %vm4834_vm12 = vcmp.eq.s32.totalorder %v4738_v15, %v16970_v33  ;;  %v4661_v15 = vadd.s32 640, %v16969_v57 }
0x162f   :  { %11743 = vmatmul.mubr.msk.bf16.vlgmr.msra.gmra.mrb[172].mxu1 %vm506_vm8, %v13845_v9  ;;  %v10847_v9 = vsel %vm4824_vm11, 1.0, %v16935_v61  ;;  %vm4833_vm11 = vcmp.eq.s32.totalorder %v4737_v21, %v16970_v33 }
0x1630   :  { %10975 = vmatmul.mubr.msk.f32.gmra.mrb[52].mxu0 %vm126_vm1, %v10847_v9  ;;  %v10856_v37 = vsel %vm4833_vm11, 1.0, %v16935_v61  ;;  %v10857_v9 = vsel %vm4834_vm12, 1.0, %v16935_v61  ;;  %6430 = vmatpush1.bf16.msra.mxu1 %v12197_v29  ;;  %v4757_v27 = vand.u32 1, %v4661_v15  ;;  %v4665_v29 = vadd.s32 672, %v16969_v57 }
0x1631   :  { %5767 = vmatprep.mubr.f32.mxu0 %v16935_v61 }
0x1634   :  { %10976 = vmatmul.mubr.msk.f32.gmra.mrb[54].mxu0 %vm126_vm1, %v10848_v11  ;;  %v10858_v11 = vsel %vm4835_vm13, 1.0, %v16935_v61  ;;  %vm4844_vm13 = vcmp.eq.s32.totalorder %v4748_v8, %v16970_v33 }
0x1635   :  { %5773 = vmatprep.mubr.f32.mxu0 %v16935_v61 }
0x1638   :  { %10977 = vmatmul.mubr.msk.f32.gmra.mrb[56].mxu0 %vm126_vm1, %v10849_v24  ;;  %v10859_v24 = vsel %vm4836_vm14, 1.0, %v16935_v61 }
0x1639   :  { %5779 = vmatprep.mubr.f32.mxu0 %v16935_v61 }
0x163c   :  { %10978 = vmatmul.mubr.msk.f32.gmra.mrb[58].mxu0 %vm126_vm1, %v10850_v50 }
0x163d   :  { %5785 = vmatprep.mubr.f32.mxu0 %v16935_v61 }
0x1640   :  { %10979 = vmatmul.mubr.msk.f32.gmra.mrb[60].mxu0 %vm126_vm1, %v10851_v23  ;;  %v4747_v23 = vand.u32 1, %v4651_v63 }
0x1641   :  { %5791 = vmatprep.mubr.f32.mxu0 %v16935_v61 }
0x1642   :  { %vm4843_vm12 = vcmp.eq.s32.totalorder %v4747_v23, %v16970_v33 }
0x1643   :  { %v10866_v2 = vsel %vm4843_vm12, 1.0, %v16935_v61 }
0x1644   :  { %10980 = vmatmul.mubr.msk.f32.gmra.mrb[64].mxu0 %vm126_vm1, %v10852_v48  ;;  %v4653_v48 = vadd.s32 576, %v16969_v57 }
0x1645   :  { %5797 = vmatprep.mubr.f32.mxu0 %v16935_v61 }
0x1647   :  { %v11710_v42 = vpop.f32.mrb[144].mxu1 }
0x1648   :  { %v4060_v53 = vadd.f32 %v11710_v42, %v13831_v38  ;;  %v4051_v34 = vpop.f32.mrb[145].mxu1  ;;  %10981 = vmatmul.mubr.msk.f32.gmra.mrb[66].mxu0 %vm126_vm1, %v10853_v30  ;;  %v4741_v42 = vand.u32 1, %v4645_v1  ;;  %v4749_v30 = vand.u32 1, %v4653_v48 }
0x1649   :  { %v4052_v10 = vadd.f32 %v13831_v38, %v4051_v34  ;;  %v11711_v16 = vpop.f32.mrb[146].mxu1  ;;  %5803 = vmatprep.mubr.f32.mxu0 %v16935_v61  ;;  %v4742_v34 = vand.u32 1, %v4646_v20 }
0x164a   :  { %v4063_v43 = vadd.f32 %v11711_v16, %v13831_v38  ;;  %v4054_v40 = vpop.f32.mrb[147].mxu1  ;;  %v4168_v25 = vmax.f32 %v4060_v53, 0.0  ;;  %vm4837_vm15 = vcmp.eq.s32.totalorder %v4741_v42, %v16970_v33  ;;  %vm4845_vm14 = vcmp.eq.s32.totalorder %v4749_v30, %v16970_v33 }
0x164b   :  { %v4055_v14 = vadd.f32 %v13831_v38, %v4054_v40  ;;  %v4166_v44 = vmax.f32 %v4052_v10, 0.0  ;;  %v10860_v53 = vsel %vm4837_vm15, 1.0, %v16935_v61  ;;  %vm4838_vm0 = vcmp.eq.s32.totalorder %v4742_v34, %v16970_v33 }
0x164c   :  { %v4169_v49 = vmax.f32 %v4063_v43, 0.0  ;;  %10982 = vmatmul.mubr.msk.f32.gmra.mrb[68].mxu0 %vm126_vm1, %v10854_v31  ;;  %v4647_v10 = vadd.s32 528, %v16969_v57  ;;  %v10861_v16 = vsel %vm4838_vm0, 1.0, %v16935_v61  ;;  %v4648_v43 = vadd.s32 536, %v16969_v57 }
0x164d   :  { %v4167_v60 = vmax.f32 %v4055_v14, 0.0  ;;  %5809 = vmatprep.mubr.f32.mxu0 %v16935_v61  ;;  %v4649_v14 = vadd.s32 544, %v16969_v57  ;;  %v10868_v59 = vsel %vm4845_vm14, 1.0, %v16935_v61  ;;  %v4761_v30 = vand.u32 1, %v4665_v29 }
0x164e   :  { %v4203_v47 = vpack.c.bf16 %v4169_v49, %v4168_v25  ;;  %v4743_v46 = vand.u32 1, %v4647_v10  ;;  %v4744_v50 = vand.u32 1, %v4648_v43  ;;  %v4650_v49 = vadd.s32 552, %v16969_v57 }
0x164f   :  { %v4202_v13 = vpack.c.bf16 %v4167_v60, %v4166_v44  ;;  %v4745_v25 = vand.u32 1, %v4649_v14  ;;  %v4664_v43 = vadd.s32 664, %v16969_v57  ;;  %v4672_v29 = vadd.s32 728, %v16969_v57 }
0x1650   :  { %10983 = vmatmul.mubr.msk.f32.gmra.mrb[70].mxu0 %vm126_vm1, %v10855_v3  ;;  %vm4839_vm5 = vcmp.eq.s32.totalorder %v4743_v46, %v16970_v33  ;;  %vm4840_vm9 = vcmp.eq.s32.totalorder %v4744_v50, %v16970_v33  ;;  %v4746_v60 = vand.u32 1, %v4650_v49  ;;  %v4755_v3 = vand.u32 1, %v4659_v19  ;;  %v12200_v49 = vld [vmem:[#allocation2 + $0x1b8] sm:$0xff]  }
0x1651   :  { %11746 = vmatprep.mubr.msk.bf16.mxu1 %vm506_vm8, %v4202_v13  ;;  %5815 = vmatprep.mubr.f32.mxu0 %v16935_v61  ;;  %v10862_v40 = vsel %vm4839_vm5, 1.0, %v16935_v61  ;;  %v10863_v26 = vsel %vm4840_vm9, 1.0, %v16935_v61  ;;  %vm4841_vm10 = vcmp.eq.s32.totalorder %v4745_v25, %v16970_v33  ;;  %v12196_v13 = vld [vmem:[#allocation2 + $0x1b0] sm:$0xff]  }
0x1652   :  { %11747 = vmatmul.mubr.msk.bf16.gmra.mrb[176].mxu1 %vm506_vm8, %v4203_v47  ;;  %v10864_v44 = vsel %vm4841_vm10, 1.0, %v16935_v61  ;;  %vm4842_vm11 = vcmp.eq.s32.totalorder %v4746_v60, %v16970_v33  ;;  %7765 = vmatpush1.bf16.msra.mxu0 %v12196_v13 }
0x1653   :  { %v10865_v47 = vsel %vm4842_vm11, 1.0, %v16935_v61  ;;  %7766 = vmatprep.subr.bf16.mxu0 %v16937_v41  ;;  %vm4851_vm11 = vcmp.eq.s32.totalorder %v4755_v3, %v16970_v33 }
0x1654   :  { %10984 = vmatmul.mubr.msk.f32.gmra.mrb[72].mxu0 %vm126_vm1, %v10856_v37  ;;  %v10874_v21 = vsel %vm4851_vm11, 1.0, %v16935_v61 }
0x1655   :  { %5821 = vmatprep.mubr.f32.mxu0 %v16935_v61 }
0x1656   :  { %7767 = vmatpush1.bf16.msra.mxu0 %v12200_v49 }
0x1657   :  { %v11714_v4 = vpop.f32.mrb[148].mxu1  ;;  %7768 = vmatprep.subr.bf16.mxu0 %v16937_v41 }
0x1658   :  { %v4076_v18 = vadd.f32 %v11714_v4, %v13831_v38  ;;  %v4067_v5 = vpop.f32.mrb[149].mxu1  ;;  %10985 = vmatmul.mubr.msk.f32.gmra.mrb[74].mxu0 %vm126_vm1, %v10857_v9  ;;  %v10867_v4 = vsel %vm4844_vm13, 1.0, %v16935_v61  ;;  %v14147_v9 = vpop.f32.mrb[208].mxu0  ;;  %vm4853_vm13 = vcmp.eq.s32.totalorder %v4757_v27, %v16970_v33 }
0x1659   :  { %v4068_v32 = vadd.f32 %v13831_v38, %v4067_v5  ;;  %v11715_v12 = vpop.f32.mrb[150].mxu1  ;;  %5827 = vmatprep.mubr.f32.mxu0 %v16935_v61  ;;  %v10876_v1 = vsel %vm4853_vm13, 1.0, %v16935_v61 }
0x165a   :  { %v4079_v54 = vadd.f32 %v11715_v12, %v13831_v38  ;;  %v4070_v28 = vpop.f32.mrb[151].mxu1  ;;  %v4172_v45 = vmax.f32 %v4076_v18, 0.0  ;;  %v4654_v18 = vadd.s32 584, %v16969_v57 }
0x165b   :  { %v4071_v36 = vadd.f32 %v13831_v38, %v4070_v28  ;;  %v4170_v0 = vmax.f32 %v4068_v32, 0.0  ;;  %v4655_v32 = vadd.s32 592, %v16969_v57 }
0x165c   :  { %v4173_v52 = vmax.f32 %v4079_v54, 0.0  ;;  %10986 = vmatmul.mubr.msk.f32.gmra.mrb[76].mxu0 %vm126_vm1, %v10858_v11  ;;  %v4750_v5 = vand.u32 1, %v4654_v18  ;;  %v4656_v54 = vadd.s32 600, %v16969_v57  ;;  %v14150_v11 = vpop.f32.mrb[209].mxu0 }
0x165d   :  { %v4171_v51 = vmax.f32 %v4071_v36, 0.0  ;;  %5833 = vmatprep.mubr.f32.mxu0 %v16935_v61  ;;  %v4751_v55 = vand.u32 1, %v4655_v32  ;;  %v4657_v36 = vadd.s32 608, %v16969_v57  ;;  %v14153_v62 = vpop.f32.mrb[210].mxu0 }
0x165e   :  { %v4205_v17 = vpack.c.bf16 %v4173_v52, %v4172_v45  ;;  %vm4846_vm15 = vcmp.eq.s32.totalorder %v4750_v5, %v16970_v33  ;;  %v4752_v31 = vand.u32 1, %v4656_v54  ;;  %v4658_v52 = vadd.s32 616, %v16969_v57  ;;  %v14160_v20 = vpop.f32.mrb[211].mxu0 }
0x165f   :  { %v4204_v35 = vpack.c.bf16 %v4171_v51, %v4170_v0  ;;  %v10869_v12 = vsel %vm4846_vm15, 1.0, %v16935_v61  ;;  %vm4847_vm0 = vcmp.eq.s32.totalorder %v4751_v55, %v16970_v33  ;;  %v4753_v45 = vand.u32 1, %v4657_v36  ;;  %v14166_v10 = vpop.f32.mrb[212].mxu0 }
0x1660   :  { %10987 = vmatmul.mubr.msk.f32.gmra.mrb[78].mxu0 %vm126_vm1, %v10859_v24  ;;  %v10870_v28 = vsel %vm4847_vm0, 1.0, %v16935_v61  ;;  %vm4848_vm5 = vcmp.eq.s32.totalorder %v4752_v31, %v16970_v33  ;;  %v4754_v51 = vand.u32 1, %v4658_v52  ;;  %v4662_v24 = vadd.s32 648, %v16969_v57  ;;  %v14169_v46 = vpop.f32.mrb[213].mxu0 }
0x1661   :  { %11750 = vmatprep.mubr.msk.bf16.mxu1 %vm506_vm8, %v4204_v35  ;;  %5839 = vmatprep.mubr.f32.mxu0 %v16935_v61  ;;  %v10871_v58 = vsel %vm4848_vm5, 1.0, %v16935_v61  ;;  %vm4849_vm9 = vcmp.eq.s32.totalorder %v4753_v45, %v16970_v33  ;;  %v4660_v35 = vadd.s32 632, %v16969_v57  ;;  %v14176_v25 = vpop.f32.mrb[214].mxu0  ;;  %v4666_v5 = vadd.s32 680, %v16969_v57 }
0x1662   :  { %11751 = vmatmul.mubr.msk.bf16.gmra.mrb[180].mxu1 %vm506_vm8, %v4205_v17  ;;  %v10872_v0 = vsel %vm4849_vm9, 1.0, %v16935_v61  ;;  %vm4850_vm10 = vcmp.eq.s32.totalorder %v4754_v51, %v16970_v33  ;;  %v4758_v42 = vand.u32 1, %v4662_v24  ;;  %vm4857_vm5 = vcmp.eq.s32.totalorder %v4761_v30, %v16970_v33 }
0x1663   :  { %v10873_v17 = vsel %vm4850_vm10, 1.0, %v16935_v61  ;;  %v4756_v37 = vand.u32 1, %v4660_v35  ;;  %v10880_v55 = vsel %vm4857_vm5, 1.0, %v16935_v61  ;;  %v4667_v36 = vadd.s32 688, %v16969_v57 }
0x1664   :  { %10988 = vmatmul.mubr.msk.f32.gmra.mrb[62].mxu0 %vm126_vm1, %v10860_v53  ;;  %vm4854_vm14 = vcmp.eq.s32.totalorder %v4758_v42, %v16970_v33  ;;  %v4663_v53 = vadd.s32 656, %v16969_v57 }
0x1665   :  { %5845 = vmatprep.mubr.f32.mxu0 %v16935_v61  ;;  %vm4852_vm12 = vcmp.eq.s32.totalorder %v4756_v37, %v16970_v33  ;;  %v10877_v34 = vsel %vm4854_vm14, 1.0, %v16935_v61  ;;  %v4763_v45 = vand.u32 1, %v4667_v36 }
0x1666   :  { %v10875_v7 = vsel %vm4852_vm12, 1.0, %v16935_v61 }
0x1667   :  { %vm4859_vm10 = vcmp.eq.s32.totalorder %v4763_v45, %v16970_v33 }
0x1668   :  { %10989 = vmatmul.mubr.msk.f32.gmra.mrb[80].mxu0 %vm126_vm1, %v10861_v16  ;;  %v4759_v16 = vand.u32 1, %v4663_v53 }
0x1669   :  { %5851 = vmatprep.mubr.f32.mxu0 %v16935_v61 }
0x166a   :  { %vm4855_vm15 = vcmp.eq.s32.totalorder %v4759_v16, %v16970_v33 }
0x166b   :  { %v10878_v50 = vsel %vm4855_vm15, 1.0, %v16935_v61 }
0x166c   :  { %10990 = vmatmul.mubr.msk.f32.gmra.mrb[82].mxu0 %vm126_vm1, %v10862_v40 }
0x166d   :  { %5857 = vmatprep.mubr.f32.mxu0 %v16935_v61 }
0x1670   :  { %10991 = vmatmul.mubr.msk.f32.gmra.mrb[84].mxu0 %vm126_vm1, %v10863_v26 }
0x1671   :  { %5863 = vmatprep.mubr.f32.mxu0 %v16935_v61 }
0x1674   :  { %10992 = vmatmul.mubr.msk.f32.gmra.mrb[86].mxu0 %vm126_vm1, %v10864_v44  ;;  %v4760_v44 = vand.u32 1, %v4664_v43 }
0x1675   :  { %5869 = vmatprep.mubr.f32.mxu0 %v16935_v61 }
0x1676   :  { %vm4856_vm0 = vcmp.eq.s32.totalorder %v4760_v44, %v16970_v33  ;;  %v4670_v44 = vadd.s32 712, %v16969_v57 }
0x1677   :  { %v10879_v48 = vsel %vm4856_vm0, 1.0, %v16935_v61 }
0x1678   :  { %10993 = vmatmul.mubr.msk.f32.gmra.mrb[88].mxu0 %vm126_vm1, %v10865_v47  ;;  %v14180_v47 = vpop.f32.mrb[215].mxu0 }
0x1679   :  { %5875 = vmatprep.mubr.f32.mxu0 %v16935_v61  ;;  %v14185_v6 = vpop.f32.mrb[216].mxu0 }
0x167a   :  { %v14192_v18 = vpop.f32.mrb[217].mxu0 }
0x167c   :  { %10994 = vmatmul.mubr.msk.f32.gmra.mrb[90].mxu0 %vm126_vm1, %v10866_v2 }
0x167d   :  { %5881 = vmatprep.mubr.f32.mxu0 %v16935_v61 }
0x1680   :  { %10995 = vmatmul.mubr.msk.f32.gmra.mrb[92].mxu0 %vm126_vm1, %v10867_v4 }
0x1681   :  { %5887 = vmatprep.mubr.f32.mxu0 %v16935_v61 }
0x1684   :  { %10996 = vmatmul.mubr.msk.f32.gmra.mrb[94].mxu0 %vm126_vm1, %v10868_v59 }
0x1685   :  { %5893 = vmatprep.mubr.f32.mxu0 %v16935_v61 }
0x1688   :  { %10997 = vmatmul.mubr.msk.f32.gmra.mrb[96].mxu0 %vm126_vm1, %v10869_v12 }
0x1689   :  { %5899 = vmatprep.mubr.f32.mxu0 %v16935_v61 }
0x168c   :  { %10998 = vmatmul.mubr.msk.f32.gmra.mrb[98].mxu0 %vm126_vm1, %v10870_v28  ;;  %v4762_v28 = vand.u32 1, %v4666_v5 }
0x168d   :  { %5905 = vmatprep.mubr.f32.mxu0 %v16935_v61 }
0x168e   :  { %vm4858_vm9 = vcmp.eq.s32.totalorder %v4762_v28, %v16970_v33  ;;  %v4673_v28 = vadd.s32 736, %v16969_v57 }
0x168f   :  { %v10881_v31 = vsel %vm4858_vm9, 1.0, %v16935_v61 }
0x1690   :  { %10999 = vmatmul.mubr.msk.f32.gmra.mrb[100].mxu0 %vm126_vm1, %v10871_v58 }
0x1691   :  { %5911 = vmatprep.mubr.f32.mxu0 %v16935_v61 }
0x1694   :  { %11000 = vmatmul.mubr.msk.f32.gmra.mrb[102].mxu0 %vm126_vm1, %v10872_v0  ;;  %v4668_v0 = vadd.s32 696, %v16969_v57 }
0x1695   :  { %5917 = vmatprep.mubr.f32.mxu0 %v16935_v61 }
0x1696   :  { %v4764_v35 = vand.u32 1, %v4668_v0 }
0x1698   :  { %11001 = vmatmul.mubr.msk.f32.gmra.mrb[104].mxu0 %vm126_vm1, %v10873_v17  ;;  %v10882_v17 = vsel %vm4859_vm10, 1.0, %v16935_v61  ;;  %vm4860_vm11 = vcmp.eq.s32.totalorder %v4764_v35, %v16970_v33 }
0x1699   :  { %5923 = vmatprep.mubr.f32.mxu0 %v16935_v61  ;;  %v10883_v53 = vsel %vm4860_vm11, 1.0, %v16935_v61 }
0x169c   :  { %11002 = vmatmul.mubr.msk.f32.gmra.mrb[106].mxu0 %vm126_vm1, %v10874_v21  ;;  %v14222_v21 = vld [vmem:[#allocation7 + $0x5] ss:$0 sm:$0xff] }
0x169d   :  { %5929 = vmatprep.mubr.f32.mxu0 %v16935_v61 }
0x16a0   :  { %11003 = vmatmul.mubr.msk.f32.gmra.mrb[108].mxu0 %vm126_vm1, %v10875_v7 }
0x16a1   :  { %5935 = vmatprep.mubr.f32.mxu0 %v16935_v61 }
0x16a4   :  { %11004 = vmatmul.mubr.msk.f32.gmra.mrb[110].mxu0 %vm126_vm1, %v10876_v1 }
0x16a5   :  { %5941 = vmatprep.mubr.f32.mxu0 %v16935_v61 }
0x16a8   :  { %11005 = vmatmul.mubr.msk.f32.gmra.mrb[112].mxu0 %vm126_vm1, %v10877_v34  ;;  %v4669_v34 = vadd.s32 704, %v16969_v57 }
0x16a9   :  { %5947 = vmatprep.mubr.f32.mxu0 %v16935_v61 }
0x16ac   :  { %11006 = vmatmul.mubr.msk.f32.gmra.mrb[114].mxu0 %vm126_vm1, %v10878_v50  ;;  %v4765_v50 = vand.u32 1, %v4669_v34 }
0x16ad   :  { %5953 = vmatprep.mubr.f32.mxu0 %v16935_v61 }
0x16ae   :  { %vm4861_vm12 = vcmp.eq.s32.totalorder %v4765_v50, %v16970_v33 }
0x16b0   :  { %11007 = vmatmul.mubr.msk.f32.gmra.mrb[116].mxu0 %vm126_vm1, %v10879_v48  ;;  %v10884_v48 = vsel %vm4861_vm12, 1.0, %v16935_v61 }
0x16b1   :  { %5959 = vmatprep.mubr.f32.mxu0 %v16935_v61 }
0x16b4   :  { %11008 = vmatmul.mubr.msk.f32.gmra.mrb[118].mxu0 %vm126_vm1, %v10880_v55  ;;  %v4768_v55 = vand.u32 1, %v4672_v29 }
0x16b5   :  { %5965 = vmatprep.mubr.f32.mxu0 %v16935_v61 }
0x16b6   :  { %vm4864_vm15 = vcmp.eq.s32.totalorder %v4768_v55, %v16970_v33 }
0x16b8   :  { %11009 = vmatmul.mubr.msk.f32.gmra.mrb[120].mxu0 %vm126_vm1, %v10881_v31 }
0x16b9   :  { %5971 = vmatprep.mubr.f32.mxu0 %v16935_v61 }
0x16ba   :  { %v11718_v40 = vpop.f32.mrb[152].mxu1 }
0x16bb   :  { %v4092_v14 = vadd.f32 %v11718_v40, %v13831_v38  ;;  %v4083_v26 = vpop.f32.mrb[153].mxu1 }
0x16bc   :  { %v4084_v60 = vadd.f32 %v13831_v38, %v4083_v26  ;;  %v11719_v63 = vpop.f32.mrb[154].mxu1  ;;  %11010 = vmatmul.mubr.msk.f32.gmra.mrb[122].mxu0 %vm126_vm1, %v10882_v17  ;;  %v4769_v17 = vand.u32 1, %v4673_v28 }
0x16bd   :  { %v4095_v23 = vadd.f32 %v11719_v63, %v13831_v38  ;;  %v4086_v13 = vpop.f32.mrb[155].mxu1  ;;  %v4176_v2 = vmax.f32 %v4092_v14, 0.0  ;;  %5977 = vmatprep.mubr.f32.mxu0 %v16935_v61  ;;  %v12201_v63 = vld [vmem:[#allocation2 + $0x1c0] sm:$0xff]  }
0x16be   :  { %v4087_v22 = vadd.f32 %v13831_v38, %v4086_v13  ;;  %v4174_v4 = vmax.f32 %v4084_v60, 0.0  ;;  %v14197_v38 = vpop.f32.mrb[218].mxu0  ;;  %v4671_v60 = vadd.s32 720, %v16969_v57  ;;  %7769 = vmatpush1.bf16.msra.mxu0 %v12201_v63  ;;  %vm4865_vm0 = vcmp.eq.s32.totalorder %v4769_v17, %v16970_v33 }
0x16bf   :  { %v4177_v8 = vmax.f32 %v4095_v23, 0.0  ;;  %v14200_v54 = vpop.f32.mrb[219].mxu0  ;;  %7770 = vmatprep.subr.bf16.mxu0 %v16937_v41 }
0x16c0   :  { %v4175_v59 = vmax.f32 %v4087_v22, 0.0  ;;  %v14209_v58 = vpop.f32.mrb[220].mxu0  ;;  %11011 = vmatmul.mubr.msk.f32.gmra.mrb[124].mxu0 %vm126_vm1, %v10883_v53  ;;  %v4767_v30 = vand.u32 1, %v4671_v60 }
0x16c1   :  { %v4207_v32 = vpack.c.bf16 %v4177_v8, %v4176_v2  ;;  %v14212_v52 = vpop.f32.mrb[221].mxu0  ;;  %5983 = vmatprep.mubr.f32.mxu0 %v16935_v61  ;;  %v4766_v8 = vand.u32 1, %v4670_v44 }
0x16c2   :  { %v4206_v12 = vpack.c.bf16 %v4175_v59, %v4174_v4  ;;  %v14217_v51 = vpop.f32.mrb[222].mxu0  ;;  %vm4863_vm14 = vcmp.eq.s32.totalorder %v4767_v30, %v16970_v33  ;;  %v10888_v30 = vsel %vm4865_vm0, 1.0, %v16935_v61 }
0x16c3   :  { %v14220_v3 = vpop.f32.mrb[223].mxu0  ;;  %vm4862_vm13 = vcmp.eq.s32.totalorder %v4766_v8, %v16970_v33  ;;  %v10886_v45 = vsel %vm4863_vm14, 1.0, %v16935_v61 }
0x16c4   :  { %11754 = vmatprep.mubr.msk.bf16.mxu1 %vm506_vm8, %v4206_v12  ;;  %v14225_v27 = vpop.f32.mrb[224].mxu0  ;;  %11012 = vmatmul.mubr.msk.f32.gmra.mrb[126].mxu0 %vm126_vm1, %v10884_v48  ;;  %v10885_v5 = vsel %vm4862_vm13, 1.0, %v16935_v61 }
0x16c5   :  { %11755 = vmatmul.mubr.msk.bf16.gmra.mrb[184].mxu1 %vm506_vm8, %v4207_v32  ;;  %v14236_v49 = vpop.f32.mrb[225].mxu0  ;;  %5989 = vmatprep.mubr.f32.mxu0 %v16935_v61 }
0x16c6   :  { %v14242_v13 = vpop.f32.mrb[226].mxu0 }
0x16c7   :  { %v14246_v2 = vpop.f32.mrb[227].mxu0 }
0x16c8   :  { %v14248_v4 = vpop.f32.mrb[228].mxu0  ;;  %11013 = vmatmul.mubr.msk.f32.gmra.mrb[128].mxu0 %vm126_vm1, %v10885_v5 }
0x16c9   :  { %v14254_v59 = vpop.f32.mrb[229].mxu0  ;;  %5995 = vmatprep.mubr.f32.mxu0 %v16935_v61 }
0x16ca   :  { %v11722_v19 = vpop.f32.mrb[156].mxu1  ;;  %v14259_v32 = vpop.f32.mrb[230].mxu0 }
0x16cb   :  { %v4108_v37 = vadd.f32 %v14222_v21, %v11722_v19  ;;  %v4099_v15 = vpop.f32.mrb[157].mxu1  ;;  %v14262_v12 = vpop.f32.mrb[231].mxu0 }
0x16cc   :  { %v4100_v7 = vadd.f32 %v14222_v21, %v4099_v15  ;;  %v11723_v1 = vpop.f32.mrb[158].mxu1  ;;  %v14265_v31 = vpop.f32.mrb[232].mxu0  ;;  %11014 = vmatmul.mubr.msk.f32.gmra.mrb[130].mxu0 %vm126_vm1, %v10886_v45  ;;  %v4676_v45 = vadd.s32 760, %v16969_v57 }
0x16cd   :  { %v4111_v24 = vadd.f32 %v14222_v21, %v11723_v1  ;;  %v4102_v42 = vpop.f32.mrb[159].mxu1  ;;  %v4180_v43 = vmax.f32 %v4108_v37, 0.0  ;;  %v14268_v36 = vpop.f32.mrb[233].mxu0  ;;  %v4674_v37 = vadd.s32 744, %v16969_v57  ;;  %6001 = vmatprep.mubr.f32.mxu0 %v16935_v61 }
0x16ce   :  { %v4103_v16 = vadd.f32 %v14222_v21, %v4102_v42  ;;  %v4178_v14 = vmax.f32 %v4100_v7, 0.0  ;;  %v14272_v0 = vpop.f32.mrb[234].mxu0 }
0x16cf   :  { %v4181_v40 = vmax.f32 %v4111_v24, 0.0  ;;  %v14275_v35 = vpop.f32.mrb[235].mxu0 }
0x16d0   :  { %v4179_v26 = vmax.f32 %v4103_v16, 0.0  ;;  %v14279_v1 = vpop.f32.mrb[236].mxu0 }
0x16d1   :  { %v4209_v23 = vpack.c.bf16 %v4181_v40, %v4180_v43  ;;  %v14283_v53 = vpop.f32.mrb[237].mxu0  ;;  %v10887_v43 = vsel %vm4864_vm15, 1.0, %v16935_v61 }
0x16d2   :  { %v4208_v22 = vpack.c.bf16 %v4179_v26, %v4178_v14  ;;  %v14288_v40 = vpop.f32.mrb[238].mxu0  ;;  %v4770_v14 = vand.u32 1, %v4674_v37  ;;  %v4675_v26 = vadd.s32 752, %v16969_v57  ;;  %11015 = vmatmul.mubr.msk.f32.gmra.mrb[132].mxu0 %vm126_vm1, %v10887_v43 }
0x16d3   :  { %v14293_v44 = vpop.f32.mrb[239].mxu0  ;;  %6007 = vmatprep.mubr.f32.mxu0 %v16935_v61 }
0x16d4   :  { %11758 = vmatprep.mubr.msk.bf16.mxu1 %vm506_vm8, %v4208_v22  ;;  %vm4866_vm5 = vcmp.eq.s32.totalorder %v4770_v14, %v16970_v33  ;;  %v4771_v28 = vand.u32 1, %v4675_v26 }
0x16d5   :  { %11759 = vmatmul.mubr.msk.bf16.gmra.mrb[188].mxu1 %vm506_vm8, %v4209_v23  ;;  %v14295_v23 = vpop.f32.mrb[240].mxu0 }
0x16d6   :  { %v14298_v48 = vpop.f32.mrb[241].mxu0  ;;  %11016 = vmatmul.mubr.msk.f32.gmra.mrb[134].mxu0 %vm126_vm1, %v10888_v30  ;;  %vm4867_vm9 = vcmp.eq.s32.totalorder %v4771_v28, %v16970_v33 }
0x16d7   :  { %16971 = vst [vmem:[#allocation50_spill] sm:$0xff] %v14298_v48  ;;  %v14302_v5 = vpop.f32.mrb[242].mxu0  ;;  %6013 = vmatprep.mubr.f32.mxu0 %v16935_v61 }
0x16d8   :  { %16972 = vst [vmem:[#allocation51_spill] sm:$0xff] %v14302_v5 }
0x16da   :  { %v11726_v19 = vpop.f32.mrb[160].mxu1 }
0x16db   :  { %v4124_v15 = vadd.f32 %v14222_v21, %v11726_v19  ;;  %v4115_v7 = vpop.f32.mrb[161].mxu1  ;;  %v14306_v19 = vpop.f32.mrb[243].mxu0 }
0x16dc   :  { %v4116_v24 = vadd.f32 %v14222_v21, %v4115_v7  ;;  %v11727_v42 = vpop.f32.mrb[162].mxu1  ;;  %16973 = vst [vmem:[#allocation52_spill] sm:$0xff] %v14306_v19  ;;  %v14308_v17 = vpop.f32.mrb[244].mxu0 }
0x16dd   :  { %v4127_v34 = vadd.f32 %v14222_v21, %v11727_v42  ;;  %v4118_v16 = vpop.f32.mrb[163].mxu1  ;;  %v4184_v60 = vmax.f32 %v4124_v15, 0.0  ;;  %16974 = vst [vmem:[#allocation53_spill] sm:$0xff] %v14308_v17  ;;  %v14312_v37 = vpop.f32.mrb[245].mxu0  ;;  %v10889_v15 = vsel %vm4866_vm5, 1.0, %v16935_v61  ;;  %v4677_v42 = vadd.s32 768, %v16969_v57 }
0x16de   :  { %v4119_v50 = vadd.f32 %v14222_v21, %v4118_v16  ;;  %v4182_v29 = vmax.f32 %v4116_v24, 0.0  ;;  %16975 = vst [vmem:[#allocation54_spill] sm:$0xff] %v14312_v37  ;;  %v14317_v7 = vpop.f32.mrb[246].mxu0  ;;  %v4772_v24 = vand.u32 1, %v4676_v45  ;;  %11017 = vmatmul.mubr.msk.f32.gmra.mrb[136].mxu0 %vm126_vm1, %v10889_v15 }
0x16df   :  { %v4185_v63 = vmax.f32 %v4127_v34, 0.0  ;;  %16976 = vst [vmem:[#allocation55_spill] sm:$0xff] %v14317_v7  ;;  %v14321_v34 = vpop.f32.mrb[247].mxu0  ;;  %6019 = vmatprep.mubr.f32.mxu0 %v16935_v61 }
0x16e0   :  { %v4183_v22 = vmax.f32 %v4119_v50, 0.0  ;;  %16977 = vst [vmem:[#allocation56_spill] sm:$0xff] %v14321_v34  ;;  %v14323_v16 = vpop.f32.mrb[248].mxu0  ;;  %v10890_v50 = vsel %vm4867_vm9, 1.0, %v16935_v61  ;;  %vm4868_vm10 = vcmp.eq.s32.totalorder %v4772_v24, %v16970_v33 }
0x16e1   :  { %v4211_v8 = vpack.c.bf16 %v4185_v63, %v4184_v60  ;;  %16978 = vst [vmem:[#allocation57_spill] sm:$0xff] %v14323_v16  ;;  %v14326_v43 = vpop.f32.mrb[249].mxu0  ;;  %v4773_v60 = vand.u32 1, %v4677_v42  ;;  %v4678_v63 = vadd.s32 776, %v16969_v57  ;;  %v10891_v15 = vsel %vm4868_vm10, 1.0, %v16935_v61 }
0x16e2   :  { %v4210_v55 = vpack.c.bf16 %v4183_v22, %v4182_v29  ;;  %16979 = vst [vmem:[#allocation58_spill] sm:$0xff] %v14326_v43  ;;  %v14330_v14 = vpop.f32.mrb[250].mxu0  ;;  %11018 = vmatmul.mubr.msk.f32.gmra.mrb[138].mxu0 %vm126_vm1, %v10890_v50 }
0x16e3   :  { %16980 = vst [vmem:[#allocation18_spill] sm:$0xff] %v14330_v14  ;;  %v14334_v29 = vpop.f32.mrb[251].mxu0  ;;  %6025 = vmatprep.mubr.f32.mxu0 %v16935_v61  ;;  %vm4869_vm11 = vcmp.eq.s32.totalorder %v4773_v60, %v16970_v33  ;;  %v4774_v42 = vand.u32 1, %v4678_v63  ;;  %v4680_v60 = vadd.s32 792, %v16969_v57 }
0x16e4   :  { %11762 = vmatprep.mubr.msk.bf16.mxu1 %vm506_vm8, %v4210_v55  ;;  %16981 = vst [vmem:[#allocation19_spill] sm:$0xff] %v14334_v29 }
0x16e5   :  { %11763 = vmatmul.mubr.msk.bf16.gmra.mrb[192].mxu1 %vm506_vm8, %v4211_v8  ;;  %vm4870_vm12 = vcmp.eq.s32.totalorder %v4774_v42, %v16970_v33  ;;  %v4776_v63 = vand.u32 1, %v4680_v60 }
0x16e6   :  { %11019 = vmatmul.mubr.msk.f32.gmra.mrb[140].mxu0 %vm126_vm1, %v10891_v15 }
0x16e7   :  { %6031 = vmatprep.mubr.f32.mxu0 %v16935_v61  ;;  %vm4872_vm14 = vcmp.eq.s32.totalorder %v4776_v63, %v16970_v33  ;;  %v14369_v63 = vld [vmem:[#allocation10 + $0x5] ss:$0 sm:$0xff] }
0x16ea   :  { %v11730_v26 = vpop.f32.mrb[164].mxu1 }
0x16eb   :  { %v4140_v22 = vadd.f32 %v14222_v21, %v11730_v26  ;;  %v4131_v8 = vpop.f32.mrb[165].mxu1  ;;  %v4679_v26 = vadd.s32 784, %v16969_v57 }
0x16ec   :  { %v4132_v30 = vadd.f32 %v14222_v21, %v4131_v8  ;;  %v11731_v55 = vpop.f32.mrb[166].mxu1 }
0x16ed   :  { %v4143_v28 = vadd.f32 %v14222_v21, %v11731_v55  ;;  %v4134_v45 = vpop.f32.mrb[167].mxu1  ;;  %v4188_v29 = vmax.f32 %v4140_v22, 0.0  ;;  %v10892_v55 = vsel %vm4869_vm11, 1.0, %v16935_v61 }
0x16ee   :  { %v4135_v24 = vadd.f32 %v14222_v21, %v4134_v45  ;;  %v4186_v8 = vmax.f32 %v4132_v30, 0.0  ;;  %v4775_v45 = vand.u32 1, %v4679_v26  ;;  %11020 = vmatmul.mubr.msk.f32.gmra.mrb[144].mxu0 %vm126_vm1, %v10892_v55 }
0x16ef   :  { %v4189_v14 = vmax.f32 %v4143_v28, 0.0  ;;  %6037 = vmatprep.mubr.f32.mxu0 %v16935_v61 }
0x16f0   :  { %v4187_v43 = vmax.f32 %v4135_v24, 0.0  ;;  %vm4871_vm13 = vcmp.eq.s32.totalorder %v4775_v45, %v16970_v33 }
0x16f1   :  { %v4213_v50 = vpack.c.bf16 %v4189_v14, %v4188_v29  ;;  %v10893_v14 = vsel %vm4870_vm12, 1.0, %v16935_v61  ;;  %v10894_v29 = vsel %vm4871_vm13, 1.0, %v16935_v61 }
0x16f2   :  { %v4212_v16 = vpack.c.bf16 %v4187_v43, %v4186_v8  ;;  %v4681_v43 = vadd.s32 800, %v16969_v57  ;;  %11021 = vmatmul.mubr.msk.f32.gmra.mrb[146].mxu0 %vm126_vm1, %v10893_v14  ;;  %v10895_v8 = vsel %vm4872_vm14, 1.0, %v16935_v61 }
0x16f3   :  { %6043 = vmatprep.mubr.f32.mxu0 %v16935_v61 }
0x16f4   :  { %11766 = vmatprep.mubr.msk.bf16.mxu1 %vm506_vm8, %v4212_v16  ;;  %v4777_v22 = vand.u32 1, %v4681_v43 }
0x16f5   :  { %11767 = vmatmul.mubr.msk.bf16.gmra.mrb[196].mxu1 %vm506_vm8, %v4213_v50 }
0x16f6   :  { %11022 = vmatmul.mubr.msk.f32.gmra.mrb[148].mxu0 %vm126_vm1, %v10894_v29  ;;  %vm4873_vm15 = vcmp.eq.s32.totalorder %v4777_v22, %v16970_v33 }
0x16f7   :  { %6049 = vmatprep.mubr.f32.mxu0 %v16935_v61  ;;  %v10896_v29 = vsel %vm4873_vm15, 1.0, %v16935_v61 }
0x16fa   :  { %v11734_v16 = vpop.f32.mrb[168].mxu1  ;;  %11023 = vmatmul.mubr.msk.f32.gmra.mrb[150].mxu0 %vm126_vm1, %v10895_v8 }
0x16fb   :  { %v4156_v30 = vadd.f32 %v14222_v21, %v11734_v16  ;;  %v4147_v28 = vpop.f32.mrb[169].mxu1  ;;  %6055 = vmatprep.mubr.f32.mxu0 %v16935_v61  ;;  %v4682_v16 = vadd.s32 808, %v16969_v57 }
0x16fc   :  { %v4148_v15 = vadd.f32 %v14222_v21, %v4147_v28  ;;  %v11735_v24 = vpop.f32.mrb[170].mxu1 }
0x16fd   :  { %v4159_v42 = vadd.f32 %v14222_v21, %v11735_v24  ;;  %v4150_v26 = vpop.f32.mrb[171].mxu1  ;;  %v4192_v55 = vmax.f32 %v4156_v30, 0.0  ;;  %v4778_v30 = vand.u32 1, %v4682_v16 }
0x16fe   :  { %v4151_v50 = vadd.f32 %v14222_v21, %v4150_v26  ;;  %v4190_v60 = vmax.f32 %v4148_v15, 0.0  ;;  %11024 = vmatmul.mubr.msk.f32.gmra.mrb[152].mxu0 %vm126_vm1, %v10896_v29  ;;  %v4684_v29 = vadd.s32 824, %v16969_v57 }
0x16ff   :  { %v4193_v45 = vmax.f32 %v4159_v42, 0.0  ;;  %6061 = vmatprep.mubr.f32.mxu0 %v16935_v61  ;;  %vm4874_vm0 = vcmp.eq.s32.totalorder %v4778_v30, %v16970_v33 }
0x1700   :  { %v4191_v14 = vmax.f32 %v4151_v50, 0.0  ;;  %v4683_v50 = vadd.s32 816, %v16969_v57 }
0x1701   :  { %v4215_v43 = vpack.c.bf16 %v4193_v45, %v4192_v55  ;;  %v10897_v45 = vsel %vm4874_vm0, 1.0, %v16935_v61 }
0x1702   :  { %v4214_v28 = vpack.c.bf16 %v4191_v14, %v4190_v60  ;;  %v11744_v24 = vpop.f32.mrb[172].mxu1  ;;  %v14387_v60 = vpop.f32.mrb[252].mxu0  ;;  %v4779_v14 = vand.u32 1, %v4683_v50  ;;  %11025 = vmatmul.mubr.msk.f32.gmra.mrb[154].mxu0 %vm126_vm1, %v10897_v45 }
0x1703   :  { %v4333_v21 = vadd.f32 %v11744_v24, %v14369_v63  ;;  %v4324_v22 = vpop.f32.mrb[173].mxu1  ;;  %16982 = vst [vmem:[#allocation20_spill] sm:$0xff] %v14387_v60  ;;  %v14392_v16 = vpop.f32.mrb[253].mxu0  ;;  %6067 = vmatprep.mubr.f32.mxu0 %v16935_v61  ;;  %v4780_v24 = vand.u32 1, %v4684_v29 }
0x1704   :  { %v4325_v15 = vadd.f32 %v14369_v63, %v4324_v22  ;;  %v11745_v42 = vpop.f32.mrb[174].mxu1  ;;  %11770 = vmatprep.mubr.msk.bf16.mxu1 %vm506_vm8, %v4214_v28  ;;  %16983 = vst [vmem:[#allocation21_spill] sm:$0xff] %v14392_v16  ;;  %vm4875_vm5 = vcmp.eq.s32.totalorder %v4779_v14, %v16970_v33  ;;  %v14396_v28 = vpop.f32.mrb[254].mxu0 }
0x1705   :  { %12245 = vtanh.f32 %v4333_v21  ;;  %v4336_v26 = vadd.f32 %v11745_v42, %v14369_v63  ;;  %v4327_v8 = vpop.f32.mrb[175].mxu1  ;;  %11771 = vmatmul.mubr.msk.bf16.gmra.mrb[200].mxu1 %vm506_vm8, %v4215_v43  ;;  %v4685_v43 = vadd.s32 832, %v16969_v57  ;;  %16984 = vst [vmem:[#allocation22_spill] sm:$0xff] %v14396_v28  ;;  %v10898_v21 = vsel %vm4875_vm5, 1.0, %v16935_v61  ;;  %v14399_v22 = vpop.f32.mrb[255].mxu0 }
0x1706   :  { %12247 = vtanh.f32 %v4325_v15  ;;  %v4328_v55 = vadd.f32 %v14369_v63, %v4327_v8  ;;  %6461 = vmatprep.mubr.bf16.mxu1 %v16937_v41  ;;  %16985 = vst [vmem:[#allocation23_spill] sm:$0xff] %v14399_v22  ;;  %v4686_v15 = vadd.s32 840, %v16969_v57  ;;  %vm4876_vm9 = vcmp.eq.s32.totalorder %v4780_v24, %v16970_v33  ;;  %v14403_v42 = vpop.f32.mrb[0].mxu0  ;;  %11026 = vmatmul.mubr.msk.f32.gmra.mrb[156].mxu0 %vm126_vm1, %v10898_v21 }
0x1707   :  { %12249 = vtanh.f32 %v4336_v26  ;;  %v4781_v30 = vand.u32 1, %v4685_v43  ;;  %16986 = vst [vmem:[#allocation24_spill] sm:$0xff] %v14403_v42  ;;  %v14406_v26 = vpop.f32.mrb[1].mxu0  ;;  %6073 = vmatprep.mubr.f32.mxu0 %v16935_v61  ;;  %v10899_v8 = vsel %vm4876_vm9, 1.0, %v16935_v61 }
0x1708   :  { %12251 = vtanh.f32 %v4328_v55  ;;  %16987 = vst [vmem:[#allocation25_spill] sm:$0xff] %v14406_v26  ;;  %v14410_v50 = vpop.f32.mrb[4].mxu0  ;;  %v4782_v45 = vand.u32 1, %v4686_v15  ;;  %v4687_v15 = vadd.s32 848, %v16969_v57 }
0x1709   :  { %16988 = vst [vmem:[#allocation26_spill] sm:$0xff] %v14410_v50  ;;  %vm4877_vm10 = vcmp.eq.s32.totalorder %v4781_v30, %v16970_v33  ;;  %v14413_v55 = vpop.f32.mrb[5].mxu0 }
0x170a   :  { %16989 = vst [vmem:[#allocation27_spill] sm:$0xff] %v14413_v55  ;;  %11027 = vmatmul.mubr.msk.f32.gmra.mrb[158].mxu0 %vm126_vm1, %v10899_v8  ;;  %v10900_v24 = vsel %vm4877_vm10, 1.0, %v16935_v61  ;;  %vm4878_vm11 = vcmp.eq.s32.totalorder %v4782_v45, %v16970_v33  ;;  %v14434_v8 = vpop.f32.mrb[6].mxu0  ;;  %v4783_v45 = vand.u32 1, %v4687_v15 }
0x170b   :  { %6079 = vmatprep.mubr.f32.mxu0 %v16935_v61  ;;  %v10901_v30 = vsel %vm4878_vm11, 1.0, %v16935_v61  ;;  %16990 = vst [vmem:[#allocation28_spill] sm:$0xff] %v14434_v8 }
0x170c   :  { %vm4879_vm12 = vcmp.eq.s32.totalorder %v4783_v45, %v16970_v33 }
0x170e   :  { %11028 = vmatmul.mubr.msk.f32.gmra.mrb[160].mxu0 %vm126_vm1, %v10900_v24 }
0x170f   :  { %v12246_v14 = vpop.eup %12245  ;;  %6085 = vmatprep.mubr.f32.mxu0 %v16935_v61 }
0x1710   :  { %v12248_v29 = vpop.eup %12247 }
0x1711   :  { %v12250_v43 = vpop.eup %12249 }
0x1712   :  { %v12252_v21 = vpop.eup %12251  ;;  %v14418_v26 = vpack.c.bf16 %v12250_v43, %v12246_v14  ;;  %11029 = vmatmul.mubr.msk.f32.gmra.mrb[162].mxu0 %vm126_vm1, %v10901_v30  ;;  %v14437_v14 = vpop.f32.mrb[7].mxu0  ;;  %v10902_v43 = vsel %vm4879_vm12, 1.0, %v16935_v61  ;;  %v4689_v30 = vadd.s32 864, %v16969_v57 }
0x1713   :  { %v14421_v50 = vpack.c.bf16 %v12252_v21, %v12248_v29  ;;  %16991 = vst [vmem:[#allocation29_spill] sm:$0xff] %v14437_v14  ;;  %6091 = vmatprep.mubr.f32.mxu0 %v16935_v61  ;;  %v4688_v29 = vadd.s32 856, %v16969_v57  ;;  %v14443_v24 = vpop.f32.mrb[8].mxu0 }
0x1714   :  { %4517 = vrot.lane.b32.xlu0 %v14418_v26, %s12726_s15  ;;  %16992 = vst [vmem:[#allocation30_spill] sm:$0xff] %v14443_v24  ;;  %v14446_v55 = vpop.f32.mrb[9].mxu0 }
0x1715   :  { %4515 = vrot.lane.b32.xlu1 %v14421_v50, %s12726_s15  ;;  %11056 = vmatmul.mubr.msk.bf16.vlgmr.msra.gmra.mrb[204].mxu1 %vm213_vm2, %v14421_v50  ;;  %v4784_v21 = vand.u32 1, %v4688_v29  ;;  %16993 = vst [vmem:[#allocation31_spill] sm:$0xff] %v14446_v55  ;;  %v14455_v45 = vpop.f32.mrb[10].mxu0  ;;  %v4690_v29 = vadd.s32 872, %v16969_v57  ;;  %v4785_v55 = vand.u32 1, %v4689_v30 }
0x1716   :  { %6471 = vmatprep.mubr.bf16.mxu1 %v16937_v41  ;;  %11030 = vmatmul.mubr.msk.f32.gmra.mrb[164].mxu0 %vm126_vm1, %v10902_v43  ;;  %16994 = vst [vmem:[#allocation32_spill] sm:$0xff] %v14455_v45  ;;  %v14458_v43 = vpop.f32.mrb[11].mxu0 }
0x1717   :  { %6097 = vmatprep.mubr.f32.mxu0 %v16935_v61  ;;  %vm4880_vm13 = vcmp.eq.s32.totalorder %v4784_v21, %v16970_v33  ;;  %16995 = vst [vmem:[#allocation33_spill] sm:$0xff] %v14458_v43  ;;  %v14461_v24 = vpop.f32.mrb[12].mxu0  ;;  %v4786_v14 = vand.u32 1, %v4690_v29  ;;  %vm4881_vm14 = vcmp.eq.s32.totalorder %v4785_v55, %v16970_v33 }
0x1718   :  { %v10903_v15 = vsel %vm4880_vm13, 1.0, %v16935_v61  ;;  %16996 = vst [vmem:[#allocation34_spill] sm:$0xff] %v14461_v24  ;;  %v14465_v21 = vpop.f32.mrb[13].mxu0  ;;  %v10904_v8 = vsel %vm4881_vm14, 1.0, %v16935_v61 }
0x1719   :  { %16997 = vst [vmem:[#allocation35_spill] sm:$0xff] %v14465_v21  ;;  %vm4882_vm15 = vcmp.eq.s32.totalorder %v4786_v14, %v16970_v33  ;;  %v14475_v21 = vpop.f32.mrb[14].mxu0 }
0x171a   :  { %11031 = vmatmul.mubr.msk.f32.gmra.mrb[166].mxu0 %vm126_vm1, %v10903_v15  ;;  %v10905_v30 = vsel %vm4882_vm15, 1.0, %v16935_v61  ;;  %v4691_v15 = vadd.s32 880, %v16969_v57  ;;  %16998 = vst [vmem:[#allocation36_spill] sm:$0xff] %v14475_v21  ;;  %v14479_v22 = vpop.f32.mrb[15].mxu0 }
0x171b   :  { %6103 = vmatprep.mubr.f32.mxu0 %v16935_v61  ;;  %16999 = vst [vmem:[#allocation37_spill] sm:$0xff] %v14479_v22 }
0x171c   :  { %v4787_v42 = vand.u32 1, %v4691_v15  ;;  %v14486_v15 = vpop.f32.mrb[16].mxu0 }
0x171d   :  { %11057 = vmatmul.mubr.msk.bf16.gmra.mrb[208].mxu1 %vm213_vm2, %v14418_v26  ;;  %17000 = vst [vmem:[#allocation38_spill] sm:$0xff] %v14486_v15 }
0x171e   :  { %6481 = vmatprep.mubr.bf16.mxu1 %v16937_v41  ;;  %11032 = vmatmul.mubr.msk.f32.gmra.mrb[168].mxu0 %vm126_vm1, %v10904_v8  ;;  %vm4883_vm0 = vcmp.eq.s32.totalorder %v4787_v42, %v16970_v33 }
0x171f   :  { %6109 = vmatprep.mubr.f32.mxu0 %v16935_v61 }
0x1722   :  { %11033 = vmatmul.mubr.msk.f32.gmra.mrb[170].mxu0 %vm126_vm1, %v10905_v30  ;;  %v14489_v30 = vpop.f32.mrb[17].mxu0 }
0x1723   :  { %6115 = vmatprep.mubr.f32.mxu0 %v16935_v61  ;;  %17001 = vst [vmem:[#allocation39_spill] sm:$0xff] %v14489_v30 }
0x1725   :  { %v11748_v45 = vpop.f32.mrb[176].mxu1 }
0x1726   :  { %v4349_v29 = vadd.f32 %v11748_v45, %v14369_v63  ;;  %v4340_v24 = vpop.f32.mrb[177].mxu1  ;;  %v10906_v45 = vsel %vm4883_vm0, 1.0, %v16935_v61 }
0x1727   :  { %v4341_v55 = vadd.f32 %v14369_v63, %v4340_v24  ;;  %v11749_v43 = vpop.f32.mrb[178].mxu1  ;;  %v4692_v24 = vadd.s32 888, %v16969_v57  ;;  %11034 = vmatmul.mubr.msk.f32.gmra.mrb[172].mxu0 %vm126_vm1, %v10906_v45 }
0x1728   :  { %12253 = vtanh.f32 %v4349_v29  ;;  %v4352_v14 = vadd.f32 %v11749_v43, %v14369_v63  ;;  %v4343_v8 = vpop.f32.mrb[179].mxu1  ;;  %6121 = vmatprep.mubr.f32.mxu0 %v16935_v61  ;;  %v4693_v29 = vadd.s32 896, %v16969_v57 }
0x1729   :  { %12255 = vtanh.f32 %v4341_v55  ;;  %v4344_v28 = vadd.f32 %v14369_v63, %v4343_v8  ;;  %v4788_v43 = vand.u32 1, %v4692_v24  ;;  %v14495_v55 = vpop.f32.mrb[18].mxu0  ;;  %v4694_v24 = vadd.s32 904, %v16969_v57 }
0x172a   :  { %12257 = vtanh.f32 %v4352_v14  ;;  %17002 = vst [vmem:[#allocation40_spill] sm:$0xff] %v14495_v55  ;;  %v12202_v14 = vld [vmem:[#allocation2 + $0x1c8] sm:$0xff]   ;;  %v14497_v8 = vpop.f32.mrb[19].mxu0 }
0x172b   :  { %12259 = vtanh.f32 %v4344_v28  ;;  %vm4884_vm5 = vcmp.eq.s32.totalorder %v4788_v43, %v16970_v33  ;;  %17003 = vst [vmem:[#allocation41_spill] sm:$0xff] %v14497_v8  ;;  %v4789_v28 = vand.u32 1, %v4693_v29  ;;  %7771 = vmatpush1.bf16.msra.mxu0 %v12202_v14  ;;  %v14505_v55 = vpop.f32.mrb[20].mxu0  ;;  %v4790_v15 = vand.u32 1, %v4694_v24 }
0x172c   :  { %v10907_v42 = vsel %vm4884_vm5, 1.0, %v16935_v61  ;;  %7772 = vmatprep.subr.bf16.mxu0 %v16937_v41  ;;  %17004 = vst [vmem:[#allocation42_spill] sm:$0xff] %v14505_v55  ;;  %v14508_v29 = vpop.f32.mrb[21].mxu0 }
0x172d   :  { %11035 = vmatmul.mubr.msk.f32.gmra.mrb[174].mxu0 %vm126_vm1, %v10907_v42  ;;  %vm4885_vm9 = vcmp.eq.s32.totalorder %v4789_v28, %v16970_v33  ;;  %17005 = vst [vmem:[#allocation43_spill] sm:$0xff] %v14508_v29  ;;  %vm4886_vm10 = vcmp.eq.s32.totalorder %v4790_v15, %v16970_v33  ;;  %v4695_v28 = vadd.s32 912, %v16969_v57 }
0x172e   :  { %6127 = vmatprep.mubr.f32.mxu0 %v16935_v61  ;;  %v10908_v43 = vsel %vm4885_vm9, 1.0, %v16935_v61  ;;  %v10909_v24 = vsel %vm4886_vm10, 1.0, %v16935_v61 }
0x172f   :  { %v4791_v29 = vand.u32 1, %v4695_v28 }
0x1731   :  { %11036 = vmatmul.mubr.msk.f32.gmra.mrb[176].mxu0 %vm126_vm1, %v10908_v43  ;;  %vm4887_vm11 = vcmp.eq.s32.totalorder %v4791_v29, %v16970_v33 }
0x1732   :  { %v12254_v45 = vpop.eup %12253  ;;  %6133 = vmatprep.mubr.f32.mxu0 %v16935_v61 }
0x1733   :  { %v12256_v30 = vpop.eup %12255 }
0x1734   :  { %v12258_v8 = vpop.eup %12257 }
0x1735   :  { %v12260_v42 = vpop.eup %12259  ;;  %v11752_v14 = vpop.f32.mrb[180].mxu1  ;;  %v14510_v22 = vpack.c.bf16 %v12258_v8, %v12254_v45  ;;  %11037 = vmatmul.mubr.msk.f32.gmra.mrb[178].mxu0 %vm126_vm1, %v10909_v24 }
0x1736   :  { %v4365_v21 = vadd.f32 %v11752_v14, %v14369_v63  ;;  %v4356_v16 = vpop.f32.mrb[181].mxu1  ;;  %v14516_v55 = vpack.c.bf16 %v12260_v42, %v12256_v30  ;;  %v14522_v45 = vpop.f32.mrb[22].mxu0  ;;  %6139 = vmatprep.mubr.f32.mxu0 %v16935_v61  ;;  %v10910_v42 = vsel %vm4887_vm11, 1.0, %v16935_v61 }
0x1737   :  { %v4357_v43 = vadd.f32 %v14369_v63, %v4356_v16  ;;  %4521 = vrot.lane.b32.xlu0 %v14510_v22, %s12726_s15  ;;  %v11753_v8 = vpop.f32.mrb[182].mxu1  ;;  %17006 = vst [vmem:[#allocation44_spill] sm:$0xff] %v14522_v45  ;;  %v14529_v30 = vpop.f32.mrb[23].mxu0 }
0x1738   :  { %12261 = vtanh.f32 %v4365_v21  ;;  %v4368_v15 = vadd.f32 %v11753_v8, %v14369_v63  ;;  %v4359_v60 = vpop.f32.mrb[183].mxu1  ;;  %4519 = vrot.lane.b32.xlu1 %v14516_v55, %s12726_s15  ;;  %11058 = vmatmul.mubr.msk.bf16.gmra.mrb[212].mxu1 %vm213_vm2, %v14516_v55  ;;  %17007 = vst [vmem:[#allocation45_spill] sm:$0xff] %v14529_v30  ;;  %v4696_v21 = vadd.s32 920, %v16969_v57  ;;  %v14538_v14 = vpop.f32.mrb[2].mxu0 }
0x1739   :  { %12263 = vtanh.f32 %v4357_v43  ;;  %v4360_v16 = vadd.f32 %v14369_v63, %v4359_v60  ;;  %6491 = vmatprep.mubr.bf16.mxu1 %v16937_v41  ;;  %17008 = vst [vmem:[#allocation46_spill] sm:$0xff] %v14538_v14  ;;  %v14540_v43 = vpop.f32.mrb[3].mxu0  ;;  %11038 = vmatmul.mubr.msk.f32.gmra.mrb[180].mxu0 %vm126_vm1, %v10910_v42  ;;  %v4697_v60 = vadd.s32 928, %v16969_v57 }
0x173a   :  { %12265 = vtanh.f32 %v4368_v15  ;;  %v4792_v28 = vand.u32 1, %v4696_v21  ;;  %17009 = vst [vmem:[#allocation47_spill] sm:$0xff] %v14540_v43  ;;  %6145 = vmatprep.mubr.f32.mxu0 %v16935_v61  ;;  %v14547_v24 = vpop.f32.mrb[24].mxu0 }
0x173b   :  { %12267 = vtanh.f32 %v4360_v16  ;;  %17010 = vst [vmem:[#allocation48_spill] sm:$0xff] %v14547_v24  ;;  %v14549_v8 = vpop.f32.mrb[25].mxu0  ;;  %v4793_v15 = vand.u32 1, %v4697_v60  ;;  %v4698_v16 = vadd.s32 936, %v16969_v57 }
0x173c   :  { %vm4888_vm12 = vcmp.eq.s32.totalorder %v4792_v28, %v16970_v33  ;;  %17011 = vst [vmem:[#allocation49_spill] sm:$0xff] %v14549_v8  ;;  %v14559_v24 = vpop.f32.mrb[28].mxu0 }
0x173d   :  { %v10911_v29 = vsel %vm4888_vm12, 1.0, %v16935_v61  ;;  %vm4889_vm13 = vcmp.eq.s32.totalorder %v4793_v15, %v16970_v33  ;;  %17012 = vst [vmem:[#allocation16_spill] sm:$0xff] %v14559_v24  ;;  %v4794_v60 = vand.u32 1, %v4698_v16  ;;  %v14561_v43 = vpop.f32.mrb[29].mxu0 }
0x173e   :  { %11039 = vmatmul.mubr.msk.f32.gmra.mrb[182].mxu0 %vm126_vm1, %v10911_v29  ;;  %v10912_v42 = vsel %vm4889_vm13, 1.0, %v16935_v61  ;;  %17013 = vst [vmem:[#allocation17_spill] sm:$0xff] %v14561_v43  ;;  %v4699_v29 = vadd.s32 944, %v16969_v57  ;;  %v14574_v16 = vpop.f32.mrb[30].mxu0 }
0x173f   :  { %6151 = vmatprep.mubr.f32.mxu0 %v16935_v61  ;;  %vm4890_vm14 = vcmp.eq.s32.totalorder %v4794_v60, %v16970_v33  ;;  %17014 = vst [vmem:[#allocation59_spill] sm:$0xff] %v14574_v16 }
0x1740   :  { %11059 = vmatmul.mubr.msk.bf16.gmra.mrb[216].mxu1 %vm213_vm2, %v14510_v22  ;;  %v10913_v45 = vsel %vm4890_vm14, 1.0, %v16935_v61  ;;  %v4795_v43 = vand.u32 1, %v4699_v29  ;;  %v4701_v29 = vadd.s32 960, %v16969_v57 }
0x1741   :  { %6501 = vmatprep.mubr.bf16.mxu1 %v16937_v41 }
0x1742   :  { %v12262_v21 = vpop.eup %12261  ;;  %11040 = vmatmul.mubr.msk.f32.gmra.mrb[184].mxu0 %vm126_vm1, %v10912_v42  ;;  %vm4891_vm15 = vcmp.eq.s32.totalorder %v4795_v43, %v16970_v33  ;;  %v4797_v16 = vand.u32 1, %v4701_v29  ;;  %v4703_v29 = vadd.s32 976, %v16969_v57 }
0x1743   :  { %v12264_v28 = vpop.eup %12263  ;;  %6157 = vmatprep.mubr.f32.mxu0 %v16935_v61 }
0x1744   :  { %v12266_v8 = vpop.eup %12265  ;;  %vm4893_vm5 = vcmp.eq.s32.totalorder %v4797_v16, %v16970_v33 }
0x1745   :  { %v12268_v14 = vpop.eup %12267  ;;  %v14563_v30 = vpack.c.bf16 %v12266_v8, %v12262_v21  ;;  %v14580_v8 = vpop.f32.mrb[31].mxu0  ;;  %v10914_v21 = vsel %vm4891_vm15, 1.0, %v16935_v61 }
0x1746   :  { %v14568_v15 = vpack.c.bf16 %v12268_v14, %v12264_v28  ;;  %17015 = vst [vmem:[#allocation60_spill] sm:$0xff] %v14580_v8  ;;  %11041 = vmatmul.mubr.msk.f32.gmra.mrb[186].mxu0 %vm126_vm1, %v10913_v45  ;;  %v4700_v14 = vadd.s32 952, %v16969_v57  ;;  %v14588_v42 = vpop.f32.mrb[32].mxu0 }
0x1747   :  { %4525 = vrot.lane.b32.xlu0 %v14563_v30, %s12726_s15  ;;  %6163 = vmatprep.mubr.f32.mxu0 %v16935_v61  ;;  %17016 = vst [vmem:[#allocation61_spill] sm:$0xff] %v14588_v42  ;;  %v14590_v60 = vpop.f32.mrb[33].mxu0 }
0x1748   :  { %4523 = vrot.lane.b32.xlu1 %v14568_v15, %s12726_s15  ;;  %11060 = vmatmul.mubr.msk.bf16.gmra.mrb[220].mxu1 %vm213_vm2, %v14568_v15  ;;  %v4796_v28 = vand.u32 1, %v4700_v14  ;;  %17017 = vst [vmem:[#allocation62_spill] sm:$0xff] %v14590_v60  ;;  %v14597_v43 = vpop.f32.mrb[34].mxu0  ;;  %v4702_v14 = vadd.s32 968, %v16969_v57  ;;  %v4799_v60 = vand.u32 1, %v4703_v29  ;;  %v4705_v29 = vadd.s32 992, %v16969_v57 }
0x1749   :  { %6511 = vmatprep.mubr.bf16.mxu1 %v16937_v41  ;;  %17018 = vst [vmem:[#allocation63_spill] sm:$0xff] %v14597_v43  ;;  %v14599_v8 = vpop.f32.mrb[35].mxu0 }
0x174a   :  { %11042 = vmatmul.mubr.msk.f32.gmra.mrb[188].mxu0 %vm126_vm1, %v10914_v21  ;;  %vm4892_vm0 = vcmp.eq.s32.totalorder %v4796_v28, %v16970_v33  ;;  %17019 = vst [vmem:[#allocation64_spill] sm:$0xff] %v14599_v8  ;;  %v10916_v21 = vsel %vm4893_vm5, 1.0, %v16935_v61  ;;  %v14609_v28 = vpop.f32.mrb[36].mxu0  ;;  %v4798_v43 = vand.u32 1, %v4702_v14  ;;  %vm4895_vm10 = vcmp.eq.s32.totalorder %v4799_v60, %v16970_v33 }
0x174b   :  { %6169 = vmatprep.mubr.f32.mxu0 %v16935_v61  ;;  %v10915_v45 = vsel %vm4892_vm0, 1.0, %v16935_v61  ;;  %17020 = vst [vmem:[#allocation65_spill] sm:$0xff] %v14609_v28  ;;  %v14611_v8 = vpop.f32.mrb[37].mxu0  ;;  %v4704_v14 = vadd.s32 984, %v16969_v57 }
0x174c   :  { %17021 = vst [vmem:[#allocation66_spill] sm:$0xff] %v14611_v8  ;;  %vm4894_vm9 = vcmp.eq.s32.totalorder %v4798_v43, %v16970_v33  ;;  %v10918_v43 = vsel %vm4895_vm10, 1.0, %v16935_v61 }
0x174d   :  { %v10917_v16 = vsel %vm4894_vm9, 1.0, %v16935_v61  ;;  %v4800_v8 = vand.u32 1, %v4704_v14  ;;  %v4706_v14 = vadd.s32 1000, %v16969_v57 }
0x174e   :  { %11043 = vmatmul.mubr.msk.f32.gmra.mrb[190].mxu0 %vm126_vm1, %v10915_v45  ;;  %v14618_v45 = vpop.f32.mrb[38].mxu0 }
0x174f   :  { %6175 = vmatprep.mubr.f32.mxu0 %v16935_v61  ;;  %17022 = vst [vmem:[#allocation67_spill] sm:$0xff] %v14618_v45  ;;  %v14620_v42 = vpop.f32.mrb[39].mxu0  ;;  %vm4896_vm11 = vcmp.eq.s32.totalorder %v4800_v8, %v16970_v33  ;;  %v4801_v45 = vand.u32 1, %v4705_v29 }
0x1750   :  { %11061 = vmatmul.mubr.msk.bf16.gmra.mrb[224].mxu1 %vm213_vm2, %v14563_v30  ;;  %17023 = vst [vmem:[#allocation68_spill] sm:$0xff] %v14620_v42  ;;  %v10919_v60 = vsel %vm4896_vm11, 1.0, %v16935_v61 }
0x1751   :  { %6521 = vmatprep.mubr.bf16.mxu1 %v16937_v41  ;;  %vm4897_vm12 = vcmp.eq.s32.totalorder %v4801_v45, %v16970_v33 }
0x1752   :  { %11044 = vmatmul.mubr.msk.f32.gmra.mrb[192].mxu0 %vm126_vm1, %v10916_v21  ;;  %v14627_v21 = vpop.f32.mrb[40].mxu0  ;;  %v10920_v8 = vsel %vm4897_vm12, 1.0, %v16935_v61 }
0x1753   :  { %6181 = vmatprep.mubr.f32.mxu0 %v16935_v61  ;;  %17024 = vst [vmem:[#allocation69_spill] sm:$0xff] %v14627_v21  ;;  %v14629_v28 = vpop.f32.mrb[41].mxu0 }
0x1754   :  { %17025 = vst [vmem:[#allocation70_spill] sm:$0xff] %v14629_v28  ;;  %v4802_v28 = vand.u32 1, %v4706_v14  ;;  %v4708_v14 = vadd.s32 1016, %v16969_v57 }
0x1756   :  { %11045 = vmatmul.mubr.msk.f32.gmra.mrb[194].mxu0 %vm126_vm1, %v10917_v16  ;;  %v14636_v16 = vpop.f32.mrb[42].mxu0  ;;  %vm4898_vm13 = vcmp.eq.s32.totalorder %v4802_v28, %v16970_v33 }
0x1757   :  { %6187 = vmatprep.mubr.f32.mxu0 %v16935_v61  ;;  %17026 = vst [vmem:[#allocation71_spill] sm:$0xff] %v14636_v16  ;;  %v14638_v42 = vpop.f32.mrb[43].mxu0  ;;  %v10921_v45 = vsel %vm4898_vm13, 1.0, %v16935_v61 }
0x1758   :  { %17027 = vst [vmem:[#allocation72_spill] sm:$0xff] %v14638_v42 }
0x175a   :  { %11046 = vmatmul.mubr.msk.f32.gmra.mrb[196].mxu0 %vm126_vm1, %v10918_v43  ;;  %v14645_v43 = vpop.f32.mrb[44].mxu0 }
0x175b   :  { %6193 = vmatprep.mubr.f32.mxu0 %v16935_v61  ;;  %17028 = vst [vmem:[#allocation73_spill] sm:$0xff] %v14645_v43  ;;  %v14647_v21 = vpop.f32.mrb[45].mxu0 }
0x175c   :  { %17029 = vst [vmem:[#allocation74_spill] sm:$0xff] %v14647_v21  ;;  %v14651_v29 = vpop.f32.mrb[46].mxu0  ;;  %v4804_v21 = vand.u32 1, %v4708_v14 }
0x175d   :  { %17030 = vst [vmem:[#allocation75_spill] sm:$0xff] %v14651_v29  ;;  %v14656_v16 = vpop.f32.mrb[47].mxu0 }
0x175e   :  { %11047 = vmatmul.mubr.msk.f32.gmra.mrb[198].mxu0 %vm126_vm1, %v10919_v60  ;;  %v4707_v60 = vadd.s32 1008, %v16969_v57  ;;  %17031 = vst [vmem:[#allocation76_spill] sm:$0xff] %v14656_v16  ;;  %v14663_v29 = vpop.f32.mrb[26].mxu0  ;;  %vm4900_vm15 = vcmp.eq.s32.totalorder %v4804_v21, %v16970_v33 }
0x175f   :  { %6199 = vmatprep.mubr.f32.mxu0 %v16935_v61  ;;  %17032 = vst [vmem:[#allocation77_spill] sm:$0xff] %v14663_v29  ;;  %v14665_v43 = vpop.f32.mrb[27].mxu0  ;;  %v10923_v57 = vsel %vm4900_vm15, 1.0, %v16935_v61 }
0x1760   :  { %v4803_v42 = vand.u32 1, %v4707_v60  ;;  %17033 = vst [vmem:[#allocation78_spill] sm:$0xff] %v14665_v43  ;;  %v14672_v60 = vpop.f32.mrb[48].mxu0 }
0x1761   :  { %17034 = vst [vmem:[#allocation79_spill] sm:$0xff] %v14672_v60  ;;  %v14675_v14 = vpop.f32.mrb[49].mxu0 }
0x1762   :  { %11048 = vmatmul.mubr.msk.f32.gmra.mrb[200].mxu0 %vm126_vm1, %v10920_v8  ;;  %vm4899_vm14 = vcmp.eq.s32.totalorder %v4803_v42, %v16970_v33  ;;  %v12203_v8 = vld [vmem:[#allocation2 + $0x1d0] sm:$0xff]   ;;  %v12204_v42 = vld [vmem:[#allocation2 + $0x1d8] ss:$0 sps:$4 sm:$0xff]   ;;  %17035 = vst [vmem:[#allocation80_spill] sm:$0xff] %v14675_v14 }
0x1763   :  { %6205 = vmatprep.mubr.f32.mxu0 %v16935_v61  ;;  %v10922_v28 = vsel %vm4899_vm14, 1.0, %v16935_v61  ;;  %7773 = vmatpush1.bf16.msra.mxu0 %v12203_v8  ;;  %v14678_v8 = vpop.f32.mrb[50].mxu0 }
0x1764   :  { %7774 = vmatprep.subr.bf16.mxu0 %v16937_v41  ;;  %17036 = vst [vmem:[#allocation81_spill] sm:$0xff] %v14678_v8 }
0x1766   :  { %11049 = vmatmul.mubr.msk.f32.gmra.mrb[202].mxu0 %vm126_vm1, %v10921_v45  ;;  %v7756_v45 = vsel %vm340_vm3, %v12204_v42, 0 }
0x1767   :  { %6211 = vmatprep.mubr.f32.mxu0 %v16935_v61  ;;  %7775 = vmatpush1.bf16.msra.mxu0 %v7756_v45 }
0x176a   :  { %11050 = vmatmul.mubr.msk.f32.gmra.mrb[204].mxu0 %vm126_vm1, %v10922_v28  ;;  %v14680_v28 = vpop.f32.mrb[51].mxu0 }
0x176b   :  { %6217 = vmatprep.mubr.f32.mxu0 %v16935_v61  ;;  %17037 = vst [vmem:[#allocation82_spill] sm:$0xff] %v14680_v28  ;;  %v14682_v33 = vpop.f32.mrb[52].mxu0 }
0x176c   :  { %17038 = vst [vmem:[#allocation83_spill] sm:$0xff] %v14682_v33  ;;  %v14684_v21 = vpop.f32.mrb[53].mxu0 }
0x176d   :  { %17039 = vst [vmem:[#allocation84_spill] sm:$0xff] %v14684_v21  ;;  %v14686_v43 = vpop.f32.mrb[54].mxu0 }
0x176e   :  { %11051 = vmatmul.mubr.msk.f32.gmra.mrb[206].mxu0 %vm126_vm1, %v10923_v57  ;;  %17040 = vst [vmem:[#allocation85_spill] sm:$0xff] %v14686_v43  ;;  %v14688_v61 = vpop.f32.mrb[55].mxu0 }
0x176f   :  { %17041 = vst [vmem:[#allocation86_spill] sm:$0xff] %v14688_v61  ;;  %v14690_v60 = vpop.f32.mrb[56].mxu0 }
0x1770   :  { %17042 = vst [vmem:[#allocation87_spill] sm:$0xff] %v14690_v60  ;;  %v14692_v42 = vpop.f32.mrb[57].mxu0 }
0x1771   :  { %17043 = vst [vmem:[#allocation88_spill] sm:$0xff] %v14692_v42  ;;  %v14694_v45 = vpop.f32.mrb[58].mxu0 }
0x1772   :  { %17044 = vst [vmem:[#allocation89_spill] sm:$0xff] %v14694_v45  ;;  %v14696_v14 = vpop.f32.mrb[59].mxu0 }
0x1773   :  { %17045 = vst [vmem:[#allocation90_spill] sm:$0xff] %v14696_v14  ;;  %v14698_v57 = vpop.f32.mrb[60].mxu0 }
0x1774   :  { %17046 = vst [vmem:[#allocation91_spill] sm:$0xff] %v14698_v57  ;;  %v14700_v8 = vpop.f32.mrb[61].mxu0 }
0x1775   :  { %17047 = vst [vmem:[#allocation92_spill] sm:$0xff] %v14700_v8  ;;  %v14702_v28 = vpop.f32.mrb[64].mxu0 }
0x1776   :  { %17048 = vst [vmem:[#allocation93_spill] sm:$0xff] %v14702_v28  ;;  %v14704_v33 = vpop.f32.mrb[65].mxu0 }
0x1777   :  { %17049 = vst [vmem:[#allocation94_spill] sm:$0xff] %v14704_v33  ;;  %v14706_v21 = vpop.f32.mrb[66].mxu0 }
0x1778   :  { %17050 = vst [vmem:[#allocation95_spill] sm:$0xff] %v14706_v21  ;;  %v14708_v43 = vpop.f32.mrb[67].mxu0 }
0x1779   :  { %17051 = vst [vmem:[#allocation96_spill] sm:$0xff] %v14708_v43  ;;  %v14710_v61 = vpop.f32.mrb[68].mxu0 }
0x177a   :  { %17052 = vst [vmem:[#allocation97_spill] sm:$0xff] %v14710_v61  ;;  %v14712_v60 = vpop.f32.mrb[69].mxu0 }
0x177b   :  { %17053 = vst [vmem:[#allocation98_spill] sm:$0xff] %v14712_v60  ;;  %v14714_v45 = vpop.f32.mrb[70].mxu0 }
0x177c   :  { %17054 = vst [vmem:[#allocation99_spill] sm:$0xff] %v14714_v45  ;;  %v14717_v29 = vpop.f32.mrb[71].mxu0 }
0x177d   :  { %17055 = vst [vmem:[#allocation100_spill] sm:$0xff] %v14717_v29  ;;  %v14722_v43 = vpop.f32.mrb[72].mxu0 }
0x177e   :  { %17056 = vst [vmem:[#allocation101_spill] sm:$0xff] %v14722_v43  ;;  %v14724_v60 = vpop.f32.mrb[73].mxu0 }
0x177f   :  { %17057 = vst [vmem:[#allocation102_spill] sm:$0xff] %v14724_v60 }
0x1798   :  { %v11756_v42 = vpop.f32.mrb[184].mxu1 }
0x1799   :  { %v4381_v14 = vadd.f32 %v11756_v42, %v14369_v63  ;;  %v4372_v57 = vpop.f32.mrb[185].mxu1  ;;  %v14726_v42 = vpop.f32.mrb[74].mxu0 }
0x179a   :  { %v4373_v28 = vadd.f32 %v14369_v63, %v4372_v57  ;;  %v11757_v8 = vpop.f32.mrb[186].mxu1  ;;  %17058 = vst [vmem:[#allocation103_spill] sm:$0xff] %v14726_v42  ;;  %v14728_v45 = vpop.f32.mrb[75].mxu0 }
0x179b   :  { %12269 = vtanh.f32 %v4381_v14  ;;  %v4384_v21 = vadd.f32 %v11757_v8, %v14369_v63  ;;  %v4375_v33 = vpop.f32.mrb[187].mxu1  ;;  %17059 = vst [vmem:[#allocation104_spill] sm:$0xff] %v14728_v45  ;;  %v14730_v29 = vpop.f32.mrb[76].mxu0 }
0x179c   :  { %12271 = vtanh.f32 %v4373_v28  ;;  %v4376_v61 = vadd.f32 %v14369_v63, %v4375_v33  ;;  %17060 = vst [vmem:[#allocation105_spill] sm:$0xff] %v14730_v29  ;;  %v14732_v14 = vpop.f32.mrb[77].mxu0 }
0x179d   :  { %12273 = vtanh.f32 %v4384_v21  ;;  %17061 = vst [vmem:[#allocation106_spill] sm:$0xff] %v14732_v14  ;;  %v14736_v43 = vpop.f32.mrb[78].mxu0 }
0x179e   :  { %12275 = vtanh.f32 %v4376_v61  ;;  %17062 = vst [vmem:[#allocation107_spill] sm:$0xff] %v14736_v43 }
0x17a5   :  { %v12270_v57 = vpop.eup %12269 }
0x17a6   :  { %v12272_v8 = vpop.eup %12271 }
0x17a7   :  { %v12274_v16 = vpop.eup %12273 }
0x17a8   :  { %v12276_v28 = vpop.eup %12275  ;;  %v11760_v24 = vpop.f32.mrb[188].mxu1  ;;  %v14734_v33 = vpack.c.bf16 %v12274_v16, %v12270_v57 }
0x17a9   :  { %v4397_v21 = vadd.f32 %v11760_v24, %v14369_v63  ;;  %v4388_v61 = vpop.f32.mrb[189].mxu1  ;;  %v14739_v60 = vpack.c.bf16 %v12276_v28, %v12272_v8  ;;  %v14749_v24 = vpop.f32.mrb[79].mxu0 }
0x17aa   :  { %v4389_v45 = vadd.f32 %v14369_v63, %v4388_v61  ;;  %4529 = vrot.lane.b32.xlu0 %v14734_v33, %s12726_s15  ;;  %v11761_v29 = vpop.f32.mrb[190].mxu1  ;;  %17063 = vst [vmem:[#allocation108_spill] sm:$0xff] %v14749_v24  ;;  %v14753_v57 = vpop.f32.mrb[62].mxu0 }
0x17ab   :  { %12277 = vtanh.f32 %v4397_v21  ;;  %v4400_v14 = vadd.f32 %v11761_v29, %v14369_v63  ;;  %v4391_v42 = vpop.f32.mrb[191].mxu1  ;;  %4527 = vrot.lane.b32.xlu1 %v14739_v60, %s12726_s15  ;;  %11062 = vmatmul.mubr.msk.bf16.gmra.mrb[228].mxu1 %vm213_vm2, %v14739_v60  ;;  %17064 = vst [vmem:[#allocation109_spill] sm:$0xff] %v14753_v57  ;;  %v14755_v8 = vpop.f32.mrb[63].mxu0 }
0x17ac   :  { %12279 = vtanh.f32 %v4389_v45  ;;  %v4392_v16 = vadd.f32 %v14369_v63, %v4391_v42  ;;  %6531 = vmatprep.mubr.bf16.mxu1 %v16937_v41  ;;  %17065 = vst [vmem:[#allocation110_spill] sm:$0xff] %v14755_v8  ;;  %v14757_v29 = vpop.f32.mrb[80].mxu0  ;;  %v12205_v45 = vld [vmem:[#allocation6 + $0xd8] sm:$0xff]  }
0x17ad   :  { %12281 = vtanh.f32 %v4400_v14  ;;  %17066 = vst [vmem:[#allocation111_spill] sm:$0xff] %v14757_v29  ;;  %v14759_v28 = vpop.f32.mrb[81].mxu0  ;;  %11774 = vmatprep.subr.bf16.mxu1 %v12205_v45 }
0x17ae   :  { %12283 = vtanh.f32 %v4392_v16  ;;  %17067 = vst [vmem:[#allocation112_spill] sm:$0xff] %v14759_v28  ;;  %v14763_v21 = vpop.f32.mrb[82].mxu0  ;;  %11775 = vmatpush3.bf16.msra.mxu1 %v12205_v45 }
0x17af   :  { %17068 = vst [vmem:[#allocation113_spill] sm:$0xff] %v14763_v21  ;;  %v14766_v42 = vpop.f32.mrb[83].mxu0 }
0x17b0   :  { %17069 = vst [vmem:[#allocation114_spill] sm:$0xff] %v14766_v42  ;;  %v14768_v14 = vpop.f32.mrb[84].mxu0 }
0x17b1   :  { %17070 = vst [vmem:[#allocation115_spill] sm:$0xff] %v14768_v14  ;;  %v14770_v16 = vpop.f32.mrb[85].mxu0 }
0x17b2   :  { %17071 = vst [vmem:[#allocation116_spill] sm:$0xff] %v14770_v16 }
0x17b3   :  { %11063 = vmatmul.mubr.msk.bf16.gmra.mrb[232].mxu1 %vm213_vm2, %v14734_v33 }
0x17b4   :  { %6541 = vmatprep.mubr.bf16.mxu1 %v16937_v41 }
0x17b5   :  { %v12278_v61 = vpop.eup %12277 }
0x17b6   :  { %v12280_v8 = vpop.eup %12279 }
0x17b7   :  { %v12282_v29 = vpop.eup %12281 }
0x17b8   :  { %v12284_v28 = vpop.eup %12283  ;;  %v11764_v57 = vpop.f32.mrb[192].mxu1  ;;  %v14772_v24 = vpack.c.bf16 %v12282_v29, %v12278_v61 }
0x17b9   :  { %v4413_v21 = vadd.f32 %v11764_v57, %v14369_v63  ;;  %v4404_v43 = vpop.f32.mrb[193].mxu1  ;;  %v14775_v34 = vpack.c.bf16 %v12284_v28, %v12280_v8  ;;  %v14785_v57 = vpop.f32.mrb[86].mxu0 }
0x17ba   :  { %v4405_v42 = vadd.f32 %v14369_v63, %v4404_v43  ;;  %4533 = vrot.lane.b32.xlu0 %v14772_v24, %s12726_s15  ;;  %v11765_v14 = vpop.f32.mrb[194].mxu1  ;;  %17072 = vst [vmem:[#allocation117_spill] sm:$0xff] %v14785_v57  ;;  %v14789_v43 = vpop.f32.mrb[87].mxu0 }
0x17bb   :  { %12285 = vtanh.f32 %v4413_v21  ;;  %v4416_v45 = vadd.f32 %v11765_v14, %v14369_v63  ;;  %v4407_v16 = vpop.f32.mrb[195].mxu1  ;;  %4531 = vrot.lane.b32.xlu1 %v14775_v34, %s12726_s15  ;;  %11064 = vmatmul.mubr.msk.bf16.gmra.mrb[236].mxu1 %vm213_vm2, %v14775_v34  ;;  %17073 = vst [vmem:[#allocation118_spill] sm:$0xff] %v14789_v43  ;;  %v14791_v29 = vpop.f32.mrb[88].mxu0 }
0x17bc   :  { %12287 = vtanh.f32 %v4405_v42  ;;  %v4408_v8 = vadd.f32 %v14369_v63, %v4407_v16  ;;  %6551 = vmatprep.mubr.bf16.mxu1 %v16937_v41  ;;  %17074 = vst [vmem:[#allocation119_spill] sm:$0xff] %v14791_v29  ;;  %v14793_v28 = vpop.f32.mrb[89].mxu0 }
0x17bd   :  { %12289 = vtanh.f32 %v4416_v45  ;;  %17075 = vst [vmem:[#allocation120_spill] sm:$0xff] %v14793_v28  ;;  %v14797_v21 = vpop.f32.mrb[90].mxu0 }
0x17be   :  { %12291 = vtanh.f32 %v4408_v8  ;;  %17076 = vst [vmem:[#allocation121_spill] sm:$0xff] %v14797_v21  ;;  %v14800_v42 = vpop.f32.mrb[91].mxu0 }
0x17bf   :  { %17077 = vst [vmem:[#allocation122_spill] sm:$0xff] %v14800_v42  ;;  %v14802_v14 = vpop.f32.mrb[92].mxu0 }
0x17c0   :  { %17078 = vst [vmem:[#allocation123_spill] sm:$0xff] %v14802_v14  ;;  %v14804_v43 = vpop.f32.mrb[93].mxu0 }
0x17c1   :  { %17079 = vst [vmem:[#allocation124_spill] sm:$0xff] %v14804_v43 }
0x17c3   :  { %11065 = vmatmul.mubr.msk.bf16.gmra.mrb[240].mxu1 %vm213_vm2, %v14772_v24 }
0x17c4   :  { %6561 = vmatprep.mubr.bf16.mxu1 %v16937_v41 }
0x17c5   :  { %v12286_v61 = vpop.eup %12285 }
0x17c6   :  { %v12288_v16 = vpop.eup %12287 }
0x17c7   :  { %v12290_v45 = vpop.eup %12289 }
0x17c8   :  { %v12292_v29 = vpop.eup %12291  ;;  %v11768_v8 = vpop.f32.mrb[196].mxu1  ;;  %v14806_v57 = vpack.c.bf16 %v12290_v45, %v12286_v61 }
0x17c9   :  { %v4429_v28 = vadd.f32 %v11768_v8, %v14369_v63  ;;  %v4420_v7 = vpop.f32.mrb[197].mxu1  ;;  %v14809_v37 = vpack.c.bf16 %v12292_v29, %v12288_v16  ;;  %v14819_v61 = vpop.f32.mrb[94].mxu0 }
0x17ca   :  { %v4421_v21 = vadd.f32 %v14369_v63, %v4420_v7  ;;  %4537 = vrot.lane.b32.xlu0 %v14806_v57, %s12726_s15  ;;  %v11769_v42 = vpop.f32.mrb[198].mxu1  ;;  %17080 = vst [vmem:[#allocation125_spill] sm:$0xff] %v14819_v61  ;;  %v14823_v7 = vpop.f32.mrb[95].mxu0 }
0x17cb   :  { %12293 = vtanh.f32 %v4429_v28  ;;  %v4432_v14 = vadd.f32 %v11769_v42, %v14369_v63  ;;  %v4423_v43 = vpop.f32.mrb[199].mxu1  ;;  %4535 = vrot.lane.b32.xlu1 %v14809_v37, %s12726_s15  ;;  %11066 = vmatmul.mubr.msk.bf16.gmra.mrb[244].mxu1 %vm213_vm2, %v14809_v37  ;;  %17081 = vst [vmem:[#allocation126_spill] sm:$0xff] %v14823_v7  ;;  %v14825_v28 = vpop.f32.mrb[96].mxu0 }
0x17cc   :  { %12295 = vtanh.f32 %v4421_v21  ;;  %v4424_v29 = vadd.f32 %v14369_v63, %v4423_v43  ;;  %6571 = vmatprep.mubr.bf16.mxu1 %v16937_v41  ;;  %17082 = vst [vmem:[#allocation127_spill] sm:$0xff] %v14825_v28  ;;  %v14827_v42 = vpop.f32.mrb[97].mxu0 }
0x17cd   :  { %12297 = vtanh.f32 %v4432_v14  ;;  %17083 = vst [vmem:[#allocation128_spill] sm:$0xff] %v14827_v42  ;;  %v14831_v16 = vpop.f32.mrb[98].mxu0 }
0x17ce   :  { %12299 = vtanh.f32 %v4424_v29  ;;  %17084 = vst [vmem:[#allocation129_spill] sm:$0xff] %v14831_v16  ;;  %v14834_v21 = vpop.f32.mrb[99].mxu0 }
0x17cf   :  { %17085 = vst [vmem:[#allocation130_spill] sm:$0xff] %v14834_v21  ;;  %v14836_v45 = vpop.f32.mrb[100].mxu0 }
0x17d0   :  { %17086 = vst [vmem:[#allocation131_spill] sm:$0xff] %v14836_v45  ;;  %v14838_v7 = vpop.f32.mrb[101].mxu0 }
0x17d1   :  { %17087 = vst [vmem:[#allocation132_spill] sm:$0xff] %v14838_v7 }
0x17d3   :  { %11067 = vmatmul.mubr.msk.bf16.gmra.mrb[248].mxu1 %vm213_vm2, %v14806_v57 }
0x17d4   :  { %6581 = vmatprep.mubr.bf16.mxu1 %v16937_v41 }
0x17d5   :  { %v12294_v43 = vpop.eup %12293 }
0x17d6   :  { %v12296_v8 = vpop.eup %12295 }
0x17d7   :  { %v12298_v14 = vpop.eup %12297 }
0x17d8   :  { %v12300_v28 = vpop.eup %12299  ;;  %v11772_v29 = vpop.f32.mrb[200].mxu1  ;;  %v14840_v61 = vpack.c.bf16 %v12298_v14, %v12294_v43 }
0x17d9   :  { %v4445_v42 = vadd.f32 %v11772_v29, %v14369_v63  ;;  %v4436_v17 = vpop.f32.mrb[201].mxu1  ;;  %v14843_v19 = vpack.c.bf16 %v12300_v28, %v12296_v8  ;;  %v14853_v43 = vpop.f32.mrb[102].mxu0 }
0x17da   :  { %v4437_v16 = vadd.f32 %v14369_v63, %v4436_v17  ;;  %4541 = vrot.lane.b32.xlu0 %v14840_v61, %s12726_s15  ;;  %v11773_v21 = vpop.f32.mrb[202].mxu1  ;;  %17088 = vst [vmem:[#allocation133_spill] sm:$0xff] %v14853_v43  ;;  %v14857_v17 = vpop.f32.mrb[103].mxu0 }
0x17db   :  { %12301 = vtanh.f32 %v4445_v42  ;;  %v4448_v45 = vadd.f32 %v11773_v21, %v14369_v63  ;;  %v4439_v7 = vpop.f32.mrb[203].mxu1  ;;  %4539 = vrot.lane.b32.xlu1 %v14843_v19, %s12726_s15  ;;  %11068 = vmatmul.mubr.msk.bf16.gmra.mrb[252].mxu1 %vm213_vm2, %v14843_v19  ;;  %17089 = vst [vmem:[#allocation134_spill] sm:$0xff] %v14857_v17  ;;  %v14859_v42 = vpop.f32.mrb[104].mxu0 }
0x17dc   :  { %12303 = vtanh.f32 %v4437_v16  ;;  %v4440_v28 = vadd.f32 %v14369_v63, %v4439_v7  ;;  %6591 = vmatprep.mubr.bf16.mxu1 %v16937_v41  ;;  %17090 = vst [vmem:[#allocation135_spill] sm:$0xff] %v14859_v42  ;;  %v14861_v21 = vpop.f32.mrb[105].mxu0 }
0x17dd   :  { %12305 = vtanh.f32 %v4448_v45  ;;  %17091 = vst [vmem:[#allocation136_spill] sm:$0xff] %v14861_v21  ;;  %v14863_v8 = vpop.f32.mrb[106].mxu0 }
0x17de   :  { %12307 = vtanh.f32 %v4440_v28  ;;  %17092 = vst [vmem:[#allocation137_spill] sm:$0xff] %v14863_v8  ;;  %v14865_v14 = vpop.f32.mrb[107].mxu0 }
0x17df   :  { %17093 = vst [vmem:[#allocation138_spill] sm:$0xff] %v14865_v14  ;;  %v14869_v16 = vpop.f32.mrb[108].mxu0 }
0x17e0   :  { %17094 = vst [vmem:[#allocation139_spill] sm:$0xff] %v14869_v16  ;;  %v14872_v63 = vpop.f32.mrb[109].mxu0 }
0x17e1   :  { %17095 = vst [vmem:[#allocation140_spill] sm:$0xff] %v14872_v63  ;;  %v14874_v45 = vpop.f32.mrb[110].mxu0 }
0x17e2   :  { %17096 = vst [vmem:[#allocation141_spill] sm:$0xff] %v14874_v45  ;;  %v14876_v28 = vpop.f32.mrb[111].mxu0 }
0x17e3   :  { %11069 = vmatmul.mubr.msk.bf16.gmra.mrb[0].mxu1 %vm213_vm2, %v14840_v61  ;;  %17097 = vst [vmem:[#allocation142_spill] sm:$0xff] %v14876_v28  ;;  %v14878_v42 = vpop.f32.mrb[112].mxu0 }
0x17e4   :  { %6601 = vmatprep.mubr.bf16.mxu1 %v16937_v41  ;;  %17098 = vst [vmem:[#allocation143_spill] sm:$0xff] %v14878_v42  ;;  %v14882_v43 = vpop.f32.mrb[113].mxu0 }
0x17e5   :  { %v12302_v7 = vpop.eup %12301  ;;  %v14887_v63 = vpop.f32.mrb[114].mxu0 }
0x17e6   :  { %v12304_v29 = vpop.eup %12303  ;;  %17099 = vst [vmem:[#allocation144_spill] sm:$0xff] %v14887_v63  ;;  %v14892_v42 = vpop.f32.mrb[115].mxu0 }
0x17e7   :  { %v12306_v21 = vpop.eup %12305  ;;  %17100 = vst [vmem:[#allocation145_spill] sm:$0xff] %v14892_v42 }
0x17e8   :  { %v12308_v8 = vpop.eup %12307  ;;  %v6463_v14 = vpop.f32.mrb[204].mxu1  ;;  %v14880_v17 = vpack.c.bf16 %v12306_v21, %v12302_v7 }
0x17e9   :  { %v6464_v16 = vadd.f32 %v6463_v14, %v14139_v56  ;;  %v6465_v5 = vpop.f32.mrb[205].mxu1  ;;  %v14885_v48 = vpack.c.bf16 %v12308_v8, %v12304_v29  ;;  %v14899_v56 = vpop.f32.mrb[116].mxu0 }
0x17ea   :  { %v6466_v45 = vadd.f32 %v6465_v5, %v14143_v39  ;;  %4545 = vrot.lane.b32.xlu0 %v14880_v17, %s12726_s15  ;;  %v6467_v28 = vpop.f32.mrb[206].mxu1  ;;  %17101 = vst [vmem:[#allocation146_spill] sm:$0xff] %v14899_v56  ;;  %v14903_v39 = vpop.f32.mrb[117].mxu0 }
0x17eb   :  { %v6468_v21 = vadd.f32 %v6467_v28, %v14147_v9  ;;  %4543 = vrot.lane.b32.xlu1 %v14885_v48, %s12726_s15  ;;  %v6469_v7 = vpop.f32.mrb[207].mxu1  ;;  %11070 = vmatmul.mubr.msk.bf16.gmra.mrb[4].mxu1 %vm213_vm2, %v14885_v48  ;;  %17102 = vst [vmem:[#allocation147_spill] sm:$0xff] %v14903_v39  ;;  %v7102_v5 = vmax.f32 %v6464_v16, 0.0  ;;  %v14905_v29 = vpop.f32.mrb[118].mxu0 }
0x17ec   :  { %v6470_v8 = vadd.f32 %v6469_v7, %v14150_v11  ;;  %6611 = vmatprep.mubr.bf16.mxu1 %v16937_v41  ;;  %v7103_v9 = vmax.f32 %v6466_v45, 0.0  ;;  %v14909_v42 = vpop.f32.mrb[119].mxu0 }
0x17ed   :  { %v7104_v14 = vmax.f32 %v6468_v21, 0.0  ;;  %v14913_v11 = vpop.f32.mrb[120].mxu0 }
0x17ee   :  { %v7105_v28 = vmax.f32 %v6470_v8, 0.0  ;;  %4549 = vrot.lane.b32.xlu0 %v14418_v26, %s12728_s24  ;;  %v14915_v39 = vpop.f32.mrb[121].mxu0 }
0x17ef   :  { %v7376_v63 = vpack.c.bf16 %v7104_v14, %v7102_v5  ;;  %4547 = vrot.lane.b32.xlu1 %v14421_v50, %s12728_s24  ;;  %17103 = vst [vmem:[#allocation148_spill] sm:$0xff] %v14915_v39  ;;  %v14918_v45 = vpop.f32.mrb[122].mxu0 }
0x17f0   :  { %v7377_v7 = vpack.c.bf16 %v7105_v28, %v7103_v9  ;;  %v6473_v56 = vpop.f32.mrb[208].mxu1  ;;  %17104 = vst [vmem:[#allocation149_spill] sm:$0xff] %v14918_v45  ;;  %v14924_v14 = vpop.f32.mrb[123].mxu0 }
0x17f1   :  { %v6474_v16 = vadd.f32 %v6473_v56, %v14153_v62  ;;  %v6475_v21 = vpop.f32.mrb[209].mxu1  ;;  %17105 = vst [vmem:[#allocation150_spill] sm:$0xff] %v14924_v14  ;;  %v14931_v62 = vpop.f32.mrb[124].mxu0 }
0x17f2   :  { %v6476_v8 = vadd.f32 %v6475_v21, %v14160_v20  ;;  %4553 = vrot.lane.b32.xlu0 %v14510_v22, %s12728_s24  ;;  %v6477_v5 = vpop.f32.mrb[210].mxu1  ;;  %11130 = vmatprep.mubr.msk.bf16.mxu0 %vm126_vm1, %v7377_v7  ;;  %v14935_v56 = vpop.f32.mrb[125].mxu0 }
0x17f3   :  { %v6478_v9 = vadd.f32 %v6477_v5, %v14166_v10  ;;  %4551 = vrot.lane.b32.xlu1 %v14516_v55, %s12728_s24  ;;  %v6479_v28 = vpop.f32.mrb[211].mxu1  ;;  %11071 = vmatmul.mubr.msk.bf16.gmra.mrb[12].mxu1 %vm213_vm2, %v14880_v17  ;;  %v7106_v7 = vmax.f32 %v6474_v16, 0.0  ;;  %v14937_v14 = vpop.f32.mrb[126].mxu0 }
0x17f4   :  { %v6480_v20 = vadd.f32 %v6479_v28, %v14169_v46  ;;  %7791 = vmatmul.mubr.bf16.vlgmr.msra.gmra.mrb[208].mxu0 %v7376_v63  ;;  %6621 = vmatprep.mubr.bf16.mxu1 %v16937_v41  ;;  %v7107_v10 = vmax.f32 %v6476_v8, 0.0  ;;  %v14941_v45 = vpop.f32.mrb[127].mxu0 }
0x17f5   :  { %v7108_v21 = vmax.f32 %v6478_v9, 0.0  ;;  %v14945_v46 = vpop.f32.mrb[128].mxu0  ;;  %v4516_v9 = vpop.permute.xlu1 %4515 }
0x17f6   :  { %v7109_v5 = vmax.f32 %v6480_v20, 0.0  ;;  %4557 = vrot.lane.b32.xlu0 %v14563_v30, %s12728_s24  ;;  %v14947_v28 = vpop.f32.mrb[129].mxu0 }
0x17f7   :  { %v7378_v39 = vpack.c.bf16 %v7108_v21, %v7106_v7  ;;  %4555 = vrot.lane.b32.xlu1 %v14568_v15, %s12728_s24  ;;  %17106 = vst [vmem:[#allocation151_spill] sm:$0xff] %v14947_v28  ;;  %v14949_v16 = vpop.f32.mrb[130].mxu0 }
0x17f8   :  { %v7379_v63 = vpack.c.bf16 %v7109_v5, %v7107_v10  ;;  %17107 = vst [vmem:[#allocation152_spill] sm:$0xff] %v14949_v16  ;;  %v14954_v8 = vpop.f32.mrb[131].mxu0 }
0x17f9   :  { %17108 = vst [vmem:[#allocation153_spill] sm:$0xff] %v14954_v8  ;;  %v14959_v20 = vpop.f32.mrb[132].mxu0 }
0x17fa   :  { %4561 = vrot.lane.b32.xlu0 %v14734_v33, %s12728_s24  ;;  %11131 = vmatprep.mubr.msk.bf16.mxu0 %vm126_vm1, %v7379_v63  ;;  %17109 = vst [vmem:[#allocation154_spill] sm:$0xff] %v14959_v20  ;;  %v14962_v7 = vpop.f32.mrb[133].mxu0  ;;  %v4518_v63 = vpop.permute.xlu0 %4517 }
0x17fb   :  { %4559 = vrot.lane.b32.xlu1 %v14739_v60, %s12728_s24  ;;  %11072 = vmatmul.mubr.msk.bf16.gmra.mrb[16].mxu1 %vm213_vm2, %v4516_v9  ;;  %17110 = vst [vmem:[#allocation155_spill] sm:$0xff] %v14962_v7  ;;  %v14964_v21 = vpop.f32.mrb[134].mxu0 }
0x17fc   :  { %7799 = vmatmul.mubr.bf16.gmra.mrb[212].mxu0 %v7378_v39  ;;  %6631 = vmatprep.mubr.bf16.mxu1 %v16937_v41  ;;  %17111 = vst [vmem:[#allocation156_spill] sm:$0xff] %v14964_v21  ;;  %v14970_v10 = vpop.f32.mrb[135].mxu0 }
0x17fd   :  { %17112 = vst [vmem:[#allocation157_spill] sm:$0xff] %v14970_v10  ;;  %v14972_v5 = vpop.f32.mrb[136].mxu0 }
0x17fe   :  { %4565 = vrot.lane.b32.xlu0 %v14772_v24, %s12728_s24  ;;  %17113 = vst [vmem:[#allocation158_spill] sm:$0xff] %v14972_v5  ;;  %v14976_v39 = vpop.f32.mrb[137].mxu0 }
0x17ff   :  { %4563 = vrot.lane.b32.xlu1 %v14775_v34, %s12728_s24  ;;  %17114 = vst [vmem:[#allocation159_spill] sm:$0xff] %v14976_v39  ;;  %v14981_v9 = vpop.f32.mrb[138].mxu0 }
0x1800   :  { %17115 = vst [vmem:[#allocation160_spill] sm:$0xff] %v14981_v9  ;;  %v14984_v21 = vpop.f32.mrb[139].mxu0  ;;  %v4520_v9 = vpop.permute.xlu1 %4519 }
0x1801   :  { %17116 = vst [vmem:[#allocation161_spill] sm:$0xff] %v14984_v21  ;;  %v14986_v10 = vpop.f32.mrb[140].mxu0 }
0x1802   :  { %4569 = vrot.lane.b32.xlu0 %v14806_v57, %s12728_s24  ;;  %17117 = vst [vmem:[#allocation162_spill] sm:$0xff] %v14986_v10  ;;  %v14990_v5 = vpop.f32.mrb[141].mxu0 }
0x1803   :  { %4567 = vrot.lane.b32.xlu1 %v14809_v37, %s12728_s24  ;;  %11073 = vmatmul.mubr.msk.bf16.gmra.mrb[20].mxu1 %vm213_vm2, %v4518_v63  ;;  %17118 = vst [vmem:[#allocation163_spill] sm:$0xff] %v14990_v5  ;;  %v14994_v39 = vpop.f32.mrb[144].mxu0 }
0x1804   :  { %6641 = vmatprep.mubr.bf16.mxu1 %v16937_v41  ;;  %17119 = vst [vmem:[#allocation164_spill] sm:$0xff] %v14994_v39  ;;  %v14996_v7 = vpop.f32.mrb[145].mxu0 }
0x1805   :  { %17120 = vst [vmem:[#allocation165_spill] sm:$0xff] %v14996_v7  ;;  %v14998_v63 = vpop.f32.mrb[146].mxu0 }
0x1806   :  { %4573 = vrot.lane.b32.xlu0 %v14840_v61, %s12728_s24  ;;  %17121 = vst [vmem:[#allocation166_spill] sm:$0xff] %v14998_v63  ;;  %v15002_v21 = vpop.f32.mrb[147].mxu0 }
0x1807   :  { %4571 = vrot.lane.b32.xlu1 %v14843_v19, %s12728_s24  ;;  %17122 = vst [vmem:[#allocation167_spill] sm:$0xff] %v15002_v21  ;;  %v15007_v5 = vpop.f32.mrb[148].mxu0 }
0x1808   :  { %17123 = vst [vmem:[#allocation168_spill] sm:$0xff] %v15007_v5  ;;  %v15011_v63 = vpop.f32.mrb[149].mxu0 }
0x1809   :  { %17124 = vst [vmem:[#allocation169_spill] sm:$0xff] %v15011_v63  ;;  %v15014_v16 = vpop.f32.mrb[150].mxu0 }
0x180a   :  { %4577 = vrot.lane.b32.xlu0 %v14880_v17, %s12728_s24  ;;  %17125 = vst [vmem:[#allocation170_spill] sm:$0xff] %v15014_v16  ;;  %v15019_v28 = vpop.f32.mrb[151].mxu0 }
0x180b   :  { %4575 = vrot.lane.b32.xlu1 %v14885_v48, %s12728_s24  ;;  %v6483_v10 = vpop.f32.mrb[212].mxu1  ;;  %11074 = vmatmul.mubr.msk.bf16.gmra.mrb[24].mxu1 %vm213_vm2, %v4520_v9  ;;  %17126 = vst [vmem:[#allocation171_spill] sm:$0xff] %v15019_v28 }
0x180c   :  { %v6484_v39 = vadd.f32 %v6483_v10, %v14176_v25  ;;  %v6485_v20 = vpop.f32.mrb[213].mxu1  ;;  %6651 = vmatprep.mubr.bf16.mxu1 %v16937_v41  ;;  %v15024_v10 = vpop.f32.mrb[152].mxu0 }
0x180d   :  { %v6486_v7 = vadd.f32 %v6485_v20, %v14180_v47  ;;  %v6487_v8 = vpop.f32.mrb[214].mxu1  ;;  %v15026_v20 = vpop.f32.mrb[153].mxu0 }
0x180e   :  { %v6488_v21 = vadd.f32 %v6487_v8, %v14185_v6  ;;  %4581 = vrot.lane.b32.xlu0 %v14418_v26, %s12730_s16  ;;  %v6489_v9 = vpop.f32.mrb[215].mxu1  ;;  %v7110_v63 = vmax.f32 %v6484_v39, 0.0  ;;  %v15028_v6 = vpop.f32.mrb[154].mxu0 }
0x180f   :  { %v6490_v25 = vadd.f32 %v6489_v9, %v14192_v18  ;;  %4579 = vrot.lane.b32.xlu1 %v14421_v50, %s12730_s16  ;;  %v7111_v16 = vmax.f32 %v6486_v7, 0.0  ;;  %v4522_v8 = vpop.permute.xlu0 %4521  ;;  %v15032_v28 = vpop.f32.mrb[155].mxu0 }
0x1810   :  { %v7112_v47 = vmax.f32 %v6488_v21, 0.0  ;;  %v15037_v21 = vpop.f32.mrb[156].mxu0 }
0x1811   :  { %v7113_v5 = vmax.f32 %v6490_v25, 0.0 }
0x1812   :  { %v7380_v26 = vpack.c.bf16 %v7112_v47, %v7110_v63  ;;  %4585 = vrot.lane.b32.xlu0 %v14510_v22, %s12730_s16  ;;  %v15041_v63 = vpop.f32.mrb[157].mxu0 }
0x1813   :  { %v7381_v18 = vpack.c.bf16 %v7113_v5, %v7111_v16  ;;  %4583 = vrot.lane.b32.xlu1 %v14516_v55, %s12730_s16  ;;  %v6493_v50 = vpop.f32.mrb[216].mxu1  ;;  %11075 = vmatmul.mubr.msk.bf16.gmra.mrb[8].mxu1 %vm213_vm2, %v4522_v8  ;;  %v15045_v16 = vpop.f32.mrb[158].mxu0 }
0x1814   :  { %v6494_v7 = vadd.f32 %v6493_v50, %v14197_v38  ;;  %v6495_v39 = vpop.f32.mrb[217].mxu1  ;;  %6661 = vmatprep.mubr.bf16.mxu1 %v16937_v41  ;;  %v15050_v38 = vpop.f32.mrb[159].mxu0 }
0x1815   :  { %v6496_v22 = vadd.f32 %v6495_v39, %v14200_v54  ;;  %v6497_v9 = vpop.f32.mrb[218].mxu1  ;;  %11132 = vmatprep.mubr.msk.bf16.mxu0 %vm126_vm1, %v7381_v18  ;;  %v15055_v54 = vpop.f32.mrb[160].mxu0 }
0x1816   :  { %v6498_v55 = vadd.f32 %v6497_v9, %v14209_v58  ;;  %4589 = vrot.lane.b32.xlu0 %v14563_v30, %s12730_s16  ;;  %v6499_v5 = vpop.f32.mrb[219].mxu1  ;;  %7807 = vmatmul.mubr.bf16.gmra.mrb[216].mxu0 %v7380_v26  ;;  %v7114_v47 = vmax.f32 %v6494_v7, 0.0  ;;  %v15057_v18 = vpop.f32.mrb[161].mxu0 }
0x1817   :  { %v6500_v25 = vadd.f32 %v6499_v5, %v14212_v52  ;;  %4587 = vrot.lane.b32.xlu1 %v14568_v15, %s12730_s16  ;;  %v7115_v50 = vmax.f32 %v6496_v22, 0.0  ;;  %v15059_v39 = vpop.f32.mrb[162].mxu0  ;;  %v4524_v30 = vpop.permute.xlu1 %4523 }
0x1818   :  { %v7116_v8 = vmax.f32 %v6498_v55, 0.0  ;;  %v15063_v26 = vpop.f32.mrb[163].mxu0 }
0x1819   :  { %v7117_v58 = vmax.f32 %v6500_v25, 0.0  ;;  %v15068_v7 = vpop.f32.mrb[164].mxu0 }
0x181a   :  { %v7382_v9 = vpack.c.bf16 %v7116_v8, %v7114_v47  ;;  %4593 = vrot.lane.b32.xlu0 %v14734_v33, %s12730_s16  ;;  %v15077_v47 = vpop.f32.mrb[165].mxu0  ;;  %v12206_v8 = vld [vmem:[#allocation6 + $0xe0] sm:$0xff]  }
0x181b   :  { %v7383_v52 = vpack.c.bf16 %v7117_v58, %v7115_v50  ;;  %4591 = vrot.lane.b32.xlu1 %v14739_v60, %s12730_s16  ;;  %v6503_v15 = vpop.f32.mrb[220].mxu1  ;;  %11076 = vmatmul.mubr.msk.bf16.gmra.mrb[28].mxu1 %vm213_vm2, %v4524_v30  ;;  %v15082_v50 = vpop.f32.mrb[166].mxu0 }
0x181c   :  { %v6504_v22 = vadd.f32 %v6503_v15, %v14217_v51  ;;  %v6505_v55 = vpop.f32.mrb[221].mxu1  ;;  %6671 = vmatprep.mubr.bf16.mxu1 %v16937_v41  ;;  %11776 = vmatprep.subr.bf16.mxu1 %v12206_v8  ;;  %v15084_v30 = vpop.f32.mrb[167].mxu0 }
0x181d   :  { %v6506_v5 = vadd.f32 %v6505_v55, %v14220_v3  ;;  %v6507_v25 = vpop.f32.mrb[222].mxu1  ;;  %11133 = vmatprep.mubr.msk.bf16.mxu0 %vm126_vm1, %v7383_v52  ;;  %11777 = vmatpush3.bf16.msra.mxu1 %v12206_v8 }
0x181e   :  { %v6508_v33 = vadd.f32 %v6507_v25, %v14225_v27  ;;  %4597 = vrot.lane.b32.xlu0 %v14772_v24, %s12730_s16  ;;  %v6509_v60 = vpop.f32.mrb[223].mxu1  ;;  %7815 = vmatmul.mubr.bf16.gmra.mrb[220].mxu0 %v7382_v9  ;;  %v7118_v3 = vmax.f32 %v6504_v22, 0.0  ;;  %v15086_v24 = vpop.f32.mrb[168].mxu0 }
0x181f   :  { %v6510_v51 = vadd.f32 %v6509_v60, %v14236_v49  ;;  %4595 = vrot.lane.b32.xlu1 %v14775_v34, %s12730_s16  ;;  %v7119_v27 = vmax.f32 %v6506_v5, 0.0  ;;  %v4526_v9 = vpop.permute.xlu0 %4525  ;;  %v15090_v49 = vpop.f32.mrb[169].mxu0 }
0x1820   :  { %v7120_v58 = vmax.f32 %v6508_v33, 0.0  ;;  %v15095_v55 = vpop.f32.mrb[170].mxu0 }
0x1821   :  { %v7121_v52 = vmax.f32 %v6510_v51, 0.0  ;;  %v15099_v33 = vpop.f32.mrb[171].mxu0 }
0x1822   :  { %v7384_v15 = vpack.c.bf16 %v7120_v58, %v7118_v3  ;;  %4601 = vrot.lane.b32.xlu0 %v14806_v57, %s12730_s16  ;;  %v15103_v8 = vpop.f32.mrb[172].mxu0 }
0x1823   :  { %v7385_v34 = vpack.c.bf16 %v7121_v52, %v7119_v27  ;;  %4599 = vrot.lane.b32.xlu1 %v14809_v37, %s12730_s16  ;;  %v6513_v22 = vpop.f32.mrb[224].mxu1  ;;  %11077 = vmatmul.mubr.msk.bf16.gmra.mrb[32].mxu1 %vm213_vm2, %v4526_v9 }
0x1824   :  { %v6514_v5 = vadd.f32 %v6513_v22, %v14242_v13  ;;  %v6515_v25 = vpop.f32.mrb[225].mxu1  ;;  %6681 = vmatprep.mubr.bf16.mxu1 %v16937_v41  ;;  %v15108_v13 = vpop.f32.mrb[173].mxu0 }
0x1825   :  { %v6516_v57 = vadd.f32 %v6515_v25, %v14246_v2  ;;  %v6517_v60 = vpop.f32.mrb[226].mxu1  ;;  %11134 = vmatprep.mubr.msk.bf16.mxu0 %vm126_vm1, %v7385_v34  ;;  %v15113_v2 = vpop.f32.mrb[174].mxu0 }
0x1826   :  { %v6518_v37 = vadd.f32 %v6517_v60, %v14248_v4  ;;  %4605 = vrot.lane.b32.xlu0 %v14840_v61, %s12730_s16  ;;  %v6519_v51 = vpop.f32.mrb[227].mxu1  ;;  %7823 = vmatmul.mubr.bf16.gmra.mrb[224].mxu0 %v7384_v15  ;;  %v7122_v58 = vmax.f32 %v6514_v5, 0.0  ;;  %v15115_v52 = vpop.f32.mrb[175].mxu0 }
0x1827   :  { %v6520_v3 = vadd.f32 %v6519_v51, %v14254_v59  ;;  %4603 = vrot.lane.b32.xlu1 %v14843_v19, %s12730_s16  ;;  %v7123_v9 = vmax.f32 %v6516_v57, 0.0  ;;  %v15117_v34 = vpop.f32.mrb[176].mxu0  ;;  %v4528_v61 = vpop.permute.xlu1 %4527 }
0x1828   :  { %v7124_v27 = vmax.f32 %v6518_v37, 0.0  ;;  %17127 = vst [vmem:[#allocation172_spill] sm:$0xff] %v15117_v34  ;;  %v15121_v15 = vpop.f32.mrb[177].mxu0  ;;  %v4530_v37 = vpop.permute.xlu0 %4529 }
0x1829   :  { %v7125_v4 = vmax.f32 %v6520_v3, 0.0  ;;  %17128 = vst [vmem:[#allocation173_spill] sm:$0xff] %v15121_v15  ;;  %v15126_v19 = vpop.f32.mrb[178].mxu0 }
0x182a   :  { %v7386_v22 = vpack.c.bf16 %v7124_v27, %v7122_v58  ;;  %4609 = vrot.lane.b32.xlu0 %v14880_v17, %s12730_s16  ;;  %17129 = vst [vmem:[#allocation174_spill] sm:$0xff] %v15126_v19  ;;  %v15129_v5 = vpop.f32.mrb[179].mxu0 }
0x182b   :  { %v7387_v59 = vpack.c.bf16 %v7125_v4, %v7123_v9  ;;  %4607 = vrot.lane.b32.xlu1 %v14885_v48, %s12730_s16  ;;  %11078 = vmatmul.mubr.msk.bf16.gmra.mrb[36].mxu1 %vm213_vm2, %v4528_v61  ;;  %17130 = vst [vmem:[#allocation175_spill] sm:$0xff] %v15129_v5  ;;  %v15132_v25 = vpop.f32.mrb[180].mxu0 }
0x182c   :  { %6691 = vmatprep.mubr.bf16.mxu1 %v16937_v41  ;;  %17131 = vst [vmem:[#allocation176_spill] sm:$0xff] %v15132_v25  ;;  %v15134_v17 = vpop.f32.mrb[181].mxu0  ;;  %v12207_v25 = vld [vmem:[#allocation6 + $0xe8] sm:$0xff]  }
0x182d   :  { %11135 = vmatprep.mubr.msk.bf16.mxu0 %vm126_vm1, %v7387_v59  ;;  %17132 = vst [vmem:[#allocation177_spill] sm:$0xff] %v15134_v17  ;;  %v15136_v57 = vpop.f32.mrb[182].mxu0  ;;  %v4532_v59 = vpop.permute.xlu1 %4531  ;;  %11778 = vmatprep.subr.bf16.mxu1 %v12207_v25 }
0x182e   :  { %7831 = vmatmul.mubr.bf16.gmra.mrb[228].mxu0 %v7386_v22  ;;  %17133 = vst [vmem:[#allocation178_spill] sm:$0xff] %v15136_v57  ;;  %v15138_v60 = vpop.f32.mrb[183].mxu0  ;;  %11779 = vmatpush3.bf16.msra.mxu1 %v12207_v25 }
0x182f   :  { %17134 = vst [vmem:[#allocation179_spill] sm:$0xff] %v15138_v60  ;;  %v15140_v48 = vpop.f32.mrb[184].mxu0 }
0x1830   :  { %17135 = vst [vmem:[#allocation180_spill] sm:$0xff] %v15140_v48  ;;  %v15142_v51 = vpop.f32.mrb[185].mxu0 }
0x1831   :  { %17136 = vst [vmem:[#allocation181_spill] sm:$0xff] %v15142_v51  ;;  %v15145_v3 = vpop.f32.mrb[186].mxu0 }
0x1832   :  { %17137 = vst [vmem:[#allocation182_spill] sm:$0xff] %v15145_v3  ;;  %v15148_v58 = vpop.f32.mrb[187].mxu0  ;;  %v4534_v3 = vpop.permute.xlu0 %4533 }
0x1833   :  { %11079 = vmatmul.mubr.msk.bf16.gmra.mrb[40].mxu1 %vm213_vm2, %v4530_v37  ;;  %17138 = vst [vmem:[#allocation183_spill] sm:$0xff] %v15148_v58  ;;  %v15150_v27 = vpop.f32.mrb[188].mxu0 }
0x1834   :  { %6701 = vmatprep.mubr.bf16.mxu1 %v16937_v41  ;;  %17139 = vst [vmem:[#allocation184_spill] sm:$0xff] %v15150_v27  ;;  %v15152_v9 = vpop.f32.mrb[189].mxu0 }
0x1835   :  { %17140 = vst [vmem:[#allocation185_spill] sm:$0xff] %v15152_v9  ;;  %v15154_v4 = vpop.f32.mrb[190].mxu0 }
0x1836   :  { %17141 = vst [vmem:[#allocation186_spill] sm:$0xff] %v15154_v4  ;;  %v15156_v61 = vpop.f32.mrb[191].mxu0 }
0x1837   :  { %17142 = vst [vmem:[#allocation187_spill] sm:$0xff] %v15156_v61  ;;  %v15158_v22 = vpop.f32.mrb[192].mxu0 }
0x1838   :  { %17143 = vst [vmem:[#allocation188_spill] sm:$0xff] %v15158_v22  ;;  %v15160_v51 = vpop.f32.mrb[193].mxu0 }
0x1839   :  { %17144 = vst [vmem:[#allocation189_spill] sm:$0xff] %v15160_v51  ;;  %v15163_v37 = vpop.f32.mrb[194].mxu0 }
0x183a   :  { %17145 = vst [vmem:[#allocation190_spill] sm:$0xff] %v15163_v37  ;;  %v15166_v58 = vpop.f32.mrb[195].mxu0 }
0x183b   :  { %11080 = vmatmul.mubr.msk.bf16.gmra.mrb[44].mxu1 %vm213_vm2, %v4532_v59  ;;  %17146 = vst [vmem:[#allocation191_spill] sm:$0xff] %v15166_v58  ;;  %v15168_v27 = vpop.f32.mrb[196].mxu0 }
0x183c   :  { %6711 = vmatprep.mubr.bf16.mxu1 %v16937_v41  ;;  %17147 = vst [vmem:[#allocation192_spill] sm:$0xff] %v15168_v27  ;;  %v15170_v9 = vpop.f32.mrb[197].mxu0 }
0x183d   :  { %17148 = vst [vmem:[#allocation193_spill] sm:$0xff] %v15170_v9  ;;  %v15172_v4 = vpop.f32.mrb[198].mxu0 }
0x183e   :  { %17149 = vst [vmem:[#allocation194_spill] sm:$0xff] %v15172_v4  ;;  %v15174_v61 = vpop.f32.mrb[199].mxu0 }
0x183f   :  { %17150 = vst [vmem:[#allocation195_spill] sm:$0xff] %v15174_v61  ;;  %v15176_v22 = vpop.f32.mrb[200].mxu0 }
0x1840   :  { %17151 = vst [vmem:[#allocation196_spill] sm:$0xff] %v15176_v22  ;;  %v15178_v51 = vpop.f32.mrb[201].mxu0  ;;  %v4536_v22 = vpop.permute.xlu1 %4535 }
0x1841   :  { %17152 = vst [vmem:[#allocation197_spill] sm:$0xff] %v15178_v51  ;;  %v15181_v59 = vpop.f32.mrb[202].mxu0 }
0x1842   :  { %17153 = vst [vmem:[#allocation198_spill] sm:$0xff] %v15181_v59  ;;  %v15184_v58 = vpop.f32.mrb[203].mxu0 }
0x1843   :  { %11081 = vmatmul.mubr.msk.bf16.gmra.mrb[48].mxu1 %vm213_vm2, %v4534_v3  ;;  %17154 = vst [vmem:[#allocation199_spill] sm:$0xff] %v15184_v58  ;;  %v15186_v27 = vpop.f32.mrb[204].mxu0  ;;  %v4538_v3 = vpop.permute.xlu0 %4537 }
0x1844   :  { %6721 = vmatprep.mubr.bf16.mxu1 %v16937_v41  ;;  %17155 = vst [vmem:[#allocation200_spill] sm:$0xff] %v15186_v27  ;;  %v15188_v9 = vpop.f32.mrb[205].mxu0 }
0x1845   :  { %17156 = vst [vmem:[#allocation201_spill] sm:$0xff] %v15188_v9  ;;  %v15190_v4 = vpop.f32.mrb[206].mxu0 }
0x1846   :  { %17157 = vst [vmem:[#allocation202_spill] sm:$0xff] %v15190_v4  ;;  %v15192_v61 = vpop.f32.mrb[207].mxu0 }
0x1847   :  { %17158 = vst [vmem:[#allocation203_spill] sm:$0xff] %v15192_v61 }
0x184b   :  { %11082 = vmatmul.mubr.msk.bf16.gmra.mrb[52].mxu1 %vm213_vm2, %v4536_v22 }
0x184c   :  { %6731 = vmatprep.mubr.bf16.mxu1 %v16937_v41  ;;  %v4542_v9 = vpop.permute.xlu0 %4541 }
0x184d   :  { %v4540_v59 = vpop.permute.xlu1 %4539 }
0x1853   :  { %11083 = vmatmul.mubr.msk.bf16.gmra.mrb[56].mxu1 %vm213_vm2, %v4538_v3 }
0x1854   :  { %6741 = vmatprep.mubr.bf16.mxu1 %v16937_v41 }
0x185b   :  { %11084 = vmatmul.mubr.msk.bf16.gmra.mrb[60].mxu1 %vm213_vm2, %v4540_v59 }
0x185c   :  { %6751 = vmatprep.mubr.bf16.mxu1 %v16937_v41  ;;  %v4546_v22 = vpop.permute.xlu0 %4545 }
0x185d   :  { %v4544_v61 = vpop.permute.xlu1 %4543 }
0x1860   :  { %v4550_v37 = vpop.permute.xlu0 %4549 }
0x1861   :  { %v4548_v3 = vpop.permute.xlu1 %4547 }
0x1863   :  { %11085 = vmatmul.mubr.msk.bf16.gmra.mrb[64].mxu1 %vm213_vm2, %v4542_v9 }
0x1864   :  { %6761 = vmatprep.mubr.bf16.mxu1 %v16937_v41 }
0x186b   :  { %11086 = vmatmul.mubr.msk.bf16.gmra.mrb[68].mxu1 %vm213_vm2, %v4544_v61 }
0x186c   :  { %6771 = vmatprep.mubr.bf16.mxu1 %v16937_v41 }
0x1873   :  { %11087 = vmatmul.mubr.msk.bf16.gmra.mrb[72].mxu1 %vm213_vm2, %v4546_v22 }
0x1874   :  { %6781 = vmatprep.mubr.bf16.mxu1 %v16937_v41 }
0x187b   :  { %11088 = vmatmul.mubr.msk.bf16.gmra.mrb[76].mxu1 %vm213_vm2, %v4548_v3 }
0x187c   :  { %6791 = vmatprep.mubr.bf16.mxu1 %v16937_v41 }
0x187e   :  { %v6523_v59 = vpop.f32.mrb[228].mxu1 }
0x187f   :  { %v6524_v9 = vadd.f32 %v6523_v59, %v14259_v32  ;;  %v6525_v4 = vpop.f32.mrb[229].mxu1 }
0x1880   :  { %v6526_v27 = vadd.f32 %v6525_v4, %v14262_v12  ;;  %v6527_v58 = vpop.f32.mrb[230].mxu1 }
0x1881   :  { %v6528_v61 = vadd.f32 %v6527_v58, %v14265_v31  ;;  %v6529_v51 = vpop.f32.mrb[231].mxu1  ;;  %v7126_v48 = vmax.f32 %v6524_v9, 0.0 }
0x1882   :  { %v6530_v22 = vadd.f32 %v6529_v51, %v14268_v36  ;;  %v7127_v3 = vmax.f32 %v6526_v27, 0.0  ;;  %v4552_v27 = vpop.permute.xlu1 %4551 }
0x1883   :  { %v7128_v60 = vmax.f32 %v6528_v61, 0.0  ;;  %11089 = vmatmul.mubr.msk.bf16.gmra.mrb[80].mxu1 %vm213_vm2, %v4550_v37 }
0x1884   :  { %v7129_v57 = vmax.f32 %v6530_v22, 0.0  ;;  %6801 = vmatprep.mubr.bf16.mxu1 %v16937_v41 }
0x1885   :  { %v7388_v17 = vpack.c.bf16 %v7128_v60, %v7126_v48 }
0x1886   :  { %v7389_v32 = vpack.c.bf16 %v7129_v57, %v7127_v3  ;;  %v6533_v59 = vpop.f32.mrb[232].mxu1 }
0x1887   :  { %v6534_v12 = vadd.f32 %v6533_v59, %v14272_v0  ;;  %v6535_v4 = vpop.f32.mrb[233].mxu1  ;;  %v17159_v59 = vld [vmem:[#allocation50_spill] sm:$0xff] }
0x1888   :  { %v6536_v31 = vadd.f32 %v6535_v4, %v14275_v35  ;;  %v6537_v58 = vpop.f32.mrb[234].mxu1  ;;  %11136 = vmatprep.mubr.msk.bf16.mxu0 %vm126_vm1, %v7389_v32  ;;  %v4554_v32 = vpop.permute.xlu0 %4553 }
0x1889   :  { %v6538_v36 = vadd.f32 %v6537_v58, %v14279_v1  ;;  %v6539_v51 = vpop.f32.mrb[235].mxu1  ;;  %7839 = vmatmul.mubr.bf16.gmra.mrb[232].mxu0 %v7388_v17  ;;  %v7130_v57 = vmax.f32 %v6534_v12, 0.0 }
0x188a   :  { %v6540_v60 = vadd.f32 %v6539_v51, %v14283_v53  ;;  %v7131_v0 = vmax.f32 %v6536_v31, 0.0 }
0x188b   :  { %v7132_v48 = vmax.f32 %v6538_v36, 0.0  ;;  %11090 = vmatmul.mubr.msk.bf16.gmra.mrb[84].mxu1 %vm213_vm2, %v4552_v27  ;;  %v17160_v27 = vld [vmem:[#allocation51_spill] sm:$0xff] }
0x188c   :  { %v7133_v37 = vmax.f32 %v6540_v60, 0.0  ;;  %6811 = vmatprep.mubr.bf16.mxu1 %v16937_v41 }
0x188d   :  { %v7390_v35 = vpack.c.bf16 %v7132_v48, %v7130_v57 }
0x188e   :  { %v7391_v9 = vpack.c.bf16 %v7133_v37, %v7131_v0  ;;  %v6543_v61 = vpop.f32.mrb[236].mxu1  ;;  %v17162_v37 = vld [vmem:[#allocation53_spill] sm:$0xff] }
0x188f   :  { %v6544_v22 = vadd.f32 %v6543_v61, %v14288_v40  ;;  %v6545_v1 = vpop.f32.mrb[237].mxu1  ;;  %v4556_v61 = vpop.permute.xlu1 %4555 }
0x1890   :  { %v6546_v17 = vadd.f32 %v6545_v1, %v14293_v44  ;;  %v6547_v25 = vpop.f32.mrb[238].mxu1  ;;  %11137 = vmatprep.mubr.msk.bf16.mxu0 %vm126_vm1, %v7391_v9 }
0x1891   :  { %v6548_v53 = vadd.f32 %v6547_v25, %v14295_v23  ;;  %v6549_v3 = vpop.f32.mrb[239].mxu1  ;;  %7847 = vmatmul.mubr.bf16.gmra.mrb[236].mxu0 %v7390_v35  ;;  %v7134_v4 = vmax.f32 %v6544_v22, 0.0  ;;  %v17161_v23 = vld [vmem:[#allocation52_spill] sm:$0xff]  ;;  %v17163_v22 = vld [vmem:[#allocation54_spill] sm:$0xff] }
0x1892   :  { %v6550_v12 = vadd.f32 %v6549_v3, %v17159_v59  ;;  %v7135_v58 = vmax.f32 %v6546_v17, 0.0 }
0x1893   :  { %v7136_v31 = vmax.f32 %v6548_v53, 0.0  ;;  %11091 = vmatmul.mubr.msk.bf16.gmra.mrb[88].mxu1 %vm213_vm2, %v4554_v32 }
0x1894   :  { %v7137_v36 = vmax.f32 %v6550_v12, 0.0  ;;  %6821 = vmatprep.mubr.bf16.mxu1 %v16937_v41 }
0x1895   :  { %v7392_v40 = vpack.c.bf16 %v7136_v31, %v7134_v4  ;;  %v17164_v4 = vld [vmem:[#allocation55_spill] sm:$0xff] }
0x1896   :  { %v7393_v44 = vpack.c.bf16 %v7137_v36, %v7135_v58  ;;  %v6553_v51 = vpop.f32.mrb[240].mxu1  ;;  %v17165_v36 = vld [vmem:[#allocation56_spill] sm:$0xff] }
0x1897   :  { %v6554_v60 = vadd.f32 %v6553_v51, %v17160_v27  ;;  %v6555_v57 = vpop.f32.mrb[241].mxu1  ;;  %v17166_v51 = vld [vmem:[#allocation57_spill] sm:$0xff] }
0x1898   :  { %v6556_v48 = vadd.f32 %v6555_v57, %v17161_v23  ;;  %v6557_v0 = vpop.f32.mrb[242].mxu1  ;;  %11138 = vmatprep.mubr.msk.bf16.mxu0 %vm126_vm1, %v7393_v44  ;;  %v4558_v57 = vpop.permute.xlu0 %4557  ;;  %v17167_v23 = vld [vmem:[#allocation58_spill] sm:$0xff] }
0x1899   :  { %v6558_v35 = vadd.f32 %v6557_v0, %v17162_v37  ;;  %v6559_v9 = vpop.f32.mrb[243].mxu1  ;;  %7855 = vmatmul.mubr.bf16.gmra.mrb[240].mxu0 %v7392_v40  ;;  %v7138_v17 = vmax.f32 %v6554_v60, 0.0 }
0x189a   :  { %v6560_v1 = vadd.f32 %v6559_v9, %v17163_v22  ;;  %v7139_v53 = vmax.f32 %v6556_v48, 0.0 }
0x189b   :  { %v7140_v25 = vmax.f32 %v6558_v35, 0.0  ;;  %11092 = vmatmul.mubr.msk.bf16.gmra.mrb[92].mxu1 %vm213_vm2, %v4556_v61 }
0x189c   :  { %v7141_v3 = vmax.f32 %v6560_v1, 0.0  ;;  %6831 = vmatprep.mubr.bf16.mxu1 %v16937_v41 }
0x189d   :  { %v7394_v32 = vpack.c.bf16 %v7140_v25, %v7138_v17  ;;  %v17168_v17 = vld [vmem:[#allocation18_spill] sm:$0xff] }
0x189e   :  { %v7395_v59 = vpack.c.bf16 %v7141_v3, %v7139_v53  ;;  %v6563_v12 = vpop.f32.mrb[244].mxu1  ;;  %v17169_v3 = vld [vmem:[#allocation19_spill] sm:$0xff] }
0x189f   :  { %v6564_v31 = vadd.f32 %v6563_v12, %v17164_v4  ;;  %v6565_v58 = vpop.f32.mrb[245].mxu1  ;;  %v17170_v12 = vld [vmem:[#allocation20_spill] sm:$0xff] }
0x18a0   :  { %v6566_v44 = vadd.f32 %v6565_v58, %v17165_v36  ;;  %v6567_v40 = vpop.f32.mrb[246].mxu1  ;;  %11139 = vmatprep.mubr.msk.bf16.mxu0 %vm126_vm1, %v7395_v59  ;;  %v4560_v58 = vpop.permute.xlu1 %4559  ;;  %v17171_v36 = vld [vmem:[#allocation21_spill] sm:$0xff] }
0x18a1   :  { %v6568_v27 = vadd.f32 %v6567_v40, %v17166_v51  ;;  %v6569_v60 = vpop.f32.mrb[247].mxu1  ;;  %7863 = vmatmul.mubr.bf16.gmra.mrb[244].mxu0 %v7394_v32  ;;  %v7142_v0 = vmax.f32 %v6564_v31, 0.0 }
0x18a2   :  { %v6570_v48 = vadd.f32 %v6569_v60, %v17167_v23  ;;  %v7143_v35 = vmax.f32 %v6566_v44, 0.0 }
0x18a3   :  { %v7144_v37 = vmax.f32 %v6568_v27, 0.0  ;;  %11093 = vmatmul.mubr.msk.bf16.gmra.mrb[96].mxu1 %vm213_vm2, %v4558_v57 }
0x18a4   :  { %v7145_v9 = vmax.f32 %v6570_v48, 0.0  ;;  %6841 = vmatprep.mubr.bf16.mxu1 %v16937_v41 }
0x18a5   :  { %v7396_v61 = vpack.c.bf16 %v7144_v37, %v7142_v0  ;;  %v17172_v0 = vld [vmem:[#allocation22_spill] sm:$0xff] }
0x18a6   :  { %v7397_v22 = vpack.c.bf16 %v7145_v9, %v7143_v35  ;;  %v6573_v1 = vpop.f32.mrb[248].mxu1  ;;  %v17173_v9 = vld [vmem:[#allocation23_spill] sm:$0xff] }
0x18a7   :  { %v6574_v25 = vadd.f32 %v6573_v1, %v17168_v17  ;;  %v6575_v53 = vpop.f32.mrb[249].mxu1  ;;  %v17174_v1 = vld [vmem:[#allocation24_spill] sm:$0xff] }
0x18a8   :  { %v6576_v59 = vadd.f32 %v6575_v53, %v17169_v3  ;;  %v6577_v32 = vpop.f32.mrb[250].mxu1  ;;  %11140 = vmatprep.mubr.msk.bf16.mxu0 %vm126_vm1, %v7397_v22  ;;  %v4562_v53 = vpop.permute.xlu0 %4561  ;;  %v17175_v3 = vld [vmem:[#allocation25_spill] sm:$0xff] }
0x18a9   :  { %v6578_v4 = vadd.f32 %v6577_v32, %v17170_v12  ;;  %v6579_v31 = vpop.f32.mrb[251].mxu1  ;;  %7871 = vmatmul.mubr.bf16.gmra.mrb[248].mxu0 %v7396_v61  ;;  %v7146_v40 = vmax.f32 %v6574_v25, 0.0 }
0x18aa   :  { %v6580_v44 = vadd.f32 %v6579_v31, %v17171_v36  ;;  %v7147_v27 = vmax.f32 %v6576_v59, 0.0 }
0x18ab   :  { %v7148_v51 = vmax.f32 %v6578_v4, 0.0  ;;  %11094 = vmatmul.mubr.msk.bf16.gmra.mrb[100].mxu1 %vm213_vm2, %v4560_v58 }
0x18ac   :  { %v7149_v60 = vmax.f32 %v6580_v44, 0.0  ;;  %6851 = vmatprep.mubr.bf16.mxu1 %v16937_v41 }
0x18ad   :  { %v7398_v57 = vpack.c.bf16 %v7148_v51, %v7146_v40  ;;  %v17176_v40 = vld [vmem:[#allocation26_spill] sm:$0xff] }
0x18ae   :  { %v7399_v23 = vpack.c.bf16 %v7149_v60, %v7147_v27  ;;  %v6583_v48 = vpop.f32.mrb[252].mxu1  ;;  %v17177_v60 = vld [vmem:[#allocation27_spill] sm:$0xff] }
0x18af   :  { %v6584_v37 = vadd.f32 %v6583_v48, %v17172_v0  ;;  %v6585_v35 = vpop.f32.mrb[253].mxu1  ;;  %v17178_v48 = vld [vmem:[#allocation28_spill] sm:$0xff] }
0x18b0   :  { %v6586_v22 = vadd.f32 %v6585_v35, %v17173_v9  ;;  %v6587_v61 = vpop.f32.mrb[254].mxu1  ;;  %11141 = vmatprep.mubr.msk.bf16.mxu0 %vm126_vm1, %v7399_v23  ;;  %v4564_v35 = vpop.permute.xlu1 %4563  ;;  %v17179_v9 = vld [vmem:[#allocation29_spill] sm:$0xff] }
0x18b1   :  { %v6588_v17 = vadd.f32 %v6587_v61, %v17174_v1  ;;  %v6589_v25 = vpop.f32.mrb[255].mxu1  ;;  %7879 = vmatmul.mubr.bf16.gmra.mrb[252].mxu0 %v7398_v57  ;;  %v7150_v32 = vmax.f32 %v6584_v37, 0.0 }
0x18b2   :  { %v6590_v59 = vadd.f32 %v6589_v25, %v17175_v3  ;;  %v7151_v4 = vmax.f32 %v6586_v22, 0.0 }
0x18b3   :  { %v7152_v12 = vmax.f32 %v6588_v17, 0.0  ;;  %11095 = vmatmul.mubr.msk.bf16.gmra.mrb[104].mxu1 %vm213_vm2, %v4562_v53 }
0x18b4   :  { %v7153_v31 = vmax.f32 %v6590_v59, 0.0  ;;  %6861 = vmatprep.mubr.bf16.mxu1 %v16937_v41 }
0x18b5   :  { %v7400_v58 = vpack.c.bf16 %v7152_v12, %v7150_v32  ;;  %v17180_v32 = vld [vmem:[#allocation30_spill] sm:$0xff] }
0x18b6   :  { %v7401_v36 = vpack.c.bf16 %v7153_v31, %v7151_v4  ;;  %v6593_v44 = vpop.f32.mrb[0].mxu1  ;;  %v17181_v31 = vld [vmem:[#allocation31_spill] sm:$0xff] }
0x18b7   :  { %v6594_v51 = vadd.f32 %v6593_v44, %v17176_v40  ;;  %v6595_v27 = vpop.f32.mrb[1].mxu1  ;;  %v17182_v44 = vld [vmem:[#allocation32_spill] sm:$0xff] }
0x18b8   :  { %v6596_v23 = vadd.f32 %v6595_v27, %v17177_v60  ;;  %v6597_v57 = vpop.f32.mrb[2].mxu1  ;;  %11142 = vmatprep.mubr.msk.bf16.mxu0 %vm126_vm1, %v7401_v36  ;;  %v4566_v27 = vpop.permute.xlu0 %4565  ;;  %v17183_v60 = vld [vmem:[#allocation33_spill] sm:$0xff] }
0x18b9   :  { %v6598_v0 = vadd.f32 %v6597_v57, %v17178_v48  ;;  %v6599_v37 = vpop.f32.mrb[3].mxu1  ;;  %7887 = vmatmul.mubr.bf16.gmra.mrb[4].mxu0 %v7400_v58  ;;  %v7154_v61 = vmax.f32 %v6594_v51, 0.0 }
0x18ba   :  { %v6600_v22 = vadd.f32 %v6599_v37, %v17179_v9  ;;  %v7155_v17 = vmax.f32 %v6596_v23, 0.0  ;;  %v15270_v9 = vld [vmem:[#allocation4 + $0x6] ss:$0 sm:$0xff] }
0x18bb   :  { %v7156_v1 = vmax.f32 %v6598_v0, 0.0  ;;  %11096 = vmatmul.mubr.msk.bf16.gmra.mrb[108].mxu1 %vm213_vm2, %v4564_v35 }
0x18bc   :  { %v7157_v25 = vmax.f32 %v6600_v22, 0.0  ;;  %6871 = vmatprep.mubr.bf16.mxu1 %v16937_v41 }
0x18bd   :  { %v7402_v53 = vpack.c.bf16 %v7156_v1, %v7154_v61  ;;  %v17184_v1 = vld [vmem:[#allocation34_spill] sm:$0xff] }
0x18be   :  { %v7403_v3 = vpack.c.bf16 %v7157_v25, %v7155_v17  ;;  %v6603_v59 = vpop.f32.mrb[4].mxu1 }
0x18bf   :  { %v6604_v12 = vadd.f32 %v6603_v59, %v17180_v32  ;;  %v6605_v4 = vpop.f32.mrb[5].mxu1  ;;  %v17185_v59 = vld [vmem:[#allocation35_spill] sm:$0xff] }
0x18c0   :  { %v6606_v36 = vadd.f32 %v6605_v4, %v17181_v31  ;;  %v6607_v58 = vpop.f32.mrb[6].mxu1  ;;  %11143 = vmatprep.mubr.msk.bf16.mxu0 %vm126_vm1, %v7403_v3  ;;  %v17186_v31 = vld [vmem:[#allocation36_spill] sm:$0xff] }
0x18c1   :  { %v6608_v40 = vadd.f32 %v6607_v58, %v17182_v44  ;;  %v6609_v51 = vpop.f32.mrb[7].mxu1  ;;  %7895 = vmatmul.mubr.bf16.gmra.mrb[8].mxu0 %v7402_v53  ;;  %v7158_v57 = vmax.f32 %v6604_v12, 0.0 }
0x18c2   :  { %v6610_v23 = vadd.f32 %v6609_v51, %v17183_v60  ;;  %v7159_v0 = vmax.f32 %v6606_v36, 0.0 }
0x18c3   :  { %v7160_v48 = vmax.f32 %v6608_v40, 0.0  ;;  %11097 = vmatmul.mubr.msk.bf16.gmra.mrb[112].mxu1 %vm213_vm2, %v4566_v27  ;;  %v4568_v40 = vpop.permute.xlu1 %4567  ;;  %v17187_v27 = vld [vmem:[#allocation37_spill] sm:$0xff] }
0x18c4   :  { %v7161_v37 = vmax.f32 %v6610_v23, 0.0  ;;  %6881 = vmatprep.mubr.bf16.mxu1 %v16937_v41 }
0x18c5   :  { %v7404_v35 = vpack.c.bf16 %v7160_v48, %v7158_v57 }
0x18c6   :  { %v7405_v22 = vpack.c.bf16 %v7161_v37, %v7159_v0  ;;  %v6613_v61 = vpop.f32.mrb[12].mxu1 }
0x18c7   :  { %v6614_v17 = vadd.f32 %v6613_v61, %v17184_v1  ;;  %v7792_v25 = vpop.f32.mrb[208].mxu0  ;;  %v6615_v53 = vpop.f32.mrb[13].mxu1 }
0x18c8   :  { %v7793_v3 = vadd.f32 %v15270_v9, %v7792_v25  ;;  %v6616_v32 = vadd.f32 %v6615_v53, %v17185_v59  ;;  %v7794_v12 = vpop.f32.mrb[209].mxu0  ;;  %v6617_v4 = vpop.f32.mrb[14].mxu1  ;;  %11144 = vmatprep.mubr.msk.bf16.mxu0 %vm126_vm1, %v7405_v22  ;;  %v17188_v59 = vld [vmem:[#allocation38_spill] sm:$0xff] }
0x18c9   :  { %v6618_v36 = vadd.f32 %v6617_v4, %v17186_v31  ;;  %v7795_v58 = vpop.f32.mrb[210].mxu0  ;;  %v6619_v44 = vpop.f32.mrb[15].mxu1  ;;  %7903 = vmatmul.mubr.bf16.gmra.mrb[12].mxu0 %v7404_v35  ;;  %v7162_v57 = vmax.f32 %v6614_v17, 0.0 }
0x18ca   :  { %v7796_v51 = vadd.f32 %v15270_v9, %v7795_v58  ;;  %v6620_v60 = vadd.f32 %v6619_v44, %v17187_v27  ;;  %v7797_v23 = vpop.f32.mrb[211].mxu0  ;;  %v8303_v0 = vmax.f32 %v7793_v3, 0.0  ;;  %v7163_v37 = vmax.f32 %v6616_v32, 0.0  ;;  %v17190_v32 = vld [vmem:[#allocation40_spill] sm:$0xff] }
0x18cb   :  { %v7164_v48 = vmax.f32 %v6618_v36, 0.0  ;;  %11098 = vmatmul.mubr.msk.bf16.gmra.mrb[116].mxu1 %vm213_vm2, %v4568_v40  ;;  %v17189_v36 = vld [vmem:[#allocation39_spill] sm:$0xff] }
0x18cc   :  { %v8304_v61 = vmax.f32 %v7796_v51, 0.0  ;;  %v7165_v1 = vmax.f32 %v6620_v60, 0.0  ;;  %6891 = vmatprep.mubr.bf16.mxu1 %v16937_v41  ;;  %v4570_v60 = vpop.permute.xlu0 %4569 }
0x18cd   :  { %v7406_v22 = vpack.c.bf16 %v7164_v48, %v7162_v57  ;;  %v17191_v57 = vld [vmem:[#allocation41_spill] sm:$0xff] }
0x18ce   :  { %v15281_v25 = vpack.c.bf16 %v8304_v61, %v8303_v0  ;;  %v7407_v35 = vpack.c.bf16 %v7165_v1, %v7163_v37  ;;  %v6623_v53 = vpop.f32.mrb[16].mxu1 }
0x18cf   :  { %v6624_v12 = vadd.f32 %v6623_v53, %v17188_v59  ;;  %v7800_v4 = vpop.f32.mrb[212].mxu0  ;;  %v6625_v31 = vpop.f32.mrb[17].mxu1 }
0x18d0   :  { %v7801_v17 = vadd.f32 %v15270_v9, %v7800_v4  ;;  %v6626_v58 = vadd.f32 %v6625_v31, %v17189_v36  ;;  %v7802_v44 = vpop.f32.mrb[213].mxu0  ;;  %v6627_v3 = vpop.f32.mrb[18].mxu1  ;;  %11145 = vmatprep.mubr.msk.bf16.mxu0 %vm126_vm1, %v7407_v35 }
0x18d1   :  { %v6628_v40 = vadd.f32 %v6627_v3, %v17190_v32  ;;  %v7803_v51 = vpop.f32.mrb[214].mxu0  ;;  %v6629_v27 = vpop.f32.mrb[19].mxu1  ;;  %7911 = vmatmul.mubr.bf16.gmra.mrb[16].mxu0 %v7406_v22  ;;  %v7166_v37 = vmax.f32 %v6624_v12, 0.0  ;;  %v17192_v44 = vld [vmem:[#allocation42_spill] sm:$0xff] }
0x18d2   :  { %v7804_v23 = vadd.f32 %v15270_v9, %v7803_v51  ;;  %v6630_v48 = vadd.f32 %v6629_v27, %v17191_v57  ;;  %v7805_v0 = vpop.f32.mrb[215].mxu0  ;;  %v8305_v1 = vmax.f32 %v7801_v17, 0.0  ;;  %v7167_v53 = vmax.f32 %v6626_v58, 0.0  ;;  %v17193_v51 = vld [vmem:[#allocation43_spill] sm:$0xff] }
0x18d3   :  { %v7168_v61 = vmax.f32 %v6628_v40, 0.0  ;;  %11099 = vmatmul.mubr.msk.bf16.gmra.mrb[120].mxu1 %vm213_vm2, %v4570_v60  ;;  %v17194_v40 = vld [vmem:[#allocation44_spill] sm:$0xff]  ;;  %v4572_v60 = vpop.permute.xlu1 %4571 }
0x18d4   :  { %v8306_v59 = vmax.f32 %v7804_v23, 0.0  ;;  %v7169_v4 = vmax.f32 %v6630_v48, 0.0  ;;  %6901 = vmatprep.mubr.bf16.mxu1 %v16937_v41  ;;  %v17195_v23 = vld [vmem:[#allocation45_spill] sm:$0xff] }
0x18d5   :  { %v7408_v35 = vpack.c.bf16 %v7168_v61, %v7166_v37 }
0x18d6   :  { %v15292_v31 = vpack.c.bf16 %v8306_v59, %v8305_v1  ;;  %v7409_v22 = vpack.c.bf16 %v7169_v4, %v7167_v53  ;;  %v6633_v36 = vpop.f32.mrb[20].mxu1  ;;  %v17196_v4 = vld [vmem:[#allocation46_spill] sm:$0xff] }
0x18d7   :  { %v6634_v3 = vadd.f32 %v6633_v36, %v17192_v44  ;;  %v6635_v32 = vpop.f32.mrb[21].mxu1  ;;  %v17197_v44 = vld [vmem:[#allocation47_spill] sm:$0xff] }
0x18d8   :  { %v6636_v27 = vadd.f32 %v6635_v32, %v17193_v51  ;;  %v6637_v12 = vpop.f32.mrb[22].mxu1  ;;  %11146 = vmatprep.mubr.msk.bf16.mxu0 %vm126_vm1, %v7409_v22  ;;  %v17198_v51 = vld [vmem:[#allocation48_spill] sm:$0xff] }
0x18d9   :  { %v6638_v17 = vadd.f32 %v6637_v12, %v17194_v40  ;;  %v6639_v58 = vpop.f32.mrb[23].mxu1  ;;  %7919 = vmatmul.mubr.bf16.gmra.mrb[20].mxu0 %v7408_v35  ;;  %v7170_v48 = vmax.f32 %v6634_v3, 0.0  ;;  %v4574_v40 = vpop.permute.xlu0 %4573 }
0x18da   :  { %v6640_v57 = vadd.f32 %v6639_v58, %v17195_v23  ;;  %v7171_v37 = vmax.f32 %v6636_v27, 0.0  ;;  %v17199_v27 = vld [vmem:[#allocation49_spill] sm:$0xff] }
0x18db   :  { %v7172_v0 = vmax.f32 %v6638_v17, 0.0  ;;  %11100 = vmatmul.mubr.msk.bf16.gmra.mrb[124].mxu1 %vm213_vm2, %v4572_v60 }
0x18dc   :  { %v7173_v61 = vmax.f32 %v6640_v57, 0.0  ;;  %6911 = vmatprep.mubr.bf16.mxu1 %v16937_v41 }
0x18dd   :  { %v7410_v1 = vpack.c.bf16 %v7172_v0, %v7170_v48 }
0x18de   :  { %v7411_v53 = vpack.c.bf16 %v7173_v61, %v7171_v37  ;;  %v6643_v59 = vpop.f32.mrb[24].mxu1  ;;  %v17200_v61 = vld [vmem:[#allocation16_spill] sm:$0xff] }
0x18df   :  { %v6644_v22 = vadd.f32 %v6643_v59, %v17196_v4  ;;  %v6645_v36 = vpop.f32.mrb[25].mxu1  ;;  %v17201_v4 = vld [vmem:[#allocation17_spill] sm:$0xff] }
0x18e0   :  { %v6646_v32 = vadd.f32 %v6645_v36, %v17197_v44  ;;  %v6647_v35 = vpop.f32.mrb[26].mxu1  ;;  %11147 = vmatprep.mubr.msk.bf16.mxu0 %vm126_vm1, %v7411_v53  ;;  %v17202_v44 = vld [vmem:[#allocation59_spill] sm:$0xff] }
0x18e1   :  { %v6648_v3 = vadd.f32 %v6647_v35, %v17198_v51  ;;  %v6649_v12 = vpop.f32.mrb[27].mxu1  ;;  %7927 = vmatmul.mubr.bf16.gmra.mrb[0].mxu0 %v7410_v1  ;;  %v7174_v58 = vmax.f32 %v6644_v22, 0.0 }
0x18e2   :  { %v6650_v17 = vadd.f32 %v6649_v12, %v17199_v27  ;;  %v7175_v23 = vmax.f32 %v6646_v32, 0.0  ;;  %v4576_v32 = vpop.permute.xlu1 %4575 }
0x18e3   :  { %v7176_v60 = vmax.f32 %v6648_v3, 0.0  ;;  %11101 = vmatmul.mubr.msk.bf16.gmra.mrb[128].mxu1 %vm213_vm2, %v4574_v40  ;;  %v17203_v3 = vld [vmem:[#allocation60_spill] sm:$0xff] }
0x18e4   :  { %v7177_v57 = vmax.f32 %v6650_v17, 0.0  ;;  %6921 = vmatprep.mubr.bf16.mxu1 %v16937_v41 }
0x18e5   :  { %v7412_v48 = vpack.c.bf16 %v7176_v60, %v7174_v58 }
0x18e6   :  { %v7413_v0 = vpack.c.bf16 %v7177_v57, %v7175_v23  ;;  %v6653_v37 = vpop.f32.mrb[8].mxu1 }
0x18e7   :  { %v6654_v53 = vadd.f32 %v6653_v37, %v17200_v61  ;;  %v6655_v59 = vpop.f32.mrb[9].mxu1 }
0x18e8   :  { %v6656_v36 = vadd.f32 %v6655_v59, %v17201_v4  ;;  %v6657_v1 = vpop.f32.mrb[10].mxu1  ;;  %11148 = vmatprep.mubr.msk.bf16.mxu0 %vm126_vm1, %v7413_v0 }
0x18e9   :  { %v6658_v22 = vadd.f32 %v6657_v1, %v17202_v44  ;;  %v6659_v35 = vpop.f32.mrb[11].mxu1  ;;  %v7808_v51 = vpop.f32.mrb[216].mxu0  ;;  %7935 = vmatmul.mubr.bf16.gmra.mrb[28].mxu0 %v7412_v48  ;;  %v7178_v17 = vmax.f32 %v6654_v53, 0.0  ;;  %v12208_v44 = vld [vmem:[#allocation6 + $0xf0] sm:$0xff]  }
0x18ea   :  { %v6660_v12 = vadd.f32 %v6659_v35, %v17203_v3  ;;  %v7809_v40 = vadd.f32 %v15270_v9, %v7808_v51  ;;  %v7810_v27 = vpop.f32.mrb[217].mxu0  ;;  %v7179_v23 = vmax.f32 %v6656_v36, 0.0  ;;  %v17204_v35 = vld [vmem:[#allocation61_spill] sm:$0xff]  ;;  %11780 = vmatprep.subr.bf16.mxu1 %v12208_v44 }
0x18eb   :  { %v7180_v58 = vmax.f32 %v6658_v22, 0.0  ;;  %11102 = vmatmul.mubr.msk.bf16.gmra.mrb[132].mxu1 %vm213_vm2, %v4576_v32  ;;  %v7811_v60 = vpop.f32.mrb[218].mxu0  ;;  %v17205_v32 = vld [vmem:[#allocation62_spill] sm:$0xff] }
0x18ec   :  { %v7181_v57 = vmax.f32 %v6660_v12, 0.0  ;;  %v7812_v0 = vadd.f32 %v15270_v9, %v7811_v60  ;;  %v7813_v37 = vpop.f32.mrb[219].mxu0  ;;  %6931 = vmatprep.mubr.bf16.mxu1 %v16937_v41  ;;  %v8307_v59 = vmax.f32 %v7809_v40, 0.0  ;;  %v17206_v12 = vld [vmem:[#allocation63_spill] sm:$0xff]  ;;  %11781 = vmatpush3.bf16.msra.mxu1 %v12208_v44  ;;  %v4578_v40 = vpop.permute.xlu0 %4577 }
0x18ed   :  { %v7414_v61 = vpack.c.bf16 %v7180_v58, %v7178_v17  ;;  %v17207_v58 = vld [vmem:[#allocation64_spill] sm:$0xff] }
0x18ee   :  { %v7415_v48 = vpack.c.bf16 %v7181_v57, %v7179_v23  ;;  %v8308_v4 = vmax.f32 %v7812_v0, 0.0  ;;  %v6663_v1 = vpop.f32.mrb[28].mxu1 }
0x18ef   :  { %v6664_v51 = vadd.f32 %v6663_v1, %v17204_v35  ;;  %v6665_v53 = vpop.f32.mrb[29].mxu1 }
0x18f0   :  { %v15318_v22 = vpack.c.bf16 %v8308_v4, %v8307_v59  ;;  %v6666_v3 = vadd.f32 %v6665_v53, %v17205_v32  ;;  %v6667_v36 = vpop.f32.mrb[30].mxu1  ;;  %11149 = vmatprep.mubr.msk.bf16.mxu0 %vm126_vm1, %v7415_v48 }
0x18f1   :  { %v6668_v27 = vadd.f32 %v6667_v36, %v17206_v12  ;;  %v6669_v60 = vpop.f32.mrb[31].mxu1  ;;  %v7816_v17 = vpop.f32.mrb[220].mxu0  ;;  %7943 = vmatmul.mubr.bf16.gmra.mrb[32].mxu0 %v7414_v61  ;;  %v7182_v37 = vmax.f32 %v6664_v51, 0.0 }
0x18f2   :  { %v6670_v23 = vadd.f32 %v6669_v60, %v17207_v58  ;;  %v7817_v57 = vadd.f32 %v15270_v9, %v7816_v17  ;;  %v7818_v0 = vpop.f32.mrb[221].mxu0  ;;  %v7183_v1 = vmax.f32 %v6666_v3, 0.0  ;;  %v12209_v60 = vld [vmem:[#allocation6 + $0xf8] ss:$0 sps:$4 sm:$0x33]   ;;  %v17208_v17 = vld [vmem:[#allocation65_spill] sm:$0xff] }
0x18f3   :  { %v7184_v59 = vmax.f32 %v6668_v27, 0.0  ;;  %11103 = vmatmul.mubr.msk.bf16.gmra.mrb[136].mxu1 %vm213_vm2, %v4578_v40  ;;  %v7819_v4 = vpop.f32.mrb[222].mxu0  ;;  %v17209_v40 = vld [vmem:[#allocation66_spill] sm:$0xff]  ;;  %12052 = vmatprep.subr.msk.bf16.mxu1 %vm433_vm4, %v12209_v60 }
0x18f4   :  { %v7185_v48 = vmax.f32 %v6670_v23, 0.0  ;;  %v7820_v35 = vadd.f32 %v15270_v9, %v7819_v4  ;;  %v7821_v53 = vpop.f32.mrb[223].mxu0  ;;  %6941 = vmatprep.mubr.bf16.mxu1 %v16937_v41  ;;  %v8309_v32 = vmax.f32 %v7817_v57, 0.0  ;;  %v8733_v23 = vsel %vm433_vm4, %v12209_v60, 0 }
0x18f5   :  { %v7416_v61 = vpack.c.bf16 %v7184_v59, %v7182_v37  ;;  %v17210_v37 = vld [vmem:[#allocation67_spill] sm:$0xff]  ;;  %11783 = vmatpush3.bf16.msra.mxu1 %v8733_v23 }
0x18f6   :  { %v7417_v44 = vpack.c.bf16 %v7185_v48, %v7183_v1  ;;  %v8310_v36 = vmax.f32 %v7820_v35, 0.0  ;;  %v6673_v12 = vpop.f32.mrb[32].mxu1  ;;  %v4580_v1 = vpop.permute.xlu1 %4579  ;;  %v17211_v48 = vld [vmem:[#allocation68_spill] sm:$0xff] }
0x18f7   :  { %v6674_v58 = vadd.f32 %v6673_v12, %v17208_v17  ;;  %v6675_v51 = vpop.f32.mrb[33].mxu1 }
0x18f8   :  { %v15329_v27 = vpack.c.bf16 %v8310_v36, %v8309_v32  ;;  %v6676_v0 = vadd.f32 %v6675_v51, %v17209_v40  ;;  %v6677_v3 = vpop.f32.mrb[34].mxu1  ;;  %11150 = vmatprep.mubr.msk.bf16.mxu0 %vm126_vm1, %v7417_v44 }
0x18f9   :  { %v6678_v59 = vadd.f32 %v6677_v3, %v17210_v37  ;;  %v6679_v57 = vpop.f32.mrb[35].mxu1  ;;  %v7824_v4 = vpop.f32.mrb[224].mxu0  ;;  %7951 = vmatmul.mubr.bf16.gmra.mrb[36].mxu0 %v7416_v61  ;;  %v7186_v36 = vmax.f32 %v6674_v58, 0.0 }
0x18fa   :  { %v6680_v35 = vadd.f32 %v6679_v57, %v17211_v48  ;;  %v7825_v53 = vadd.f32 %v15270_v9, %v7824_v4  ;;  %v7826_v32 = vpop.f32.mrb[225].mxu0  ;;  %v7187_v17 = vmax.f32 %v6676_v0, 0.0  ;;  %v17212_v48 = vld [vmem:[#allocation69_spill] sm:$0xff]  ;;  %v17214_v0 = vld [vmem:[#allocation71_spill] sm:$0xff] }
0x18fb   :  { %v7188_v12 = vmax.f32 %v6678_v59, 0.0  ;;  %11104 = vmatmul.mubr.msk.bf16.gmra.mrb[140].mxu1 %vm213_vm2, %v4580_v1  ;;  %v7827_v44 = vpop.f32.mrb[226].mxu0  ;;  %v17213_v59 = vld [vmem:[#allocation70_spill] sm:$0xff] }
0x18fc   :  { %v7189_v51 = vmax.f32 %v6680_v35, 0.0  ;;  %v7828_v60 = vadd.f32 %v15270_v9, %v7827_v44  ;;  %v7829_v40 = vpop.f32.mrb[227].mxu0  ;;  %6951 = vmatprep.mubr.bf16.mxu1 %v16937_v41  ;;  %v8311_v23 = vmax.f32 %v7825_v53, 0.0 }
0x18fd   :  { %v7418_v61 = vpack.c.bf16 %v7188_v12, %v7186_v36  ;;  %v4582_v36 = vpop.permute.xlu0 %4581  ;;  %v17215_v12 = vld [vmem:[#allocation72_spill] sm:$0xff] }
0x18fe   :  { %v7419_v3 = vpack.c.bf16 %v7189_v51, %v7187_v17  ;;  %v8312_v37 = vmax.f32 %v7828_v60, 0.0  ;;  %v6683_v57 = vpop.f32.mrb[36].mxu1 }
0x18ff   :  { %v6684_v4 = vadd.f32 %v6683_v57, %v17212_v48  ;;  %v6685_v32 = vpop.f32.mrb[37].mxu1 }
0x1900   :  { %v15342_v58 = vpack.c.bf16 %v8312_v37, %v8311_v23  ;;  %v6686_v1 = vadd.f32 %v6685_v32, %v17213_v59  ;;  %v6687_v5 = vpop.f32.mrb[38].mxu1  ;;  %11151 = vmatprep.mubr.msk.bf16.mxu0 %vm126_vm1, %v7419_v3 }
0x1901   :  { %v6688_v35 = vadd.f32 %v6687_v5, %v17214_v0  ;;  %v6689_v44 = vpop.f32.mrb[39].mxu1  ;;  %v7832_v40 = vpop.f32.mrb[228].mxu0  ;;  %7959 = vmatmul.mubr.bf16.gmra.mrb[40].mxu0 %v7418_v61  ;;  %v7190_v60 = vmax.f32 %v6684_v4, 0.0 }
0x1902   :  { %v6690_v53 = vadd.f32 %v6689_v44, %v17215_v12  ;;  %v7833_v17 = vadd.f32 %v15270_v9, %v7832_v40  ;;  %v7834_v51 = vpop.f32.mrb[229].mxu0  ;;  %v7191_v37 = vmax.f32 %v6686_v1, 0.0  ;;  %v17216_v12 = vld [vmem:[#allocation73_spill] sm:$0xff]  ;;  %v17218_v1 = vld [vmem:[#allocation75_spill] sm:$0xff] }
0x1903   :  { %v7192_v57 = vmax.f32 %v6688_v35, 0.0  ;;  %11105 = vmatmul.mubr.msk.bf16.gmra.mrb[144].mxu1 %vm213_vm2, %v4582_v36  ;;  %v7835_v23 = vpop.f32.mrb[230].mxu0  ;;  %v17217_v35 = vld [vmem:[#allocation74_spill] sm:$0xff] }
0x1904   :  { %v7193_v48 = vmax.f32 %v6690_v53, 0.0  ;;  %v7836_v3 = vadd.f32 %v15270_v9, %v7835_v23  ;;  %v7837_v32 = vpop.f32.mrb[231].mxu0  ;;  %6961 = vmatprep.mubr.bf16.mxu1 %v16937_v41  ;;  %v8313_v59 = vmax.f32 %v7833_v17, 0.0 }
0x1905   :  { %v7420_v5 = vpack.c.bf16 %v7192_v57, %v7190_v60  ;;  %v4584_v32 = vpop.permute.xlu1 %4583  ;;  %v17219_v60 = vld [vmem:[#allocation76_spill] sm:$0xff] }
0x1906   :  { %v7421_v61 = vpack.c.bf16 %v7193_v48, %v7191_v37  ;;  %v8314_v0 = vmax.f32 %v7836_v3, 0.0  ;;  %v6693_v44 = vpop.f32.mrb[40].mxu1 }
0x1907   :  { %v6694_v40 = vadd.f32 %v6693_v44, %v17216_v12  ;;  %v6695_v51 = vpop.f32.mrb[41].mxu1  ;;  %v17220_v12 = vld [vmem:[#allocation77_spill] sm:$0xff] }
0x1908   :  { %v15353_v4 = vpack.c.bf16 %v8314_v0, %v8313_v59  ;;  %v6696_v36 = vadd.f32 %v6695_v51, %v17217_v35  ;;  %v6697_v19 = vpop.f32.mrb[42].mxu1  ;;  %11152 = vmatprep.mubr.msk.bf16.mxu0 %vm126_vm1, %v7421_v61 }
0x1909   :  { %v6698_v53 = vadd.f32 %v6697_v19, %v17218_v1  ;;  %v6699_v23 = vpop.f32.mrb[43].mxu1  ;;  %7967 = vmatmul.mubr.bf16.gmra.mrb[44].mxu0 %v7420_v5  ;;  %v7194_v17 = vmax.f32 %v6694_v40, 0.0  ;;  %v17221_v19 = vld [vmem:[#allocation78_spill] sm:$0xff]  ;;  %v17222_v1 = vld [vmem:[#allocation79_spill] sm:$0xff] }
0x190a   :  { %v6700_v57 = vadd.f32 %v6699_v23, %v17219_v60  ;;  %v7195_v48 = vmax.f32 %v6696_v36, 0.0  ;;  %v4586_v23 = vpop.permute.xlu0 %4585  ;;  %v17223_v36 = vld [vmem:[#allocation80_spill] sm:$0xff] }
0x190b   :  { %v7196_v37 = vmax.f32 %v6698_v53, 0.0  ;;  %11106 = vmatmul.mubr.msk.bf16.gmra.mrb[148].mxu1 %vm213_vm2, %v4584_v32 }
0x190c   :  { %v7197_v3 = vmax.f32 %v6700_v57, 0.0  ;;  %6971 = vmatprep.mubr.bf16.mxu1 %v16937_v41 }
0x190d   :  { %v7422_v59 = vpack.c.bf16 %v7196_v37, %v7194_v17 }
0x190e   :  { %v7423_v0 = vpack.c.bf16 %v7197_v3, %v7195_v48  ;;  %v6703_v44 = vpop.f32.mrb[44].mxu1 }
0x190f   :  { %v6704_v61 = vadd.f32 %v6703_v44, %v17220_v12  ;;  %v6705_v51 = vpop.f32.mrb[45].mxu1  ;;  %v17224_v12 = vld [vmem:[#allocation81_spill] sm:$0xff] }
0x1910   :  { %v6706_v35 = vadd.f32 %v6705_v51, %v17221_v19  ;;  %v6707_v5 = vpop.f32.mrb[46].mxu1  ;;  %11153 = vmatprep.mubr.msk.bf16.mxu0 %vm126_vm1, %v7423_v0  ;;  %v17225_v19 = vld [vmem:[#allocation82_spill] sm:$0xff] }
0x1911   :  { %v6708_v40 = vadd.f32 %v6707_v5, %v17222_v1  ;;  %v6709_v53 = vpop.f32.mrb[47].mxu1  ;;  %7975 = vmatmul.mubr.bf16.gmra.mrb[24].mxu0 %v7422_v59  ;;  %v7198_v60 = vmax.f32 %v6704_v61, 0.0  ;;  %v17226_v1 = vld [vmem:[#allocation83_spill] sm:$0xff] }
0x1912   :  { %v6710_v32 = vadd.f32 %v6709_v53, %v17223_v36  ;;  %v7199_v17 = vmax.f32 %v6706_v35, 0.0  ;;  %v4588_v53 = vpop.permute.xlu1 %4587  ;;  %v17227_v35 = vld [vmem:[#allocation84_spill] sm:$0xff] }
0x1913   :  { %v7200_v57 = vmax.f32 %v6708_v40, 0.0  ;;  %11107 = vmatmul.mubr.msk.bf16.gmra.mrb[152].mxu1 %vm213_vm2, %v4586_v23 }
0x1914   :  { %v7201_v37 = vmax.f32 %v6710_v32, 0.0  ;;  %6981 = vmatprep.mubr.bf16.mxu1 %v16937_v41 }
0x1915   :  { %v7424_v48 = vpack.c.bf16 %v7200_v57, %v7198_v60 }
0x1916   :  { %v7425_v3 = vpack.c.bf16 %v7201_v37, %v7199_v17  ;;  %v6713_v44 = vpop.f32.mrb[48].mxu1 }
0x1917   :  { %v6714_v0 = vadd.f32 %v6713_v44, %v17224_v12  ;;  %v6715_v51 = vpop.f32.mrb[49].mxu1  ;;  %v17228_v12 = vld [vmem:[#allocation85_spill] sm:$0xff] }
0x1918   :  { %v6716_v5 = vadd.f32 %v6715_v51, %v17225_v19  ;;  %v6717_v59 = vpop.f32.mrb[50].mxu1  ;;  %11154 = vmatprep.mubr.msk.bf16.mxu0 %vm126_vm1, %v7425_v3  ;;  %v17229_v19 = vld [vmem:[#allocation86_spill] sm:$0xff] }
0x1919   :  { %v6718_v61 = vadd.f32 %v6717_v59, %v17226_v1  ;;  %v6719_v40 = vpop.f32.mrb[51].mxu1  ;;  %7983 = vmatmul.mubr.bf16.gmra.mrb[48].mxu0 %v7424_v48  ;;  %v7202_v36 = vmax.f32 %v6714_v0, 0.0  ;;  %v17230_v1 = vld [vmem:[#allocation87_spill] sm:$0xff] }
0x191a   :  { %v6720_v23 = vadd.f32 %v6719_v40, %v17227_v35  ;;  %v7203_v60 = vmax.f32 %v6716_v5, 0.0  ;;  %v4590_v40 = vpop.permute.xlu0 %4589  ;;  %v17231_v5 = vld [vmem:[#allocation88_spill] sm:$0xff] }
0x191b   :  { %v7204_v32 = vmax.f32 %v6718_v61, 0.0  ;;  %11108 = vmatmul.mubr.msk.bf16.gmra.mrb[156].mxu1 %vm213_vm2, %v4588_v53 }
0x191c   :  { %v7205_v57 = vmax.f32 %v6720_v23, 0.0  ;;  %6991 = vmatprep.mubr.bf16.mxu1 %v16937_v41 }
0x191d   :  { %v7426_v17 = vpack.c.bf16 %v7204_v32, %v7202_v36 }
0x191e   :  { %v7427_v37 = vpack.c.bf16 %v7205_v57, %v7203_v60  ;;  %v6723_v44 = vpop.f32.mrb[52].mxu1 }
0x191f   :  { %v6724_v3 = vadd.f32 %v6723_v44, %v17228_v12  ;;  %v6725_v51 = vpop.f32.mrb[53].mxu1  ;;  %v17232_v12 = vld [vmem:[#allocation89_spill] sm:$0xff] }
0x1920   :  { %v6726_v59 = vadd.f32 %v6725_v51, %v17229_v19  ;;  %v6727_v48 = vpop.f32.mrb[54].mxu1  ;;  %11155 = vmatprep.mubr.msk.bf16.mxu0 %vm126_vm1, %v7427_v37  ;;  %v17233_v19 = vld [vmem:[#allocation90_spill] sm:$0xff] }
0x1921   :  { %v6728_v0 = vadd.f32 %v6727_v48, %v17230_v1  ;;  %v6729_v61 = vpop.f32.mrb[55].mxu1  ;;  %7991 = vmatmul.mubr.bf16.gmra.mrb[52].mxu0 %v7426_v17  ;;  %v7206_v35 = vmax.f32 %v6724_v3, 0.0  ;;  %v17234_v1 = vld [vmem:[#allocation91_spill] sm:$0xff] }
0x1922   :  { %v6730_v53 = vadd.f32 %v6729_v61, %v17231_v5  ;;  %v7207_v36 = vmax.f32 %v6726_v59, 0.0  ;;  %v4592_v61 = vpop.permute.xlu1 %4591  ;;  %v17235_v59 = vld [vmem:[#allocation92_spill] sm:$0xff] }
0x1923   :  { %v7208_v23 = vmax.f32 %v6728_v0, 0.0  ;;  %11109 = vmatmul.mubr.msk.bf16.gmra.mrb[160].mxu1 %vm213_vm2, %v4590_v40 }
0x1924   :  { %v7209_v32 = vmax.f32 %v6730_v53, 0.0  ;;  %7001 = vmatprep.mubr.bf16.mxu1 %v16937_v41 }
0x1925   :  { %v7428_v60 = vpack.c.bf16 %v7208_v23, %v7206_v35 }
0x1926   :  { %v7429_v57 = vpack.c.bf16 %v7209_v32, %v7207_v36  ;;  %v6733_v44 = vpop.f32.mrb[56].mxu1 }
0x1927   :  { %v6734_v37 = vadd.f32 %v6733_v44, %v17232_v12  ;;  %v6735_v51 = vpop.f32.mrb[57].mxu1  ;;  %v17236_v12 = vld [vmem:[#allocation93_spill] sm:$0xff] }
0x1928   :  { %v6736_v48 = vadd.f32 %v6735_v51, %v17233_v19  ;;  %v6737_v17 = vpop.f32.mrb[58].mxu1  ;;  %11156 = vmatprep.mubr.msk.bf16.mxu0 %vm126_vm1, %v7429_v57  ;;  %v17237_v19 = vld [vmem:[#allocation94_spill] sm:$0xff] }
0x1929   :  { %v6738_v3 = vadd.f32 %v6737_v17, %v17234_v1  ;;  %v6739_v0 = vpop.f32.mrb[59].mxu1  ;;  %7999 = vmatmul.mubr.bf16.gmra.mrb[56].mxu0 %v7428_v60  ;;  %v7210_v5 = vmax.f32 %v6734_v37, 0.0  ;;  %v17238_v1 = vld [vmem:[#allocation95_spill] sm:$0xff] }
0x192a   :  { %v6740_v40 = vadd.f32 %v6739_v0, %v17235_v59  ;;  %v7211_v35 = vmax.f32 %v6736_v48, 0.0  ;;  %v4594_v0 = vpop.permute.xlu0 %4593  ;;  %v17239_v48 = vld [vmem:[#allocation96_spill] sm:$0xff] }
0x192b   :  { %v7212_v53 = vmax.f32 %v6738_v3, 0.0  ;;  %11110 = vmatmul.mubr.msk.bf16.gmra.mrb[164].mxu1 %vm213_vm2, %v4592_v61 }
0x192c   :  { %v7213_v23 = vmax.f32 %v6740_v40, 0.0  ;;  %7011 = vmatprep.mubr.bf16.mxu1 %v16937_v41 }
0x192d   :  { %v7430_v36 = vpack.c.bf16 %v7212_v53, %v7210_v5 }
0x192e   :  { %v7431_v32 = vpack.c.bf16 %v7213_v23, %v7211_v35  ;;  %v6743_v44 = vpop.f32.mrb[60].mxu1 }
0x192f   :  { %v6744_v57 = vadd.f32 %v6743_v44, %v17236_v12  ;;  %v6745_v51 = vpop.f32.mrb[61].mxu1  ;;  %v17240_v12 = vld [vmem:[#allocation97_spill] sm:$0xff] }
0x1930   :  { %v6746_v17 = vadd.f32 %v6745_v51, %v17237_v19  ;;  %v6747_v60 = vpop.f32.mrb[62].mxu1  ;;  %11157 = vmatprep.mubr.msk.bf16.mxu0 %vm126_vm1, %v7431_v32  ;;  %v17241_v19 = vld [vmem:[#allocation98_spill] sm:$0xff] }
0x1931   :  { %v6748_v37 = vadd.f32 %v6747_v60, %v17238_v1  ;;  %v6749_v3 = vpop.f32.mrb[63].mxu1  ;;  %8007 = vmatmul.mubr.bf16.gmra.mrb[64].mxu0 %v7430_v36  ;;  %v7214_v59 = vmax.f32 %v6744_v57, 0.0  ;;  %v17242_v1 = vld [vmem:[#allocation99_spill] sm:$0xff] }
0x1932   :  { %v6750_v61 = vadd.f32 %v6749_v3, %v17239_v48  ;;  %v7215_v5 = vmax.f32 %v6746_v17, 0.0  ;;  %v4596_v3 = vpop.permute.xlu1 %4595  ;;  %v17243_v17 = vld [vmem:[#allocation100_spill] sm:$0xff] }
0x1933   :  { %v7216_v40 = vmax.f32 %v6748_v37, 0.0  ;;  %11111 = vmatmul.mubr.msk.bf16.gmra.mrb[168].mxu1 %vm213_vm2, %v4594_v0 }
0x1934   :  { %v7217_v53 = vmax.f32 %v6750_v61, 0.0  ;;  %7021 = vmatprep.mubr.bf16.mxu1 %v16937_v41 }
0x1935   :  { %v7432_v35 = vpack.c.bf16 %v7216_v40, %v7214_v59 }
0x1936   :  { %v7433_v23 = vpack.c.bf16 %v7217_v53, %v7215_v5  ;;  %v6753_v44 = vpop.f32.mrb[64].mxu1 }
0x1937   :  { %v6754_v32 = vadd.f32 %v6753_v44, %v17240_v12  ;;  %v6755_v51 = vpop.f32.mrb[65].mxu1  ;;  %v17244_v12 = vld [vmem:[#allocation101_spill] sm:$0xff] }
0x1938   :  { %v6756_v60 = vadd.f32 %v6755_v51, %v17241_v19  ;;  %v6757_v36 = vpop.f32.mrb[66].mxu1  ;;  %11158 = vmatprep.mubr.msk.bf16.mxu0 %vm126_vm1, %v7433_v23  ;;  %v17245_v19 = vld [vmem:[#allocation102_spill] sm:$0xff] }
0x1939   :  { %v6758_v57 = vadd.f32 %v6757_v36, %v17242_v1  ;;  %v6759_v37 = vpop.f32.mrb[67].mxu1  ;;  %8015 = vmatmul.mubr.bf16.gmra.mrb[68].mxu0 %v7432_v35  ;;  %v7218_v48 = vmax.f32 %v6754_v32, 0.0  ;;  %v17246_v1 = vld [vmem:[#allocation103_spill] sm:$0xff] }
0x193a   :  { %v6760_v0 = vadd.f32 %v6759_v37, %v17243_v17  ;;  %v7219_v59 = vmax.f32 %v6756_v60, 0.0  ;;  %v4598_v37 = vpop.permute.xlu0 %4597  ;;  %v17247_v60 = vld [vmem:[#allocation104_spill] sm:$0xff] }
0x193b   :  { %v7220_v61 = vmax.f32 %v6758_v57, 0.0  ;;  %11112 = vmatmul.mubr.msk.bf16.gmra.mrb[172].mxu1 %vm213_vm2, %v4596_v3 }
0x193c   :  { %v7221_v40 = vmax.f32 %v6760_v0, 0.0  ;;  %7031 = vmatprep.mubr.bf16.mxu1 %v16937_v41 }
0x193d   :  { %v7434_v5 = vpack.c.bf16 %v7220_v61, %v7218_v48 }
0x193e   :  { %v7435_v53 = vpack.c.bf16 %v7221_v40, %v7219_v59  ;;  %v6763_v44 = vpop.f32.mrb[68].mxu1 }
0x193f   :  { %v6764_v23 = vadd.f32 %v6763_v44, %v17244_v12  ;;  %v6765_v51 = vpop.f32.mrb[69].mxu1  ;;  %v17248_v12 = vld [vmem:[#allocation105_spill] sm:$0xff] }
0x1940   :  { %v6766_v36 = vadd.f32 %v6765_v51, %v17245_v19  ;;  %v6767_v35 = vpop.f32.mrb[70].mxu1  ;;  %11159 = vmatprep.mubr.msk.bf16.mxu0 %vm126_vm1, %v7435_v53  ;;  %v17249_v19 = vld [vmem:[#allocation106_spill] sm:$0xff] }
0x1941   :  { %v6768_v32 = vadd.f32 %v6767_v35, %v17246_v1  ;;  %v6769_v57 = vpop.f32.mrb[71].mxu1  ;;  %8023 = vmatmul.mubr.bf16.gmra.mrb[72].mxu0 %v7434_v5  ;;  %v7222_v17 = vmax.f32 %v6764_v23, 0.0  ;;  %v17250_v1 = vld [vmem:[#allocation107_spill] sm:$0xff] }
0x1942   :  { %v6770_v3 = vadd.f32 %v6769_v57, %v17247_v60  ;;  %v7223_v48 = vmax.f32 %v6766_v36, 0.0  ;;  %v4600_v57 = vpop.permute.xlu1 %4599  ;;  %v17251_v36 = vld [vmem:[#allocation108_spill] sm:$0xff] }
0x1943   :  { %v7224_v0 = vmax.f32 %v6768_v32, 0.0  ;;  %11113 = vmatmul.mubr.msk.bf16.gmra.mrb[176].mxu1 %vm213_vm2, %v4598_v37 }
0x1944   :  { %v7225_v61 = vmax.f32 %v6770_v3, 0.0  ;;  %7041 = vmatprep.mubr.bf16.mxu1 %v16937_v41 }
0x1945   :  { %v7436_v59 = vpack.c.bf16 %v7224_v0, %v7222_v17 }
0x1946   :  { %v7437_v40 = vpack.c.bf16 %v7225_v61, %v7223_v48  ;;  %v6773_v44 = vpop.f32.mrb[72].mxu1 }
0x1947   :  { %v6774_v53 = vadd.f32 %v6773_v44, %v17248_v12  ;;  %v6775_v51 = vpop.f32.mrb[73].mxu1  ;;  %v17252_v12 = vld [vmem:[#allocation109_spill] sm:$0xff] }
0x1948   :  { %v6776_v35 = vadd.f32 %v6775_v51, %v17249_v19  ;;  %v6777_v5 = vpop.f32.mrb[74].mxu1  ;;  %11160 = vmatprep.mubr.msk.bf16.mxu0 %vm126_vm1, %v7437_v40  ;;  %v17253_v19 = vld [vmem:[#allocation110_spill] sm:$0xff] }
0x1949   :  { %v6778_v23 = vadd.f32 %v6777_v5, %v17250_v1  ;;  %v6779_v32 = vpop.f32.mrb[75].mxu1  ;;  %8031 = vmatmul.mubr.bf16.gmra.mrb[76].mxu0 %v7436_v59  ;;  %v7226_v60 = vmax.f32 %v6774_v53, 0.0  ;;  %v17254_v1 = vld [vmem:[#allocation111_spill] sm:$0xff] }
0x194a   :  { %v6780_v37 = vadd.f32 %v6779_v32, %v17251_v36  ;;  %v7227_v17 = vmax.f32 %v6776_v35, 0.0  ;;  %v4602_v32 = vpop.permute.xlu0 %4601  ;;  %v17255_v35 = vld [vmem:[#allocation112_spill] sm:$0xff] }
0x194b   :  { %v7228_v3 = vmax.f32 %v6778_v23, 0.0  ;;  %11114 = vmatmul.mubr.msk.bf16.gmra.mrb[180].mxu1 %vm213_vm2, %v4600_v57 }
0x194c   :  { %v7229_v0 = vmax.f32 %v6780_v37, 0.0  ;;  %7051 = vmatprep.mubr.bf16.mxu1 %v16937_v41 }
0x194d   :  { %v7438_v48 = vpack.c.bf16 %v7228_v3, %v7226_v60 }
0x194e   :  { %v7439_v61 = vpack.c.bf16 %v7229_v0, %v7227_v17  ;;  %v6783_v44 = vpop.f32.mrb[76].mxu1 }
0x194f   :  { %v6784_v40 = vadd.f32 %v6783_v44, %v17252_v12  ;;  %v6785_v51 = vpop.f32.mrb[77].mxu1  ;;  %v17256_v12 = vld [vmem:[#allocation113_spill] sm:$0xff] }
0x1950   :  { %v6786_v5 = vadd.f32 %v6785_v51, %v17253_v19  ;;  %v6787_v59 = vpop.f32.mrb[78].mxu1  ;;  %11161 = vmatprep.mubr.msk.bf16.mxu0 %vm126_vm1, %v7439_v61  ;;  %v17257_v19 = vld [vmem:[#allocation114_spill] sm:$0xff] }
0x1951   :  { %v6788_v53 = vadd.f32 %v6787_v59, %v17254_v1  ;;  %v6789_v23 = vpop.f32.mrb[79].mxu1  ;;  %8039 = vmatmul.mubr.bf16.gmra.mrb[60].mxu0 %v7438_v48  ;;  %v7230_v36 = vmax.f32 %v6784_v40, 0.0  ;;  %v17258_v1 = vld [vmem:[#allocation115_spill] sm:$0xff] }
0x1952   :  { %v6790_v57 = vadd.f32 %v6789_v23, %v17255_v35  ;;  %v7231_v60 = vmax.f32 %v6786_v5, 0.0  ;;  %v4604_v23 = vpop.permute.xlu1 %4603  ;;  %v17259_v5 = vld [vmem:[#allocation116_spill] sm:$0xff] }
0x1953   :  { %v7232_v37 = vmax.f32 %v6788_v53, 0.0  ;;  %11115 = vmatmul.mubr.msk.bf16.gmra.mrb[184].mxu1 %vm213_vm2, %v4602_v32 }
0x1954   :  { %v7233_v3 = vmax.f32 %v6790_v57, 0.0  ;;  %7061 = vmatprep.mubr.bf16.mxu1 %v16937_v41 }
0x1955   :  { %v7440_v17 = vpack.c.bf16 %v7232_v37, %v7230_v36 }
0x1956   :  { %v7441_v0 = vpack.c.bf16 %v7233_v3, %v7231_v60  ;;  %v6793_v44 = vpop.f32.mrb[80].mxu1 }
0x1957   :  { %v6794_v61 = vadd.f32 %v6793_v44, %v17256_v12  ;;  %v6795_v51 = vpop.f32.mrb[81].mxu1 }
0x1958   :  { %v6796_v59 = vadd.f32 %v6795_v51, %v17257_v19  ;;  %v6797_v48 = vpop.f32.mrb[82].mxu1  ;;  %11162 = vmatprep.mubr.msk.bf16.mxu0 %vm126_vm1, %v7441_v0 }
0x1959   :  { %v6798_v40 = vadd.f32 %v6797_v48, %v17258_v1  ;;  %v6799_v53 = vpop.f32.mrb[83].mxu1  ;;  %8047 = vmatmul.mubr.bf16.gmra.mrb[80].mxu0 %v7440_v17  ;;  %v7234_v35 = vmax.f32 %v6794_v61, 0.0  ;;  %v17260_v17 = vld [vmem:[#allocation117_spill] sm:$0xff] }
0x195a   :  { %v6800_v32 = vadd.f32 %v6799_v53, %v17259_v5  ;;  %v7235_v36 = vmax.f32 %v6796_v59, 0.0  ;;  %v17261_v53 = vld [vmem:[#allocation118_spill] sm:$0xff] }
0x195b   :  { %v7236_v57 = vmax.f32 %v6798_v40, 0.0  ;;  %11116 = vmatmul.mubr.msk.bf16.gmra.mrb[188].mxu1 %vm213_vm2, %v4604_v23 }
0x195c   :  { %v7237_v37 = vmax.f32 %v6800_v32, 0.0  ;;  %v7840_v60 = vpop.f32.mrb[232].mxu0  ;;  %7071 = vmatprep.mubr.bf16.mxu1 %v16937_v41 }
0x195d   :  { %v7442_v3 = vpack.c.bf16 %v7236_v57, %v7234_v35  ;;  %v7841_v44 = vadd.f32 %v15270_v9, %v7840_v60  ;;  %v7842_v0 = vpop.f32.mrb[233].mxu0  ;;  %v17262_v35 = vld [vmem:[#allocation119_spill] sm:$0xff] }
0x195e   :  { %v7443_v12 = vpack.c.bf16 %v7237_v37, %v7235_v36  ;;  %v6803_v51 = vpop.f32.mrb[84].mxu1  ;;  %v7843_v19 = vpop.f32.mrb[234].mxu0  ;;  %v17263_v37 = vld [vmem:[#allocation120_spill] sm:$0xff] }
0x195f   :  { %v6804_v48 = vadd.f32 %v6803_v51, %v17260_v17  ;;  %v7844_v1 = vadd.f32 %v15270_v9, %v7843_v19  ;;  %v6805_v61 = vpop.f32.mrb[85].mxu1  ;;  %v7845_v40 = vpop.f32.mrb[235].mxu0  ;;  %v8315_v5 = vmax.f32 %v7841_v44, 0.0 }
0x1960   :  { %v6806_v23 = vadd.f32 %v6805_v61, %v17261_v53  ;;  %v6807_v59 = vpop.f32.mrb[86].mxu1  ;;  %11163 = vmatprep.mubr.msk.bf16.mxu0 %vm126_vm1, %v7443_v12  ;;  %v4606_v36 = vpop.permute.xlu0 %4605 }
0x1961   :  { %v8316_v32 = vmax.f32 %v7844_v1, 0.0  ;;  %v6808_v57 = vadd.f32 %v6807_v59, %v17262_v35  ;;  %v6809_v60 = vpop.f32.mrb[87].mxu1  ;;  %8055 = vmatmul.mubr.bf16.gmra.mrb[84].mxu0 %v7442_v3  ;;  %v7238_v15 = vmax.f32 %v6804_v48, 0.0  ;;  %v17264_v35 = vld [vmem:[#allocation121_spill] sm:$0xff] }
0x1962   :  { %v6810_v0 = vadd.f32 %v6809_v60, %v17263_v37  ;;  %v7239_v17 = vmax.f32 %v6806_v23, 0.0 }
0x1963   :  { %v15438_v51 = vpack.c.bf16 %v8316_v32, %v8315_v5  ;;  %v7240_v19 = vmax.f32 %v6808_v57, 0.0  ;;  %11117 = vmatmul.mubr.msk.bf16.gmra.mrb[192].mxu1 %vm213_vm2, %v4606_v36  ;;  %v17265_v57 = vld [vmem:[#allocation122_spill] sm:$0xff] }
0x1964   :  { %v7241_v61 = vmax.f32 %v6810_v0, 0.0  ;;  %v7848_v40 = vpop.f32.mrb[236].mxu0  ;;  %7081 = vmatprep.mubr.bf16.mxu1 %v16937_v41 }
0x1965   :  { %v7444_v44 = vpack.c.bf16 %v7240_v19, %v7238_v15  ;;  %v7849_v12 = vadd.f32 %v15270_v9, %v7848_v40  ;;  %v7850_v1 = vpop.f32.mrb[237].mxu0  ;;  %v17266_v15 = vld [vmem:[#allocation123_spill] sm:$0xff] }
0x1966   :  { %v7445_v53 = vpack.c.bf16 %v7241_v61, %v7239_v17  ;;  %v6813_v3 = vpop.f32.mrb[88].mxu1  ;;  %v7851_v59 = vpop.f32.mrb[238].mxu0  ;;  %v17267_v61 = vld [vmem:[#allocation124_spill] sm:$0xff] }
0x1967   :  { %v6814_v60 = vadd.f32 %v6813_v3, %v17264_v35  ;;  %v7852_v48 = vadd.f32 %v15270_v9, %v7851_v59  ;;  %v6815_v5 = vpop.f32.mrb[89].mxu1  ;;  %v7853_v32 = vpop.f32.mrb[239].mxu0  ;;  %v8317_v37 = vmax.f32 %v7849_v12, 0.0 }
0x1968   :  { %v6816_v36 = vadd.f32 %v6815_v5, %v17265_v57  ;;  %v6817_v23 = vpop.f32.mrb[90].mxu1  ;;  %11164 = vmatprep.mubr.msk.bf16.mxu0 %vm126_vm1, %v7445_v53  ;;  %v4608_v17 = vpop.permute.xlu1 %4607 }
0x1969   :  { %v8318_v0 = vmax.f32 %v7852_v48, 0.0  ;;  %v6818_v19 = vadd.f32 %v6817_v23, %v17266_v15  ;;  %v6819_v40 = vpop.f32.mrb[91].mxu1  ;;  %8063 = vmatmul.mubr.bf16.gmra.mrb[88].mxu0 %v7444_v44  ;;  %v7242_v34 = vmax.f32 %v6814_v60, 0.0  ;;  %v17268_v15 = vld [vmem:[#allocation125_spill] sm:$0xff] }
0x196a   :  { %v6820_v1 = vadd.f32 %v6819_v40, %v17267_v61  ;;  %v7243_v35 = vmax.f32 %v6816_v36, 0.0 }
0x196b   :  { %v15449_v3 = vpack.c.bf16 %v8318_v0, %v8317_v37  ;;  %v7244_v59 = vmax.f32 %v6818_v19, 0.0  ;;  %11118 = vmatmul.mubr.msk.bf16.gmra.mrb[196].mxu1 %vm213_vm2, %v4608_v17  ;;  %v17269_v19 = vld [vmem:[#allocation126_spill] sm:$0xff] }
0x196c   :  { %v7245_v5 = vmax.f32 %v6820_v1, 0.0  ;;  %v7856_v32 = vpop.f32.mrb[240].mxu0  ;;  %7091 = vmatprep.mubr.bf16.mxu1 %v16937_v41 }
0x196d   :  { %v7446_v12 = vpack.c.bf16 %v7244_v59, %v7242_v34  ;;  %v7857_v53 = vadd.f32 %v15270_v9, %v7856_v32  ;;  %v7858_v48 = vpop.f32.mrb[241].mxu0  ;;  %v17270_v34 = vld [vmem:[#allocation127_spill] sm:$0xff] }
0x196e   :  { %v7447_v57 = vpack.c.bf16 %v7245_v5, %v7243_v35  ;;  %v6823_v44 = vpop.f32.mrb[92].mxu1  ;;  %v7859_v23 = vpop.f32.mrb[242].mxu0  ;;  %v17271_v5 = vld [vmem:[#allocation128_spill] sm:$0xff] }
0x196f   :  { %v6824_v40 = vadd.f32 %v6823_v44, %v17268_v15  ;;  %v7860_v60 = vadd.f32 %v15270_v9, %v7859_v23  ;;  %v6825_v37 = vpop.f32.mrb[93].mxu1  ;;  %v7861_v0 = vpop.f32.mrb[243].mxu0  ;;  %v8319_v61 = vmax.f32 %v7857_v53, 0.0 }
0x1970   :  { %v6826_v17 = vadd.f32 %v6825_v37, %v17269_v19  ;;  %v6827_v36 = vpop.f32.mrb[94].mxu1  ;;  %11165 = vmatprep.mubr.msk.bf16.mxu0 %vm126_vm1, %v7447_v57  ;;  %v4610_v35 = vpop.permute.xlu0 %4609 }
0x1971   :  { %v8320_v41 = vmax.f32 %v7860_v60, 0.0  ;;  %v6828_v1 = vadd.f32 %v6827_v36, %v17270_v34  ;;  %v6829_v59 = vpop.f32.mrb[95].mxu1  ;;  %8071 = vmatmul.mubr.bf16.gmra.mrb[92].mxu0 %v7446_v12  ;;  %v7246_v48 = vmax.f32 %v6824_v40, 0.0  ;;  %v17272_v34 = vld [vmem:[#allocation129_spill] sm:$0xff] }
0x1972   :  { %v6830_v32 = vadd.f32 %v6829_v59, %v17271_v5  ;;  %v7247_v15 = vmax.f32 %v6826_v17, 0.0  ;;  %v17273_v59 = vld [vmem:[#allocation130_spill] sm:$0xff] }
0x1973   :  { %v15460_v44 = vpack.c.bf16 %v8320_v41, %v8319_v61  ;;  %v7248_v23 = vmax.f32 %v6828_v1, 0.0  ;;  %11119 = vmatmul.mubr.msk.bf16.gmra.mrb[200].mxu1 %vm213_vm2, %v4610_v35  ;;  %v15467_v61 = vld [vmem:[#allocation4 + $0x6] ss:$0 sm:$0xff] }
0x1974   :  { %v7249_v37 = vmax.f32 %v6830_v32, 0.0  ;;  %v7864_v0 = vpop.f32.mrb[244].mxu0  ;;  %11784 = vmatprep.mubr.msk.bf16.mxu1 %vm429_vm6, %v15281_v25 }
0x1975   :  { %v7448_v53 = vpack.c.bf16 %v7248_v23, %v7246_v48  ;;  %v7865_v57 = vadd.f32 %v15270_v9, %v7864_v0  ;;  %v7866_v60 = vpop.f32.mrb[245].mxu0  ;;  %v17274_v9 = vld [vmem:[#allocation131_spill] sm:$0xff] }
0x1976   :  { %v7449_v12 = vpack.c.bf16 %v7249_v37, %v7247_v15  ;;  %v6833_v19 = vpop.f32.mrb[96].mxu1  ;;  %v7867_v36 = vpop.f32.mrb[246].mxu0  ;;  %v17275_v15 = vld [vmem:[#allocation132_spill] sm:$0xff] }
0x1977   :  { %v6834_v40 = vadd.f32 %v6833_v19, %v17272_v34  ;;  %v7868_v41 = vadd.f32 %v15467_v61, %v7867_v36  ;;  %v6835_v1 = vpop.f32.mrb[97].mxu1  ;;  %v7869_v17 = vpop.f32.mrb[247].mxu0  ;;  %v8321_v25 = vmax.f32 %v7865_v57, 0.0 }
0x1978   :  { %v6836_v35 = vadd.f32 %v6835_v1, %v17273_v59  ;;  %v6837_v5 = vpop.f32.mrb[98].mxu1  ;;  %11166 = vmatprep.mubr.msk.bf16.mxu0 %vm126_vm1, %v7449_v12 }
0x1979   :  { %v8322_v32 = vmax.f32 %v7868_v41, 0.0  ;;  %v6838_v48 = vadd.f32 %v6837_v5, %v17274_v9  ;;  %v6839_v23 = vpop.f32.mrb[99].mxu1  ;;  %8079 = vmatmul.mubr.bf16.gmra.mrb[96].mxu0 %v7448_v53  ;;  %v7250_v0 = vmax.f32 %v6834_v40, 0.0  ;;  %v17276_v40 = vld [vmem:[#allocation133_spill] sm:$0xff] }
0x197a   :  { %v6840_v37 = vadd.f32 %v6839_v23, %v17275_v15  ;;  %v7251_v36 = vmax.f32 %v6836_v35, 0.0  ;;  %v17278_v15 = vld [vmem:[#allocation135_spill] sm:$0xff] }
0x197b   :  { %v15474_v60 = vpack.c.bf16 %v8322_v32, %v8321_v25  ;;  %v7252_v19 = vmax.f32 %v6838_v48, 0.0  ;;  %11785 = vmatmul.mubr.msk.bf16.vlgmr.msra.gmra.mrb[204].mxu1 %vm429_vm6, %v15292_v31  ;;  %v17277_v31 = vld [vmem:[#allocation134_spill] sm:$0xff] }
0x197c   :  { %v7253_v34 = vmax.f32 %v6840_v37, 0.0  ;;  %v7872_v1 = vpop.f32.mrb[248].mxu0  ;;  %11788 = vmatprep.mubr.msk.bf16.mxu1 %vm429_vm6, %v15318_v22 }
0x197d   :  { %v7450_v57 = vpack.c.bf16 %v7252_v19, %v7250_v0  ;;  %v7873_v12 = vadd.f32 %v15467_v61, %v7872_v1  ;;  %v7874_v41 = vpop.f32.mrb[249].mxu0  ;;  %v17279_v19 = vld [vmem:[#allocation136_spill] sm:$0xff] }
0x197e   :  { %v7451_v53 = vpack.c.bf16 %v7253_v34, %v7251_v36  ;;  %v6843_v17 = vpop.f32.mrb[100].mxu1  ;;  %v7875_v59 = vpop.f32.mrb[250].mxu0 }
0x197f   :  { %v6844_v5 = vadd.f32 %v6843_v17, %v17276_v40  ;;  %v7876_v25 = vadd.f32 %v15467_v61, %v7875_v59  ;;  %v6845_v32 = vpop.f32.mrb[101].mxu1  ;;  %v7877_v9 = vpop.f32.mrb[251].mxu0  ;;  %v8323_v23 = vmax.f32 %v7873_v12, 0.0 }
0x1980   :  { %v6846_v35 = vadd.f32 %v6845_v32, %v17277_v31  ;;  %v6847_v48 = vpop.f32.mrb[102].mxu1  ;;  %11167 = vmatprep.mubr.msk.bf16.mxu0 %vm126_vm1, %v7451_v53 }
0x1981   :  { %v8324_v22 = vmax.f32 %v7876_v25, 0.0  ;;  %v6848_v37 = vadd.f32 %v6847_v48, %v17278_v15  ;;  %v6849_v0 = vpop.f32.mrb[103].mxu1  ;;  %8087 = vmatmul.mubr.bf16.gmra.mrb[100].mxu0 %v7450_v57  ;;  %v7254_v34 = vmax.f32 %v6844_v5, 0.0  ;;  %v17280_v5 = vld [vmem:[#allocation137_spill] sm:$0xff] }
0x1982   :  { %v6850_v36 = vadd.f32 %v6849_v0, %v17279_v19  ;;  %v7255_v17 = vmax.f32 %v6846_v35, 0.0  ;;  %v17282_v0 = vld [vmem:[#allocation139_spill] sm:$0xff] }
0x1983   :  { %v15487_v1 = vpack.c.bf16 %v8324_v22, %v8323_v23  ;;  %v7256_v41 = vmax.f32 %v6848_v37, 0.0  ;;  %11789 = vmatmul.mubr.msk.bf16.gmra.mrb[208].mxu1 %vm429_vm6, %v15329_v27  ;;  %v17281_v27 = vld [vmem:[#allocation138_spill] sm:$0xff] }
0x1984   :  { %v7257_v59 = vmax.f32 %v6850_v36, 0.0  ;;  %v7880_v40 = vpop.f32.mrb[252].mxu0  ;;  %11792 = vmatprep.mubr.msk.bf16.mxu1 %vm429_vm6, %v15342_v58 }
0x1985   :  { %v7452_v12 = vpack.c.bf16 %v7256_v41, %v7254_v34  ;;  %v7881_v53 = vadd.f32 %v15467_v61, %v7880_v40  ;;  %v7882_v25 = vpop.f32.mrb[253].mxu0  ;;  %v17283_v34 = vld [vmem:[#allocation140_spill] sm:$0xff] }
0x1986   :  { %v7453_v57 = vpack.c.bf16 %v7257_v59, %v7255_v17  ;;  %v6853_v32 = vpop.f32.mrb[104].mxu1  ;;  %v7883_v9 = vpop.f32.mrb[254].mxu0 }
0x1987   :  { %v6854_v31 = vadd.f32 %v6853_v32, %v17280_v5  ;;  %v7884_v48 = vadd.f32 %v15467_v61, %v7883_v9  ;;  %v6855_v23 = vpop.f32.mrb[105].mxu1  ;;  %v7885_v22 = vpop.f32.mrb[255].mxu0  ;;  %v8325_v37 = vmax.f32 %v7881_v53, 0.0 }
0x1988   :  { %v6856_v35 = vadd.f32 %v6855_v23, %v17281_v27  ;;  %v6857_v15 = vpop.f32.mrb[106].mxu1  ;;  %11168 = vmatprep.mubr.msk.bf16.mxu0 %vm126_vm1, %v7453_v57 }
0x1989   :  { %v8326_v58 = vmax.f32 %v7884_v48, 0.0  ;;  %v6858_v19 = vadd.f32 %v6857_v15, %v17282_v0  ;;  %v6859_v36 = vpop.f32.mrb[107].mxu1  ;;  %8095 = vmatmul.mubr.bf16.gmra.mrb[104].mxu0 %v7452_v12  ;;  %v7258_v17 = vmax.f32 %v6854_v31, 0.0  ;;  %v17284_v31 = vld [vmem:[#allocation141_spill] sm:$0xff] }
0x198a   :  { %v6860_v41 = vadd.f32 %v6859_v36, %v17283_v34  ;;  %v7259_v25 = vmax.f32 %v6856_v35, 0.0 }
0x198b   :  { %v15500_v59 = vpack.c.bf16 %v8326_v58, %v8325_v37  ;;  %v7260_v40 = vmax.f32 %v6858_v19, 0.0  ;;  %11793 = vmatmul.mubr.msk.bf16.gmra.mrb[212].mxu1 %vm429_vm6, %v15353_v4  ;;  %v17285_v4 = vld [vmem:[#allocation142_spill] sm:$0xff]  ;;  %v17286_v19 = vld [vmem:[#allocation143_spill] sm:$0xff] }
0x198c   :  { %v7261_v32 = vmax.f32 %v6860_v41, 0.0  ;;  %v7888_v9 = vpop.f32.mrb[4].mxu0  ;;  %11796 = vmatprep.mubr.msk.bf16.mxu1 %vm429_vm6, %v15438_v51 }
0x198d   :  { %v7454_v53 = vpack.c.bf16 %v7260_v40, %v7258_v17  ;;  %v7889_v57 = vadd.f32 %v15467_v61, %v7888_v9  ;;  %v7890_v5 = vpop.f32.mrb[5].mxu0 }
0x198e   :  { %v7455_v12 = vpack.c.bf16 %v7261_v32, %v7259_v25  ;;  %v6863_v48 = vpop.f32.mrb[108].mxu1  ;;  %v7891_v23 = vpop.f32.mrb[6].mxu0 }
0x198f   :  { %v6864_v22 = vadd.f32 %v6863_v48, %v17284_v31  ;;  %v7892_v27 = vadd.f32 %v15467_v61, %v7891_v23  ;;  %v6865_v15 = vpop.f32.mrb[109].mxu1  ;;  %v7893_v37 = vpop.f32.mrb[7].mxu0  ;;  %v8327_v0 = vmax.f32 %v7889_v57, 0.0 }
0x1990   :  { %v6866_v35 = vadd.f32 %v6865_v15, %v17285_v4  ;;  %v6867_v58 = vpop.f32.mrb[110].mxu1  ;;  %11169 = vmatprep.mubr.msk.bf16.mxu0 %vm126_vm1, %v7455_v12 }
0x1991   :  { %v8328_v51 = vmax.f32 %v7892_v27, 0.0  ;;  %v6868_v36 = vadd.f32 %v6867_v58, %v17286_v19  ;;  %v6869_v34 = vpop.f32.mrb[111].mxu1  ;;  %8103 = vmatmul.mubr.bf16.gmra.mrb[108].mxu0 %v7454_v53  ;;  %v7262_v17 = vmax.f32 %v6864_v22, 0.0 }
0x1992   :  { %v6870_v41 = vadd.f32 %v6869_v34, %v14882_v43  ;;  %v7263_v32 = vmax.f32 %v6866_v35, 0.0  ;;  %v17287_v43 = vld [vmem:[#allocation144_spill] sm:$0xff] }
0x1993   :  { %v8453_v40 = vpack.c.bf16 %v8328_v51, %v8327_v0  ;;  %v7264_v25 = vmax.f32 %v6868_v36, 0.0  ;;  %11797 = vmatmul.mubr.msk.bf16.gmra.mrb[216].mxu1 %vm429_vm6, %v15449_v3  ;;  %v17288_v3 = vld [vmem:[#allocation145_spill] sm:$0xff]  ;;  %v17289_v0 = vld [vmem:[#allocation146_spill] sm:$0xff]  ;;  %v17290_v36 = vld [vmem:[#allocation147_spill] sm:$0xff] }
0x1994   :  { %v7265_v9 = vmax.f32 %v6870_v41, 0.0  ;;  %v7896_v5 = vpop.f32.mrb[8].mxu0  ;;  %11800 = vmatprep.mubr.msk.bf16.mxu1 %vm429_vm6, %v15460_v44 }
0x1995   :  { %v7456_v57 = vpack.c.bf16 %v7264_v25, %v7262_v17  ;;  %v7897_v12 = vadd.f32 %v15467_v61, %v7896_v5  ;;  %v7898_v48 = vpop.f32.mrb[9].mxu0 }
0x1996   :  { %v7457_v23 = vpack.c.bf16 %v7265_v9, %v7263_v32  ;;  %v6873_v53 = vpop.f32.mrb[112].mxu1  ;;  %v7899_v31 = vpop.f32.mrb[10].mxu0 }
0x1997   :  { %v6874_v22 = vadd.f32 %v6873_v53, %v17287_v43  ;;  %v7900_v27 = vadd.f32 %v15467_v61, %v7899_v31  ;;  %v6875_v15 = vpop.f32.mrb[113].mxu1  ;;  %v7901_v37 = vpop.f32.mrb[11].mxu0  ;;  %v8329_v58 = vmax.f32 %v7897_v12, 0.0 }
0x1998   :  { %v6876_v4 = vadd.f32 %v6875_v15, %v17288_v3  ;;  %v6877_v35 = vpop.f32.mrb[114].mxu1  ;;  %11170 = vmatprep.mubr.msk.bf16.mxu0 %vm126_vm1, %v7457_v23 }
0x1999   :  { %v8330_v44 = vmax.f32 %v7900_v27, 0.0  ;;  %v6878_v51 = vadd.f32 %v6877_v35, %v17289_v0  ;;  %v6879_v19 = vpop.f32.mrb[115].mxu1  ;;  %8111 = vmatmul.mubr.bf16.gmra.mrb[112].mxu0 %v7456_v57  ;;  %v7266_v41 = vmax.f32 %v6874_v22, 0.0 }
0x199a   :  { %v6880_v34 = vadd.f32 %v6879_v19, %v17290_v36  ;;  %v7267_v32 = vmax.f32 %v6876_v4, 0.0 }
0x199b   :  { %v8454_v17 = vpack.c.bf16 %v8330_v44, %v8329_v58  ;;  %v7268_v25 = vmax.f32 %v6878_v51, 0.0  ;;  %11801 = vmatmul.mubr.msk.bf16.gmra.mrb[220].mxu1 %vm429_vm6, %v15474_v60  ;;  %v17291_v58 = vld [vmem:[#allocation148_spill] sm:$0xff] }
0x199c   :  { %v7269_v9 = vmax.f32 %v6880_v34, 0.0  ;;  %v7904_v5 = vpop.f32.mrb[12].mxu0  ;;  %11804 = vmatprep.mubr.msk.bf16.mxu1 %vm429_vm6, %v15487_v1 }
0x199d   :  { %v7458_v12 = vpack.c.bf16 %v7268_v25, %v7266_v41  ;;  %v7905_v48 = vadd.f32 %v15467_v61, %v7904_v5  ;;  %v7906_v23 = vpop.f32.mrb[13].mxu0  ;;  %v17292_v5 = vld [vmem:[#allocation149_spill] sm:$0xff] }
0x199e   :  { %v7459_v53 = vpack.c.bf16 %v7269_v9, %v7267_v32  ;;  %v6883_v57 = vpop.f32.mrb[116].mxu1  ;;  %v7907_v31 = vpop.f32.mrb[14].mxu0 }
0x199f   :  { %v6884_v43 = vadd.f32 %v6883_v57, %v14905_v29  ;;  %v7908_v22 = vadd.f32 %v15467_v61, %v7907_v31  ;;  %v6885_v27 = vpop.f32.mrb[117].mxu1  ;;  %v7909_v15 = vpop.f32.mrb[15].mxu0  ;;  %v8331_v3 = vmax.f32 %v7905_v48, 0.0  ;;  %v17293_v57 = vld [vmem:[#allocation150_spill] sm:$0xff] }
0x19a0   :  { %v6886_v60 = vadd.f32 %v6885_v27, %v14909_v42  ;;  %v6887_v37 = vpop.f32.mrb[118].mxu1  ;;  %11171 = vmatprep.mubr.msk.bf16.mxu0 %vm126_vm1, %v7459_v53 }
0x19a1   :  { %v8332_v1 = vmax.f32 %v7908_v22, 0.0  ;;  %v6888_v4 = vadd.f32 %v6887_v37, %v14913_v11  ;;  %v6889_v35 = vpop.f32.mrb[119].mxu1  ;;  %8119 = vmatmul.mubr.bf16.gmra.mrb[116].mxu0 %v7458_v12  ;;  %v7270_v0 = vmax.f32 %v6884_v43, 0.0 }
0x19a2   :  { %v6890_v44 = vadd.f32 %v6889_v35, %v17291_v58  ;;  %v7271_v19 = vmax.f32 %v6886_v60, 0.0 }
0x19a3   :  { %v8455_v51 = vpack.c.bf16 %v8332_v1, %v8331_v3  ;;  %v7272_v29 = vmax.f32 %v6888_v4, 0.0  ;;  %11805 = vmatmul.mubr.msk.bf16.gmra.mrb[224].mxu1 %vm429_vm6, %v15500_v59 }
0x19a4   :  { %v7273_v36 = vmax.f32 %v6890_v44, 0.0  ;;  %v7912_v42 = vpop.f32.mrb[16].mxu0  ;;  %11808 = vmatprep.mubr.msk.bf16.mxu1 %vm429_vm6, %v8453_v40 }
0x19a5   :  { %v7460_v34 = vpack.c.bf16 %v7272_v29, %v7270_v0  ;;  %v7913_v41 = vadd.f32 %v15467_v61, %v7912_v42  ;;  %v7914_v25 = vpop.f32.mrb[17].mxu0 }
0x19a6   :  { %v7461_v11 = vpack.c.bf16 %v7273_v36, %v7271_v19  ;;  %v6893_v32 = vpop.f32.mrb[120].mxu1  ;;  %v7915_v9 = vpop.f32.mrb[18].mxu0 }
0x19a7   :  { %v6894_v12 = vadd.f32 %v6893_v32, %v17292_v5  ;;  %v7916_v48 = vadd.f32 %v15467_v61, %v7915_v9  ;;  %v6895_v23 = vpop.f32.mrb[121].mxu1  ;;  %v7917_v53 = vpop.f32.mrb[19].mxu0  ;;  %v8333_v43 = vmax.f32 %v7913_v41, 0.0  ;;  %v17294_v9 = vld [vmem:[#allocation151_spill] sm:$0xff] }
0x19a8   :  { %v6896_v59 = vadd.f32 %v6895_v23, %v17293_v57  ;;  %v6897_v31 = vpop.f32.mrb[122].mxu1  ;;  %11172 = vmatprep.mubr.msk.bf16.mxu0 %vm126_vm1, %v7461_v11 }
0x19a9   :  { %v8334_v40 = vmax.f32 %v7916_v48, 0.0  ;;  %v6898_v22 = vadd.f32 %v6897_v31, %v14931_v62  ;;  %v6899_v27 = vpop.f32.mrb[123].mxu1  ;;  %8127 = vmatmul.mubr.bf16.gmra.mrb[120].mxu0 %v7460_v34  ;;  %v7274_v60 = vmax.f32 %v6894_v12, 0.0 }
0x19aa   :  { %v6900_v15 = vadd.f32 %v6899_v27, %v14935_v56  ;;  %v7275_v1 = vmax.f32 %v6896_v59, 0.0 }
0x19ab   :  { %v8456_v37 = vpack.c.bf16 %v8334_v40, %v8333_v43  ;;  %v7276_v3 = vmax.f32 %v6898_v22, 0.0  ;;  %11809 = vmatmul.mubr.msk.bf16.gmra.mrb[228].mxu1 %vm429_vm6, %v8454_v17  ;;  %v17295_v22 = vld [vmem:[#allocation152_spill] sm:$0xff] }
0x19ac   :  { %v7277_v4 = vmax.f32 %v6900_v15, 0.0  ;;  %v7920_v35 = vpop.f32.mrb[20].mxu0  ;;  %11812 = vmatprep.mubr.msk.bf16.mxu1 %vm429_vm6, %v8455_v51 }
0x19ad   :  { %v7462_v58 = vpack.c.bf16 %v7276_v3, %v7274_v60  ;;  %v7921_v44 = vadd.f32 %v15467_v61, %v7920_v35  ;;  %v7922_v0 = vpop.f32.mrb[21].mxu0 }
0x19ae   :  { %v7463_v29 = vpack.c.bf16 %v7277_v4, %v7275_v1  ;;  %v6903_v62 = vpop.f32.mrb[124].mxu1  ;;  %v7923_v19 = vpop.f32.mrb[22].mxu0  ;;  %v12210_v1 = vld [vmem:[#allocation9 + $0x78] sm:$0xff]   ;;  %v17297_v0 = vld [vmem:[#allocation154_spill] sm:$0xff] }
0x19af   :  { %v6904_v36 = vadd.f32 %v6903_v62, %v14937_v14  ;;  %v7924_v56 = vadd.f32 %v15467_v61, %v7923_v19  ;;  %v6905_v42 = vpop.f32.mrb[125].mxu1  ;;  %v7925_v34 = vpop.f32.mrb[23].mxu0  ;;  %v8335_v25 = vmax.f32 %v7921_v44, 0.0  ;;  %11912 = vmatprep.subr.bf16.mxu1 %v12210_v1  ;;  %v17298_v19 = vld [vmem:[#allocation155_spill] sm:$0xff] }
0x19b0   :  { %v6906_v17 = vadd.f32 %v6905_v42, %v14941_v45  ;;  %v6907_v41 = vpop.f32.mrb[126].mxu1  ;;  %11173 = vmatprep.mubr.msk.bf16.mxu0 %vm126_vm1, %v7463_v29  ;;  %11913 = vmatpush3.bf16.msra.mxu1 %v12210_v1 }
0x19b1   :  { %v8336_v51 = vmax.f32 %v7924_v56, 0.0  ;;  %v6908_v11 = vadd.f32 %v6907_v41, %v14945_v46  ;;  %v6909_v32 = vpop.f32.mrb[127].mxu1  ;;  %8135 = vmatmul.mubr.bf16.gmra.mrb[124].mxu0 %v7462_v58  ;;  %v7278_v12 = vmax.f32 %v6904_v36, 0.0 }
0x19b2   :  { %v6910_v5 = vadd.f32 %v6909_v32, %v17294_v9  ;;  %v7279_v23 = vmax.f32 %v6906_v17, 0.0 }
0x19b3   :  { %v8457_v48 = vpack.c.bf16 %v8336_v51, %v8335_v25  ;;  %v7280_v14 = vmax.f32 %v6908_v11, 0.0  ;;  %11813 = vmatmul.mubr.msk.bf16.gmra.mrb[232].mxu1 %vm429_vm6, %v8456_v37  ;;  %v17296_v37 = vld [vmem:[#allocation153_spill] sm:$0xff] }
0x19b4   :  { %v7281_v53 = vmax.f32 %v6910_v5, 0.0  ;;  %v7928_v57 = vpop.f32.mrb[0].mxu0 }
0x19b5   :  { %v7464_v45 = vpack.c.bf16 %v7280_v14, %v7278_v12  ;;  %v7929_v59 = vadd.f32 %v15467_v61, %v7928_v57  ;;  %v7930_v31 = vpop.f32.mrb[1].mxu0  ;;  %11816 = vmatprep.mubr.msk.bf16.mxu1 %vm429_vm6, %v8457_v48  ;;  %v17299_v48 = vld [vmem:[#allocation156_spill] sm:$0xff] }
0x19b6   :  { %v7465_v43 = vpack.c.bf16 %v7281_v53, %v7279_v23  ;;  %v6913_v46 = vpop.f32.mrb[128].mxu1  ;;  %v7931_v40 = vpop.f32.mrb[2].mxu0 }
0x19b7   :  { %v6914_v27 = vadd.f32 %v6913_v46, %v17295_v22  ;;  %v7932_v15 = vadd.f32 %v15467_v61, %v7931_v40  ;;  %v6915_v60 = vpop.f32.mrb[129].mxu1  ;;  %v7933_v3 = vpop.f32.mrb[3].mxu0  ;;  %v8337_v58 = vmax.f32 %v7929_v59, 0.0  ;;  %v17301_v40 = vld [vmem:[#allocation158_spill] sm:$0xff] }
0x19b8   :  { %v6916_v4 = vadd.f32 %v6915_v60, %v17296_v37  ;;  %v6917_v35 = vpop.f32.mrb[130].mxu1  ;;  %11174 = vmatprep.mubr.msk.bf16.mxu0 %vm126_vm1, %v7465_v43 }
0x19b9   :  { %v8338_v44 = vmax.f32 %v7932_v15, 0.0  ;;  %v6918_v29 = vadd.f32 %v6917_v35, %v17297_v0  ;;  %v6919_v62 = vpop.f32.mrb[131].mxu1  ;;  %8143 = vmatmul.mubr.bf16.gmra.mrb[128].mxu0 %v7464_v45  ;;  %v7282_v56 = vmax.f32 %v6914_v27, 0.0  ;;  %v17300_v45 = vld [vmem:[#allocation157_spill] sm:$0xff]  ;;  %v17302_v15 = vld [vmem:[#allocation159_spill] sm:$0xff] }
0x19ba   :  { %v6920_v36 = vadd.f32 %v6919_v62, %v17298_v19  ;;  %v7283_v17 = vmax.f32 %v6916_v4, 0.0 }
0x19bb   :  { %v8458_v42 = vpack.c.bf16 %v8338_v44, %v8337_v58  ;;  %v7284_v34 = vmax.f32 %v6918_v29, 0.0 }
0x19bc   :  { %v7285_v41 = vmax.f32 %v6920_v36, 0.0  ;;  %v7936_v25 = vpop.f32.mrb[28].mxu0 }
0x19bd   :  { %v7466_v51 = vpack.c.bf16 %v7284_v34, %v7282_v56  ;;  %v7937_v11 = vadd.f32 %v15467_v61, %v7936_v25  ;;  %v7938_v32 = vpop.f32.mrb[29].mxu0  ;;  %11817 = vmatmul.mubr.msk.bf16.gmra.mrb[236].mxu1 %vm429_vm6, %v8458_v42  ;;  %v17303_v56 = vld [vmem:[#allocation160_spill] sm:$0xff]  ;;  %v17304_v25 = vld [vmem:[#allocation161_spill] sm:$0xff] }
0x19be   :  { %v7467_v9 = vpack.c.bf16 %v7285_v41, %v7283_v17  ;;  %v6923_v5 = vpop.f32.mrb[132].mxu1  ;;  %v7939_v12 = vpop.f32.mrb[30].mxu0 }
0x19bf   :  { %v6924_v14 = vadd.f32 %v6923_v5, %v17299_v48  ;;  %v7940_v23 = vadd.f32 %v15467_v61, %v7939_v12  ;;  %v6925_v53 = vpop.f32.mrb[133].mxu1  ;;  %v7941_v57 = vpop.f32.mrb[31].mxu0  ;;  %v8339_v43 = vmax.f32 %v7937_v11, 0.0  ;;  %v17305_v5 = vld [vmem:[#allocation162_spill] sm:$0xff] }
0x19c0   :  { %v6926_v59 = vadd.f32 %v6925_v53, %v17300_v45  ;;  %v6927_v31 = vpop.f32.mrb[134].mxu1  ;;  %11175 = vmatprep.mubr.msk.bf16.mxu0 %vm126_vm1, %v7467_v9 }
0x19c1   :  { %v8340_v46 = vmax.f32 %v7940_v23, 0.0  ;;  %v6928_v22 = vadd.f32 %v6927_v31, %v17301_v40  ;;  %v6929_v27 = vpop.f32.mrb[135].mxu1  ;;  %8151 = vmatmul.mubr.bf16.gmra.mrb[132].mxu0 %v7466_v51  ;;  %v7286_v3 = vmax.f32 %v6924_v14, 0.0  ;;  %v17306_v14 = vld [vmem:[#allocation163_spill] sm:$0xff] }
0x19c2   :  { %v6930_v60 = vadd.f32 %v6929_v27, %v17302_v15  ;;  %v7287_v4 = vmax.f32 %v6926_v59, 0.0 }
0x19c3   :  { %v8459_v1 = vpack.c.bf16 %v8340_v46, %v8339_v43  ;;  %v7288_v37 = vmax.f32 %v6928_v22, 0.0 }
0x19c4   :  { %v7289_v35 = vmax.f32 %v6930_v60, 0.0  ;;  %v7944_v58 = vpop.f32.mrb[32].mxu0 }
0x19c5   :  { %v7468_v44 = vpack.c.bf16 %v7288_v37, %v7286_v3  ;;  %v7945_v0 = vadd.f32 %v15467_v61, %v7944_v58  ;;  %v7946_v29 = vpop.f32.mrb[33].mxu0  ;;  %11820 = vmatprep.mubr.msk.bf16.mxu1 %vm429_vm6, %v8459_v1  ;;  %v17307_v3 = vld [vmem:[#allocation164_spill] sm:$0xff]  ;;  %v17308_v58 = vld [vmem:[#allocation165_spill] sm:$0xff] }
0x19c6   :  { %v7469_v62 = vpack.c.bf16 %v7289_v35, %v7287_v4  ;;  %v6933_v19 = vpop.f32.mrb[136].mxu1  ;;  %v7947_v36 = vpop.f32.mrb[34].mxu0 }
0x19c7   :  { %v6934_v42 = vadd.f32 %v6933_v19, %v17303_v56  ;;  %v7948_v34 = vadd.f32 %v15467_v61, %v7947_v36  ;;  %v6935_v17 = vpop.f32.mrb[137].mxu1  ;;  %v7949_v41 = vpop.f32.mrb[35].mxu0  ;;  %v8341_v32 = vmax.f32 %v7945_v0, 0.0  ;;  %v17309_v19 = vld [vmem:[#allocation166_spill] sm:$0xff] }
0x19c8   :  { %v6936_v51 = vadd.f32 %v6935_v17, %v17304_v25  ;;  %v6937_v11 = vpop.f32.mrb[138].mxu1  ;;  %11176 = vmatprep.mubr.msk.bf16.mxu0 %vm126_vm1, %v7469_v62 }
0x19c9   :  { %v8342_v9 = vmax.f32 %v7948_v34, 0.0  ;;  %v6938_v12 = vadd.f32 %v6937_v11, %v17305_v5  ;;  %v6939_v48 = vpop.f32.mrb[139].mxu1  ;;  %8159 = vmatmul.mubr.bf16.gmra.mrb[136].mxu0 %v7468_v44  ;;  %v7290_v53 = vmax.f32 %v6934_v42, 0.0  ;;  %v17310_v42 = vld [vmem:[#allocation167_spill] sm:$0xff] }
0x19ca   :  { %v6940_v23 = vadd.f32 %v6939_v48, %v17306_v14  ;;  %v7291_v59 = vmax.f32 %v6936_v51, 0.0 }
0x19cb   :  { %v8460_v57 = vpack.c.bf16 %v8342_v9, %v8341_v32  ;;  %v7292_v45 = vmax.f32 %v6938_v12, 0.0 }
0x19cc   :  { %v7293_v31 = vmax.f32 %v6940_v23, 0.0  ;;  %v7952_v43 = vpop.f32.mrb[36].mxu0 }
0x19cd   :  { %v7470_v46 = vpack.c.bf16 %v7292_v45, %v7290_v53  ;;  %v7953_v40 = vadd.f32 %v15467_v61, %v7952_v43  ;;  %v7954_v22 = vpop.f32.mrb[37].mxu0  ;;  %11821 = vmatmul.mubr.msk.bf16.gmra.mrb[240].mxu1 %vm429_vm6, %v8460_v57  ;;  %v17311_v53 = vld [vmem:[#allocation168_spill] sm:$0xff]  ;;  %v17312_v43 = vld [vmem:[#allocation169_spill] sm:$0xff] }
0x19ce   :  { %v7471_v27 = vpack.c.bf16 %v7293_v31, %v7291_v59  ;;  %v6943_v15 = vpop.f32.mrb[140].mxu1  ;;  %v7955_v60 = vpop.f32.mrb[38].mxu0 }
0x19cf   :  { %v6944_v1 = vadd.f32 %v6943_v15, %v17307_v3  ;;  %v7956_v37 = vadd.f32 %v15467_v61, %v7955_v60  ;;  %v6945_v4 = vpop.f32.mrb[141].mxu1  ;;  %v7957_v35 = vpop.f32.mrb[39].mxu0  ;;  %v8343_v29 = vmax.f32 %v7953_v40, 0.0  ;;  %v17313_v15 = vld [vmem:[#allocation170_spill] sm:$0xff] }
0x19d0   :  { %v6946_v44 = vadd.f32 %v6945_v4, %v17308_v58  ;;  %v6947_v0 = vpop.f32.mrb[142].mxu1  ;;  %11177 = vmatprep.mubr.msk.bf16.mxu0 %vm126_vm1, %v7471_v27 }
0x19d1   :  { %v8344_v62 = vmax.f32 %v7956_v37, 0.0  ;;  %v6948_v36 = vadd.f32 %v6947_v0, %v17309_v19  ;;  %v6949_v56 = vpop.f32.mrb[143].mxu1  ;;  %8167 = vmatmul.mubr.bf16.gmra.mrb[140].mxu0 %v7470_v46  ;;  %v7294_v17 = vmax.f32 %v6944_v1, 0.0  ;;  %v17314_v1 = vld [vmem:[#allocation171_spill] sm:$0xff] }
0x19d2   :  { %v6950_v34 = vadd.f32 %v6949_v56, %v17310_v42  ;;  %v7295_v51 = vmax.f32 %v6946_v44, 0.0 }
0x19d3   :  { %v8461_v41 = vpack.c.bf16 %v8344_v62, %v8343_v29  ;;  %v7296_v25 = vmax.f32 %v6948_v36, 0.0 }
0x19d4   :  { %v7297_v11 = vmax.f32 %v6950_v34, 0.0  ;;  %v7960_v32 = vpop.f32.mrb[40].mxu0 }
0x19d5   :  { %v7472_v9 = vpack.c.bf16 %v7296_v25, %v7294_v17  ;;  %v7961_v5 = vadd.f32 %v15467_v61, %v7960_v32  ;;  %v7962_v12 = vpop.f32.mrb[41].mxu0  ;;  %11824 = vmatprep.mubr.msk.bf16.mxu1 %vm429_vm6, %v8461_v41 }
0x19d6   :  { %v7473_v48 = vpack.c.bf16 %v7297_v11, %v7295_v51  ;;  %v6953_v14 = vpop.f32.mrb[144].mxu1  ;;  %v7963_v23 = vpop.f32.mrb[42].mxu0 }
0x19d7   :  { %v6954_v57 = vadd.f32 %v6953_v14, %v17311_v53  ;;  %v7964_v45 = vadd.f32 %v15467_v61, %v7963_v23  ;;  %v6955_v59 = vpop.f32.mrb[145].mxu1  ;;  %v7965_v31 = vpop.f32.mrb[43].mxu0  ;;  %v8345_v22 = vmax.f32 %v7961_v5, 0.0 }
0x19d8   :  { %v6956_v46 = vadd.f32 %v6955_v59, %v17312_v43  ;;  %v6957_v40 = vpop.f32.mrb[146].mxu1  ;;  %11178 = vmatprep.mubr.msk.bf16.mxu0 %vm126_vm1, %v7473_v48 }
0x19d9   :  { %v8346_v27 = vmax.f32 %v7964_v45, 0.0  ;;  %v6958_v60 = vadd.f32 %v6957_v40, %v17313_v15  ;;  %v6959_v3 = vpop.f32.mrb[147].mxu1  ;;  %8175 = vmatmul.mubr.bf16.gmra.mrb[144].mxu0 %v7472_v9  ;;  %v7298_v4 = vmax.f32 %v6954_v57, 0.0 }
0x19da   :  { %v6960_v37 = vadd.f32 %v6959_v3, %v17314_v1  ;;  %v7299_v44 = vmax.f32 %v6956_v46, 0.0 }
0x19db   :  { %v8462_v35 = vpack.c.bf16 %v8346_v27, %v8345_v22  ;;  %v7300_v58 = vmax.f32 %v6958_v60, 0.0 }
0x19dc   :  { %v7301_v0 = vmax.f32 %v6960_v37, 0.0  ;;  %v7968_v29 = vpop.f32.mrb[44].mxu0 }
0x19dd   :  { %v7474_v62 = vpack.c.bf16 %v7300_v58, %v7298_v4  ;;  %v7969_v19 = vadd.f32 %v15467_v61, %v7968_v29  ;;  %v7970_v36 = vpop.f32.mrb[45].mxu0  ;;  %11825 = vmatmul.mubr.msk.bf16.gmra.mrb[244].mxu1 %vm429_vm6, %v8462_v35 }
0x19de   :  { %v7475_v56 = vpack.c.bf16 %v7301_v0, %v7299_v44  ;;  %v6963_v42 = vpop.f32.mrb[148].mxu1  ;;  %v7971_v34 = vpop.f32.mrb[46].mxu0 }
0x19df   :  { %v6964_v17 = vadd.f32 %v6963_v42, %v15024_v10  ;;  %v7972_v41 = vadd.f32 %v15467_v61, %v7971_v34  ;;  %v6965_v25 = vpop.f32.mrb[149].mxu1  ;;  %v7973_v51 = vpop.f32.mrb[47].mxu0  ;;  %v8347_v9 = vmax.f32 %v7969_v19, 0.0 }
0x19e0   :  { %v6966_v11 = vadd.f32 %v6965_v25, %v15026_v20  ;;  %v6967_v32 = vpop.f32.mrb[150].mxu1  ;;  %11179 = vmatprep.mubr.msk.bf16.mxu0 %vm126_vm1, %v7475_v56 }
0x19e1   :  { %v8348_v5 = vmax.f32 %v7972_v41, 0.0  ;;  %v6968_v12 = vadd.f32 %v6967_v32, %v15028_v6  ;;  %v6969_v48 = vpop.f32.mrb[151].mxu1  ;;  %8183 = vmatmul.mubr.bf16.gmra.mrb[148].mxu0 %v7474_v62  ;;  %v7302_v23 = vmax.f32 %v6964_v17, 0.0 }
0x19e2   :  { %v6970_v14 = vadd.f32 %v6969_v48, %v15032_v28  ;;  %v7303_v57 = vmax.f32 %v6966_v11, 0.0 }
0x19e3   :  { %v8463_v53 = vpack.c.bf16 %v8348_v5, %v8347_v9  ;;  %v7304_v10 = vmax.f32 %v6968_v12, 0.0 }
0x19e4   :  { %v7305_v45 = vmax.f32 %v6970_v14, 0.0  ;;  %v7976_v59 = vpop.f32.mrb[24].mxu0 }
0x19e5   :  { %v7476_v31 = vpack.c.bf16 %v7304_v10, %v7302_v23  ;;  %v7977_v20 = vadd.f32 %v15467_v61, %v7976_v59  ;;  %v7978_v43 = vpop.f32.mrb[25].mxu0  ;;  %11828 = vmatprep.mubr.msk.bf16.mxu1 %vm429_vm6, %v8463_v53 }
0x19e6   :  { %v7477_v46 = vpack.c.bf16 %v7305_v45, %v7303_v57  ;;  %v6973_v40 = vpop.f32.mrb[152].mxu1  ;;  %v7979_v22 = vpop.f32.mrb[26].mxu0 }
0x19e7   :  { %v6974_v6 = vadd.f32 %v6973_v40, %v15037_v21  ;;  %v7980_v27 = vadd.f32 %v15467_v61, %v7979_v22  ;;  %v6975_v28 = vpop.f32.mrb[153].mxu1  ;;  %v7981_v15 = vpop.f32.mrb[27].mxu0  ;;  %v8349_v1 = vmax.f32 %v7977_v20, 0.0 }
0x19e8   :  { %v6976_v60 = vadd.f32 %v6975_v28, %v15041_v63  ;;  %v6977_v3 = vpop.f32.mrb[154].mxu1  ;;  %11180 = vmatprep.mubr.msk.bf16.mxu0 %vm126_vm1, %v7477_v46 }
0x19e9   :  { %v8350_v37 = vmax.f32 %v7980_v27, 0.0  ;;  %v6978_v4 = vadd.f32 %v6977_v3, %v15045_v16  ;;  %v6979_v35 = vpop.f32.mrb[155].mxu1  ;;  %8191 = vmatmul.mubr.bf16.gmra.mrb[152].mxu0 %v7476_v31  ;;  %v7306_v44 = vmax.f32 %v6974_v6, 0.0 }
0x19ea   :  { %v6980_v58 = vadd.f32 %v6979_v35, %v15050_v38  ;;  %v7307_v29 = vmax.f32 %v6976_v60, 0.0 }
0x19eb   :  { %v8464_v0 = vpack.c.bf16 %v8350_v37, %v8349_v1  ;;  %v7308_v21 = vmax.f32 %v6978_v4, 0.0 }
0x19ec   :  { %v7309_v62 = vmax.f32 %v6980_v58, 0.0  ;;  %v7984_v19 = vpop.f32.mrb[48].mxu0 }
0x19ed   :  { %v7478_v36 = vpack.c.bf16 %v7308_v21, %v7306_v44  ;;  %v7985_v63 = vadd.f32 %v15467_v61, %v7984_v19  ;;  %v7986_v56 = vpop.f32.mrb[49].mxu0  ;;  %11829 = vmatmul.mubr.msk.bf16.gmra.mrb[248].mxu1 %vm429_vm6, %v8464_v0 }
0x19ee   :  { %v7479_v42 = vpack.c.bf16 %v7309_v62, %v7307_v29  ;;  %v6983_v34 = vpop.f32.mrb[156].mxu1  ;;  %v7987_v17 = vpop.f32.mrb[50].mxu0 }
0x19ef   :  { %v6984_v16 = vadd.f32 %v6983_v34, %v15055_v54  ;;  %v7988_v41 = vadd.f32 %v15467_v61, %v7987_v17  ;;  %v6985_v38 = vpop.f32.mrb[157].mxu1  ;;  %v7989_v25 = vpop.f32.mrb[51].mxu0  ;;  %v8351_v32 = vmax.f32 %v7985_v63, 0.0 }
0x19f0   :  { %v6986_v51 = vadd.f32 %v6985_v38, %v15057_v18  ;;  %v6987_v11 = vpop.f32.mrb[158].mxu1  ;;  %11181 = vmatprep.mubr.msk.bf16.mxu0 %vm126_vm1, %v7479_v42 }
0x19f1   :  { %v8352_v9 = vmax.f32 %v7988_v41, 0.0  ;;  %v6988_v5 = vadd.f32 %v6987_v11, %v15059_v39  ;;  %v6989_v12 = vpop.f32.mrb[159].mxu1  ;;  %8199 = vmatmul.mubr.bf16.gmra.mrb[156].mxu0 %v7478_v36  ;;  %v7310_v14 = vmax.f32 %v6984_v16, 0.0 }
0x19f2   :  { %v6990_v48 = vadd.f32 %v6989_v12, %v15063_v26  ;;  %v7311_v53 = vmax.f32 %v6986_v51, 0.0 }
0x19f3   :  { %v8465_v23 = vpack.c.bf16 %v8352_v9, %v8351_v32  ;;  %v7312_v54 = vmax.f32 %v6988_v5, 0.0 }
0x19f4   :  { %v7313_v10 = vmax.f32 %v6990_v48, 0.0  ;;  %v7992_v57 = vpop.f32.mrb[52].mxu0 }
0x19f5   :  { %v7480_v45 = vpack.c.bf16 %v7312_v54, %v7310_v14  ;;  %v7993_v18 = vadd.f32 %v15467_v61, %v7992_v57  ;;  %v7994_v59 = vpop.f32.mrb[53].mxu0  ;;  %11832 = vmatprep.mubr.msk.bf16.mxu1 %vm429_vm6, %v8465_v23 }
0x19f6   :  { %v7481_v31 = vpack.c.bf16 %v7313_v10, %v7311_v53  ;;  %v6993_v20 = vpop.f32.mrb[160].mxu1  ;;  %v7995_v43 = vpop.f32.mrb[54].mxu0 }
0x19f7   :  { %v6994_v39 = vadd.f32 %v6993_v20, %v15068_v7  ;;  %v7996_v46 = vadd.f32 %v15467_v61, %v7995_v43  ;;  %v6995_v26 = vpop.f32.mrb[161].mxu1  ;;  %v7997_v40 = vpop.f32.mrb[55].mxu0  ;;  %v8353_v27 = vmax.f32 %v7993_v18, 0.0 }
0x19f8   :  { %v6996_v22 = vadd.f32 %v6995_v26, %v15077_v47  ;;  %v6997_v6 = vpop.f32.mrb[162].mxu1  ;;  %11182 = vmatprep.mubr.msk.bf16.mxu0 %vm126_vm1, %v7481_v31 }
0x19f9   :  { %v8354_v28 = vmax.f32 %v7996_v46, 0.0  ;;  %v6998_v15 = vadd.f32 %v6997_v6, %v15082_v50  ;;  %v6999_v60 = vpop.f32.mrb[163].mxu1  ;;  %8207 = vmatmul.mubr.bf16.gmra.mrb[160].mxu0 %v7480_v45  ;;  %v7314_v1 = vmax.f32 %v6994_v39, 0.0 }
0x19fa   :  { %v7000_v3 = vadd.f32 %v6999_v60, %v15084_v30  ;;  %v7315_v4 = vmax.f32 %v6996_v22, 0.0 }
0x19fb   :  { %v8466_v37 = vpack.c.bf16 %v8354_v28, %v8353_v27  ;;  %v7316_v7 = vmax.f32 %v6998_v15, 0.0  ;;  %v17315_v15 = vld [vmem:[#allocation172_spill] sm:$0xff] }
0x19fc   :  { %v7317_v35 = vmax.f32 %v7000_v3, 0.0  ;;  %v8000_v58 = vpop.f32.mrb[56].mxu0 }
0x19fd   :  { %v7482_v44 = vpack.c.bf16 %v7316_v7, %v7314_v1  ;;  %v8001_v47 = vadd.f32 %v15467_v61, %v8000_v58  ;;  %v8002_v0 = vpop.f32.mrb[57].mxu0  ;;  %11833 = vmatmul.mubr.msk.bf16.gmra.mrb[252].mxu1 %vm429_vm6, %v8466_v37  ;;  %v17316_v37 = vld [vmem:[#allocation173_spill] sm:$0xff] }
0x19fe   :  { %v7483_v21 = vpack.c.bf16 %v7317_v35, %v7315_v4  ;;  %v7003_v29 = vpop.f32.mrb[164].mxu1  ;;  %v8003_v62 = vpop.f32.mrb[58].mxu0 }
0x19ff   :  { %v7004_v50 = vadd.f32 %v7003_v29, %v15086_v24  ;;  %v8004_v19 = vadd.f32 %v15467_v61, %v8003_v62  ;;  %v7005_v30 = vpop.f32.mrb[165].mxu1  ;;  %v8005_v36 = vpop.f32.mrb[59].mxu0  ;;  %v8355_v42 = vmax.f32 %v8001_v47, 0.0 }
0x1a00   :  { %v7006_v63 = vadd.f32 %v7005_v30, %v15090_v49  ;;  %v7007_v56 = vpop.f32.mrb[166].mxu1  ;;  %11183 = vmatprep.mubr.msk.bf16.mxu0 %vm126_vm1, %v7483_v21  ;;  %v17318_v21 = vld [vmem:[#allocation175_spill] sm:$0xff] }
0x1a01   :  { %v8356_v34 = vmax.f32 %v8004_v19, 0.0  ;;  %v7008_v17 = vadd.f32 %v7007_v56, %v15095_v55  ;;  %v7009_v16 = vpop.f32.mrb[167].mxu1  ;;  %8215 = vmatmul.mubr.bf16.gmra.mrb[164].mxu0 %v7482_v44  ;;  %v7318_v38 = vmax.f32 %v7004_v50, 0.0  ;;  %v17317_v44 = vld [vmem:[#allocation174_spill] sm:$0xff]  ;;  %v15651_v56 = vld [vmem:[#allocation4 + $0x6] ss:$0 sm:$0xff] }
0x1a02   :  { %v7010_v41 = vadd.f32 %v7009_v16, %v15099_v33  ;;  %v7319_v51 = vmax.f32 %v7006_v63, 0.0 }
0x1a03   :  { %v8467_v25 = vpack.c.bf16 %v8356_v34, %v8355_v42  ;;  %v7320_v24 = vmax.f32 %v7008_v17, 0.0 }
0x1a04   :  { %v7321_v11 = vmax.f32 %v7010_v41, 0.0  ;;  %v8008_v32 = vpop.f32.mrb[64].mxu0 }
0x1a05   :  { %v7484_v9 = vpack.c.bf16 %v7320_v24, %v7318_v38  ;;  %v8009_v49 = vadd.f32 %v15467_v61, %v8008_v32  ;;  %v8010_v5 = vpop.f32.mrb[65].mxu0  ;;  %11836 = vmatprep.mubr.msk.bf16.mxu1 %vm429_vm6, %v8467_v25  ;;  %v17319_v38 = vld [vmem:[#allocation176_spill] sm:$0xff]  ;;  %v17320_v32 = vld [vmem:[#allocation177_spill] sm:$0xff] }
0x1a06   :  { %v7485_v12 = vpack.c.bf16 %v7321_v11, %v7319_v51  ;;  %v7013_v48 = vpop.f32.mrb[168].mxu1  ;;  %v8011_v14 = vpop.f32.mrb[66].mxu0 }
0x1a07   :  { %v7014_v55 = vadd.f32 %v7013_v48, %v15103_v8  ;;  %v8012_v23 = vadd.f32 %v15467_v61, %v8011_v14  ;;  %v7015_v33 = vpop.f32.mrb[169].mxu1  ;;  %v8013_v54 = vpop.f32.mrb[67].mxu0  ;;  %v8357_v57 = vmax.f32 %v8009_v49, 0.0  ;;  %v17321_v48 = vld [vmem:[#allocation178_spill] sm:$0xff] }
0x1a08   :  { %v7016_v53 = vadd.f32 %v7015_v33, %v15108_v13  ;;  %v7017_v10 = vpop.f32.mrb[170].mxu1  ;;  %11184 = vmatprep.mubr.msk.bf16.mxu0 %vm126_vm1, %v7485_v12 }
0x1a09   :  { %v8358_v45 = vmax.f32 %v8012_v23, 0.0  ;;  %v7018_v18 = vadd.f32 %v7017_v10, %v15113_v2  ;;  %v7019_v59 = vpop.f32.mrb[171].mxu1  ;;  %8223 = vmatmul.mubr.bf16.gmra.mrb[168].mxu0 %v7484_v9  ;;  %v7322_v20 = vmax.f32 %v7014_v55, 0.0  ;;  %v12211_v2 = vld [vmem:[#allocation9 + $0x80] sm:$0xff]   ;;  %v17322_v23 = vld [vmem:[#allocation179_spill] sm:$0xff] }
0x1a0a   :  { %v7020_v31 = vadd.f32 %v7019_v59, %v15115_v52  ;;  %v7323_v39 = vmax.f32 %v7016_v53, 0.0  ;;  %11914 = vmatprep.subr.bf16.mxu1 %v12211_v2 }
0x1a0b   :  { %v8468_v43 = vpack.c.bf16 %v8358_v45, %v8357_v57  ;;  %v7324_v8 = vmax.f32 %v7018_v18, 0.0  ;;  %11915 = vmatpush3.bf16.msra.mxu1 %v12211_v2 }
0x1a0c   :  { %v7325_v46 = vmax.f32 %v7020_v31, 0.0  ;;  %v8016_v26 = vpop.f32.mrb[68].mxu0 }
0x1a0d   :  { %v7486_v40 = vpack.c.bf16 %v7324_v8, %v7322_v20  ;;  %v8017_v13 = vadd.f32 %v15467_v61, %v8016_v26  ;;  %v8018_v22 = vpop.f32.mrb[69].mxu0  ;;  %11837 = vmatmul.mubr.msk.bf16.gmra.mrb[0].mxu1 %vm429_vm6, %v8468_v43 }
0x1a0e   :  { %v7487_v6 = vpack.c.bf16 %v7325_v46, %v7323_v39  ;;  %v7023_v27 = vpop.f32.mrb[172].mxu1  ;;  %v8019_v28 = vpop.f32.mrb[70].mxu0  ;;  %v17323_v46 = vld [vmem:[#allocation180_spill] sm:$0xff] }
0x1a0f   :  { %v7024_v60 = vadd.f32 %v7023_v27, %v17315_v15  ;;  %v8020_v52 = vadd.f32 %v15467_v61, %v8019_v28  ;;  %v7025_v3 = vpop.f32.mrb[173].mxu1  ;;  %v8021_v1 = vpop.f32.mrb[71].mxu0  ;;  %v8359_v35 = vmax.f32 %v8017_v13, 0.0 }
0x1a10   :  { %v7026_v7 = vadd.f32 %v7025_v3, %v17316_v37  ;;  %v7027_v4 = vpop.f32.mrb[174].mxu1  ;;  %11185 = vmatprep.mubr.msk.bf16.mxu0 %vm126_vm1, %v7487_v6  ;;  %v17324_v6 = vld [vmem:[#allocation181_spill] sm:$0xff]  ;;  %v17326_v1 = vld [vmem:[#allocation183_spill] sm:$0xff] }
0x1a11   :  { %v8360_v58 = vmax.f32 %v8020_v52, 0.0  ;;  %v7028_v47 = vadd.f32 %v7027_v4, %v17317_v44  ;;  %v7029_v0 = vpop.f32.mrb[175].mxu1  ;;  %8231 = vmatmul.mubr.bf16.gmra.mrb[172].mxu0 %v7486_v40  ;;  %v7326_v62 = vmax.f32 %v7024_v60, 0.0  ;;  %v17325_v60 = vld [vmem:[#allocation182_spill] sm:$0xff] }
0x1a12   :  { %v7030_v29 = vadd.f32 %v7029_v0, %v17318_v21  ;;  %v7327_v19 = vmax.f32 %v7026_v7, 0.0 }
0x1a13   :  { %v8469_v50 = vpack.c.bf16 %v8360_v58, %v8359_v35  ;;  %v7328_v61 = vmax.f32 %v7028_v47, 0.0 }
0x1a14   :  { %v7329_v30 = vmax.f32 %v7030_v29, 0.0  ;;  %v8024_v36 = vpop.f32.mrb[72].mxu0 }
0x1a15   :  { %v7488_v63 = vpack.c.bf16 %v7328_v61, %v7326_v62  ;;  %v8025_v42 = vadd.f32 %v15651_v56, %v8024_v36  ;;  %v8026_v34 = vpop.f32.mrb[73].mxu0  ;;  %11840 = vmatprep.mubr.msk.bf16.mxu1 %vm429_vm6, %v8469_v50 }
0x1a16   :  { %v7489_v17 = vpack.c.bf16 %v7329_v30, %v7327_v19  ;;  %v7033_v16 = vpop.f32.mrb[176].mxu1  ;;  %v8027_v41 = vpop.f32.mrb[74].mxu0  ;;  %v17327_v19 = vld [vmem:[#allocation184_spill] sm:$0xff]  ;;  %v17328_v34 = vld [vmem:[#allocation185_spill] sm:$0xff] }
0x1a17   :  { %v7034_v25 = vadd.f32 %v7033_v16, %v17319_v38  ;;  %v8028_v24 = vadd.f32 %v15651_v56, %v8027_v41  ;;  %v7035_v51 = vpop.f32.mrb[177].mxu1  ;;  %v8029_v11 = vpop.f32.mrb[75].mxu0  ;;  %v8361_v5 = vmax.f32 %v8025_v42, 0.0 }
0x1a18   :  { %v7036_v9 = vadd.f32 %v7035_v51, %v17320_v32  ;;  %v7037_v49 = vpop.f32.mrb[178].mxu1  ;;  %11186 = vmatprep.mubr.msk.bf16.mxu0 %vm126_vm1, %v7489_v17  ;;  %v17330_v11 = vld [vmem:[#allocation187_spill] sm:$0xff] }
0x1a19   :  { %v8362_v12 = vmax.f32 %v8028_v24, 0.0  ;;  %v7038_v14 = vadd.f32 %v7037_v49, %v17321_v48  ;;  %v7039_v55 = vpop.f32.mrb[179].mxu1  ;;  %8239 = vmatmul.mubr.bf16.gmra.mrb[176].mxu0 %v7488_v63  ;;  %v7330_v54 = vmax.f32 %v7034_v25, 0.0  ;;  %v17329_v25 = vld [vmem:[#allocation186_spill] sm:$0xff] }
0x1a1a   :  { %v7040_v33 = vadd.f32 %v7039_v55, %v17322_v23  ;;  %v7331_v57 = vmax.f32 %v7036_v9, 0.0 }
0x1a1b   :  { %v8470_v53 = vpack.c.bf16 %v8362_v12, %v8361_v5  ;;  %v7332_v10 = vmax.f32 %v7038_v14, 0.0 }
0x1a1c   :  { %v7333_v45 = vmax.f32 %v7040_v33, 0.0  ;;  %v8032_v18 = vpop.f32.mrb[76].mxu0 }
0x1a1d   :  { %v7490_v59 = vpack.c.bf16 %v7332_v10, %v7330_v54  ;;  %v8033_v31 = vadd.f32 %v15651_v56, %v8032_v18  ;;  %v8034_v20 = vpop.f32.mrb[77].mxu0  ;;  %11841 = vmatmul.mubr.msk.bf16.gmra.mrb[4].mxu1 %vm429_vm6, %v8470_v53 }
0x1a1e   :  { %v7491_v43 = vpack.c.bf16 %v7333_v45, %v7331_v57  ;;  %v7043_v8 = vpop.f32.mrb[180].mxu1  ;;  %v8035_v39 = vpop.f32.mrb[78].mxu0  ;;  %v17331_v57 = vld [vmem:[#allocation188_spill] sm:$0xff]  ;;  %v17332_v20 = vld [vmem:[#allocation189_spill] sm:$0xff] }
0x1a1f   :  { %v7044_v26 = vadd.f32 %v7043_v8, %v17323_v46  ;;  %v8036_v40 = vadd.f32 %v15651_v56, %v8035_v39  ;;  %v7045_v13 = vpop.f32.mrb[181].mxu1  ;;  %v8037_v22 = vpop.f32.mrb[79].mxu0  ;;  %v8363_v2 = vmax.f32 %v8033_v31, 0.0 }
0x1a20   :  { %v7046_v27 = vadd.f32 %v7045_v13, %v17324_v6  ;;  %v7047_v28 = vpop.f32.mrb[182].mxu1  ;;  %11187 = vmatprep.mubr.msk.bf16.mxu0 %vm126_vm1, %v7491_v43  ;;  %v17334_v22 = vld [vmem:[#allocation191_spill] sm:$0xff] }
0x1a21   :  { %v8364_v15 = vmax.f32 %v8036_v40, 0.0  ;;  %v7048_v52 = vadd.f32 %v7047_v28, %v17325_v60  ;;  %v7049_v3 = vpop.f32.mrb[183].mxu1  ;;  %8247 = vmatmul.mubr.bf16.gmra.mrb[180].mxu0 %v7490_v59  ;;  %v7334_v7 = vmax.f32 %v7044_v26, 0.0  ;;  %v17333_v26 = vld [vmem:[#allocation190_spill] sm:$0xff] }
0x1a22   :  { %v7050_v37 = vadd.f32 %v7049_v3, %v17326_v1  ;;  %v7335_v58 = vmax.f32 %v7046_v27, 0.0 }
0x1a23   :  { %v8471_v4 = vpack.c.bf16 %v8364_v15, %v8363_v2  ;;  %v7336_v35 = vmax.f32 %v7048_v52, 0.0 }
0x1a24   :  { %v7337_v44 = vmax.f32 %v7050_v37, 0.0  ;;  %v8040_v47 = vpop.f32.mrb[60].mxu0 }
0x1a25   :  { %v7492_v0 = vpack.c.bf16 %v7336_v35, %v7334_v7  ;;  %v8041_v21 = vadd.f32 %v15651_v56, %v8040_v47  ;;  %v8042_v29 = vpop.f32.mrb[61].mxu0  ;;  %11844 = vmatprep.mubr.msk.bf16.mxu1 %vm429_vm6, %v8471_v4 }
0x1a26   :  { %v7493_v62 = vpack.c.bf16 %v7337_v44, %v7335_v58  ;;  %v7053_v50 = vpop.f32.mrb[184].mxu1  ;;  %v8043_v61 = vpop.f32.mrb[62].mxu0  ;;  %v17335_v58 = vld [vmem:[#allocation192_spill] sm:$0xff]  ;;  %v17336_v29 = vld [vmem:[#allocation193_spill] sm:$0xff] }
0x1a27   :  { %v7054_v30 = vadd.f32 %v7053_v50, %v17327_v19  ;;  %v8044_v36 = vadd.f32 %v15651_v56, %v8043_v61  ;;  %v7055_v63 = vpop.f32.mrb[185].mxu1  ;;  %v8045_v42 = vpop.f32.mrb[63].mxu0  ;;  %v8365_v41 = vmax.f32 %v8041_v21, 0.0 }
0x1a28   :  { %v7056_v17 = vadd.f32 %v7055_v63, %v17328_v34  ;;  %v7057_v16 = vpop.f32.mrb[186].mxu1  ;;  %11188 = vmatprep.mubr.msk.bf16.mxu0 %vm126_vm1, %v7493_v62  ;;  %v17338_v42 = vld [vmem:[#allocation195_spill] sm:$0xff] }
0x1a29   :  { %v8366_v38 = vmax.f32 %v8044_v36, 0.0  ;;  %v7058_v24 = vadd.f32 %v7057_v16, %v17329_v25  ;;  %v7059_v51 = vpop.f32.mrb[187].mxu1  ;;  %8255 = vmatmul.mubr.bf16.gmra.mrb[184].mxu0 %v7492_v0  ;;  %v7338_v9 = vmax.f32 %v7054_v30, 0.0  ;;  %v17337_v30 = vld [vmem:[#allocation194_spill] sm:$0xff] }
0x1a2a   :  { %v7060_v32 = vadd.f32 %v7059_v51, %v17330_v11  ;;  %v7339_v12 = vmax.f32 %v7056_v17, 0.0 }
0x1a2b   :  { %v8472_v49 = vpack.c.bf16 %v8366_v38, %v8365_v41  ;;  %v7340_v5 = vmax.f32 %v7058_v24, 0.0 }
0x1a2c   :  { %v7341_v48 = vmax.f32 %v7060_v32, 0.0  ;;  %v8048_v14 = vpop.f32.mrb[80].mxu0 }
0x1a2d   :  { %v7494_v55 = vpack.c.bf16 %v7340_v5, %v7338_v9  ;;  %v8049_v23 = vadd.f32 %v15651_v56, %v8048_v14  ;;  %v8050_v33 = vpop.f32.mrb[81].mxu0  ;;  %11845 = vmatmul.mubr.msk.bf16.gmra.mrb[12].mxu1 %vm429_vm6, %v8472_v49 }
0x1a2e   :  { %v7495_v54 = vpack.c.bf16 %v7341_v48, %v7339_v12  ;;  %v7063_v53 = vpop.f32.mrb[188].mxu1  ;;  %v8051_v10 = vpop.f32.mrb[82].mxu0  ;;  %v17339_v12 = vld [vmem:[#allocation196_spill] sm:$0xff]  ;;  %v17340_v33 = vld [vmem:[#allocation197_spill] sm:$0xff] }
0x1a2f   :  { %v7064_v45 = vadd.f32 %v7063_v53, %v17331_v57  ;;  %v8052_v18 = vadd.f32 %v15651_v56, %v8051_v10  ;;  %v7065_v59 = vpop.f32.mrb[189].mxu1  ;;  %v8053_v31 = vpop.f32.mrb[83].mxu0  ;;  %v8367_v39 = vmax.f32 %v8049_v23, 0.0 }
0x1a30   :  { %v7066_v43 = vadd.f32 %v7065_v59, %v17332_v20  ;;  %v7067_v8 = vpop.f32.mrb[190].mxu1  ;;  %11189 = vmatprep.mubr.msk.bf16.mxu0 %vm126_vm1, %v7495_v54  ;;  %v17342_v31 = vld [vmem:[#allocation199_spill] sm:$0xff] }
0x1a31   :  { %v8368_v46 = vmax.f32 %v8052_v18, 0.0  ;;  %v7068_v40 = vadd.f32 %v7067_v8, %v17333_v26  ;;  %v7069_v13 = vpop.f32.mrb[191].mxu1  ;;  %8263 = vmatmul.mubr.bf16.gmra.mrb[188].mxu0 %v7494_v55  ;;  %v7342_v27 = vmax.f32 %v7064_v45, 0.0  ;;  %v17341_v45 = vld [vmem:[#allocation198_spill] sm:$0xff] }
0x1a32   :  { %v7070_v6 = vadd.f32 %v7069_v13, %v17334_v22  ;;  %v7343_v15 = vmax.f32 %v7066_v43, 0.0 }
0x1a33   :  { %v8473_v28 = vpack.c.bf16 %v8368_v46, %v8367_v39  ;;  %v7344_v2 = vmax.f32 %v7068_v40, 0.0 }
0x1a34   :  { %v7345_v60 = vmax.f32 %v7070_v6, 0.0  ;;  %v8056_v52 = vpop.f32.mrb[84].mxu0 }
0x1a35   :  { %v7496_v3 = vpack.c.bf16 %v7344_v2, %v7342_v27  ;;  %v8057_v1 = vadd.f32 %v15651_v56, %v8056_v52  ;;  %v8058_v37 = vpop.f32.mrb[85].mxu0  ;;  %11848 = vmatprep.mubr.msk.bf16.mxu1 %vm429_vm6, %v8473_v28 }
0x1a36   :  { %v7497_v7 = vpack.c.bf16 %v7345_v60, %v7343_v15  ;;  %v7073_v4 = vpop.f32.mrb[192].mxu1  ;;  %v8059_v35 = vpop.f32.mrb[86].mxu0  ;;  %v17343_v15 = vld [vmem:[#allocation200_spill] sm:$0xff]  ;;  %v17344_v37 = vld [vmem:[#allocation201_spill] sm:$0xff] }
0x1a37   :  { %v7074_v44 = vadd.f32 %v7073_v4, %v17335_v58  ;;  %v8060_v47 = vadd.f32 %v15651_v56, %v8059_v35  ;;  %v7075_v0 = vpop.f32.mrb[193].mxu1  ;;  %v8061_v21 = vpop.f32.mrb[87].mxu0  ;;  %v8369_v61 = vmax.f32 %v8057_v1, 0.0 }
0x1a38   :  { %v7076_v62 = vadd.f32 %v7075_v0, %v17336_v29  ;;  %v7077_v50 = vpop.f32.mrb[194].mxu1  ;;  %11190 = vmatprep.mubr.msk.bf16.mxu0 %vm126_vm1, %v7497_v7  ;;  %v17346_v21 = vld [vmem:[#allocation203_spill] sm:$0xff] }
0x1a39   :  { %v8370_v19 = vmax.f32 %v8060_v47, 0.0  ;;  %v7078_v36 = vadd.f32 %v7077_v50, %v17337_v30  ;;  %v7079_v63 = vpop.f32.mrb[195].mxu1  ;;  %8271 = vmatmul.mubr.bf16.gmra.mrb[192].mxu0 %v7496_v3  ;;  %v7346_v17 = vmax.f32 %v7074_v44, 0.0  ;;  %v17345_v44 = vld [vmem:[#allocation202_spill] sm:$0xff] }
0x1a3a   :  { %v7080_v34 = vadd.f32 %v7079_v63, %v17338_v42  ;;  %v7347_v38 = vmax.f32 %v7076_v62, 0.0  ;;  %v15709_v63 = vld [vmem:[#allocation7 + $0x6] ss:$0 sm:$0xff] }
0x1a3b   :  { %v8474_v16 = vpack.c.bf16 %v8370_v19, %v8369_v61  ;;  %v7348_v41 = vmax.f32 %v7078_v36, 0.0 }
0x1a3c   :  { %v7349_v25 = vmax.f32 %v7080_v34, 0.0  ;;  %v8064_v24 = vpop.f32.mrb[88].mxu0 }
0x1a3d   :  { %v7498_v51 = vpack.c.bf16 %v7348_v41, %v7346_v17  ;;  %v8065_v11 = vadd.f32 %v15651_v56, %v8064_v24  ;;  %v8066_v32 = vpop.f32.mrb[89].mxu0  ;;  %11849 = vmatmul.mubr.msk.bf16.gmra.mrb[16].mxu1 %vm429_vm6, %v8474_v16 }
0x1a3e   :  { %v7499_v9 = vpack.c.bf16 %v7349_v25, %v7347_v38  ;;  %v7083_v49 = vpop.f32.mrb[196].mxu1  ;;  %v8067_v5 = vpop.f32.mrb[90].mxu0 }
0x1a3f   :  { %v7084_v48 = vadd.f32 %v7083_v49, %v17339_v12  ;;  %v8068_v14 = vadd.f32 %v15651_v56, %v8067_v5  ;;  %v7085_v55 = vpop.f32.mrb[197].mxu1  ;;  %v8069_v23 = vpop.f32.mrb[91].mxu0  ;;  %v8371_v10 = vmax.f32 %v8065_v11, 0.0 }
0x1a40   :  { %v7086_v54 = vadd.f32 %v7085_v55, %v17340_v33  ;;  %v7087_v53 = vpop.f32.mrb[198].mxu1  ;;  %11191 = vmatprep.mubr.msk.bf16.mxu0 %vm126_vm1, %v7499_v9 }
0x1a41   :  { %v8372_v57 = vmax.f32 %v8068_v14, 0.0  ;;  %v7088_v18 = vadd.f32 %v7087_v53, %v17341_v45  ;;  %v7089_v59 = vpop.f32.mrb[199].mxu1  ;;  %8279 = vmatmul.mubr.bf16.gmra.mrb[196].mxu0 %v7498_v51  ;;  %v7350_v43 = vmax.f32 %v7084_v48, 0.0 }
0x1a42   :  { %v7090_v20 = vadd.f32 %v7089_v59, %v17342_v31  ;;  %v7351_v46 = vmax.f32 %v7086_v54, 0.0 }
0x1a43   :  { %v8475_v8 = vpack.c.bf16 %v8372_v57, %v8371_v10  ;;  %v7352_v39 = vmax.f32 %v7088_v18, 0.0 }
0x1a44   :  { %v7353_v26 = vmax.f32 %v7090_v20, 0.0  ;;  %v8072_v40 = vpop.f32.mrb[92].mxu0 }
0x1a45   :  { %v7500_v13 = vpack.c.bf16 %v7352_v39, %v7350_v43  ;;  %v8073_v22 = vadd.f32 %v15651_v56, %v8072_v40  ;;  %v8074_v6 = vpop.f32.mrb[93].mxu0  ;;  %11852 = vmatprep.mubr.msk.bf16.mxu1 %vm429_vm6, %v8475_v8 }
0x1a46   :  { %v7501_v27 = vpack.c.bf16 %v7353_v26, %v7351_v46  ;;  %v7093_v28 = vpop.f32.mrb[200].mxu1  ;;  %v8075_v2 = vpop.f32.mrb[94].mxu0 }
0x1a47   :  { %v7094_v60 = vadd.f32 %v7093_v28, %v17343_v15  ;;  %v8076_v52 = vadd.f32 %v15651_v56, %v8075_v2  ;;  %v7095_v3 = vpop.f32.mrb[201].mxu1  ;;  %v8077_v1 = vpop.f32.mrb[95].mxu0  ;;  %v8373_v35 = vmax.f32 %v8073_v22, 0.0 }
0x1a48   :  { %v7096_v7 = vadd.f32 %v7095_v3, %v17344_v37  ;;  %v7097_v4 = vpop.f32.mrb[202].mxu1  ;;  %11192 = vmatprep.mubr.msk.bf16.mxu0 %vm126_vm1, %v7501_v27 }
0x1a49   :  { %v8374_v58 = vmax.f32 %v8076_v52, 0.0  ;;  %v7098_v47 = vadd.f32 %v7097_v4, %v17345_v44  ;;  %v7099_v0 = vpop.f32.mrb[203].mxu1  ;;  %8287 = vmatmul.mubr.bf16.gmra.mrb[200].mxu0 %v7500_v13  ;;  %v7354_v62 = vmax.f32 %v7094_v60, 0.0 }
0x1a4a   :  { %v7100_v29 = vadd.f32 %v7099_v0, %v17346_v21  ;;  %v7355_v19 = vmax.f32 %v7096_v7, 0.0 }
0x1a4b   :  { %v8476_v50 = vpack.c.bf16 %v8374_v58, %v8373_v35  ;;  %v7356_v61 = vmax.f32 %v7098_v47, 0.0 }
0x1a4c   :  { %v7357_v30 = vmax.f32 %v7100_v29, 0.0  ;;  %v8080_v36 = vpop.f32.mrb[96].mxu0 }
0x1a4d   :  { %v7502_v42 = vpack.c.bf16 %v7356_v61, %v7354_v62  ;;  %v8081_v34 = vadd.f32 %v15651_v56, %v8080_v36  ;;  %v8082_v17 = vpop.f32.mrb[97].mxu0  ;;  %11853 = vmatmul.mubr.msk.bf16.gmra.mrb[20].mxu1 %vm429_vm6, %v8476_v50 }
0x1a4e   :  { %v7503_v16 = vpack.c.bf16 %v7357_v30, %v7355_v19  ;;  %v8083_v41 = vpop.f32.mrb[98].mxu0  ;;  %v11786_v38 = vpop.f32.mrb[204].mxu1 }
0x1a4f   :  { %v8084_v25 = vadd.f32 %v15651_v56, %v8083_v41  ;;  %v8778_v24 = vadd.f32 %v11786_v38, %v15709_v63  ;;  %v8085_v51 = vpop.f32.mrb[99].mxu0  ;;  %v8769_v11 = vpop.f32.mrb[205].mxu1  ;;  %v8375_v49 = vmax.f32 %v8081_v34, 0.0  ;;  %v12212_v41 = vld [vmem:[#allocation9 + $0x88] ss:$0 sps:$4 sm:$0x11]  }
0x1a50   :  { %v8770_v32 = vadd.f32 %v15709_v63, %v8769_v11  ;;  %11193 = vmatprep.mubr.msk.bf16.mxu0 %vm126_vm1, %v7503_v16  ;;  %v11787_v9 = vpop.f32.mrb[206].mxu1  ;;  %12053 = vmatprep.subr.msk.bf16.mxu1 %vm510_vm7, %v12212_v41  ;;  %vm10369_vm1 = vcmask 97280  }
0x1a51   :  { %v8376_v5 = vmax.f32 %v8084_v25, 0.0  ;;  %v8781_v12 = vadd.f32 %v11787_v9, %v15709_v63  ;;  %8295 = vmatmul.mubr.bf16.gmra.mrb[204].mxu0 %v7502_v42  ;;  %v8772_v48 = vpop.f32.mrb[207].mxu1  ;;  %v9282_v23 = vmax.f32 %v8778_v24, 0.0  ;;  %v9694_v9 = vsel %vm510_vm7, %v12212_v41, 0 }
0x1a52   :  { %v8773_v14 = vadd.f32 %v15709_v63, %v8772_v48  ;;  %v9280_v54 = vmax.f32 %v8770_v32, 0.0  ;;  %11917 = vmatpush3.bf16.msra.mxu1 %v9694_v9 }
0x1a53   :  { %v8477_v55 = vpack.c.bf16 %v8376_v5, %v8375_v49  ;;  %v9283_v33 = vmax.f32 %v8781_v12, 0.0 }
0x1a54   :  { %v9281_v53 = vmax.f32 %v8773_v14, 0.0  ;;  %v8088_v10 = vpop.f32.mrb[100].mxu0 }
0x1a55   :  { %v15719_v57 = vpack.c.bf16 %v9283_v33, %v9282_v23  ;;  %v8089_v45 = vadd.f32 %v15651_v56, %v8088_v10  ;;  %v8090_v18 = vpop.f32.mrb[101].mxu0  ;;  %11856 = vmatprep.mubr.msk.bf16.mxu1 %vm429_vm6, %v8477_v55 }
0x1a56   :  { %v15723_v59 = vpack.c.bf16 %v9281_v53, %v9280_v54  ;;  %v8091_v31 = vpop.f32.mrb[102].mxu0  ;;  %v11790_v20 = vpop.f32.mrb[208].mxu1 }
0x1a57   :  { %v8092_v43 = vadd.f32 %v15651_v56, %v8091_v31  ;;  %v8794_v8 = vadd.f32 %v11790_v20, %v15709_v63  ;;  %v8093_v39 = vpop.f32.mrb[103].mxu0  ;;  %v8785_v46 = vpop.f32.mrb[209].mxu1  ;;  %v8377_v13 = vmax.f32 %v8089_v45, 0.0 }
0x1a58   :  { %v8786_v26 = vadd.f32 %v15709_v63, %v8785_v46  ;;  %v11791_v40 = vpop.f32.mrb[210].mxu1 }
0x1a59   :  { %v8378_v22 = vmax.f32 %v8092_v43, 0.0  ;;  %v8797_v6 = vadd.f32 %v11791_v40, %v15709_v63  ;;  %v8788_v27 = vpop.f32.mrb[211].mxu1  ;;  %v9286_v15 = vmax.f32 %v8794_v8, 0.0 }
0x1a5a   :  { %v8789_v28 = vadd.f32 %v15709_v63, %v8788_v27  ;;  %v9284_v52 = vmax.f32 %v8786_v26, 0.0 }
0x1a5b   :  { %v8478_v2 = vpack.c.bf16 %v8378_v22, %v8377_v13  ;;  %v9287_v60 = vmax.f32 %v8797_v6, 0.0 }
0x1a5c   :  { %v9285_v3 = vmax.f32 %v8789_v28, 0.0  ;;  %v8096_v1 = vpop.f32.mrb[104].mxu0 }
0x1a5d   :  { %v15730_v37 = vpack.c.bf16 %v9287_v60, %v9286_v15  ;;  %v8097_v7 = vadd.f32 %v15651_v56, %v8096_v1  ;;  %v8098_v4 = vpop.f32.mrb[105].mxu0  ;;  %11857 = vmatmul.mubr.msk.bf16.gmra.mrb[24].mxu1 %vm429_vm6, %v8478_v2 }
0x1a5e   :  { %v15734_v35 = vpack.c.bf16 %v9285_v3, %v9284_v52  ;;  %v8099_v58 = vpop.f32.mrb[106].mxu0  ;;  %v11794_v44 = vpop.f32.mrb[212].mxu1 }
0x1a5f   :  { %v8100_v47 = vadd.f32 %v15651_v56, %v8099_v58  ;;  %v8810_v0 = vadd.f32 %v11794_v44, %v15709_v63  ;;  %v8101_v21 = vpop.f32.mrb[107].mxu0  ;;  %v8801_v29 = vpop.f32.mrb[213].mxu1  ;;  %v8379_v61 = vmax.f32 %v8097_v7, 0.0 }
0x1a60   :  { %v8802_v62 = vadd.f32 %v15709_v63, %v8801_v29  ;;  %v11795_v50 = vpop.f32.mrb[214].mxu1 }
0x1a61   :  { %v8380_v19 = vmax.f32 %v8100_v47, 0.0  ;;  %v8813_v30 = vadd.f32 %v11795_v50, %v15709_v63  ;;  %v8804_v36 = vpop.f32.mrb[215].mxu1  ;;  %v9290_v17 = vmax.f32 %v8810_v0, 0.0 }
0x1a62   :  { %v8805_v42 = vadd.f32 %v15709_v63, %v8804_v36  ;;  %v9288_v38 = vmax.f32 %v8802_v62, 0.0 }
0x1a63   :  { %v8479_v34 = vpack.c.bf16 %v8380_v19, %v8379_v61  ;;  %v9291_v16 = vmax.f32 %v8813_v30, 0.0 }
0x1a64   :  { %v9289_v25 = vmax.f32 %v8805_v42, 0.0  ;;  %v8104_v24 = vpop.f32.mrb[108].mxu0 }
0x1a65   :  { %v15741_v51 = vpack.c.bf16 %v9291_v16, %v9290_v17  ;;  %v8105_v11 = vadd.f32 %v15651_v56, %v8104_v24  ;;  %v8106_v32 = vpop.f32.mrb[109].mxu0  ;;  %11860 = vmatprep.mubr.msk.bf16.mxu1 %vm429_vm6, %v8479_v34 }
0x1a66   :  { %v15747_v49 = vpack.c.bf16 %v9289_v25, %v9288_v38  ;;  %v8107_v5 = vpop.f32.mrb[110].mxu0  ;;  %v11798_v12 = vpop.f32.mrb[216].mxu1 }
0x1a67   :  { %v8108_v48 = vadd.f32 %v15651_v56, %v8107_v5  ;;  %v8826_v14 = vadd.f32 %v11798_v12, %v15709_v63  ;;  %v8109_v55 = vpop.f32.mrb[111].mxu0  ;;  %v8817_v23 = vpop.f32.mrb[217].mxu1  ;;  %v8381_v53 = vmax.f32 %v8105_v11, 0.0 }
0x1a68   :  { %v8818_v33 = vadd.f32 %v15709_v63, %v8817_v23  ;;  %v11799_v54 = vpop.f32.mrb[218].mxu1 }
0x1a69   :  { %v8382_v10 = vmax.f32 %v8108_v48, 0.0  ;;  %v8829_v45 = vadd.f32 %v11799_v54, %v15709_v63  ;;  %v8820_v18 = vpop.f32.mrb[219].mxu1  ;;  %v9294_v43 = vmax.f32 %v8826_v14, 0.0 }
0x1a6a   :  { %v8821_v31 = vadd.f32 %v15709_v63, %v8820_v18  ;;  %v9292_v39 = vmax.f32 %v8818_v33, 0.0 }
0x1a6b   :  { %v8480_v20 = vpack.c.bf16 %v8382_v10, %v8381_v53  ;;  %v9295_v8 = vmax.f32 %v8829_v45, 0.0 }
0x1a6c   :  { %v9293_v46 = vmax.f32 %v8821_v31, 0.0  ;;  %v8112_v26 = vpop.f32.mrb[112].mxu0 }
0x1a6d   :  { %v15754_v40 = vpack.c.bf16 %v9295_v8, %v9294_v43  ;;  %v8113_v13 = vadd.f32 %v15651_v56, %v8112_v26  ;;  %v8114_v22 = vpop.f32.mrb[113].mxu0  ;;  %11861 = vmatmul.mubr.msk.bf16.gmra.mrb[8].mxu1 %vm429_vm6, %v8480_v20 }
0x1a6e   :  { %v15758_v6 = vpack.c.bf16 %v9293_v46, %v9292_v39  ;;  %v8115_v27 = vpop.f32.mrb[114].mxu0  ;;  %v11802_v28 = vpop.f32.mrb[220].mxu1 }
0x1a6f   :  { %v8116_v2 = vadd.f32 %v15651_v56, %v8115_v27  ;;  %v8842_v15 = vadd.f32 %v11802_v28, %v15709_v63  ;;  %v8117_v60 = vpop.f32.mrb[115].mxu0  ;;  %v8833_v52 = vpop.f32.mrb[221].mxu1  ;;  %v8383_v7 = vmax.f32 %v8113_v13, 0.0 }
0x1a70   :  { %v8834_v3 = vadd.f32 %v15709_v63, %v8833_v52  ;;  %v11803_v1 = vpop.f32.mrb[222].mxu1 }
0x1a71   :  { %v8384_v4 = vmax.f32 %v8116_v2, 0.0  ;;  %v8845_v58 = vadd.f32 %v11803_v1, %v15709_v63  ;;  %v8836_v44 = vpop.f32.mrb[223].mxu1  ;;  %v9298_v21 = vmax.f32 %v8842_v15, 0.0 }
0x1a72   :  { %v8837_v47 = vadd.f32 %v15709_v63, %v8836_v44  ;;  %v9296_v62 = vmax.f32 %v8834_v3, 0.0 }
0x1a73   :  { %v8481_v0 = vpack.c.bf16 %v8384_v4, %v8383_v7  ;;  %v9299_v29 = vmax.f32 %v8845_v58, 0.0 }
0x1a74   :  { %v9297_v50 = vmax.f32 %v8837_v47, 0.0  ;;  %v8120_v61 = vpop.f32.mrb[116].mxu0 }
0x1a75   :  { %v15765_v19 = vpack.c.bf16 %v9299_v29, %v9298_v21  ;;  %v8121_v30 = vadd.f32 %v15651_v56, %v8120_v61  ;;  %v8122_v36 = vpop.f32.mrb[117].mxu0  ;;  %11864 = vmatprep.mubr.msk.bf16.mxu1 %vm429_vm6, %v8481_v0 }
0x1a76   :  { %v15769_v42 = vpack.c.bf16 %v9297_v50, %v9296_v62  ;;  %v8123_v34 = vpop.f32.mrb[118].mxu0  ;;  %v11806_v17 = vpop.f32.mrb[224].mxu1 }
0x1a77   :  { %v8124_v16 = vadd.f32 %v15651_v56, %v8123_v34  ;;  %v8858_v41 = vadd.f32 %v11806_v17, %v15709_v63  ;;  %v8125_v38 = vpop.f32.mrb[119].mxu0  ;;  %v8849_v25 = vpop.f32.mrb[225].mxu1  ;;  %v8385_v32 = vmax.f32 %v8121_v30, 0.0 }
0x1a78   :  { %v8850_v24 = vadd.f32 %v15709_v63, %v8849_v25  ;;  %v11807_v11 = vpop.f32.mrb[226].mxu1 }
0x1a79   :  { %v8386_v9 = vmax.f32 %v8124_v16, 0.0  ;;  %v8861_v5 = vadd.f32 %v11807_v11, %v15709_v63  ;;  %v8852_v12 = vpop.f32.mrb[227].mxu1  ;;  %v9302_v55 = vmax.f32 %v8858_v41, 0.0 }
0x1a7a   :  { %v8853_v48 = vadd.f32 %v15709_v63, %v8852_v12  ;;  %v9300_v33 = vmax.f32 %v8850_v24, 0.0 }
0x1a7b   :  { %v8482_v14 = vpack.c.bf16 %v8386_v9, %v8385_v32  ;;  %v9303_v23 = vmax.f32 %v8861_v5, 0.0 }
0x1a7c   :  { %v9301_v54 = vmax.f32 %v8853_v48, 0.0  ;;  %v8128_v53 = vpop.f32.mrb[120].mxu0 }
0x1a7d   :  { %v15776_v10 = vpack.c.bf16 %v9303_v23, %v9302_v55  ;;  %v8129_v45 = vadd.f32 %v15651_v56, %v8128_v53  ;;  %v8130_v18 = vpop.f32.mrb[121].mxu0  ;;  %11865 = vmatmul.mubr.msk.bf16.gmra.mrb[28].mxu1 %vm429_vm6, %v8482_v14 }
0x1a7e   :  { %v15780_v31 = vpack.c.bf16 %v9301_v54, %v9300_v33  ;;  %v8131_v20 = vpop.f32.mrb[122].mxu0  ;;  %v11810_v43 = vpop.f32.mrb[228].mxu1 }
0x1a7f   :  { %v8132_v8 = vadd.f32 %v15651_v56, %v8131_v20  ;;  %v8874_v39 = vadd.f32 %v11810_v43, %v15709_v63  ;;  %v8133_v46 = vpop.f32.mrb[123].mxu0  ;;  %v8865_v26 = vpop.f32.mrb[229].mxu1  ;;  %v8387_v27 = vmax.f32 %v8129_v45, 0.0 }
0x1a80   :  { %v8866_v13 = vadd.f32 %v15709_v63, %v8865_v26  ;;  %v11811_v22 = vpop.f32.mrb[230].mxu1 }
0x1a81   :  { %v8388_v28 = vmax.f32 %v8132_v8, 0.0  ;;  %v8877_v2 = vadd.f32 %v11811_v22, %v15709_v63  ;;  %v8868_v15 = vpop.f32.mrb[231].mxu1  ;;  %v9306_v3 = vmax.f32 %v8874_v39, 0.0 }
0x1a82   :  { %v8869_v60 = vadd.f32 %v15709_v63, %v8868_v15  ;;  %v9304_v7 = vmax.f32 %v8866_v13, 0.0 }
0x1a83   :  { %v8483_v52 = vpack.c.bf16 %v8388_v28, %v8387_v27  ;;  %v9307_v1 = vmax.f32 %v8877_v2, 0.0 }
0x1a84   :  { %v9305_v4 = vmax.f32 %v8869_v60, 0.0  ;;  %v8136_v58 = vpop.f32.mrb[124].mxu0 }
0x1a85   :  { %v15787_v44 = vpack.c.bf16 %v9307_v1, %v9306_v3  ;;  %v8137_v47 = vadd.f32 %v15651_v56, %v8136_v58  ;;  %v8138_v0 = vpop.f32.mrb[125].mxu0  ;;  %11868 = vmatprep.mubr.msk.bf16.mxu1 %vm429_vm6, %v8483_v52 }
0x1a86   :  { %v15791_v21 = vpack.c.bf16 %v9305_v4, %v9304_v7  ;;  %v8139_v29 = vpop.f32.mrb[126].mxu0  ;;  %v11814_v62 = vpop.f32.mrb[232].mxu1 }
0x1a87   :  { %v8140_v50 = vadd.f32 %v15651_v56, %v8139_v29  ;;  %v8890_v61 = vadd.f32 %v11814_v62, %v15709_v63  ;;  %v8141_v30 = vpop.f32.mrb[127].mxu0  ;;  %v8881_v36 = vpop.f32.mrb[233].mxu1  ;;  %v8389_v16 = vmax.f32 %v8137_v47, 0.0 }
0x1a88   :  { %v8882_v34 = vadd.f32 %v15709_v63, %v8881_v36  ;;  %v11815_v17 = vpop.f32.mrb[234].mxu1 }
0x1a89   :  { %v8390_v41 = vmax.f32 %v8140_v50, 0.0  ;;  %v8893_v38 = vadd.f32 %v11815_v17, %v15709_v63  ;;  %v8884_v25 = vpop.f32.mrb[235].mxu1  ;;  %v9310_v32 = vmax.f32 %v8890_v61, 0.0 }
0x1a8a   :  { %v8885_v24 = vadd.f32 %v15709_v63, %v8884_v25  ;;  %v9308_v5 = vmax.f32 %v8882_v34, 0.0 }
0x1a8b   :  { %v8484_v11 = vpack.c.bf16 %v8390_v41, %v8389_v16  ;;  %v9311_v9 = vmax.f32 %v8893_v38, 0.0 }
0x1a8c   :  { %v9309_v12 = vmax.f32 %v8885_v24, 0.0  ;;  %v8144_v48 = vpop.f32.mrb[128].mxu0 }
0x1a8d   :  { %v15798_v14 = vpack.c.bf16 %v9311_v9, %v9310_v32  ;;  %v8145_v55 = vadd.f32 %v15651_v56, %v8144_v48  ;;  %v8146_v23 = vpop.f32.mrb[129].mxu0  ;;  %11869 = vmatmul.mubr.msk.bf16.gmra.mrb[32].mxu1 %vm429_vm6, %v8484_v11 }
0x1a8e   :  { %v15802_v33 = vpack.c.bf16 %v9309_v12, %v9308_v5  ;;  %v8147_v54 = vpop.f32.mrb[130].mxu0 }
0x1a8f   :  { %v8148_v53 = vadd.f32 %v15651_v56, %v8147_v54  ;;  %v8149_v45 = vpop.f32.mrb[131].mxu0  ;;  %v8391_v20 = vmax.f32 %v8145_v55, 0.0 }
0x1a90   :  { %v11818_v18 = vpop.f32.mrb[236].mxu1 }
0x1a91   :  { %v8392_v43 = vmax.f32 %v8148_v53, 0.0  ;;  %v8906_v8 = vadd.f32 %v11818_v18, %v15709_v63  ;;  %v8897_v39 = vpop.f32.mrb[237].mxu1 }
0x1a92   :  { %v8898_v46 = vadd.f32 %v15709_v63, %v8897_v39  ;;  %v11819_v26 = vpop.f32.mrb[238].mxu1 }
0x1a93   :  { %v8485_v13 = vpack.c.bf16 %v8392_v43, %v8391_v20  ;;  %v8909_v22 = vadd.f32 %v11819_v26, %v15709_v63  ;;  %v8900_v27 = vpop.f32.mrb[239].mxu1  ;;  %v9314_v15 = vmax.f32 %v8906_v8, 0.0 }
0x1a94   :  { %v8901_v28 = vadd.f32 %v15709_v63, %v8900_v27  ;;  %v8152_v2 = vpop.f32.mrb[132].mxu0  ;;  %v9312_v1 = vmax.f32 %v8898_v46, 0.0 }
0x1a95   :  { %v9315_v60 = vmax.f32 %v8909_v22, 0.0  ;;  %v8153_v52 = vadd.f32 %v15651_v56, %v8152_v2  ;;  %v8154_v3 = vpop.f32.mrb[133].mxu0  ;;  %11872 = vmatprep.mubr.msk.bf16.mxu1 %vm429_vm6, %v8485_v13 }
0x1a96   :  { %v9313_v7 = vmax.f32 %v8901_v28, 0.0  ;;  %v8155_v4 = vpop.f32.mrb[134].mxu0 }
0x1a97   :  { %v15811_v58 = vpack.c.bf16 %v9315_v60, %v9314_v15  ;;  %v8156_v47 = vadd.f32 %v15651_v56, %v8155_v4  ;;  %v8157_v0 = vpop.f32.mrb[135].mxu0  ;;  %v8393_v62 = vmax.f32 %v8153_v52, 0.0 }
0x1a98   :  { %v15814_v29 = vpack.c.bf16 %v9313_v7, %v9312_v1 }
0x1a99   :  { %v8394_v50 = vmax.f32 %v8156_v47, 0.0 }
0x1a9b   :  { %v8486_v61 = vpack.c.bf16 %v8394_v50, %v8393_v62 }
0x1a9c   :  { %v8160_v30 = vpop.f32.mrb[136].mxu0 }
0x1a9d   :  { %v8161_v36 = vadd.f32 %v15651_v56, %v8160_v30  ;;  %v8162_v34 = vpop.f32.mrb[137].mxu0  ;;  %11873 = vmatmul.mubr.msk.bf16.gmra.mrb[36].mxu1 %vm429_vm6, %v8486_v61 }
0x1a9e   :  { %v8163_v17 = vpop.f32.mrb[138].mxu0 }
0x1a9f   :  { %v8164_v16 = vadd.f32 %v15651_v56, %v8163_v17  ;;  %v8165_v41 = vpop.f32.mrb[139].mxu0  ;;  %v8395_v25 = vmax.f32 %v8161_v36, 0.0 }
0x1aa0   :  { %v11822_v38 = vpop.f32.mrb[240].mxu1 }
0x1aa1   :  { %v8396_v24 = vmax.f32 %v8164_v16, 0.0  ;;  %v8922_v11 = vadd.f32 %v11822_v38, %v15709_v63  ;;  %v8913_v32 = vpop.f32.mrb[241].mxu1 }
0x1aa2   :  { %v8914_v9 = vadd.f32 %v15709_v63, %v8913_v32  ;;  %v11823_v5 = vpop.f32.mrb[242].mxu1 }
0x1aa3   :  { %v8487_v12 = vpack.c.bf16 %v8396_v24, %v8395_v25  ;;  %v8925_v48 = vadd.f32 %v11823_v5, %v15709_v63  ;;  %v8916_v55 = vpop.f32.mrb[243].mxu1  ;;  %v9318_v53 = vmax.f32 %v8922_v11, 0.0 }
0x1aa4   :  { %v8917_v23 = vadd.f32 %v15709_v63, %v8916_v55  ;;  %v8168_v54 = vpop.f32.mrb[140].mxu0  ;;  %v9316_v43 = vmax.f32 %v8914_v9, 0.0 }
0x1aa5   :  { %v9319_v45 = vmax.f32 %v8925_v48, 0.0  ;;  %v8169_v18 = vadd.f32 %v15651_v56, %v8168_v54  ;;  %v8170_v20 = vpop.f32.mrb[141].mxu0  ;;  %11876 = vmatprep.mubr.msk.bf16.mxu1 %vm429_vm6, %v8487_v12 }
0x1aa6   :  { %v9317_v8 = vmax.f32 %v8917_v23, 0.0  ;;  %v8171_v39 = vpop.f32.mrb[142].mxu0 }
0x1aa7   :  { %v15825_v46 = vpack.c.bf16 %v9319_v45, %v9318_v53  ;;  %v8172_v26 = vadd.f32 %v15651_v56, %v8171_v39  ;;  %v8173_v13 = vpop.f32.mrb[143].mxu0  ;;  %v8397_v27 = vmax.f32 %v8169_v18, 0.0 }
0x1aa8   :  { %v15828_v22 = vpack.c.bf16 %v9317_v8, %v9316_v43 }
0x1aa9   :  { %v8398_v28 = vmax.f32 %v8172_v26, 0.0 }
0x1aab   :  { %v8488_v2 = vpack.c.bf16 %v8398_v28, %v8397_v27 }
0x1aac   :  { %v8176_v15 = vpop.f32.mrb[144].mxu0 }
0x1aad   :  { %v8177_v60 = vadd.f32 %v15651_v56, %v8176_v15  ;;  %v8178_v52 = vpop.f32.mrb[145].mxu0  ;;  %11877 = vmatmul.mubr.msk.bf16.gmra.mrb[40].mxu1 %vm429_vm6, %v8488_v2 }
0x1aae   :  { %v8179_v3 = vpop.f32.mrb[146].mxu0 }
0x1aaf   :  { %v8180_v1 = vadd.f32 %v15651_v56, %v8179_v3  ;;  %v8181_v7 = vpop.f32.mrb[147].mxu0  ;;  %v8399_v47 = vmax.f32 %v8177_v60, 0.0 }
0x1ab0   :  { %v11826_v4 = vpop.f32.mrb[244].mxu1 }
0x1ab1   :  { %v8400_v0 = vmax.f32 %v8180_v1, 0.0  ;;  %v8938_v62 = vadd.f32 %v11826_v4, %v15709_v63  ;;  %v8929_v50 = vpop.f32.mrb[245].mxu1 }
0x1ab2   :  { %v8930_v61 = vadd.f32 %v15709_v63, %v8929_v50  ;;  %v11827_v30 = vpop.f32.mrb[246].mxu1 }
0x1ab3   :  { %v8489_v36 = vpack.c.bf16 %v8400_v0, %v8399_v47  ;;  %v8941_v34 = vadd.f32 %v11827_v30, %v15709_v63  ;;  %v8932_v17 = vpop.f32.mrb[247].mxu1  ;;  %v9322_v38 = vmax.f32 %v8938_v62, 0.0 }
0x1ab4   :  { %v8933_v16 = vadd.f32 %v15709_v63, %v8932_v17  ;;  %v8184_v41 = vpop.f32.mrb[148].mxu0  ;;  %v9320_v32 = vmax.f32 %v8930_v61, 0.0 }
0x1ab5   :  { %v9323_v25 = vmax.f32 %v8941_v34, 0.0  ;;  %v8185_v24 = vadd.f32 %v15651_v56, %v8184_v41  ;;  %v8186_v11 = vpop.f32.mrb[149].mxu0  ;;  %11880 = vmatprep.mubr.msk.bf16.mxu1 %vm429_vm6, %v8489_v36 }
0x1ab6   :  { %v9321_v9 = vmax.f32 %v8933_v16, 0.0  ;;  %v8187_v5 = vpop.f32.mrb[150].mxu0 }
0x1ab7   :  { %v15839_v12 = vpack.c.bf16 %v9323_v25, %v9322_v38  ;;  %v8188_v48 = vadd.f32 %v15651_v56, %v8187_v5  ;;  %v8189_v55 = vpop.f32.mrb[151].mxu0  ;;  %v8401_v54 = vmax.f32 %v8185_v24, 0.0 }
0x1ab8   :  { %v15842_v23 = vpack.c.bf16 %v9321_v9, %v9320_v32  ;;  %v15858_v9 = vld [vmem:[#allocation4 + $0x6] ss:$0 sm:$0xff] }
0x1ab9   :  { %v8402_v53 = vmax.f32 %v8188_v48, 0.0 }
0x1abb   :  { %v8490_v45 = vpack.c.bf16 %v8402_v53, %v8401_v54 }
0x1abc   :  { %v8192_v18 = vpop.f32.mrb[152].mxu0 }
0x1abd   :  { %v8193_v20 = vadd.f32 %v15651_v56, %v8192_v18  ;;  %v8194_v43 = vpop.f32.mrb[153].mxu0  ;;  %11881 = vmatmul.mubr.msk.bf16.gmra.mrb[44].mxu1 %vm429_vm6, %v8490_v45 }
0x1abe   :  { %v8195_v8 = vpop.f32.mrb[154].mxu0 }
0x1abf   :  { %v8196_v39 = vadd.f32 %v15651_v56, %v8195_v8  ;;  %v8197_v26 = vpop.f32.mrb[155].mxu0  ;;  %v8403_v27 = vmax.f32 %v8193_v20, 0.0 }
0x1ac0   :  { %v11830_v13 = vpop.f32.mrb[248].mxu1 }
0x1ac1   :  { %v8404_v28 = vmax.f32 %v8196_v39, 0.0  ;;  %v8954_v2 = vadd.f32 %v11830_v13, %v15709_v63  ;;  %v8945_v15 = vpop.f32.mrb[249].mxu1 }
0x1ac2   :  { %v8946_v60 = vadd.f32 %v15709_v63, %v8945_v15  ;;  %v11831_v52 = vpop.f32.mrb[250].mxu1 }
0x1ac3   :  { %v8491_v3 = vpack.c.bf16 %v8404_v28, %v8403_v27  ;;  %v8957_v1 = vadd.f32 %v11831_v52, %v15709_v63  ;;  %v8948_v7 = vpop.f32.mrb[251].mxu1  ;;  %v9326_v0 = vmax.f32 %v8954_v2, 0.0 }
0x1ac4   :  { %v8949_v4 = vadd.f32 %v15709_v63, %v8948_v7  ;;  %v8200_v47 = vpop.f32.mrb[156].mxu0  ;;  %v9324_v30 = vmax.f32 %v8946_v60, 0.0 }
0x1ac5   :  { %v9327_v62 = vmax.f32 %v8957_v1, 0.0  ;;  %v8201_v50 = vadd.f32 %v15651_v56, %v8200_v47  ;;  %v8202_v61 = vpop.f32.mrb[157].mxu0  ;;  %11884 = vmatprep.mubr.msk.bf16.mxu1 %vm429_vm6, %v8491_v3 }
0x1ac6   :  { %v9325_v36 = vmax.f32 %v8949_v4, 0.0  ;;  %v8203_v34 = vpop.f32.mrb[158].mxu0 }
0x1ac7   :  { %v15853_v17 = vpack.c.bf16 %v9327_v62, %v9326_v0  ;;  %v8204_v16 = vadd.f32 %v15651_v56, %v8203_v34  ;;  %v8205_v41 = vpop.f32.mrb[159].mxu0  ;;  %v8405_v25 = vmax.f32 %v8201_v50, 0.0 }
0x1ac8   :  { %v15856_v38 = vpack.c.bf16 %v9325_v36, %v9324_v30 }
0x1ac9   :  { %v8406_v24 = vmax.f32 %v8204_v16, 0.0 }
0x1acb   :  { %v8492_v11 = vpack.c.bf16 %v8406_v24, %v8405_v25 }
0x1acc   :  { %v8208_v32 = vpop.f32.mrb[160].mxu0 }
0x1acd   :  { %v8209_v5 = vadd.f32 %v15858_v9, %v8208_v32  ;;  %v8210_v48 = vpop.f32.mrb[161].mxu0  ;;  %11885 = vmatmul.mubr.msk.bf16.gmra.mrb[48].mxu1 %vm429_vm6, %v8492_v11 }
0x1ace   :  { %v8211_v55 = vpop.f32.mrb[162].mxu0 }
0x1acf   :  { %v8212_v54 = vadd.f32 %v15858_v9, %v8211_v55  ;;  %v8213_v53 = vpop.f32.mrb[163].mxu0  ;;  %v8407_v56 = vmax.f32 %v8209_v5, 0.0 }
0x1ad0   :  { %v11834_v45 = vpop.f32.mrb[252].mxu1 }
0x1ad1   :  { %v8408_v18 = vmax.f32 %v8212_v54, 0.0  ;;  %v8970_v20 = vadd.f32 %v11834_v45, %v15709_v63  ;;  %v8961_v43 = vpop.f32.mrb[253].mxu1 }
0x1ad2   :  { %v8962_v8 = vadd.f32 %v15709_v63, %v8961_v43  ;;  %v11835_v39 = vpop.f32.mrb[254].mxu1 }
0x1ad3   :  { %v8493_v26 = vpack.c.bf16 %v8408_v18, %v8407_v56  ;;  %v8973_v13 = vadd.f32 %v11835_v39, %v15709_v63  ;;  %v8964_v27 = vpop.f32.mrb[255].mxu1  ;;  %v9330_v15 = vmax.f32 %v8970_v20, 0.0 }
0x1ad4   :  { %v8965_v28 = vadd.f32 %v15709_v63, %v8964_v27  ;;  %v8216_v2 = vpop.f32.mrb[164].mxu0  ;;  %v9328_v1 = vmax.f32 %v8962_v8, 0.0 }
0x1ad5   :  { %v9331_v60 = vmax.f32 %v8973_v13, 0.0  ;;  %v8217_v52 = vadd.f32 %v15858_v9, %v8216_v2  ;;  %v8218_v3 = vpop.f32.mrb[165].mxu0  ;;  %11888 = vmatprep.mubr.msk.bf16.mxu1 %vm429_vm6, %v8493_v26 }
0x1ad6   :  { %v9329_v7 = vmax.f32 %v8965_v28, 0.0  ;;  %v8219_v4 = vpop.f32.mrb[166].mxu0 }
0x1ad7   :  { %v15869_v47 = vpack.c.bf16 %v9331_v60, %v9330_v15  ;;  %v8220_v0 = vadd.f32 %v15858_v9, %v8219_v4  ;;  %v8221_v62 = vpop.f32.mrb[167].mxu0  ;;  %v8409_v61 = vmax.f32 %v8217_v52, 0.0 }
0x1ad8   :  { %v15872_v50 = vpack.c.bf16 %v9329_v7, %v9328_v1 }
0x1ad9   :  { %v8410_v30 = vmax.f32 %v8220_v0, 0.0 }
0x1adb   :  { %v8494_v36 = vpack.c.bf16 %v8410_v30, %v8409_v61 }
0x1adc   :  { %v8224_v34 = vpop.f32.mrb[168].mxu0 }
0x1add   :  { %v8225_v16 = vadd.f32 %v15858_v9, %v8224_v34  ;;  %v8226_v41 = vpop.f32.mrb[169].mxu0  ;;  %11889 = vmatmul.mubr.msk.bf16.gmra.mrb[52].mxu1 %vm429_vm6, %v8494_v36 }
0x1ade   :  { %v8227_v25 = vpop.f32.mrb[170].mxu0 }
0x1adf   :  { %v8228_v24 = vadd.f32 %v15858_v9, %v8227_v25  ;;  %v8229_v11 = vpop.f32.mrb[171].mxu0  ;;  %v8411_v5 = vmax.f32 %v8225_v16, 0.0 }
0x1ae0   :  { %v11838_v32 = vpop.f32.mrb[0].mxu1 }
0x1ae1   :  { %v8412_v48 = vmax.f32 %v8228_v24, 0.0  ;;  %v8986_v55 = vadd.f32 %v11838_v32, %v15709_v63  ;;  %v8977_v54 = vpop.f32.mrb[1].mxu1 }
0x1ae2   :  { %v8978_v53 = vadd.f32 %v15709_v63, %v8977_v54  ;;  %v11839_v45 = vpop.f32.mrb[2].mxu1 }
0x1ae3   :  { %v8495_v56 = vpack.c.bf16 %v8412_v48, %v8411_v5  ;;  %v8989_v18 = vadd.f32 %v11839_v45, %v15709_v63  ;;  %v8980_v20 = vpop.f32.mrb[3].mxu1  ;;  %v9334_v39 = vmax.f32 %v8986_v55, 0.0 }
0x1ae4   :  { %v8981_v43 = vadd.f32 %v15709_v63, %v8980_v20  ;;  %v8232_v8 = vpop.f32.mrb[172].mxu0  ;;  %v9332_v28 = vmax.f32 %v8978_v53, 0.0 }
0x1ae5   :  { %v9335_v26 = vmax.f32 %v8989_v18, 0.0  ;;  %v8233_v13 = vadd.f32 %v15858_v9, %v8232_v8  ;;  %v8234_v27 = vpop.f32.mrb[173].mxu0  ;;  %11892 = vmatprep.mubr.msk.bf16.mxu1 %vm429_vm6, %v8495_v56 }
0x1ae6   :  { %v9333_v2 = vmax.f32 %v8981_v43, 0.0  ;;  %v8235_v15 = vpop.f32.mrb[174].mxu0 }
0x1ae7   :  { %v15883_v60 = vpack.c.bf16 %v9335_v26, %v9334_v39  ;;  %v8236_v52 = vadd.f32 %v15858_v9, %v8235_v15  ;;  %v8237_v3 = vpop.f32.mrb[175].mxu0  ;;  %v8413_v7 = vmax.f32 %v8233_v13, 0.0 }
0x1ae8   :  { %v15886_v1 = vpack.c.bf16 %v9333_v2, %v9332_v28 }
0x1ae9   :  { %v8414_v4 = vmax.f32 %v8236_v52, 0.0 }
0x1aeb   :  { %v8496_v0 = vpack.c.bf16 %v8414_v4, %v8413_v7 }
0x1aec   :  { %v8240_v62 = vpop.f32.mrb[176].mxu0 }
0x1aed   :  { %v8241_v61 = vadd.f32 %v15858_v9, %v8240_v62  ;;  %v8242_v30 = vpop.f32.mrb[177].mxu0  ;;  %11893 = vmatmul.mubr.msk.bf16.gmra.mrb[56].mxu1 %vm429_vm6, %v8496_v0 }
0x1aee   :  { %v8243_v36 = vpop.f32.mrb[178].mxu0 }
0x1aef   :  { %v8244_v34 = vadd.f32 %v15858_v9, %v8243_v36  ;;  %v8245_v16 = vpop.f32.mrb[179].mxu0  ;;  %v8415_v25 = vmax.f32 %v8241_v61, 0.0 }
0x1af0   :  { %v11842_v41 = vpop.f32.mrb[4].mxu1 }
0x1af1   :  { %v8416_v24 = vmax.f32 %v8244_v34, 0.0  ;;  %v9002_v11 = vadd.f32 %v11842_v41, %v15709_v63  ;;  %v8993_v32 = vpop.f32.mrb[5].mxu1 }
0x1af2   :  { %v8994_v5 = vadd.f32 %v15709_v63, %v8993_v32  ;;  %v11843_v48 = vpop.f32.mrb[6].mxu1 }
0x1af3   :  { %v8497_v55 = vpack.c.bf16 %v8416_v24, %v8415_v25  ;;  %v9005_v54 = vadd.f32 %v11843_v48, %v15709_v63  ;;  %v8996_v53 = vpop.f32.mrb[7].mxu1  ;;  %v9338_v18 = vmax.f32 %v9002_v11, 0.0 }
0x1af4   :  { %v8997_v45 = vadd.f32 %v15709_v63, %v8996_v53  ;;  %v8248_v56 = vpop.f32.mrb[180].mxu0  ;;  %v9336_v39 = vmax.f32 %v8994_v5, 0.0 }
0x1af5   :  { %v9339_v20 = vmax.f32 %v9005_v54, 0.0  ;;  %v8249_v43 = vadd.f32 %v15858_v9, %v8248_v56  ;;  %v8250_v8 = vpop.f32.mrb[181].mxu0  ;;  %11896 = vmatprep.mubr.msk.bf16.mxu1 %vm429_vm6, %v8497_v55 }
0x1af6   :  { %v9337_v26 = vmax.f32 %v8997_v45, 0.0  ;;  %v8251_v13 = vpop.f32.mrb[182].mxu0 }
0x1af7   :  { %v15897_v27 = vpack.c.bf16 %v9339_v20, %v9338_v18  ;;  %v8252_v28 = vadd.f32 %v15858_v9, %v8251_v13  ;;  %v8253_v2 = vpop.f32.mrb[183].mxu0  ;;  %v8417_v52 = vmax.f32 %v8249_v43, 0.0 }
0x1af8   :  { %v15900_v15 = vpack.c.bf16 %v9337_v26, %v9336_v39 }
0x1af9   :  { %v8418_v3 = vmax.f32 %v8252_v28, 0.0 }
0x1afb   :  { %v8498_v7 = vpack.c.bf16 %v8418_v3, %v8417_v52 }
0x1afc   :  { %v8256_v4 = vpop.f32.mrb[184].mxu0 }
0x1afd   :  { %v8257_v0 = vadd.f32 %v15858_v9, %v8256_v4  ;;  %v8258_v62 = vpop.f32.mrb[185].mxu0  ;;  %11897 = vmatmul.mubr.msk.bf16.gmra.mrb[60].mxu1 %vm429_vm6, %v8498_v7 }
0x1afe   :  { %v8259_v61 = vpop.f32.mrb[186].mxu0 }
0x1aff   :  { %v8260_v30 = vadd.f32 %v15858_v9, %v8259_v61  ;;  %v8261_v36 = vpop.f32.mrb[187].mxu0  ;;  %v8419_v16 = vmax.f32 %v8257_v0, 0.0 }
0x1b00   :  { %v11846_v34 = vpop.f32.mrb[12].mxu1 }
0x1b01   :  { %v8420_v41 = vmax.f32 %v8260_v30, 0.0  ;;  %v9018_v25 = vadd.f32 %v11846_v34, %v15709_v63  ;;  %v9009_v24 = vpop.f32.mrb[13].mxu1 }
0x1b02   :  { %v9010_v11 = vadd.f32 %v15709_v63, %v9009_v24  ;;  %v11847_v32 = vpop.f32.mrb[14].mxu1 }
0x1b03   :  { %v8499_v5 = vpack.c.bf16 %v8420_v41, %v8419_v16  ;;  %v9021_v48 = vadd.f32 %v11847_v32, %v15709_v63  ;;  %v9012_v55 = vpop.f32.mrb[15].mxu1  ;;  %v9342_v45 = vmax.f32 %v9018_v25, 0.0 }
0x1b04   :  { %v9013_v54 = vadd.f32 %v15709_v63, %v9012_v55  ;;  %v8264_v53 = vpop.f32.mrb[188].mxu0  ;;  %v9340_v43 = vmax.f32 %v9010_v11, 0.0 }
0x1b05   :  { %v9343_v56 = vmax.f32 %v9021_v48, 0.0  ;;  %v8265_v18 = vadd.f32 %v15858_v9, %v8264_v53  ;;  %v8266_v20 = vpop.f32.mrb[189].mxu0  ;;  %11900 = vmatprep.mubr.msk.bf16.mxu1 %vm429_vm6, %v8499_v5 }
0x1b06   :  { %v9341_v8 = vmax.f32 %v9013_v54, 0.0  ;;  %v8267_v39 = vpop.f32.mrb[190].mxu0 }
0x1b07   :  { %v15911_v26 = vpack.c.bf16 %v9343_v56, %v9342_v45  ;;  %v8268_v13 = vadd.f32 %v15858_v9, %v8267_v39  ;;  %v8269_v28 = vpop.f32.mrb[191].mxu0  ;;  %v8421_v52 = vmax.f32 %v8265_v18, 0.0 }
0x1b08   :  { %v15914_v2 = vpack.c.bf16 %v9341_v8, %v9340_v43 }
0x1b09   :  { %v8422_v3 = vmax.f32 %v8268_v13, 0.0 }
0x1b0b   :  { %v8500_v7 = vpack.c.bf16 %v8422_v3, %v8421_v52 }
0x1b0c   :  { %v8272_v4 = vpop.f32.mrb[192].mxu0 }
0x1b0d   :  { %v8273_v0 = vadd.f32 %v15858_v9, %v8272_v4  ;;  %v8274_v62 = vpop.f32.mrb[193].mxu0  ;;  %11901 = vmatmul.mubr.msk.bf16.gmra.mrb[64].mxu1 %vm429_vm6, %v8500_v7 }
0x1b0e   :  { %v8275_v61 = vpop.f32.mrb[194].mxu0 }
0x1b0f   :  { %v8276_v30 = vadd.f32 %v15858_v9, %v8275_v61  ;;  %v8277_v36 = vpop.f32.mrb[195].mxu0  ;;  %v8423_v16 = vmax.f32 %v8273_v0, 0.0 }
0x1b10   :  { %v11850_v34 = vpop.f32.mrb[16].mxu1 }
0x1b11   :  { %v8424_v41 = vmax.f32 %v8276_v30, 0.0  ;;  %v9034_v25 = vadd.f32 %v11850_v34, %v15709_v63  ;;  %v9025_v24 = vpop.f32.mrb[17].mxu1 }
0x1b12   :  { %v9026_v11 = vadd.f32 %v15709_v63, %v9025_v24  ;;  %v11851_v32 = vpop.f32.mrb[18].mxu1  ;;  %v15933_v24 = vld [vmem:[#allocation7 + $0x6] ss:$0 sm:$0xff] }
0x1b13   :  { %v8501_v5 = vpack.c.bf16 %v8424_v41, %v8423_v16  ;;  %v9037_v48 = vadd.f32 %v11851_v32, %v15709_v63  ;;  %v9028_v55 = vpop.f32.mrb[19].mxu1  ;;  %v9346_v45 = vmax.f32 %v9034_v25, 0.0 }
0x1b14   :  { %v9029_v54 = vadd.f32 %v15709_v63, %v9028_v55  ;;  %v8280_v53 = vpop.f32.mrb[196].mxu0  ;;  %v9344_v43 = vmax.f32 %v9026_v11, 0.0 }
0x1b15   :  { %v9347_v56 = vmax.f32 %v9037_v48, 0.0  ;;  %v8281_v18 = vadd.f32 %v15858_v9, %v8280_v53  ;;  %v8282_v20 = vpop.f32.mrb[197].mxu0  ;;  %11904 = vmatprep.mubr.msk.bf16.mxu1 %vm429_vm6, %v8501_v5 }
0x1b16   :  { %v9345_v8 = vmax.f32 %v9029_v54, 0.0  ;;  %v8283_v39 = vpop.f32.mrb[198].mxu0 }
0x1b17   :  { %v15925_v13 = vpack.c.bf16 %v9347_v56, %v9346_v45  ;;  %v8284_v28 = vadd.f32 %v15858_v9, %v8283_v39  ;;  %v8285_v52 = vpop.f32.mrb[199].mxu0  ;;  %v8425_v7 = vmax.f32 %v8281_v18, 0.0 }
0x1b18   :  { %v15928_v3 = vpack.c.bf16 %v9345_v8, %v9344_v43 }
0x1b19   :  { %v8426_v63 = vmax.f32 %v8284_v28, 0.0 }
0x1b1b   :  { %v8502_v4 = vpack.c.bf16 %v8426_v63, %v8425_v7 }
0x1b1c   :  { %v8288_v0 = vpop.f32.mrb[200].mxu0 }
0x1b1d   :  { %v8289_v62 = vadd.f32 %v15858_v9, %v8288_v0  ;;  %v8290_v61 = vpop.f32.mrb[201].mxu0  ;;  %11905 = vmatmul.mubr.msk.bf16.gmra.mrb[68].mxu1 %vm429_vm6, %v8502_v4 }
0x1b1e   :  { %v8291_v30 = vpop.f32.mrb[202].mxu0 }
0x1b1f   :  { %v8292_v36 = vadd.f32 %v15858_v9, %v8291_v30  ;;  %v8293_v34 = vpop.f32.mrb[203].mxu0  ;;  %v8427_v41 = vmax.f32 %v8289_v62, 0.0 }
0x1b20   :  { %v11854_v16 = vpop.f32.mrb[20].mxu1 }
0x1b21   :  { %v8428_v25 = vmax.f32 %v8292_v36, 0.0  ;;  %v9050_v11 = vadd.f32 %v15933_v24, %v11854_v16  ;;  %v9041_v32 = vpop.f32.mrb[21].mxu1 }
0x1b22   :  { %v9042_v5 = vadd.f32 %v15933_v24, %v9041_v32  ;;  %v11855_v48 = vpop.f32.mrb[22].mxu1 }
0x1b23   :  { %v8503_v55 = vpack.c.bf16 %v8428_v25, %v8427_v41  ;;  %v9053_v54 = vadd.f32 %v15933_v24, %v11855_v48  ;;  %v9044_v53 = vpop.f32.mrb[23].mxu1  ;;  %v9350_v18 = vmax.f32 %v9050_v11, 0.0 }
0x1b24   :  { %v9045_v45 = vadd.f32 %v15933_v24, %v9044_v53  ;;  %v8296_v56 = vpop.f32.mrb[204].mxu0  ;;  %v9348_v39 = vmax.f32 %v9042_v5, 0.0 }
0x1b25   :  { %v9351_v20 = vmax.f32 %v9053_v54, 0.0  ;;  %v8297_v43 = vadd.f32 %v15858_v9, %v8296_v56  ;;  %v8298_v8 = vpop.f32.mrb[205].mxu0  ;;  %11908 = vmatprep.mubr.msk.bf16.mxu1 %vm429_vm6, %v8503_v55 }
0x1b26   :  { %v9349_v28 = vmax.f32 %v9045_v45, 0.0  ;;  %v8299_v52 = vpop.f32.mrb[206].mxu0 }
0x1b27   :  { %v15941_v7 = vpack.c.bf16 %v9351_v20, %v9350_v18  ;;  %v8300_v63 = vadd.f32 %v15858_v9, %v8299_v52  ;;  %v8301_v4 = vpop.f32.mrb[207].mxu0  ;;  %v8429_v62 = vmax.f32 %v8297_v43, 0.0 }
0x1b28   :  { %v15944_v0 = vpack.c.bf16 %v9349_v28, %v9348_v39 }
0x1b29   :  { %v8430_v61 = vmax.f32 %v8300_v63, 0.0 }
0x1b2b   :  { %v8504_v30 = vpack.c.bf16 %v8430_v61, %v8429_v62 }
0x1b2d   :  { %11909 = vmatmul.mubr.msk.bf16.gmra.mrb[72].mxu1 %vm429_vm6, %v8504_v30 }
0x1b2e   :  { %11918 = vmatprep.mubr.msk.bf16.mxu1 %vm506_vm8, %v15723_v59 }
0x1b30   :  { %v11858_v36 = vpop.f32.mrb[24].mxu1 }
0x1b31   :  { %v9066_v34 = vadd.f32 %v15933_v24, %v11858_v36  ;;  %v9057_v16 = vpop.f32.mrb[25].mxu1 }
0x1b32   :  { %v9058_v41 = vadd.f32 %v15933_v24, %v9057_v16  ;;  %v11859_v25 = vpop.f32.mrb[26].mxu1 }
0x1b33   :  { %v9069_v9 = vadd.f32 %v15933_v24, %v11859_v25  ;;  %v9060_v11 = vpop.f32.mrb[27].mxu1  ;;  %v9354_v5 = vmax.f32 %v9066_v34, 0.0 }
0x1b34   :  { %v9061_v32 = vadd.f32 %v15933_v24, %v9060_v11  ;;  %v9352_v55 = vmax.f32 %v9058_v41, 0.0 }
0x1b35   :  { %v9355_v48 = vmax.f32 %v9069_v9, 0.0  ;;  %11919 = vmatmul.mubr.msk.bf16.vlgmr.msra.gmra.mrb[76].mxu1 %vm506_vm8, %v15719_v57 }
0x1b36   :  { %v9353_v54 = vmax.f32 %v9061_v32, 0.0  ;;  %11922 = vmatprep.mubr.msk.bf16.mxu1 %vm506_vm8, %v15734_v35 }
0x1b37   :  { %v15957_v59 = vpack.c.bf16 %v9355_v48, %v9354_v5 }
0x1b38   :  { %v15959_v53 = vpack.c.bf16 %v9353_v54, %v9352_v55 }
0x1b3d   :  { %11923 = vmatmul.mubr.msk.bf16.gmra.mrb[80].mxu1 %vm506_vm8, %v15730_v37 }
0x1b3e   :  { %11926 = vmatprep.mubr.msk.bf16.mxu1 %vm506_vm8, %v15747_v49 }
0x1b40   :  { %v11862_v45 = vpop.f32.mrb[8].mxu1 }
0x1b41   :  { %v9082_v56 = vadd.f32 %v15933_v24, %v11862_v45  ;;  %v9073_v18 = vpop.f32.mrb[9].mxu1 }
0x1b42   :  { %v9074_v57 = vadd.f32 %v15933_v24, %v9073_v18  ;;  %v11863_v20 = vpop.f32.mrb[10].mxu1 }
0x1b43   :  { %v9085_v43 = vadd.f32 %v15933_v24, %v11863_v20  ;;  %v9076_v35 = vpop.f32.mrb[11].mxu1  ;;  %v9358_v39 = vmax.f32 %v9082_v56, 0.0 }
0x1b44   :  { %v9077_v8 = vadd.f32 %v15933_v24, %v9076_v35  ;;  %v9356_v37 = vmax.f32 %v9074_v57, 0.0 }
0x1b45   :  { %v9359_v28 = vmax.f32 %v9085_v43, 0.0  ;;  %11927 = vmatmul.mubr.msk.bf16.gmra.mrb[84].mxu1 %vm506_vm8, %v15741_v51 }
0x1b46   :  { %v9357_v52 = vmax.f32 %v9077_v8, 0.0  ;;  %11930 = vmatprep.mubr.msk.bf16.mxu1 %vm506_vm8, %v15758_v6 }
0x1b47   :  { %v15973_v49 = vpack.c.bf16 %v9359_v28, %v9358_v39 }
0x1b48   :  { %v15975_v63 = vpack.c.bf16 %v9357_v52, %v9356_v37 }
0x1b4d   :  { %11931 = vmatmul.mubr.msk.bf16.gmra.mrb[88].mxu1 %vm506_vm8, %v15754_v40 }
0x1b4e   :  { %11934 = vmatprep.mubr.msk.bf16.mxu1 %vm506_vm8, %v15769_v42 }
0x1b50   :  { %v11866_v4 = vpop.f32.mrb[28].mxu1 }
0x1b51   :  { %v9098_v62 = vadd.f32 %v15933_v24, %v11866_v4  ;;  %v9089_v61 = vpop.f32.mrb[29].mxu1 }
0x1b52   :  { %v9090_v51 = vadd.f32 %v15933_v24, %v9089_v61  ;;  %v11867_v30 = vpop.f32.mrb[30].mxu1 }
0x1b53   :  { %v9101_v36 = vadd.f32 %v15933_v24, %v11867_v30  ;;  %v9092_v6 = vpop.f32.mrb[31].mxu1  ;;  %v9362_v16 = vmax.f32 %v9098_v62, 0.0 }
0x1b54   :  { %v9093_v34 = vadd.f32 %v15933_v24, %v9092_v6  ;;  %v9360_v40 = vmax.f32 %v9090_v51, 0.0 }
0x1b55   :  { %v9363_v41 = vmax.f32 %v9101_v36, 0.0  ;;  %11935 = vmatmul.mubr.msk.bf16.gmra.mrb[92].mxu1 %vm506_vm8, %v15765_v19 }
0x1b56   :  { %v9361_v25 = vmax.f32 %v9093_v34, 0.0  ;;  %11938 = vmatprep.mubr.msk.bf16.mxu1 %vm506_vm8, %v15780_v31 }
0x1b57   :  { %v15989_v42 = vpack.c.bf16 %v9363_v41, %v9362_v16 }
0x1b58   :  { %v15991_v9 = vpack.c.bf16 %v9361_v25, %v9360_v40 }
0x1b5d   :  { %11939 = vmatmul.mubr.msk.bf16.gmra.mrb[96].mxu1 %vm506_vm8, %v15776_v10 }
0x1b5e   :  { %11942 = vmatprep.mubr.msk.bf16.mxu1 %vm506_vm8, %v15791_v21 }
0x1b60   :  { %v11870_v11 = vpop.f32.mrb[32].mxu1 }
0x1b61   :  { %v9114_v32 = vadd.f32 %v15933_v24, %v11870_v11  ;;  %v9105_v5 = vpop.f32.mrb[33].mxu1 }
0x1b62   :  { %v9106_v19 = vadd.f32 %v15933_v24, %v9105_v5  ;;  %v11871_v48 = vpop.f32.mrb[34].mxu1 }
0x1b63   :  { %v9117_v55 = vadd.f32 %v15933_v24, %v11871_v48  ;;  %v9108_v31 = vpop.f32.mrb[35].mxu1  ;;  %v9366_v45 = vmax.f32 %v9114_v32, 0.0 }
0x1b64   :  { %v9109_v54 = vadd.f32 %v15933_v24, %v9108_v31  ;;  %v9364_v10 = vmax.f32 %v9106_v19, 0.0 }
0x1b65   :  { %v9367_v56 = vmax.f32 %v9117_v55, 0.0  ;;  %11943 = vmatmul.mubr.msk.bf16.gmra.mrb[100].mxu1 %vm506_vm8, %v15787_v44 }
0x1b66   :  { %v9365_v18 = vmax.f32 %v9109_v54, 0.0  ;;  %11946 = vmatprep.mubr.msk.bf16.mxu1 %vm506_vm8, %v15802_v33 }
0x1b67   :  { %v16005_v21 = vpack.c.bf16 %v9367_v56, %v9366_v45 }
0x1b68   :  { %v16007_v57 = vpack.c.bf16 %v9365_v18, %v9364_v10 }
0x1b6d   :  { %11947 = vmatmul.mubr.msk.bf16.gmra.mrb[104].mxu1 %vm506_vm8, %v15798_v14 }
0x1b6e   :  { %11950 = vmatprep.mubr.msk.bf16.mxu1 %vm506_vm8, %v15814_v29 }
0x1b70   :  { %v11874_v20 = vpop.f32.mrb[36].mxu1 }
0x1b71   :  { %v9130_v43 = vadd.f32 %v15933_v24, %v11874_v20  ;;  %v9121_v35 = vpop.f32.mrb[37].mxu1 }
0x1b72   :  { %v9122_v44 = vadd.f32 %v15933_v24, %v9121_v35  ;;  %v11875_v8 = vpop.f32.mrb[38].mxu1 }
0x1b73   :  { %v9133_v39 = vadd.f32 %v15933_v24, %v11875_v8  ;;  %v9124_v33 = vpop.f32.mrb[39].mxu1  ;;  %v9370_v37 = vmax.f32 %v9130_v43, 0.0 }
0x1b74   :  { %v9125_v28 = vadd.f32 %v15933_v24, %v9124_v33  ;;  %v9368_v14 = vmax.f32 %v9122_v44, 0.0 }
0x1b75   :  { %v9371_v52 = vmax.f32 %v9133_v39, 0.0  ;;  %11951 = vmatmul.mubr.msk.bf16.gmra.mrb[108].mxu1 %vm506_vm8, %v15811_v58 }
0x1b76   :  { %v9369_v4 = vmax.f32 %v9125_v28, 0.0  ;;  %11954 = vmatprep.mubr.msk.bf16.mxu1 %vm506_vm8, %v15828_v22 }
0x1b77   :  { %v16021_v29 = vpack.c.bf16 %v9371_v52, %v9370_v37 }
0x1b78   :  { %v16023_v62 = vpack.c.bf16 %v9369_v4, %v9368_v14 }
0x1b7d   :  { %11955 = vmatmul.mubr.msk.bf16.gmra.mrb[112].mxu1 %vm506_vm8, %v15825_v46 }
0x1b7e   :  { %11958 = vmatprep.mubr.msk.bf16.mxu1 %vm506_vm8, %v15842_v23 }
0x1b80   :  { %v11878_v61 = vpop.f32.mrb[40].mxu1 }
0x1b81   :  { %v9146_v51 = vadd.f32 %v15933_v24, %v11878_v61  ;;  %v9137_v30 = vpop.f32.mrb[41].mxu1 }
0x1b82   :  { %v9138_v58 = vadd.f32 %v15933_v24, %v9137_v30  ;;  %v11879_v36 = vpop.f32.mrb[42].mxu1 }
0x1b83   :  { %v9149_v6 = vadd.f32 %v15933_v24, %v11879_v36  ;;  %v9140_v22 = vpop.f32.mrb[43].mxu1  ;;  %v9374_v16 = vmax.f32 %v9146_v51, 0.0 }
0x1b84   :  { %v9141_v34 = vadd.f32 %v15933_v24, %v9140_v22  ;;  %v9372_v46 = vmax.f32 %v9138_v58, 0.0 }
0x1b85   :  { %v9375_v41 = vmax.f32 %v9149_v6, 0.0  ;;  %11959 = vmatmul.mubr.msk.bf16.gmra.mrb[116].mxu1 %vm506_vm8, %v15839_v12 }
0x1b86   :  { %v9373_v40 = vmax.f32 %v9141_v34, 0.0  ;;  %11962 = vmatprep.mubr.msk.bf16.mxu1 %vm506_vm8, %v15856_v38 }
0x1b87   :  { %v16037_v23 = vpack.c.bf16 %v9375_v41, %v9374_v16 }
0x1b88   :  { %v16039_v25 = vpack.c.bf16 %v9373_v40, %v9372_v46 }
0x1b8d   :  { %11963 = vmatmul.mubr.msk.bf16.gmra.mrb[120].mxu1 %vm506_vm8, %v15853_v17 }
0x1b8e   :  { %11966 = vmatprep.mubr.msk.bf16.mxu1 %vm506_vm8, %v15872_v50 }
0x1b90   :  { %v11882_v11 = vpop.f32.mrb[44].mxu1 }
0x1b91   :  { %v9162_v32 = vadd.f32 %v15933_v24, %v11882_v11  ;;  %v9153_v5 = vpop.f32.mrb[45].mxu1 }
0x1b92   :  { %v9154_v12 = vadd.f32 %v15933_v24, %v9153_v5  ;;  %v11883_v19 = vpop.f32.mrb[46].mxu1 }
0x1b93   :  { %v9165_v48 = vadd.f32 %v15933_v24, %v11883_v19  ;;  %v9156_v38 = vpop.f32.mrb[47].mxu1  ;;  %v9378_v31 = vmax.f32 %v9162_v32, 0.0 }
0x1b94   :  { %v9157_v55 = vadd.f32 %v15933_v24, %v9156_v38  ;;  %v9376_v17 = vmax.f32 %v9154_v12, 0.0 }
0x1b95   :  { %v9379_v54 = vmax.f32 %v9165_v48, 0.0  ;;  %11967 = vmatmul.mubr.msk.bf16.gmra.mrb[124].mxu1 %vm506_vm8, %v15869_v47 }
0x1b96   :  { %v9377_v45 = vmax.f32 %v9157_v55, 0.0  ;;  %11970 = vmatprep.mubr.msk.bf16.mxu1 %vm506_vm8, %v15886_v1 }
0x1b97   :  { %v16053_v50 = vpack.c.bf16 %v9379_v54, %v9378_v31 }
0x1b98   :  { %v16055_v56 = vpack.c.bf16 %v9377_v45, %v9376_v17 }
0x1b9d   :  { %11971 = vmatmul.mubr.msk.bf16.gmra.mrb[128].mxu1 %vm506_vm8, %v15883_v60 }
0x1b9e   :  { %11974 = vmatprep.mubr.msk.bf16.mxu1 %vm506_vm8, %v15900_v15 }
0x1ba0   :  { %v11886_v10 = vpop.f32.mrb[48].mxu1 }
0x1ba1   :  { %v9178_v18 = vadd.f32 %v15933_v24, %v11886_v10  ;;  %v9169_v20 = vpop.f32.mrb[49].mxu1 }
0x1ba2   :  { %v9170_v47 = vadd.f32 %v15933_v24, %v9169_v20  ;;  %v11887_v43 = vpop.f32.mrb[50].mxu1 }
0x1ba3   :  { %v9181_v35 = vadd.f32 %v15933_v24, %v11887_v43  ;;  %v9172_v1 = vpop.f32.mrb[51].mxu1  ;;  %v9382_v8 = vmax.f32 %v9178_v18, 0.0 }
0x1ba4   :  { %v9173_v44 = vadd.f32 %v15933_v24, %v9172_v1  ;;  %v9380_v60 = vmax.f32 %v9170_v47, 0.0 }
0x1ba5   :  { %v9383_v39 = vmax.f32 %v9181_v35, 0.0  ;;  %11975 = vmatmul.mubr.msk.bf16.gmra.mrb[132].mxu1 %vm506_vm8, %v15897_v27 }
0x1ba6   :  { %v9381_v33 = vmax.f32 %v9173_v44, 0.0  ;;  %11978 = vmatprep.mubr.msk.bf16.mxu1 %vm506_vm8, %v15914_v2 }
0x1ba7   :  { %v16069_v15 = vpack.c.bf16 %v9383_v39, %v9382_v8 }
0x1ba8   :  { %v16071_v28 = vpack.c.bf16 %v9381_v33, %v9380_v60 }
0x1bad   :  { %11979 = vmatmul.mubr.msk.bf16.gmra.mrb[136].mxu1 %vm506_vm8, %v15911_v26 }
0x1bae   :  { %11982 = vmatprep.mubr.msk.bf16.mxu1 %vm506_vm8, %v15928_v3 }
0x1bb0   :  { %v11890_v37 = vpop.f32.mrb[52].mxu1 }
0x1bb1   :  { %v9194_v52 = vadd.f32 %v15933_v24, %v11890_v37  ;;  %v9185_v14 = vpop.f32.mrb[53].mxu1 }
0x1bb2   :  { %v9186_v27 = vadd.f32 %v15933_v24, %v9185_v14  ;;  %v11891_v4 = vpop.f32.mrb[54].mxu1 }
0x1bb3   :  { %v9197_v61 = vadd.f32 %v15933_v24, %v11891_v4  ;;  %v9188_v2 = vpop.f32.mrb[55].mxu1  ;;  %v9386_v30 = vmax.f32 %v9194_v52, 0.0 }
0x1bb4   :  { %v9189_v51 = vadd.f32 %v15933_v24, %v9188_v2  ;;  %v9384_v26 = vmax.f32 %v9186_v27, 0.0 }
0x1bb5   :  { %v9387_v58 = vmax.f32 %v9197_v61, 0.0  ;;  %11983 = vmatmul.mubr.msk.bf16.gmra.mrb[140].mxu1 %vm506_vm8, %v15925_v13 }
0x1bb6   :  { %v9385_v36 = vmax.f32 %v9189_v51, 0.0  ;;  %11986 = vmatprep.mubr.msk.bf16.mxu1 %vm506_vm8, %v15944_v0 }
0x1bb7   :  { %v16085_v3 = vpack.c.bf16 %v9387_v58, %v9386_v30 }
0x1bb8   :  { %v16087_v6 = vpack.c.bf16 %v9385_v36, %v9384_v26 }
0x1bbd   :  { %11987 = vmatmul.mubr.msk.bf16.gmra.mrb[144].mxu1 %vm506_vm8, %v15941_v7 }
0x1bbe   :  { %11990 = vmatprep.mubr.msk.bf16.mxu1 %vm506_vm8, %v15959_v53 }
0x1bc0   :  { %v11894_v22 = vpop.f32.mrb[56].mxu1 }
0x1bc1   :  { %v9210_v34 = vadd.f32 %v15933_v24, %v11894_v22  ;;  %v9201_v16 = vpop.f32.mrb[57].mxu1 }
0x1bc2   :  { %v9202_v13 = vadd.f32 %v15933_v24, %v9201_v16  ;;  %v11895_v41 = vpop.f32.mrb[58].mxu1 }
0x1bc3   :  { %v9213_v46 = vadd.f32 %v15933_v24, %v11895_v41  ;;  %v9204_v0 = vpop.f32.mrb[59].mxu1  ;;  %v9390_v11 = vmax.f32 %v9210_v34, 0.0 }
0x1bc4   :  { %v9205_v40 = vadd.f32 %v15933_v24, %v9204_v0  ;;  %v9388_v7 = vmax.f32 %v9202_v13, 0.0 }
0x1bc5   :  { %v9391_v32 = vmax.f32 %v9213_v46, 0.0  ;;  %11991 = vmatmul.mubr.msk.bf16.gmra.mrb[148].mxu1 %vm506_vm8, %v15957_v59 }
0x1bc6   :  { %v9389_v5 = vmax.f32 %v9205_v40, 0.0  ;;  %11994 = vmatprep.mubr.msk.bf16.mxu1 %vm506_vm8, %v15975_v63 }
0x1bc7   :  { %v16101_v53 = vpack.c.bf16 %v9391_v32, %v9390_v11 }
0x1bc8   :  { %v16103_v12 = vpack.c.bf16 %v9389_v5, %v9388_v7 }
0x1bcd   :  { %11995 = vmatmul.mubr.msk.bf16.gmra.mrb[152].mxu1 %vm506_vm8, %v15973_v49 }
0x1bce   :  { %11998 = vmatprep.mubr.msk.bf16.mxu1 %vm506_vm8, %v15991_v9 }
0x1bd0   :  { %v11898_v19 = vpop.f32.mrb[60].mxu1 }
0x1bd1   :  { %v9226_v48 = vadd.f32 %v15933_v24, %v11898_v19  ;;  %v9217_v38 = vpop.f32.mrb[61].mxu1 }
0x1bd2   :  { %v9218_v59 = vadd.f32 %v15933_v24, %v9217_v38  ;;  %v11899_v55 = vpop.f32.mrb[62].mxu1 }
0x1bd3   :  { %v9229_v31 = vadd.f32 %v15933_v24, %v11899_v55  ;;  %v9220_v63 = vpop.f32.mrb[63].mxu1  ;;  %v9394_v17 = vmax.f32 %v9226_v48, 0.0 }
0x1bd4   :  { %v9221_v54 = vadd.f32 %v15933_v24, %v9220_v63  ;;  %v9392_v49 = vmax.f32 %v9218_v59, 0.0 }
0x1bd5   :  { %v9395_v45 = vmax.f32 %v9229_v31, 0.0  ;;  %11999 = vmatmul.mubr.msk.bf16.gmra.mrb[156].mxu1 %vm506_vm8, %v15989_v42 }
0x1bd6   :  { %v9393_v10 = vmax.f32 %v9221_v54, 0.0  ;;  %12002 = vmatprep.mubr.msk.bf16.mxu1 %vm506_vm8, %v16007_v57 }
0x1bd7   :  { %v16117_v9 = vpack.c.bf16 %v9395_v45, %v9394_v17 }
0x1bd8   :  { %v16119_v18 = vpack.c.bf16 %v9393_v10, %v9392_v49 }
0x1bdd   :  { %12003 = vmatmul.mubr.msk.bf16.gmra.mrb[160].mxu1 %vm506_vm8, %v16005_v21 }
0x1bde   :  { %12006 = vmatprep.mubr.msk.bf16.mxu1 %vm506_vm8, %v16023_v62 }
0x1be0   :  { %v11902_v20 = vpop.f32.mrb[64].mxu1 }
0x1be1   :  { %v9242_v47 = vadd.f32 %v15933_v24, %v11902_v20  ;;  %v9233_v43 = vpop.f32.mrb[65].mxu1 }
0x1be2   :  { %v9234_v42 = vadd.f32 %v15933_v24, %v9233_v43  ;;  %v11903_v35 = vpop.f32.mrb[66].mxu1 }
0x1be3   :  { %v9245_v1 = vadd.f32 %v15933_v24, %v11903_v35  ;;  %v9236_v57 = vpop.f32.mrb[67].mxu1  ;;  %v9398_v8 = vmax.f32 %v9242_v47, 0.0 }
0x1be4   :  { %v9237_v44 = vadd.f32 %v15933_v24, %v9236_v57  ;;  %v9396_v21 = vmax.f32 %v9234_v42, 0.0 }
0x1be5   :  { %v9399_v39 = vmax.f32 %v9245_v1, 0.0  ;;  %12007 = vmatmul.mubr.msk.bf16.gmra.mrb[164].mxu1 %vm506_vm8, %v16021_v29 }
0x1be6   :  { %v9397_v60 = vmax.f32 %v9237_v44, 0.0  ;;  %12010 = vmatprep.mubr.msk.bf16.mxu1 %vm506_vm8, %v16039_v25 }
0x1be7   :  { %v16133_v62 = vpack.c.bf16 %v9399_v39, %v9398_v8 }
0x1be8   :  { %v16135_v33 = vpack.c.bf16 %v9397_v60, %v9396_v21 }
0x1bed   :  { %12011 = vmatmul.mubr.msk.bf16.gmra.mrb[168].mxu1 %vm506_vm8, %v16037_v23 }
0x1bee   :  { %12014 = vmatprep.mubr.msk.bf16.mxu1 %vm506_vm8, %v16055_v56 }
0x1bf0   :  { %v11906_v37 = vpop.f32.mrb[68].mxu1 }
0x1bf1   :  { %v9258_v52 = vadd.f32 %v15933_v24, %v11906_v37  ;;  %v9249_v14 = vpop.f32.mrb[69].mxu1 }
0x1bf2   :  { %v9250_v29 = vadd.f32 %v15933_v24, %v9249_v14  ;;  %v11907_v27 = vpop.f32.mrb[70].mxu1 }
0x1bf3   :  { %v9261_v4 = vadd.f32 %v15933_v24, %v11907_v27  ;;  %v9252_v25 = vpop.f32.mrb[71].mxu1  ;;  %v9402_v2 = vmax.f32 %v9258_v52, 0.0 }
0x1bf4   :  { %v9253_v61 = vadd.f32 %v15933_v24, %v9252_v25  ;;  %v9400_v23 = vmax.f32 %v9250_v29, 0.0 }
0x1bf5   :  { %v9403_v51 = vmax.f32 %v9261_v4, 0.0  ;;  %12015 = vmatmul.mubr.msk.bf16.gmra.mrb[172].mxu1 %vm506_vm8, %v16053_v50 }
0x1bf6   :  { %v9401_v30 = vmax.f32 %v9253_v61, 0.0  ;;  %12018 = vmatprep.mubr.msk.bf16.mxu1 %vm506_vm8, %v16071_v28 }
0x1bf7   :  { %v16149_v56 = vpack.c.bf16 %v9403_v51, %v9402_v2 }
0x1bf8   :  { %v16151_v58 = vpack.c.bf16 %v9401_v30, %v9400_v23 }
0x1bfd   :  { %12019 = vmatmul.mubr.msk.bf16.gmra.mrb[176].mxu1 %vm506_vm8, %v16069_v15 }
0x1bfe   :  { %12022 = vmatprep.mubr.msk.bf16.mxu1 %vm506_vm8, %v16087_v6  ;;  %v16165_v6 = vld [vmem:[#allocation10 + $0x6] ss:$0 sm:$0xff] }
0x1c00   :  { %v11910_v26 = vpop.f32.mrb[72].mxu1 }
0x1c01   :  { %v9274_v36 = vadd.f32 %v15933_v24, %v11910_v26  ;;  %v9265_v22 = vpop.f32.mrb[73].mxu1 }
0x1c02   :  { %v9266_v50 = vadd.f32 %v15933_v24, %v9265_v22  ;;  %v11911_v34 = vpop.f32.mrb[74].mxu1 }
0x1c03   :  { %v9277_v16 = vadd.f32 %v15933_v24, %v11911_v34  ;;  %v9268_v28 = vpop.f32.mrb[75].mxu1  ;;  %v9406_v41 = vmax.f32 %v9274_v36, 0.0 }
0x1c04   :  { %v9269_v13 = vadd.f32 %v15933_v24, %v9268_v28  ;;  %v9404_v15 = vmax.f32 %v9266_v50, 0.0 }
0x1c05   :  { %v9407_v46 = vmax.f32 %v9277_v16, 0.0  ;;  %12023 = vmatmul.mubr.msk.bf16.gmra.mrb[180].mxu1 %vm506_vm8, %v16085_v3 }
0x1c06   :  { %v9405_v0 = vmax.f32 %v9269_v13, 0.0  ;;  %12026 = vmatprep.mubr.msk.bf16.mxu1 %vm506_vm8, %v16103_v12 }
0x1c07   :  { %v16167_v40 = vpack.c.bf16 %v9407_v46, %v9406_v41 }
0x1c08   :  { %v16169_v11 = vpack.c.bf16 %v9405_v0, %v9404_v15  ;;  %v11920_v32 = vpop.f32.mrb[76].mxu1 }
0x1c09   :  { %v9739_v7 = vadd.f32 %v11920_v32, %v16165_v6  ;;  %v9730_v24 = vpop.f32.mrb[77].mxu1 }
0x1c0a   :  { %v9731_v5 = vadd.f32 %v16165_v6, %v9730_v24  ;;  %v11921_v19 = vpop.f32.mrb[78].mxu1 }
0x1c0b   :  { %12309 = vtanh.f32 %v9739_v7  ;;  %v9742_v3 = vadd.f32 %v11921_v19, %v16165_v6  ;;  %v9733_v48 = vpop.f32.mrb[79].mxu1 }
0x1c0c   :  { %12311 = vtanh.f32 %v9731_v5  ;;  %v9734_v12 = vadd.f32 %v16165_v6, %v9733_v48 }
0x1c0d   :  { %12313 = vtanh.f32 %v9742_v3  ;;  %12027 = vmatmul.mubr.msk.bf16.gmra.mrb[184].mxu1 %vm506_vm8, %v16101_v53 }
0x1c0e   :  { %12315 = vtanh.f32 %v9734_v12  ;;  %12030 = vmatprep.mubr.msk.bf16.mxu1 %vm506_vm8, %v16119_v18 }
0x1c10   :  { %v11924_v38 = vpop.f32.mrb[80].mxu1 }
0x1c11   :  { %v9755_v59 = vadd.f32 %v11924_v38, %v16165_v6  ;;  %v9746_v55 = vpop.f32.mrb[81].mxu1 }
0x1c12   :  { %v9747_v31 = vadd.f32 %v16165_v6, %v9746_v55  ;;  %v11925_v63 = vpop.f32.mrb[82].mxu1 }
0x1c13   :  { %12317 = vtanh.f32 %v9755_v59  ;;  %v9758_v54 = vadd.f32 %v11925_v63, %v16165_v6  ;;  %v9749_v17 = vpop.f32.mrb[83].mxu1 }
0x1c14   :  { %12319 = vtanh.f32 %v9747_v31  ;;  %v9750_v45 = vadd.f32 %v16165_v6, %v9749_v17 }
0x1c15   :  { %v12310_v53 = vpop.eup %12309  ;;  %12321 = vtanh.f32 %v9758_v54  ;;  %12031 = vmatmul.mubr.msk.bf16.gmra.mrb[188].mxu1 %vm506_vm8, %v16117_v9 }
0x1c16   :  { %v12312_v49 = vpop.eup %12311  ;;  %10372 = vst.msk [vmem:[%s16840_s9 + $0x10] sm:$0xff] %vm10369_vm1, %v12310_v53  ;;  %12323 = vtanh.f32 %v9750_v45  ;;  %12034 = vmatprep.mubr.msk.bf16.mxu1 %vm506_vm8, %v16135_v33 }
0x1c17   :  { %v12314_v10 = vpop.eup %12313  ;;  %10370 = vst.msk [vmem:[%s16840_s9] sm:$0xff] %vm10369_vm1, %v12312_v49 }
0x1c18   :  { %v12316_v18 = vpop.eup %12315  ;;  %10373 = vst.msk [vmem:[%s16840_s9 + $0x18] sm:$0xff] %vm10369_vm1, %v12314_v10  ;;  %v11928_v9 = vpop.f32.mrb[84].mxu1 }
0x1c19   :  { %10371 = vst.msk [vmem:[%s16840_s9 + $0x8] sm:$0xff] %vm10369_vm1, %v12316_v18  ;;  %v9771_v20 = vadd.f32 %v11928_v9, %v16165_v6  ;;  %v9762_v47 = vpop.f32.mrb[85].mxu1 }
0x1c1a   :  { %v9763_v43 = vadd.f32 %v16165_v6, %v9762_v47  ;;  %v11929_v42 = vpop.f32.mrb[86].mxu1 }
0x1c1b   :  { %12325 = vtanh.f32 %v9771_v20  ;;  %v9774_v35 = vadd.f32 %v11929_v42, %v16165_v6  ;;  %v9765_v1 = vpop.f32.mrb[87].mxu1 }
0x1c1c   :  { %12327 = vtanh.f32 %v9763_v43  ;;  %v9766_v57 = vadd.f32 %v16165_v6, %v9765_v1 }
0x1c1d   :  { %v12318_v44 = vpop.eup %12317  ;;  %12329 = vtanh.f32 %v9774_v35  ;;  %12035 = vmatmul.mubr.msk.bf16.gmra.mrb[192].mxu1 %vm506_vm8, %v16133_v62 }
0x1c1e   :  { %v12320_v8 = vpop.eup %12319  ;;  %10376 = vst.msk [vmem:[%s16840_s9 + $0x30] sm:$0xff] %vm10369_vm1, %v12318_v44  ;;  %12331 = vtanh.f32 %v9766_v57  ;;  %12038 = vmatprep.mubr.msk.bf16.mxu1 %vm506_vm8, %v16151_v58 }
0x1c1f   :  { %v12322_v39 = vpop.eup %12321  ;;  %10374 = vst.msk [vmem:[%s16840_s9 + $0x20] sm:$0xff] %vm10369_vm1, %v12320_v8 }
0x1c20   :  { %v12324_v21 = vpop.eup %12323  ;;  %10377 = vst.msk [vmem:[%s16840_s9 + $0x38] sm:$0xff] %vm10369_vm1, %v12322_v39  ;;  %v11932_v60 = vpop.f32.mrb[88].mxu1 }
0x1c21   :  { %10375 = vst.msk [vmem:[%s16840_s9 + $0x28] sm:$0xff] %vm10369_vm1, %v12324_v21  ;;  %v9787_v62 = vadd.f32 %v11932_v60, %v16165_v6  ;;  %v9778_v33 = vpop.f32.mrb[89].mxu1 }
0x1c22   :  { %v9779_v37 = vadd.f32 %v16165_v6, %v9778_v33  ;;  %v11933_v52 = vpop.f32.mrb[90].mxu1 }
0x1c23   :  { %12333 = vtanh.f32 %v9787_v62  ;;  %v9790_v14 = vadd.f32 %v11933_v52, %v16165_v6  ;;  %v9781_v29 = vpop.f32.mrb[91].mxu1 }
0x1c24   :  { %12335 = vtanh.f32 %v9779_v37  ;;  %v9782_v27 = vadd.f32 %v16165_v6, %v9781_v29 }
0x1c25   :  { %v12326_v4 = vpop.eup %12325  ;;  %12337 = vtanh.f32 %v9790_v14  ;;  %12039 = vmatmul.mubr.msk.bf16.gmra.mrb[196].mxu1 %vm506_vm8, %v16149_v56 }
0x1c26   :  { %v12328_v25 = vpop.eup %12327  ;;  %10380 = vst.msk [vmem:[%s16840_s9 + $0x50] sm:$0xff] %vm10369_vm1, %v12326_v4  ;;  %12339 = vtanh.f32 %v9782_v27  ;;  %12042 = vmatprep.mubr.msk.bf16.mxu1 %vm506_vm8, %v16169_v11 }
0x1c27   :  { %v12330_v61 = vpop.eup %12329  ;;  %10378 = vst.msk [vmem:[%s16840_s9 + $0x40] sm:$0xff] %vm10369_vm1, %v12328_v25 }
0x1c28   :  { %v12332_v2 = vpop.eup %12331  ;;  %10381 = vst.msk [vmem:[%s16840_s9 + $0x58] sm:$0xff] %vm10369_vm1, %v12330_v61  ;;  %v11936_v51 = vpop.f32.mrb[92].mxu1 }
0x1c29   :  { %10379 = vst.msk [vmem:[%s16840_s9 + $0x48] sm:$0xff] %vm10369_vm1, %v12332_v2  ;;  %v9803_v23 = vadd.f32 %v11936_v51, %v16165_v6  ;;  %v9794_v30 = vpop.f32.mrb[93].mxu1 }
0x1c2a   :  { %v9795_v56 = vadd.f32 %v16165_v6, %v9794_v30  ;;  %v11937_v58 = vpop.f32.mrb[94].mxu1 }
0x1c2b   :  { %12341 = vtanh.f32 %v9803_v23  ;;  %v9806_v26 = vadd.f32 %v11937_v58, %v16165_v6  ;;  %v9797_v36 = vpop.f32.mrb[95].mxu1 }
0x1c2c   :  { %12343 = vtanh.f32 %v9795_v56  ;;  %v9798_v22 = vadd.f32 %v16165_v6, %v9797_v36 }
0x1c2d   :  { %v12334_v50 = vpop.eup %12333  ;;  %12345 = vtanh.f32 %v9806_v26  ;;  %12043 = vmatmul.mubr.msk.bf16.gmra.mrb[200].mxu1 %vm506_vm8, %v16167_v40 }
0x1c2e   :  { %v12336_v34 = vpop.eup %12335  ;;  %10384 = vst.msk [vmem:[%s16840_s9 + $0x70] sm:$0xff] %vm10369_vm1, %v12334_v50  ;;  %12347 = vtanh.f32 %v9798_v22 }
0x1c2f   :  { %v12338_v16 = vpop.eup %12337  ;;  %10382 = vst.msk [vmem:[%s16840_s9 + $0x60] sm:$0xff] %vm10369_vm1, %v12336_v34 }
0x1c30   :  { %v12340_v28 = vpop.eup %12339  ;;  %10385 = vst.msk [vmem:[%s16840_s9 + $0x78] sm:$0xff] %vm10369_vm1, %v12338_v16  ;;  %v11940_v13 = vpop.f32.mrb[96].mxu1 }
0x1c31   :  { %10383 = vst.msk [vmem:[%s16840_s9 + $0x68] sm:$0xff] %vm10369_vm1, %v12340_v28  ;;  %v9819_v41 = vadd.f32 %v11940_v13, %v16165_v6  ;;  %v9810_v46 = vpop.f32.mrb[97].mxu1 }
0x1c32   :  { %v9811_v15 = vadd.f32 %v16165_v6, %v9810_v46  ;;  %v11941_v0 = vpop.f32.mrb[98].mxu1 }
0x1c33   :  { %12349 = vtanh.f32 %v9819_v41  ;;  %v9822_v40 = vadd.f32 %v11941_v0, %v16165_v6  ;;  %v9813_v11 = vpop.f32.mrb[99].mxu1 }
0x1c34   :  { %12351 = vtanh.f32 %v9811_v15  ;;  %v9814_v32 = vadd.f32 %v16165_v6, %v9813_v11 }
0x1c35   :  { %v12342_v7 = vpop.eup %12341  ;;  %12353 = vtanh.f32 %v9822_v40 }
0x1c36   :  { %v12344_v24 = vpop.eup %12343  ;;  %10388 = vst.msk [vmem:[%s16840_s9 + $0x90] sm:$0xff] %vm10369_vm1, %v12342_v7  ;;  %12355 = vtanh.f32 %v9814_v32 }
0x1c37   :  { %v12346_v5 = vpop.eup %12345  ;;  %10386 = vst.msk [vmem:[%s16840_s9 + $0x80] sm:$0xff] %vm10369_vm1, %v12344_v24 }
0x1c38   :  { %v12348_v19 = vpop.eup %12347  ;;  %10389 = vst.msk [vmem:[%s16840_s9 + $0x98] sm:$0xff] %vm10369_vm1, %v12346_v5  ;;  %v11944_v3 = vpop.f32.mrb[100].mxu1 }
0x1c39   :  { %10387 = vst.msk [vmem:[%s16840_s9 + $0x88] sm:$0xff] %vm10369_vm1, %v12348_v19  ;;  %v9835_v48 = vadd.f32 %v11944_v3, %v16165_v6  ;;  %v9826_v12 = vpop.f32.mrb[101].mxu1 }
0x1c3a   :  { %v9827_v38 = vadd.f32 %v16165_v6, %v9826_v12  ;;  %v11945_v59 = vpop.f32.mrb[102].mxu1 }
0x1c3b   :  { %12357 = vtanh.f32 %v9835_v48  ;;  %v9838_v55 = vadd.f32 %v11945_v59, %v16165_v6  ;;  %v9829_v31 = vpop.f32.mrb[103].mxu1 }
0x1c3c   :  { %12359 = vtanh.f32 %v9827_v38  ;;  %v9830_v63 = vadd.f32 %v16165_v6, %v9829_v31 }
0x1c3d   :  { %v12350_v54 = vpop.eup %12349  ;;  %12361 = vtanh.f32 %v9838_v55 }
0x1c3e   :  { %v12352_v17 = vpop.eup %12351  ;;  %10392 = vst.msk [vmem:[%s16840_s9 + $0xb0] sm:$0xff] %vm10369_vm1, %v12350_v54  ;;  %12363 = vtanh.f32 %v9830_v63 }
0x1c3f   :  { %v12354_v45 = vpop.eup %12353  ;;  %10390 = vst.msk [vmem:[%s16840_s9 + $0xa0] sm:$0xff] %vm10369_vm1, %v12352_v17 }
0x1c40   :  { %v12356_v53 = vpop.eup %12355  ;;  %10393 = vst.msk [vmem:[%s16840_s9 + $0xb8] sm:$0xff] %vm10369_vm1, %v12354_v45  ;;  %v11948_v49 = vpop.f32.mrb[104].mxu1 }
0x1c41   :  { %10391 = vst.msk [vmem:[%s16840_s9 + $0xa8] sm:$0xff] %vm10369_vm1, %v12356_v53  ;;  %v9851_v10 = vadd.f32 %v11948_v49, %v16165_v6  ;;  %v9842_v18 = vpop.f32.mrb[105].mxu1 }
0x1c42   :  { %v9843_v9 = vadd.f32 %v16165_v6, %v9842_v18  ;;  %v11949_v20 = vpop.f32.mrb[106].mxu1 }
0x1c43   :  { %12365 = vtanh.f32 %v9851_v10  ;;  %v9854_v47 = vadd.f32 %v11949_v20, %v16165_v6  ;;  %v9845_v43 = vpop.f32.mrb[107].mxu1 }
0x1c44   :  { %12367 = vtanh.f32 %v9843_v9  ;;  %v9846_v42 = vadd.f32 %v16165_v6, %v9845_v43 }
0x1c45   :  { %v12358_v35 = vpop.eup %12357  ;;  %12369 = vtanh.f32 %v9854_v47 }
0x1c46   :  { %v12360_v1 = vpop.eup %12359  ;;  %10396 = vst.msk [vmem:[%s16840_s9 + $0xd0] sm:$0xff] %vm10369_vm1, %v12358_v35  ;;  %12371 = vtanh.f32 %v9846_v42 }
0x1c47   :  { %v12362_v57 = vpop.eup %12361  ;;  %10394 = vst.msk [vmem:[%s16840_s9 + $0xc0] sm:$0xff] %vm10369_vm1, %v12360_v1 }
0x1c48   :  { %v12364_v44 = vpop.eup %12363  ;;  %10397 = vst.msk [vmem:[%s16840_s9 + $0xd8] sm:$0xff] %vm10369_vm1, %v12362_v57  ;;  %v11952_v8 = vpop.f32.mrb[108].mxu1 }
0x1c49   :  { %10395 = vst.msk [vmem:[%s16840_s9 + $0xc8] sm:$0xff] %vm10369_vm1, %v12364_v44  ;;  %v9867_v39 = vadd.f32 %v11952_v8, %v16165_v6  ;;  %v9858_v21 = vpop.f32.mrb[109].mxu1 }
0x1c4a   :  { %v9859_v60 = vadd.f32 %v16165_v6, %v9858_v21  ;;  %v11953_v62 = vpop.f32.mrb[110].mxu1 }
0x1c4b   :  { %12373 = vtanh.f32 %v9867_v39  ;;  %v9870_v33 = vadd.f32 %v11953_v62, %v16165_v6  ;;  %v9861_v37 = vpop.f32.mrb[111].mxu1 }
0x1c4c   :  { %12375 = vtanh.f32 %v9859_v60  ;;  %v9862_v52 = vadd.f32 %v16165_v6, %v9861_v37 }
0x1c4d   :  { %v12366_v14 = vpop.eup %12365  ;;  %12377 = vtanh.f32 %v9870_v33 }
0x1c4e   :  { %v12368_v29 = vpop.eup %12367  ;;  %10400 = vst.msk [vmem:[%s16840_s9 + $0xf0] sm:$0xff] %vm10369_vm1, %v12366_v14  ;;  %12379 = vtanh.f32 %v9862_v52 }
0x1c4f   :  { %v12370_v27 = vpop.eup %12369  ;;  %10398 = vst.msk [vmem:[%s16840_s9 + $0xe0] sm:$0xff] %vm10369_vm1, %v12368_v29 }
0x1c50   :  { %v12372_v4 = vpop.eup %12371  ;;  %10401 = vst.msk [vmem:[%s16840_s9 + $0xf8] sm:$0xff] %vm10369_vm1, %v12370_v27  ;;  %v11956_v25 = vpop.f32.mrb[112].mxu1 }
0x1c51   :  { %10399 = vst.msk [vmem:[%s16840_s9 + $0xe8] sm:$0xff] %vm10369_vm1, %v12372_v4  ;;  %v9883_v61 = vadd.f32 %v11956_v25, %v16165_v6  ;;  %v9874_v2 = vpop.f32.mrb[113].mxu1 }
0x1c52   :  { %v9875_v51 = vadd.f32 %v16165_v6, %v9874_v2  ;;  %v11957_v23 = vpop.f32.mrb[114].mxu1 }
0x1c53   :  { %12381 = vtanh.f32 %v9883_v61  ;;  %v9886_v30 = vadd.f32 %v11957_v23, %v16165_v6  ;;  %v9877_v56 = vpop.f32.mrb[115].mxu1 }
0x1c54   :  { %12383 = vtanh.f32 %v9875_v51  ;;  %v9878_v58 = vadd.f32 %v16165_v6, %v9877_v56 }
0x1c55   :  { %v12374_v26 = vpop.eup %12373  ;;  %12385 = vtanh.f32 %v9886_v30 }
0x1c56   :  { %v12376_v36 = vpop.eup %12375  ;;  %10404 = vst.msk [vmem:[%s16840_s9 + $0x110] sm:$0xff] %vm10369_vm1, %v12374_v26  ;;  %12387 = vtanh.f32 %v9878_v58 }
0x1c57   :  { %v12378_v22 = vpop.eup %12377  ;;  %10402 = vst.msk [vmem:[%s16840_s9 + $0x100] sm:$0xff] %vm10369_vm1, %v12376_v36 }
0x1c58   :  { %v12380_v50 = vpop.eup %12379  ;;  %10405 = vst.msk [vmem:[%s16840_s9 + $0x118] sm:$0xff] %vm10369_vm1, %v12378_v22  ;;  %v11960_v34 = vpop.f32.mrb[116].mxu1 }
0x1c59   :  { %10403 = vst.msk [vmem:[%s16840_s9 + $0x108] sm:$0xff] %vm10369_vm1, %v12380_v50  ;;  %v9899_v16 = vadd.f32 %v11960_v34, %v16165_v6  ;;  %v9890_v28 = vpop.f32.mrb[117].mxu1 }
0x1c5a   :  { %v9891_v13 = vadd.f32 %v16165_v6, %v9890_v28  ;;  %v11961_v41 = vpop.f32.mrb[118].mxu1 }
0x1c5b   :  { %12389 = vtanh.f32 %v9899_v16  ;;  %v9902_v46 = vadd.f32 %v11961_v41, %v16165_v6  ;;  %v9893_v15 = vpop.f32.mrb[119].mxu1 }
0x1c5c   :  { %12391 = vtanh.f32 %v9891_v13  ;;  %v9894_v0 = vadd.f32 %v16165_v6, %v9893_v15 }
0x1c5d   :  { %v12382_v40 = vpop.eup %12381  ;;  %12393 = vtanh.f32 %v9902_v46 }
0x1c5e   :  { %v12384_v11 = vpop.eup %12383  ;;  %10408 = vst.msk [vmem:[%s16840_s9 + $0x130] sm:$0xff] %vm10369_vm1, %v12382_v40  ;;  %12395 = vtanh.f32 %v9894_v0 }
0x1c5f   :  { %v12386_v32 = vpop.eup %12385  ;;  %10406 = vst.msk [vmem:[%s16840_s9 + $0x120] sm:$0xff] %vm10369_vm1, %v12384_v11 }
0x1c60   :  { %v12388_v7 = vpop.eup %12387  ;;  %10409 = vst.msk [vmem:[%s16840_s9 + $0x138] sm:$0xff] %vm10369_vm1, %v12386_v32  ;;  %v11964_v24 = vpop.f32.mrb[120].mxu1 }
0x1c61   :  { %10407 = vst.msk [vmem:[%s16840_s9 + $0x128] sm:$0xff] %vm10369_vm1, %v12388_v7  ;;  %v9915_v5 = vadd.f32 %v11964_v24, %v16165_v6  ;;  %v9906_v19 = vpop.f32.mrb[121].mxu1 }
0x1c62   :  { %v9907_v3 = vadd.f32 %v16165_v6, %v9906_v19  ;;  %v11965_v48 = vpop.f32.mrb[122].mxu1 }
0x1c63   :  { %12397 = vtanh.f32 %v9915_v5  ;;  %v9918_v12 = vadd.f32 %v11965_v48, %v16165_v6  ;;  %v9909_v38 = vpop.f32.mrb[123].mxu1 }
0x1c64   :  { %12399 = vtanh.f32 %v9907_v3  ;;  %v9910_v59 = vadd.f32 %v16165_v6, %v9909_v38 }
0x1c65   :  { %v12390_v55 = vpop.eup %12389  ;;  %12401 = vtanh.f32 %v9918_v12 }
0x1c66   :  { %v12392_v31 = vpop.eup %12391  ;;  %10412 = vst.msk [vmem:[%s16840_s9 + $0x150] sm:$0xff] %vm10369_vm1, %v12390_v55  ;;  %12403 = vtanh.f32 %v9910_v59 }
0x1c67   :  { %v12394_v63 = vpop.eup %12393  ;;  %10410 = vst.msk [vmem:[%s16840_s9 + $0x140] sm:$0xff] %vm10369_vm1, %v12392_v31 }
0x1c68   :  { %v12396_v54 = vpop.eup %12395  ;;  %10413 = vst.msk [vmem:[%s16840_s9 + $0x158] sm:$0xff] %vm10369_vm1, %v12394_v63  ;;  %v11968_v17 = vpop.f32.mrb[124].mxu1 }
0x1c69   :  { %10411 = vst.msk [vmem:[%s16840_s9 + $0x148] sm:$0xff] %vm10369_vm1, %v12396_v54  ;;  %v9931_v45 = vadd.f32 %v11968_v17, %v16165_v6  ;;  %v9922_v53 = vpop.f32.mrb[125].mxu1 }
0x1c6a   :  { %v9923_v49 = vadd.f32 %v16165_v6, %v9922_v53  ;;  %v11969_v10 = vpop.f32.mrb[126].mxu1 }
0x1c6b   :  { %12405 = vtanh.f32 %v9931_v45  ;;  %v9934_v18 = vadd.f32 %v11969_v10, %v16165_v6  ;;  %v9925_v9 = vpop.f32.mrb[127].mxu1 }
0x1c6c   :  { %12407 = vtanh.f32 %v9923_v49  ;;  %v9926_v20 = vadd.f32 %v16165_v6, %v9925_v9 }
0x1c6d   :  { %v12398_v47 = vpop.eup %12397  ;;  %12409 = vtanh.f32 %v9934_v18 }
0x1c6e   :  { %v12400_v43 = vpop.eup %12399  ;;  %10416 = vst.msk [vmem:[%s16840_s9 + $0x170] sm:$0xff] %vm10369_vm1, %v12398_v47  ;;  %12411 = vtanh.f32 %v9926_v20 }
0x1c6f   :  { %v12402_v42 = vpop.eup %12401  ;;  %10414 = vst.msk [vmem:[%s16840_s9 + $0x160] sm:$0xff] %vm10369_vm1, %v12400_v43 }
0x1c70   :  { %v12404_v35 = vpop.eup %12403  ;;  %10417 = vst.msk [vmem:[%s16840_s9 + $0x178] sm:$0xff] %vm10369_vm1, %v12402_v42  ;;  %v11972_v1 = vpop.f32.mrb[128].mxu1 }
0x1c71   :  { %10415 = vst.msk [vmem:[%s16840_s9 + $0x168] sm:$0xff] %vm10369_vm1, %v12404_v35  ;;  %v9947_v57 = vadd.f32 %v11972_v1, %v16165_v6  ;;  %v9938_v44 = vpop.f32.mrb[129].mxu1 }
0x1c72   :  { %v9939_v8 = vadd.f32 %v16165_v6, %v9938_v44  ;;  %v11973_v39 = vpop.f32.mrb[130].mxu1 }
0x1c73   :  { %12413 = vtanh.f32 %v9947_v57  ;;  %v9950_v21 = vadd.f32 %v11973_v39, %v16165_v6  ;;  %v9941_v60 = vpop.f32.mrb[131].mxu1 }
0x1c74   :  { %12415 = vtanh.f32 %v9939_v8  ;;  %v9942_v62 = vadd.f32 %v16165_v6, %v9941_v60 }
0x1c75   :  { %v12406_v33 = vpop.eup %12405  ;;  %12417 = vtanh.f32 %v9950_v21 }
0x1c76   :  { %v12408_v37 = vpop.eup %12407  ;;  %10420 = vst.msk [vmem:[%s16840_s9 + $0x190] sm:$0xff] %vm10369_vm1, %v12406_v33  ;;  %12419 = vtanh.f32 %v9942_v62 }
0x1c77   :  { %v12410_v52 = vpop.eup %12409  ;;  %10418 = vst.msk [vmem:[%s16840_s9 + $0x180] sm:$0xff] %vm10369_vm1, %v12408_v37 }
0x1c78   :  { %v12412_v14 = vpop.eup %12411  ;;  %10421 = vst.msk [vmem:[%s16840_s9 + $0x198] sm:$0xff] %vm10369_vm1, %v12410_v52  ;;  %v11976_v29 = vpop.f32.mrb[132].mxu1 }
0x1c79   :  { %10419 = vst.msk [vmem:[%s16840_s9 + $0x188] sm:$0xff] %vm10369_vm1, %v12412_v14  ;;  %v9963_v27 = vadd.f32 %v11976_v29, %v16165_v6  ;;  %v9954_v4 = vpop.f32.mrb[133].mxu1 }
0x1c7a   :  { %v9955_v25 = vadd.f32 %v16165_v6, %v9954_v4  ;;  %v11977_v61 = vpop.f32.mrb[134].mxu1 }
0x1c7b   :  { %12421 = vtanh.f32 %v9963_v27  ;;  %v9966_v2 = vadd.f32 %v11977_v61, %v16165_v6  ;;  %v9957_v51 = vpop.f32.mrb[135].mxu1 }
0x1c7c   :  { %12423 = vtanh.f32 %v9955_v25  ;;  %v9958_v23 = vadd.f32 %v16165_v6, %v9957_v51 }
0x1c7d   :  { %v12414_v30 = vpop.eup %12413  ;;  %12425 = vtanh.f32 %v9966_v2 }
0x1c7e   :  { %v12416_v56 = vpop.eup %12415  ;;  %10424 = vst.msk [vmem:[%s16840_s9 + $0x1b0] sm:$0xff] %vm10369_vm1, %v12414_v30  ;;  %12427 = vtanh.f32 %v9958_v23 }
0x1c7f   :  { %v12418_v58 = vpop.eup %12417  ;;  %10422 = vst.msk [vmem:[%s16840_s9 + $0x1a0] sm:$0xff] %vm10369_vm1, %v12416_v56 }
0x1c80   :  { %v12420_v26 = vpop.eup %12419  ;;  %10425 = vst.msk [vmem:[%s16840_s9 + $0x1b8] sm:$0xff] %vm10369_vm1, %v12418_v58  ;;  %v11980_v36 = vpop.f32.mrb[136].mxu1 }
0x1c81   :  { %10423 = vst.msk [vmem:[%s16840_s9 + $0x1a8] sm:$0xff] %vm10369_vm1, %v12420_v26  ;;  %v9979_v22 = vadd.f32 %v11980_v36, %v16165_v6  ;;  %v9970_v50 = vpop.f32.mrb[137].mxu1 }
0x1c82   :  { %v9971_v34 = vadd.f32 %v16165_v6, %v9970_v50  ;;  %v11981_v16 = vpop.f32.mrb[138].mxu1 }
0x1c83   :  { %12429 = vtanh.f32 %v9979_v22  ;;  %v9982_v28 = vadd.f32 %v11981_v16, %v16165_v6  ;;  %v9973_v13 = vpop.f32.mrb[139].mxu1 }
0x1c84   :  { %12431 = vtanh.f32 %v9971_v34  ;;  %v9974_v41 = vadd.f32 %v16165_v6, %v9973_v13 }
0x1c85   :  { %v12422_v46 = vpop.eup %12421  ;;  %12433 = vtanh.f32 %v9982_v28 }
0x1c86   :  { %v12424_v15 = vpop.eup %12423  ;;  %10428 = vst.msk [vmem:[%s16840_s9 + $0x1d0] sm:$0xff] %vm10369_vm1, %v12422_v46  ;;  %12435 = vtanh.f32 %v9974_v41 }
0x1c87   :  { %v12426_v0 = vpop.eup %12425  ;;  %10426 = vst.msk [vmem:[%s16840_s9 + $0x1c0] sm:$0xff] %vm10369_vm1, %v12424_v15 }
0x1c88   :  { %v12428_v40 = vpop.eup %12427  ;;  %10429 = vst.msk [vmem:[%s16840_s9 + $0x1d8] sm:$0xff] %vm10369_vm1, %v12426_v0  ;;  %v11984_v11 = vpop.f32.mrb[140].mxu1 }
0x1c89   :  { %10427 = vst.msk [vmem:[%s16840_s9 + $0x1c8] sm:$0xff] %vm10369_vm1, %v12428_v40  ;;  %v9995_v32 = vadd.f32 %v11984_v11, %v16165_v6  ;;  %v9986_v7 = vpop.f32.mrb[141].mxu1 }
0x1c8a   :  { %v9987_v24 = vadd.f32 %v16165_v6, %v9986_v7  ;;  %v11985_v5 = vpop.f32.mrb[142].mxu1 }
0x1c8b   :  { %12437 = vtanh.f32 %v9995_v32  ;;  %v9998_v19 = vadd.f32 %v11985_v5, %v16165_v6  ;;  %v9989_v3 = vpop.f32.mrb[143].mxu1 }
0x1c8c   :  { %12439 = vtanh.f32 %v9987_v24  ;;  %v9990_v48 = vadd.f32 %v16165_v6, %v9989_v3 }
0x1c8d   :  { %v12430_v12 = vpop.eup %12429  ;;  %12441 = vtanh.f32 %v9998_v19 }
0x1c8e   :  { %v12432_v38 = vpop.eup %12431  ;;  %10432 = vst.msk [vmem:[%s16840_s9 + $0x1f0] sm:$0xff] %vm10369_vm1, %v12430_v12  ;;  %12443 = vtanh.f32 %v9990_v48 }
0x1c8f   :  { %v12434_v59 = vpop.eup %12433  ;;  %10430 = vst.msk [vmem:[%s16840_s9 + $0x1e0] sm:$0xff] %vm10369_vm1, %v12432_v38 }
0x1c90   :  { %v12436_v55 = vpop.eup %12435  ;;  %10433 = vst.msk [vmem:[%s16840_s9 + $0x1f8] sm:$0xff] %vm10369_vm1, %v12434_v59  ;;  %v11988_v31 = vpop.f32.mrb[144].mxu1 }
0x1c91   :  { %10431 = vst.msk [vmem:[%s16840_s9 + $0x1e8] sm:$0xff] %vm10369_vm1, %v12436_v55  ;;  %v10011_v63 = vadd.f32 %v11988_v31, %v16165_v6  ;;  %v10002_v54 = vpop.f32.mrb[145].mxu1 }
0x1c92   :  { %v10003_v17 = vadd.f32 %v16165_v6, %v10002_v54  ;;  %v11989_v45 = vpop.f32.mrb[146].mxu1 }
0x1c93   :  { %12445 = vtanh.f32 %v10011_v63  ;;  %v10014_v53 = vadd.f32 %v11989_v45, %v16165_v6  ;;  %v10005_v49 = vpop.f32.mrb[147].mxu1 }
0x1c94   :  { %12447 = vtanh.f32 %v10003_v17  ;;  %v10006_v10 = vadd.f32 %v16165_v6, %v10005_v49 }
0x1c95   :  { %v12438_v18 = vpop.eup %12437  ;;  %12449 = vtanh.f32 %v10014_v53 }
0x1c96   :  { %v12440_v9 = vpop.eup %12439  ;;  %10436 = vst.msk [vmem:[%s16840_s9 + $0x210] sm:$0xff] %vm10369_vm1, %v12438_v18  ;;  %12451 = vtanh.f32 %v10006_v10 }
0x1c97   :  { %v12442_v20 = vpop.eup %12441  ;;  %10434 = vst.msk [vmem:[%s16840_s9 + $0x200] sm:$0xff] %vm10369_vm1, %v12440_v9 }
0x1c98   :  { %v12444_v47 = vpop.eup %12443  ;;  %10437 = vst.msk [vmem:[%s16840_s9 + $0x218] sm:$0xff] %vm10369_vm1, %v12442_v20  ;;  %v11992_v43 = vpop.f32.mrb[148].mxu1 }
0x1c99   :  { %10435 = vst.msk [vmem:[%s16840_s9 + $0x208] sm:$0xff] %vm10369_vm1, %v12444_v47  ;;  %v10027_v42 = vadd.f32 %v11992_v43, %v16165_v6  ;;  %v10018_v35 = vpop.f32.mrb[149].mxu1 }
0x1c9a   :  { %v10019_v1 = vadd.f32 %v16165_v6, %v10018_v35  ;;  %v11993_v57 = vpop.f32.mrb[150].mxu1 }
0x1c9b   :  { %12453 = vtanh.f32 %v10027_v42  ;;  %v10030_v44 = vadd.f32 %v11993_v57, %v16165_v6  ;;  %v10021_v8 = vpop.f32.mrb[151].mxu1 }
0x1c9c   :  { %12455 = vtanh.f32 %v10019_v1  ;;  %v10022_v39 = vadd.f32 %v16165_v6, %v10021_v8 }
0x1c9d   :  { %v12446_v21 = vpop.eup %12445  ;;  %12457 = vtanh.f32 %v10030_v44 }
0x1c9e   :  { %v12448_v60 = vpop.eup %12447  ;;  %10440 = vst.msk [vmem:[%s16840_s9 + $0x230] sm:$0xff] %vm10369_vm1, %v12446_v21  ;;  %12459 = vtanh.f32 %v10022_v39 }
0x1c9f   :  { %v12450_v62 = vpop.eup %12449  ;;  %10438 = vst.msk [vmem:[%s16840_s9 + $0x220] sm:$0xff] %vm10369_vm1, %v12448_v60 }
0x1ca0   :  { %v12452_v33 = vpop.eup %12451  ;;  %10441 = vst.msk [vmem:[%s16840_s9 + $0x238] sm:$0xff] %vm10369_vm1, %v12450_v62  ;;  %v11996_v37 = vpop.f32.mrb[152].mxu1 }
0x1ca1   :  { %10439 = vst.msk [vmem:[%s16840_s9 + $0x228] sm:$0xff] %vm10369_vm1, %v12452_v33  ;;  %v10043_v52 = vadd.f32 %v11996_v37, %v16165_v6  ;;  %v10034_v14 = vpop.f32.mrb[153].mxu1 }
0x1ca2   :  { %v10035_v29 = vadd.f32 %v16165_v6, %v10034_v14  ;;  %v11997_v27 = vpop.f32.mrb[154].mxu1 }
0x1ca3   :  { %12461 = vtanh.f32 %v10043_v52  ;;  %v10046_v4 = vadd.f32 %v11997_v27, %v16165_v6  ;;  %v10037_v25 = vpop.f32.mrb[155].mxu1 }
0x1ca4   :  { %12463 = vtanh.f32 %v10035_v29  ;;  %v10038_v61 = vadd.f32 %v16165_v6, %v10037_v25 }
0x1ca5   :  { %v12454_v2 = vpop.eup %12453  ;;  %12465 = vtanh.f32 %v10046_v4 }
0x1ca6   :  { %v12456_v51 = vpop.eup %12455  ;;  %10444 = vst.msk [vmem:[%s16840_s9 + $0x250] sm:$0xff] %vm10369_vm1, %v12454_v2  ;;  %12467 = vtanh.f32 %v10038_v61 }
0x1ca7   :  { %v12458_v23 = vpop.eup %12457  ;;  %10442 = vst.msk [vmem:[%s16840_s9 + $0x240] sm:$0xff] %vm10369_vm1, %v12456_v51 }
0x1ca8   :  { %v12460_v30 = vpop.eup %12459  ;;  %10445 = vst.msk [vmem:[%s16840_s9 + $0x258] sm:$0xff] %vm10369_vm1, %v12458_v23  ;;  %v12000_v56 = vpop.f32.mrb[156].mxu1 }
0x1ca9   :  { %10443 = vst.msk [vmem:[%s16840_s9 + $0x248] sm:$0xff] %vm10369_vm1, %v12460_v30  ;;  %v10059_v58 = vadd.f32 %v12000_v56, %v16165_v6  ;;  %v10050_v26 = vpop.f32.mrb[157].mxu1 }
0x1caa   :  { %v10051_v36 = vadd.f32 %v16165_v6, %v10050_v26  ;;  %v12001_v22 = vpop.f32.mrb[158].mxu1 }
0x1cab   :  { %12469 = vtanh.f32 %v10059_v58  ;;  %v10062_v50 = vadd.f32 %v12001_v22, %v16165_v6  ;;  %v10053_v34 = vpop.f32.mrb[159].mxu1  ;;  %v16676_v22 = vld [vmem:[#allocation10 + $0x6] ss:$0 sm:$0xff] }
0x1cac   :  { %12471 = vtanh.f32 %v10051_v36  ;;  %v10054_v16 = vadd.f32 %v16165_v6, %v10053_v34 }
0x1cad   :  { %v12462_v28 = vpop.eup %12461  ;;  %12473 = vtanh.f32 %v10062_v50 }
0x1cae   :  { %v12464_v13 = vpop.eup %12463  ;;  %10448 = vst.msk [vmem:[%s16840_s9 + $0x270] sm:$0xff] %vm10369_vm1, %v12462_v28  ;;  %12475 = vtanh.f32 %v10054_v16 }
0x1caf   :  { %v12466_v41 = vpop.eup %12465  ;;  %10446 = vst.msk [vmem:[%s16840_s9 + $0x260] sm:$0xff] %vm10369_vm1, %v12464_v13 }
0x1cb0   :  { %v12468_v46 = vpop.eup %12467  ;;  %10449 = vst.msk [vmem:[%s16840_s9 + $0x278] sm:$0xff] %vm10369_vm1, %v12466_v41  ;;  %v12004_v15 = vpop.f32.mrb[160].mxu1 }
0x1cb1   :  { %10447 = vst.msk [vmem:[%s16840_s9 + $0x268] sm:$0xff] %vm10369_vm1, %v12468_v46  ;;  %v10075_v0 = vadd.f32 %v12004_v15, %v16165_v6  ;;  %v10066_v40 = vpop.f32.mrb[161].mxu1 }
0x1cb2   :  { %v10067_v11 = vadd.f32 %v16165_v6, %v10066_v40  ;;  %v12005_v32 = vpop.f32.mrb[162].mxu1 }
0x1cb3   :  { %12477 = vtanh.f32 %v10075_v0  ;;  %v10078_v7 = vadd.f32 %v12005_v32, %v16165_v6  ;;  %v10069_v24 = vpop.f32.mrb[163].mxu1 }
0x1cb4   :  { %12479 = vtanh.f32 %v10067_v11  ;;  %v10070_v5 = vadd.f32 %v16165_v6, %v10069_v24 }
0x1cb5   :  { %v12470_v19 = vpop.eup %12469  ;;  %12481 = vtanh.f32 %v10078_v7 }
0x1cb6   :  { %v12472_v3 = vpop.eup %12471  ;;  %10452 = vst.msk [vmem:[%s16840_s9 + $0x290] sm:$0xff] %vm10369_vm1, %v12470_v19  ;;  %12483 = vtanh.f32 %v10070_v5 }
0x1cb7   :  { %v12474_v48 = vpop.eup %12473  ;;  %10450 = vst.msk [vmem:[%s16840_s9 + $0x280] sm:$0xff] %vm10369_vm1, %v12472_v3 }
0x1cb8   :  { %v12476_v12 = vpop.eup %12475  ;;  %10453 = vst.msk [vmem:[%s16840_s9 + $0x298] sm:$0xff] %vm10369_vm1, %v12474_v48  ;;  %v12008_v38 = vpop.f32.mrb[164].mxu1 }
0x1cb9   :  { %10451 = vst.msk [vmem:[%s16840_s9 + $0x288] sm:$0xff] %vm10369_vm1, %v12476_v12  ;;  %v10091_v59 = vadd.f32 %v12008_v38, %v16165_v6  ;;  %v10082_v55 = vpop.f32.mrb[165].mxu1 }
0x1cba   :  { %v10083_v31 = vadd.f32 %v16165_v6, %v10082_v55  ;;  %v12009_v63 = vpop.f32.mrb[166].mxu1 }
0x1cbb   :  { %12485 = vtanh.f32 %v10091_v59  ;;  %v10094_v54 = vadd.f32 %v12009_v63, %v16165_v6  ;;  %v10085_v17 = vpop.f32.mrb[167].mxu1 }
0x1cbc   :  { %12487 = vtanh.f32 %v10083_v31  ;;  %v10086_v45 = vadd.f32 %v16165_v6, %v10085_v17 }
0x1cbd   :  { %v12478_v53 = vpop.eup %12477  ;;  %12489 = vtanh.f32 %v10094_v54 }
0x1cbe   :  { %v12480_v49 = vpop.eup %12479  ;;  %10456 = vst.msk [vmem:[%s16840_s9 + $0x2b0] sm:$0xff] %vm10369_vm1, %v12478_v53  ;;  %12491 = vtanh.f32 %v10086_v45 }
0x1cbf   :  { %v12482_v10 = vpop.eup %12481  ;;  %10454 = vst.msk [vmem:[%s16840_s9 + $0x2a0] sm:$0xff] %vm10369_vm1, %v12480_v49 }
0x1cc0   :  { %v12484_v18 = vpop.eup %12483  ;;  %10457 = vst.msk [vmem:[%s16840_s9 + $0x2b8] sm:$0xff] %vm10369_vm1, %v12482_v10  ;;  %v12012_v9 = vpop.f32.mrb[168].mxu1 }
0x1cc1   :  { %10455 = vst.msk [vmem:[%s16840_s9 + $0x2a8] sm:$0xff] %vm10369_vm1, %v12484_v18  ;;  %v10107_v20 = vadd.f32 %v12012_v9, %v16165_v6  ;;  %v10098_v47 = vpop.f32.mrb[169].mxu1 }
0x1cc2   :  { %v10099_v43 = vadd.f32 %v16165_v6, %v10098_v47  ;;  %v12013_v42 = vpop.f32.mrb[170].mxu1 }
0x1cc3   :  { %12493 = vtanh.f32 %v10107_v20  ;;  %v10110_v35 = vadd.f32 %v12013_v42, %v16165_v6  ;;  %v10101_v1 = vpop.f32.mrb[171].mxu1 }
0x1cc4   :  { %12495 = vtanh.f32 %v10099_v43  ;;  %v10102_v57 = vadd.f32 %v16165_v6, %v10101_v1 }
0x1cc5   :  { %v12486_v44 = vpop.eup %12485  ;;  %12497 = vtanh.f32 %v10110_v35 }
0x1cc6   :  { %v12488_v8 = vpop.eup %12487  ;;  %10460 = vst.msk [vmem:[%s16840_s9 + $0x2d0] sm:$0xff] %vm10369_vm1, %v12486_v44  ;;  %12499 = vtanh.f32 %v10102_v57 }
0x1cc7   :  { %v12490_v39 = vpop.eup %12489  ;;  %10458 = vst.msk [vmem:[%s16840_s9 + $0x2c0] sm:$0xff] %vm10369_vm1, %v12488_v8 }
0x1cc8   :  { %v12492_v21 = vpop.eup %12491  ;;  %10461 = vst.msk [vmem:[%s16840_s9 + $0x2d8] sm:$0xff] %vm10369_vm1, %v12490_v39  ;;  %v12016_v60 = vpop.f32.mrb[172].mxu1 }
0x1cc9   :  { %10459 = vst.msk [vmem:[%s16840_s9 + $0x2c8] sm:$0xff] %vm10369_vm1, %v12492_v21  ;;  %v10123_v62 = vadd.f32 %v12016_v60, %v16165_v6  ;;  %v10114_v33 = vpop.f32.mrb[173].mxu1 }
0x1cca   :  { %v10115_v37 = vadd.f32 %v16165_v6, %v10114_v33  ;;  %v12017_v52 = vpop.f32.mrb[174].mxu1 }
0x1ccb   :  { %12501 = vtanh.f32 %v10123_v62  ;;  %v10126_v14 = vadd.f32 %v12017_v52, %v16165_v6  ;;  %v10117_v29 = vpop.f32.mrb[175].mxu1 }
0x1ccc   :  { %12503 = vtanh.f32 %v10115_v37  ;;  %v10118_v27 = vadd.f32 %v16165_v6, %v10117_v29 }
0x1ccd   :  { %v12494_v4 = vpop.eup %12493  ;;  %12505 = vtanh.f32 %v10126_v14 }
0x1cce   :  { %v12496_v25 = vpop.eup %12495  ;;  %10464 = vst.msk [vmem:[%s16840_s9 + $0x2f0] sm:$0xff] %vm10369_vm1, %v12494_v4  ;;  %12507 = vtanh.f32 %v10118_v27 }
0x1ccf   :  { %v12498_v61 = vpop.eup %12497  ;;  %10462 = vst.msk [vmem:[%s16840_s9 + $0x2e0] sm:$0xff] %vm10369_vm1, %v12496_v25 }
0x1cd0   :  { %v12500_v2 = vpop.eup %12499  ;;  %10465 = vst.msk [vmem:[%s16840_s9 + $0x2f8] sm:$0xff] %vm10369_vm1, %v12498_v61  ;;  %v12020_v51 = vpop.f32.mrb[176].mxu1 }
0x1cd1   :  { %10463 = vst.msk [vmem:[%s16840_s9 + $0x2e8] sm:$0xff] %vm10369_vm1, %v12500_v2  ;;  %v10139_v23 = vadd.f32 %v12020_v51, %v16165_v6  ;;  %v10130_v30 = vpop.f32.mrb[177].mxu1 }
0x1cd2   :  { %v10131_v56 = vadd.f32 %v16165_v6, %v10130_v30  ;;  %v12021_v58 = vpop.f32.mrb[178].mxu1 }
0x1cd3   :  { %12509 = vtanh.f32 %v10139_v23  ;;  %v10142_v26 = vadd.f32 %v12021_v58, %v16165_v6  ;;  %v10133_v36 = vpop.f32.mrb[179].mxu1 }
0x1cd4   :  { %12511 = vtanh.f32 %v10131_v56  ;;  %v10134_v50 = vadd.f32 %v16676_v22, %v10133_v36 }
0x1cd5   :  { %v12502_v34 = vpop.eup %12501  ;;  %12513 = vtanh.f32 %v10142_v26 }
0x1cd6   :  { %v12504_v16 = vpop.eup %12503  ;;  %10468 = vst.msk [vmem:[%s16840_s9 + $0x310] sm:$0xff] %vm10369_vm1, %v12502_v34  ;;  %12515 = vtanh.f32 %v10134_v50 }
0x1cd7   :  { %v12506_v28 = vpop.eup %12505  ;;  %10466 = vst.msk [vmem:[%s16840_s9 + $0x300] sm:$0xff] %vm10369_vm1, %v12504_v16 }
0x1cd8   :  { %v12508_v6 = vpop.eup %12507  ;;  %10469 = vst.msk [vmem:[%s16840_s9 + $0x318] sm:$0xff] %vm10369_vm1, %v12506_v28  ;;  %v12024_v13 = vpop.f32.mrb[180].mxu1 }
0x1cd9   :  { %10467 = vst.msk [vmem:[%s16840_s9 + $0x308] sm:$0xff] %vm10369_vm1, %v12508_v6  ;;  %v10155_v41 = vadd.f32 %v16676_v22, %v12024_v13  ;;  %v10146_v46 = vpop.f32.mrb[181].mxu1 }
0x1cda   :  { %v10147_v15 = vadd.f32 %v16676_v22, %v10146_v46  ;;  %v12025_v0 = vpop.f32.mrb[182].mxu1 }
0x1cdb   :  { %12517 = vtanh.f32 %v10155_v41  ;;  %v10158_v40 = vadd.f32 %v16676_v22, %v12025_v0  ;;  %v10149_v11 = vpop.f32.mrb[183].mxu1 }
0x1cdc   :  { %12519 = vtanh.f32 %v10147_v15  ;;  %v10150_v32 = vadd.f32 %v16676_v22, %v10149_v11 }
0x1cdd   :  { %v12510_v7 = vpop.eup %12509  ;;  %12521 = vtanh.f32 %v10158_v40 }
0x1cde   :  { %v12512_v24 = vpop.eup %12511  ;;  %10472 = vst.msk [vmem:[%s16840_s9 + $0x330] sm:$0xff] %vm10369_vm1, %v12510_v7  ;;  %12523 = vtanh.f32 %v10150_v32 }
0x1cdf   :  { %v12514_v5 = vpop.eup %12513  ;;  %10470 = vst.msk [vmem:[%s16840_s9 + $0x320] sm:$0xff] %vm10369_vm1, %v12512_v24 }
0x1ce0   :  { %v12516_v19 = vpop.eup %12515  ;;  %10473 = vst.msk [vmem:[%s16840_s9 + $0x338] sm:$0xff] %vm10369_vm1, %v12514_v5  ;;  %v12028_v3 = vpop.f32.mrb[184].mxu1 }
0x1ce1   :  { %10471 = vst.msk [vmem:[%s16840_s9 + $0x328] sm:$0xff] %vm10369_vm1, %v12516_v19  ;;  %v10171_v48 = vadd.f32 %v16676_v22, %v12028_v3  ;;  %v10162_v12 = vpop.f32.mrb[185].mxu1 }
0x1ce2   :  { %v10163_v38 = vadd.f32 %v16676_v22, %v10162_v12  ;;  %v12029_v59 = vpop.f32.mrb[186].mxu1 }
0x1ce3   :  { %12525 = vtanh.f32 %v10171_v48  ;;  %v10174_v55 = vadd.f32 %v16676_v22, %v12029_v59  ;;  %v10165_v31 = vpop.f32.mrb[187].mxu1 }
0x1ce4   :  { %12527 = vtanh.f32 %v10163_v38  ;;  %v10166_v63 = vadd.f32 %v16676_v22, %v10165_v31 }
0x1ce5   :  { %v12518_v54 = vpop.eup %12517  ;;  %12529 = vtanh.f32 %v10174_v55 }
0x1ce6   :  { %v12520_v17 = vpop.eup %12519  ;;  %10476 = vst.msk [vmem:[%s16840_s9 + $0x350] sm:$0xff] %vm10369_vm1, %v12518_v54  ;;  %12531 = vtanh.f32 %v10166_v63 }
0x1ce7   :  { %v12522_v45 = vpop.eup %12521  ;;  %10474 = vst.msk [vmem:[%s16840_s9 + $0x340] sm:$0xff] %vm10369_vm1, %v12520_v17 }
0x1ce8   :  { %v12524_v53 = vpop.eup %12523  ;;  %10477 = vst.msk [vmem:[%s16840_s9 + $0x358] sm:$0xff] %vm10369_vm1, %v12522_v45  ;;  %v12032_v49 = vpop.f32.mrb[188].mxu1 }
0x1ce9   :  { %10475 = vst.msk [vmem:[%s16840_s9 + $0x348] sm:$0xff] %vm10369_vm1, %v12524_v53  ;;  %v10187_v10 = vadd.f32 %v16676_v22, %v12032_v49  ;;  %v10178_v18 = vpop.f32.mrb[189].mxu1 }
0x1cea   :  { %v10179_v9 = vadd.f32 %v16676_v22, %v10178_v18  ;;  %v12033_v20 = vpop.f32.mrb[190].mxu1 }
0x1ceb   :  { %12533 = vtanh.f32 %v10187_v10  ;;  %v10190_v47 = vadd.f32 %v16676_v22, %v12033_v20  ;;  %v10181_v43 = vpop.f32.mrb[191].mxu1 }
0x1cec   :  { %12535 = vtanh.f32 %v10179_v9  ;;  %v10182_v42 = vadd.f32 %v16676_v22, %v10181_v43 }
0x1ced   :  { %v12526_v35 = vpop.eup %12525  ;;  %12537 = vtanh.f32 %v10190_v47 }
0x1cee   :  { %v12528_v1 = vpop.eup %12527  ;;  %10480 = vst.msk [vmem:[%s16840_s9 + $0x370] sm:$0xff] %vm10369_vm1, %v12526_v35  ;;  %12539 = vtanh.f32 %v10182_v42 }
0x1cef   :  { %v12530_v57 = vpop.eup %12529  ;;  %10478 = vst.msk [vmem:[%s16840_s9 + $0x360] sm:$0xff] %vm10369_vm1, %v12528_v1 }
0x1cf0   :  { %v12532_v44 = vpop.eup %12531  ;;  %10481 = vst.msk [vmem:[%s16840_s9 + $0x378] sm:$0xff] %vm10369_vm1, %v12530_v57  ;;  %v12036_v8 = vpop.f32.mrb[192].mxu1 }
0x1cf1   :  { %10479 = vst.msk [vmem:[%s16840_s9 + $0x368] sm:$0xff] %vm10369_vm1, %v12532_v44  ;;  %v10203_v39 = vadd.f32 %v16676_v22, %v12036_v8  ;;  %v10194_v21 = vpop.f32.mrb[193].mxu1 }
0x1cf2   :  { %v10195_v60 = vadd.f32 %v16676_v22, %v10194_v21  ;;  %v12037_v62 = vpop.f32.mrb[194].mxu1 }
0x1cf3   :  { %12541 = vtanh.f32 %v10203_v39  ;;  %v10206_v33 = vadd.f32 %v16676_v22, %v12037_v62  ;;  %v10197_v37 = vpop.f32.mrb[195].mxu1 }
0x1cf4   :  { %12543 = vtanh.f32 %v10195_v60  ;;  %v10198_v52 = vadd.f32 %v16676_v22, %v10197_v37 }
0x1cf5   :  { %v12534_v14 = vpop.eup %12533  ;;  %12545 = vtanh.f32 %v10206_v33 }
0x1cf6   :  { %v12536_v29 = vpop.eup %12535  ;;  %10484 = vst.msk [vmem:[%s16840_s9 + $0x390] sm:$0xff] %vm10369_vm1, %v12534_v14  ;;  %12547 = vtanh.f32 %v10198_v52 }
0x1cf7   :  { %v12538_v27 = vpop.eup %12537  ;;  %10482 = vst.msk [vmem:[%s16840_s9 + $0x380] sm:$0xff] %vm10369_vm1, %v12536_v29 }
0x1cf8   :  { %v12540_v4 = vpop.eup %12539  ;;  %10485 = vst.msk [vmem:[%s16840_s9 + $0x398] sm:$0xff] %vm10369_vm1, %v12538_v27  ;;  %v12040_v25 = vpop.f32.mrb[196].mxu1 }
0x1cf9   :  { %10483 = vst.msk [vmem:[%s16840_s9 + $0x388] sm:$0xff] %vm10369_vm1, %v12540_v4  ;;  %v10219_v61 = vadd.f32 %v16676_v22, %v12040_v25  ;;  %v10210_v2 = vpop.f32.mrb[197].mxu1 }
0x1cfa   :  { %v10211_v51 = vadd.f32 %v16676_v22, %v10210_v2  ;;  %v12041_v23 = vpop.f32.mrb[198].mxu1 }
0x1cfb   :  { %12549 = vtanh.f32 %v10219_v61  ;;  %v10222_v30 = vadd.f32 %v16676_v22, %v12041_v23  ;;  %v10213_v56 = vpop.f32.mrb[199].mxu1 }
0x1cfc   :  { %12551 = vtanh.f32 %v10211_v51  ;;  %v10214_v58 = vadd.f32 %v16676_v22, %v10213_v56 }
0x1cfd   :  { %v12542_v26 = vpop.eup %12541  ;;  %12553 = vtanh.f32 %v10222_v30 }
0x1cfe   :  { %v12544_v36 = vpop.eup %12543  ;;  %10488 = vst.msk [vmem:[%s16840_s9 + $0x3b0] sm:$0xff] %vm10369_vm1, %v12542_v26  ;;  %12555 = vtanh.f32 %v10214_v58 }
0x1cff   :  { %v12546_v50 = vpop.eup %12545  ;;  %10486 = vst.msk [vmem:[%s16840_s9 + $0x3a0] sm:$0xff] %vm10369_vm1, %v12544_v36 }
0x1d00   :  { %v12548_v34 = vpop.eup %12547  ;;  %10489 = vst.msk [vmem:[%s16840_s9 + $0x3b8] sm:$0xff] %vm10369_vm1, %v12546_v50  ;;  %v12044_v16 = vpop.f32.mrb[200].mxu1 }
0x1d01   :  { %10487 = vst.msk [vmem:[%s16840_s9 + $0x3a8] sm:$0xff] %vm10369_vm1, %v12548_v34  ;;  %v10235_v28 = vadd.f32 %v16676_v22, %v12044_v16  ;;  %v10226_v6 = vpop.f32.mrb[201].mxu1 }
0x1d02   :  { %v10227_v13 = vadd.f32 %v16676_v22, %v10226_v6  ;;  %v12045_v41 = vpop.f32.mrb[202].mxu1 }
0x1d03   :  { %12557 = vtanh.f32 %v10235_v28  ;;  %v10238_v46 = vadd.f32 %v16676_v22, %v12045_v41  ;;  %v10229_v15 = vpop.f32.mrb[203].mxu1 }
0x1d04   :  { %12559 = vtanh.f32 %v10227_v13  ;;  %v10230_v0 = vadd.f32 %v16676_v22, %v10229_v15 }
0x1d05   :  { %v12550_v40 = vpop.eup %12549  ;;  %12561 = vtanh.f32 %v10238_v46 }
0x1d06   :  { %v12552_v11 = vpop.eup %12551  ;;  %10492 = vst.msk [vmem:[%s16840_s9 + $0x3d0] sm:$0xff] %vm10369_vm1, %v12550_v40  ;;  %12563 = vtanh.f32 %v10230_v0 }
0x1d07   :  { %v12554_v32 = vpop.eup %12553  ;;  %10490 = vst.msk [vmem:[%s16840_s9 + $0x3c0] sm:$0xff] %vm10369_vm1, %v12552_v11 }
0x1d08   :  { %v12556_v7 = vpop.eup %12555  ;;  %10493 = vst.msk [vmem:[%s16840_s9 + $0x3d8] sm:$0xff] %vm10369_vm1, %v12554_v32 }
0x1d09   :  { %10491 = vst.msk [vmem:[%s16840_s9 + $0x3c8] sm:$0xff] %vm10369_vm1, %v12556_v7 }
0x1d0d   :  { %v12558_v22 = vpop.eup %12557 }
0x1d0e   :  { %v12560_v24 = vpop.eup %12559  ;;  %10496 = vst.msk [vmem:[%s16840_s9 + $0x3f0] sm:$0xff] %vm10369_vm1, %v12558_v22 }
0x1d0f   :  { %v12562_v5 = vpop.eup %12561  ;;  %10494 = vst.msk [vmem:[%s16840_s9 + $0x3e0] sm:$0xff] %vm10369_vm1, %v12560_v24 }
0x1d10   :  { %v12564_v19 = vpop.eup %12563  ;;  %10497 = vst.msk [vmem:[%s16840_s9 + $0x3f8] sm:$0xff] %vm10369_vm1, %v12562_v5 }
0x1d11   :  { %10495 = vst.msk [vmem:[%s16840_s9 + $0x3e8] sm:$0xff] %vm10369_vm1, %v12564_v19 }
0x1d12   :  { %10502 = vsyncpa [#allocation3], 1 }
0x1d13   :  { %10503 = vsyncpa [#allocation5], 1 }
0x1d14   :  { %10504 = vsyncpa [#allocation8], 1 }
0x1d15   :  { %10505 = vsyncpa [#allocation11], 1 }

</bundles_post_ra>
